<compile_context>
chip_gen: v7x
topology: tpu7x:2x2x1
jax: 0.10.0
libtpu: 0.0.40
codegen_flags: <defaults>
</compile_context>

<pallas_src>
import jax
import jax.numpy as jnp
from jax.experimental import pallas as pl
from jax.experimental.pallas import tpu as pltpu

# Exact f32 matmuls everywhere (reference, prepare-time folds, and in-kernel
# dots all pick this up), so the kernel/reference comparison is tight.
jax.config.update("jax_default_matmul_precision", "highest")

# ----------------------------- dimensions -----------------------------------
B = 2               # batch
H = 128             # stands in for BERT hidden_size (768 in the real module)
E = 16              # char_emb_dim
L = 12              # char sequence length
L_PAD = 16          # padded char length (power of two, multiple of 8)
O = 50              # num_kernels per conv
O_PAD = 128         # lane-dense padded conv channels
KS = (3, 4, 5)      # kernel_sizes
GCN_IN = 16         # gcn_in_dim
GCN_HID = 32        # gcn_hidden_dim
N_NODES = 8         # graph nodes
NUM_CLASSES = 4
OUT_PAD = 128       # lane-dense padded logits
CHAR_VOCAB = 100
VOCAB_PAD = 128     # lane-dense padded vocab for the one-hot lookup

ROWS_ACT = B * L_PAD          # 32 activation rows (16 per example)
ROWS_IDS = ROWS_ACT + 8       # padded id rows (room for tap shifts 0..4)

# ----------------------- weight-slab row offsets -----------------------------
_OFF_W3 = 0
_OFF_W4 = _OFF_W3 + 3 * VOCAB_PAD      # 384
_OFF_W5 = _OFF_W4 + 4 * VOCAB_PAD      # 896
_OFF_HW = _OFF_W5 + 5 * VOCAB_PAD      # 1536
_OFF_GWC = _OFF_HW + len(KS) * O_PAD   # 1920
_OFF_GWF = _OFF_GWC + H                # 2048
_OFF_GATE = _OFF_GWF + GCN_IN          # 2064
_OFF_FC = _OFF_GATE + 2 * H            # 2320
_W_ROWS = _OFF_FC + H                  # 2448

# bias-slab rows
_BR_C3, _BR_C4, _BR_C5 = 0, 1, 2
_BR_HW, _BR_GCN, _BR_GATE, _BR_FC = 3, 4, 5, 6
_B_ROWS = 8


# ------------------------------ fused kernel ---------------------------------
def fused_kernel(ids_ref, feat_ref, adj_ref, bert_ref, w_ref, b_ref, out_ref):
    f32 = jnp.float32

    # ---- shifted one-hot windows of the char ids (shared across branches) ---
    lane_iota = jax.lax.broadcasted_iota(jnp.int32, (ROWS_ACT, VOCAB_PAD), 1)
    oh_all = jnp.concatenate(
        [(lane_iota == ids_ref[j:j + ROWS_ACT, :]).astype(f32)
         for j in range(max(KS))], axis=1)                  # [32, 5*128]

    # row -> position-within-example (L_PAD is a power of two)
    tpos = jnp.bitwise_and(
        jax.lax.broadcasted_iota(jnp.int32, (ROWS_ACT, O_PAD), 0), L_PAD - 1)

    # ---- CharCNN: one lane-aligned matmul per branch (emb folded in) --------
    def conv_branch(k, w_off, b_row):
        l_out = L - k + 1
        w = w_ref[w_off:w_off + k * VOCAB_PAD, :]            # [k*128, 128]
        c = jnp.dot(oh_all[:, :k * VOCAB_PAD], w,
                    preferred_element_type=f32)              # [32, 128]
        c = jnp.maximum(c + b_ref[b_row:b_row + 1, :], 0.0)  # bias + ReLU
        c = jnp.where(tpos < l_out, c, 0.0)                  # mask pad rows
        return jnp.concatenate(
            [jnp.max(c[b * L_PAD:(b + 1) * L_PAD, :], axis=0, keepdims=True)
             for b in range(B)], axis=0)                     # [B, 128]

    p3 = conv_branch(3, _OFF_W3, _BR_C3)
    p4 = conv_branch(4, _OFF_W4, _BR_C4)
    p5 = conv_branch(5, _OFF_W5, _BR_C5)

    # ---- highway Linear: single matmul over the 128-aligned lane concat -----
    ph = jnp.concatenate([p3, p4, p5], axis=1)               # [B, 384]
    char_out = (jnp.dot(ph, w_ref[_OFF_HW:_OFF_HW + 3 * O_PAD, :],
                        preferred_element_type=f32)
                + b_ref[_BR_HW:_BR_HW + 1, :])               # [B, H]

    # ---- GraphConv (norm='both'), node-mean hoisted, gcn_fc folded in -------
    feat = feat_ref[...]                                     # [N, GCN_IN]
    adj = adj_ref[...]                                       # [N, N]
    char_mean = jnp.mean(char_out, axis=0, keepdims=True)    # [1, H]
    deg_in = jnp.sum(adj, axis=1, keepdims=True)             # [N, 1]
    deg_out = jnp.sum(adj, axis=0, keepdims=True)            # [1, N]
    nd = jnp.where(deg_in > 0, jax.lax.rsqrt(deg_in), 0.0)   # [N, 1]
    ns = jnp.where(deg_out > 0, jax.lax.rsqrt(deg_out), 0.0)  # [1, N]
    adj_n = adj * ns                                         # column-normalized
    hm_feat = jnp.mean(nd * jnp.dot(adj_n, feat, preferred_element_type=f32),
                       axis=0, keepdims=True)                # [1, GCN_IN]
    # every char_rep row equals char_mean -> char half collapses to a scalar
    coef = jnp.mean(nd * jnp.sum(adj_n, axis=1, keepdims=True),
                    axis=0, keepdims=True)                   # [1, 1]
    gcn_row = (jnp.dot(hm_feat, w_ref[_OFF_GWF:_OFF_GWF + GCN_IN, :],
                       preferred_element_type=f32)
               + coef * jnp.dot(char_mean, w_ref[_OFF_GWC:_OFF_GWC + H, :],
                                preferred_element_type=f32)
               + b_ref[_BR_GCN:_BR_GCN + 1, :])              # [1, H]
    gcn_out = jnp.broadcast_to(gcn_row, (B, H))

    # ---- gating fusion + classifier (128-aligned concat, fused gate) --------
    bert = bert_ref[...]                                     # [B, H]
    comb = jnp.concatenate([bert, gcn_out], axis=1)          # [B, 2H]
    gate = jax.nn.sigmoid(
        jnp.dot(comb, w_ref[_OFF_GATE:_OFF_GATE + 2 * H, :],
                preferred_element_type=f32)
        + b_ref[_BR_GATE:_BR_GATE + 1, :])                   # [B, 128] (cols 0,1 used)
    fused = gate[:, 0:1] * bert + gate[:, 1:2] * gcn_out
    out_ref[...] = (jnp.dot(fused, w_ref[_OFF_FC:_OFF_FC + H, :],
                            preferred_element_type=f32)
                    + b_ref[_BR_FC:_BR_FC + 1, :])           # [B, OUT_PAD]


# ------------------------------ wrappers --------------------------------------
def prepare_params(p):
    """One-time repack of module params into two lane-dense VMEM slabs."""
    emb_pad = jnp.pad(p['char_emb'], ((0, VOCAB_PAD - CHAR_VOCAB), (0, 0)))
    w_rows, b_rows = [], []
    # Conv branches: fold the embedding table into per-tap [128,128] weights.
    for k, (w, b) in zip(KS, p['convs']):                     # w:[k,E,O] b:[1,O]
        w_pad = jnp.pad(w, ((0, 0), (0, 0), (0, O_PAD - O)))  # [k, E, 128]
        ew = jnp.einsum('ve,keo->kvo', emb_pad, w_pad)        # [k, 128, 128]
        w_rows.append(ew.reshape(k * VOCAB_PAD, O_PAD))
        b_rows.append(jnp.pad(b, ((0, 0), (0, O_PAD - O))))
    # Highway: per-branch rows zero-padded 50 -> 128 and stacked -> [384, H].
    hw = [jnp.pad(p['hw_w'][i * O:(i + 1) * O], ((0, O_PAD - O), (0, 0)))
          for i in range(len(KS))]
    w_rows.append(jnp.concatenate(hw, axis=0))
    b_rows.append(p['hw_b'])
    # GraphConv with gcn_fc folded in (no nonlinearity between them).
    gwf_fold = p['gcn_w'][:GCN_IN] @ p['fc_gcn_w']            # [16, H]
    gwc_fold = p['gcn_w'][GCN_IN:] @ p['fc_gcn_w']            # [H, H]
    gcn_b_fold = p['gcn_b'] @ p['fc_gcn_w'] + p['fc_gcn_b']   # [1, H]
    w_rows += [gwc_fold, gwf_fold]
    b_rows.append(gcn_b_fold)
    # Gate + classifier, lane-padded to 128.
    w_rows.append(jnp.pad(p['gate_w'], ((0, 0), (0, O_PAD - 2))))
    b_rows.append(jnp.pad(p['gate_b'], ((0, 0), (0, O_PAD - 2))))
    w_rows.append(jnp.pad(p['fc_w'], ((0, 0), (0, OUT_PAD - NUM_CLASSES))))
    b_rows.append(jnp.pad(p['fc_b'], ((0, 0), (0, OUT_PAD - NUM_CLASSES))))

    w_slab = jnp.concatenate(w_rows, axis=0)
    assert w_slab.shape == (_W_ROWS, 128), w_slab.shape
    b_slab = jnp.concatenate(b_rows, axis=0)
    b_slab = jnp.pad(b_slab, ((0, _B_ROWS - b_slab.shape[0]), (0, 0)))
    return {'w': w_slab, 'b': b_slab}


@jax.jit
def vgcn_bert_dynmm_forward(bert_pooler_out, char_ids, node_feat, adj, kp):
    # Flatten char ids into the padded [ROWS_IDS, 1] layout the kernel expects
    # (pad value -1 never matches the one-hot iota -> zero contribution).
    ids = jnp.pad(char_ids.astype(jnp.int32), ((0, 0), (0, L_PAD - L)),
                  constant_values=-1).reshape(-1)
    ids = jnp.pad(ids, (0, ROWS_IDS - B * L_PAD), constant_values=-1)
    ids = ids.reshape(ROWS_IDS, 1)

    out_pad = pl.pallas_call(
        fused_kernel,
        out_shape=jax.ShapeDtypeStruct((B, OUT_PAD), jnp.float32),
        in_specs=[pl.BlockSpec(memory_space=pltpu.MemorySpace.VMEM)] * 6,
        out_specs=pl.BlockSpec(memory_space=pltpu.MemorySpace.VMEM),
    )(ids, node_feat, adj, bert_pooler_out, kp['w'], kp['b'])
    return out_pad[:, :NUM_CLASSES]


# ------------------------- reference (pure JAX) --------------------------------
def ref_forward(bert_out, char_ids, node_feat, adj, p):
    emb = p['char_emb'][char_ids]                                  # [B, L, E]
    pooled = []
    for w, b in p['convs']:
        k = w.shape[0]
        lo = L - k + 1
        acc = jnp.zeros((B, lo, O), jnp.float32)
        for j in range(k):
            acc = acc + jnp.einsum('ble,eo->blo', emb[:, j:j + lo, :], w[j])
        acc = jnp.maximum(acc + b, 0.0)
        pooled.append(acc.max(axis=1))
    cnn = jnp.concatenate(pooled, axis=1)
    char_out = cnn @ p['hw_w'] + p['hw_b']

    char_mean = char_out.mean(axis=0, keepdims=True)
    x = jnp.concatenate([node_feat, jnp.broadcast_to(char_mean, (N_NODES, H))],
                        axis=1)
    deg_in = adj.sum(axis=1, keepdims=True)
    deg_out = adj.sum(axis=0, keepdims=True)
    nd = jnp.where(deg_in > 0, deg_in ** -0.5, 0.0)
    ns = jnp.where(deg_out > 0, deg_out ** -0.5, 0.0)
    h = nd * (adj @ (x * ns.T))
    h = h @ p['gcn_w'] + p['gcn_b']
    hm = h.mean(axis=0, keepdims=True)
    gcn_out = jnp.broadcast_to(hm @ p['fc_gcn_w'] + p['fc_gcn_b'], (B, H))

    comb = jnp.concatenate([bert_out, gcn_out], axis=1)
    gate = jax.nn.sigmoid(comb @ p['gate_w'] + p['gate_b'])
    fused = gate[:, 0:1] * bert_out + gate[:, 1:2] * gcn_out
    return fused @ p['fc_w'] + p['fc_b']


# ------------------------------- main -----------------------------------------
if __name__ == "__main__":
    key = jax.random.PRNGKey(0)
    ks = jax.random.split(key, 24)

    def init(k, shape, scale=0.05):
        return jax.random.normal(k, shape, jnp.float32) * scale

    params = {
        'char_emb': init(ks[0], (CHAR_VOCAB, E)),
        # conv weights stored [k, E, O] (PyTorch [O, E, k] pre-transposed)
        'convs': [
            (init(ks[1], (3, E, O)), init(ks[2], (1, O))),
            (init(ks[3], (4, E, O)), init(ks[4], (1, O))),
            (init(ks[5], (5, E, O)), init(ks[6], (1, O))),
        ],
        'hw_w': init(ks[7], (len(KS) * O, H)),     # highway Linear(3*50 -> H)
        'hw_b': init(ks[8], (1, H)),
        'gcn_w': init(ks[9], (GCN_IN + H, GCN_HID)),
        'gcn_b': init(ks[10], (1, GCN_HID)),
        'fc_gcn_w': init(ks[11], (GCN_HID, H)),
        'fc_gcn_b': init(ks[12], (1, H)),
        'gate_w': init(ks[13], (2 * H, 2)),
        'gate_b': init(ks[14], (1, 2)),
        'fc_w': init(ks[15], (H, NUM_CLASSES)),
        'fc_b': init(ks[16], (1, NUM_CLASSES)),
    }

    # Inputs.
    bert_pooler_out = jnp.tanh(init(ks[17], (B, H), scale=1.0))   # stand-in pooler_output
    char_ids = jax.random.randint(ks[18], (B, L), 0, CHAR_VOCAB, jnp.int32)
    node_feat = init(ks[19], (N_NODES, GCN_IN), scale=1.0)
    # deterministic symmetric ring adjacency (DGL graph stand-in)
    idx = jnp.arange(N_NODES)
    adj = (jnp.zeros((N_NODES, N_NODES), jnp.float32)
           .at[idx, (idx + 1) % N_NODES].set(1.0)
           .at[(idx + 1) % N_NODES, idx].set(1.0))

    kparams = prepare_params(params)   # one-time lane-dense slab repack

    logits = vgcn_bert_dynmm_forward(bert_pooler_out, char_ids, node_feat, adj,
                                     kparams)
    logits = jax.block_until_ready(logits)

    ref = ref_forward(bert_pooler_out, char_ids, node_feat, adj, params)
    assert logits.shape == (B, NUM_CLASSES)
    assert jnp.allclose(logits, ref, atol=2e-3, rtol=2e-3), (logits, ref)

    print("KERNEL_OK")
</pallas_src>

<mosaic_0001>
module attributes {stable_mosaic.version = 11 : i64} {
  func.func @fused_kernel(%arg0: memref<40x1xi32, #tpu.memory_space<vmem>>, %arg1: memref<8x16xf32, #tpu.memory_space<vmem>>, %arg2: memref<8x8xf32, #tpu.memory_space<vmem>>, %arg3: memref<2x128xf32, #tpu.memory_space<vmem>>, %arg4: memref<2448x128xf32, #tpu.memory_space<vmem>>, %arg5: memref<8x128xf32, #tpu.memory_space<vmem>>, %arg6: memref<2x128xf32, #tpu.memory_space<vmem>>) attributes {dimension_semantics = [], scalar_prefetch = 0 : i64, scratch_operands = 0 : i64, tpu.core_type = #tpu.core_type<tc>} {
    %0 = tpu.iota {dimensions = array<i32: 1>} : vector<32x128xi32>
    %c0 = arith.constant 0 : index
    %c0_0 = arith.constant 0 : index
    %1 = vector.load %arg0[%c0, %c0_0] : memref<40x1xi32, #tpu.memory_space<vmem>>, vector<32x1xi32>
    %2 = vector.broadcast %1 : vector<32x1xi32> to vector<32x128xi32>
    %3 = arith.cmpi eq, %0, %2 : vector<32x128xi32>
    %4 = arith.extui %3 : vector<32x128xi1> to vector<32x128xi32>
    %5 = arith.sitofp %4 : vector<32x128xi32> to vector<32x128xf32>
    %c1 = arith.constant 1 : index
    %c0_1 = arith.constant 0 : index
    %6 = vector.load %arg0[%c1, %c0_1] : memref<40x1xi32, #tpu.memory_space<vmem>>, vector<32x1xi32>
    %7 = vector.broadcast %6 : vector<32x1xi32> to vector<32x128xi32>
    %8 = arith.cmpi eq, %0, %7 : vector<32x128xi32>
    %9 = arith.extui %8 : vector<32x128xi1> to vector<32x128xi32>
    %10 = arith.sitofp %9 : vector<32x128xi32> to vector<32x128xf32>
    %c2 = arith.constant 2 : index
    %c0_2 = arith.constant 0 : index
    %11 = vector.load %arg0[%c2, %c0_2] : memref<40x1xi32, #tpu.memory_space<vmem>>, vector<32x1xi32>
    %12 = vector.broadcast %11 : vector<32x1xi32> to vector<32x128xi32>
    %13 = arith.cmpi eq, %0, %12 : vector<32x128xi32>
    %14 = arith.extui %13 : vector<32x128xi1> to vector<32x128xi32>
    %15 = arith.sitofp %14 : vector<32x128xi32> to vector<32x128xf32>
    %c3 = arith.constant 3 : index
    %c0_3 = arith.constant 0 : index
    %16 = vector.load %arg0[%c3, %c0_3] : memref<40x1xi32, #tpu.memory_space<vmem>>, vector<32x1xi32>
    %17 = vector.broadcast %16 : vector<32x1xi32> to vector<32x128xi32>
    %18 = arith.cmpi eq, %0, %17 : vector<32x128xi32>
    %19 = arith.extui %18 : vector<32x128xi1> to vector<32x128xi32>
    %20 = arith.sitofp %19 : vector<32x128xi32> to vector<32x128xf32>
    %c4 = arith.constant 4 : index
    %c0_4 = arith.constant 0 : index
    %21 = vector.load %arg0[%c4, %c0_4] : memref<40x1xi32, #tpu.memory_space<vmem>>, vector<32x1xi32>
    %22 = vector.broadcast %21 : vector<32x1xi32> to vector<32x128xi32>
    %23 = arith.cmpi eq, %0, %22 : vector<32x128xi32>
    %24 = arith.extui %23 : vector<32x128xi1> to vector<32x128xi32>
    %25 = arith.sitofp %24 : vector<32x128xi32> to vector<32x128xf32>
    %26 = tpu.concatenate %5, %10, %15, %20, %25 in 1 : vector<32x128xf32>, vector<32x128xf32>, vector<32x128xf32>, vector<32x128xf32>, vector<32x128xf32> -> vector<32x640xf32>
    %27 = tpu.iota {dimensions = array<i32: 0>} : vector<32x128xi32>
    %c15_i32 = arith.constant 15 : i32
    %28 = vector.broadcast %c15_i32 : i32 to vector<32x128xi32>
    %29 = arith.andi %27, %28 : vector<32x128xi32>
    %c0_5 = arith.constant 0 : index
    %c0_6 = arith.constant 0 : index
    %30 = vector.load %arg4[%c0_5, %c0_6] : memref<2448x128xf32, #tpu.memory_space<vmem>>, vector<384x128xf32>
    %31 = vector.extract_strided_slice %26 {offsets = [0, 0], sizes = [32, 384], strides = [1, 1]} : vector<32x640xf32> to vector<32x384xf32>
    %cst = arith.constant dense<0.000000e+00> : vector<32x128xf32>
    %32 = tpu.matmul %31, %30, %cst {dimension_numbers = #tpu.dot_dimension_numbers<[1], [0], [0], [1], [0, 0, 1, 1], [], []>, precision = #tpu.contract_precision<fp32>} : vector<32x384xf32>, vector<384x128xf32>, vector<32x128xf32> -> vector<32x128xf32>
    %c0_7 = arith.constant 0 : index
    %c0_8 = arith.constant 0 : index
    %33 = vector.load %arg5[%c0_7, %c0_8] : memref<8x128xf32, #tpu.memory_space<vmem>>, vector<1x128xf32>
    %34 = vector.broadcast %33 : vector<1x128xf32> to vector<32x128xf32>
    %35 = arith.addf %32, %34 : vector<32x128xf32>
    %cst_9 = arith.constant 0.000000e+00 : f32
    %36 = vector.broadcast %cst_9 : f32 to vector<32x128xf32>
    %37 = arith.maximumf %35, %36 : vector<32x128xf32>
    %c10_i32 = arith.constant 10 : i32
    %38 = vector.broadcast %c10_i32 : i32 to vector<32x128xi32>
    %39 = arith.cmpi slt, %29, %38 : vector<32x128xi32>
    %cst_10 = arith.constant 0.000000e+00 : f32
    %40 = vector.broadcast %cst_10 : f32 to vector<32x128xf32>
    %41 = arith.select %39, %37, %40 : vector<32x128xi1>, vector<32x128xf32>
    %42 = vector.extract_strided_slice %41 {offsets = [0, 0], sizes = [16, 128], strides = [1, 1]} : vector<32x128xf32> to vector<16x128xf32>
    %cst_11 = arith.constant dense<0xFF800000> : vector<128xf32>
    %43 = vector.multi_reduction <maximumf>, %42, %cst_11 [0] : vector<16x128xf32> to vector<128xf32>
    %44 = vector.shape_cast %43 : vector<128xf32> to vector<1x128xf32>
    %45 = vector.extract_strided_slice %41 {offsets = [16, 0], sizes = [16, 128], strides = [1, 1]} : vector<32x128xf32> to vector<16x128xf32>
    %cst_12 = arith.constant dense<0xFF800000> : vector<128xf32>
    %46 = vector.multi_reduction <maximumf>, %45, %cst_12 [0] : vector<16x128xf32> to vector<128xf32>
    %47 = vector.shape_cast %46 : vector<128xf32> to vector<1x128xf32>
    %48 = tpu.concatenate %44, %47 in 0 : vector<1x128xf32>, vector<1x128xf32> -> vector<2x128xf32>
    %c384 = arith.constant 384 : index
    %c0_13 = arith.constant 0 : index
    %49 = vector.load %arg4[%c384, %c0_13] : memref<2448x128xf32, #tpu.memory_space<vmem>>, vector<512x128xf32>
    %50 = vector.extract_strided_slice %26 {offsets = [0, 0], sizes = [32, 512], strides = [1, 1]} : vector<32x640xf32> to vector<32x512xf32>
    %cst_14 = arith.constant dense<0.000000e+00> : vector<32x128xf32>
    %51 = tpu.matmul %50, %49, %cst_14 {dimension_numbers = #tpu.dot_dimension_numbers<[1], [0], [0], [1], [0, 0, 1, 1], [], []>, precision = #tpu.contract_precision<fp32>} : vector<32x512xf32>, vector<512x128xf32>, vector<32x128xf32> -> vector<32x128xf32>
    %c1_15 = arith.constant 1 : index
    %c0_16 = arith.constant 0 : index
    %52 = vector.load %arg5[%c1_15, %c0_16] : memref<8x128xf32, #tpu.memory_space<vmem>>, vector<1x128xf32>
    %53 = vector.broadcast %52 : vector<1x128xf32> to vector<32x128xf32>
    %54 = arith.addf %51, %53 : vector<32x128xf32>
    %cst_17 = arith.constant 0.000000e+00 : f32
    %55 = vector.broadcast %cst_17 : f32 to vector<32x128xf32>
    %56 = arith.maximumf %54, %55 : vector<32x128xf32>
    %c9_i32 = arith.constant 9 : i32
    %57 = vector.broadcast %c9_i32 : i32 to vector<32x128xi32>
    %58 = arith.cmpi slt, %29, %57 : vector<32x128xi32>
    %cst_18 = arith.constant 0.000000e+00 : f32
    %59 = vector.broadcast %cst_18 : f32 to vector<32x128xf32>
    %60 = arith.select %58, %56, %59 : vector<32x128xi1>, vector<32x128xf32>
    %61 = vector.extract_strided_slice %60 {offsets = [0, 0], sizes = [16, 128], strides = [1, 1]} : vector<32x128xf32> to vector<16x128xf32>
    %cst_19 = arith.constant dense<0xFF800000> : vector<128xf32>
    %62 = vector.multi_reduction <maximumf>, %61, %cst_19 [0] : vector<16x128xf32> to vector<128xf32>
    %63 = vector.shape_cast %62 : vector<128xf32> to vector<1x128xf32>
    %64 = vector.extract_strided_slice %60 {offsets = [16, 0], sizes = [16, 128], strides = [1, 1]} : vector<32x128xf32> to vector<16x128xf32>
    %cst_20 = arith.constant dense<0xFF800000> : vector<128xf32>
    %65 = vector.multi_reduction <maximumf>, %64, %cst_20 [0] : vector<16x128xf32> to vector<128xf32>
    %66 = vector.shape_cast %65 : vector<128xf32> to vector<1x128xf32>
    %67 = tpu.concatenate %63, %66 in 0 : vector<1x128xf32>, vector<1x128xf32> -> vector<2x128xf32>
    %c896 = arith.constant 896 : index
    %c0_21 = arith.constant 0 : index
    %68 = vector.load %arg4[%c896, %c0_21] : memref<2448x128xf32, #tpu.memory_space<vmem>>, vector<640x128xf32>
    %cst_22 = arith.constant dense<0.000000e+00> : vector<32x128xf32>
    %69 = tpu.matmul %26, %68, %cst_22 {dimension_numbers = #tpu.dot_dimension_numbers<[1], [0], [0], [1], [0, 0, 1, 1], [], []>, precision = #tpu.contract_precision<fp32>} : vector<32x640xf32>, vector<640x128xf32>, vector<32x128xf32> -> vector<32x128xf32>
    %c2_23 = arith.constant 2 : index
    %c0_24 = arith.constant 0 : index
    %70 = vector.load %arg5[%c2_23, %c0_24] : memref<8x128xf32, #tpu.memory_space<vmem>>, vector<1x128xf32>
    %71 = vector.broadcast %70 : vector<1x128xf32> to vector<32x128xf32>
    %72 = arith.addf %69, %71 : vector<32x128xf32>
    %cst_25 = arith.constant 0.000000e+00 : f32
    %73 = vector.broadcast %cst_25 : f32 to vector<32x128xf32>
    %74 = arith.maximumf %72, %73 : vector<32x128xf32>
    %c8_i32 = arith.constant 8 : i32
    %75 = vector.broadcast %c8_i32 : i32 to vector<32x128xi32>
    %76 = arith.cmpi slt, %29, %75 : vector<32x128xi32>
    %cst_26 = arith.constant 0.000000e+00 : f32
    %77 = vector.broadcast %cst_26 : f32 to vector<32x128xf32>
    %78 = arith.select %76, %74, %77 : vector<32x128xi1>, vector<32x128xf32>
    %79 = vector.extract_strided_slice %78 {offsets = [0, 0], sizes = [16, 128], strides = [1, 1]} : vector<32x128xf32> to vector<16x128xf32>
    %cst_27 = arith.constant dense<0xFF800000> : vector<128xf32>
    %80 = vector.multi_reduction <maximumf>, %79, %cst_27 [0] : vector<16x128xf32> to vector<128xf32>
    %81 = vector.shape_cast %80 : vector<128xf32> to vector<1x128xf32>
    %82 = vector.extract_strided_slice %78 {offsets = [16, 0], sizes = [16, 128], strides = [1, 1]} : vector<32x128xf32> to vector<16x128xf32>
    %cst_28 = arith.constant dense<0xFF800000> : vector<128xf32>
    %83 = vector.multi_reduction <maximumf>, %82, %cst_28 [0] : vector<16x128xf32> to vector<128xf32>
    %84 = vector.shape_cast %83 : vector<128xf32> to vector<1x128xf32>
    %85 = tpu.concatenate %81, %84 in 0 : vector<1x128xf32>, vector<1x128xf32> -> vector<2x128xf32>
    %86 = tpu.concatenate %48, %67, %85 in 1 : vector<2x128xf32>, vector<2x128xf32>, vector<2x128xf32> -> vector<2x384xf32>
    %c1536 = arith.constant 1536 : index
    %c0_29 = arith.constant 0 : index
    %87 = vector.load %arg4[%c1536, %c0_29] : memref<2448x128xf32, #tpu.memory_space<vmem>>, vector<384x128xf32>
    %cst_30 = arith.constant dense<0.000000e+00> : vector<2x128xf32>
    %88 = tpu.matmul %86, %87, %cst_30 {dimension_numbers = #tpu.dot_dimension_numbers<[1], [0], [0], [1], [0, 0, 1, 1], [], []>, precision = #tpu.contract_precision<fp32>} : vector<2x384xf32>, vector<384x128xf32>, vector<2x128xf32> -> vector<2x128xf32>
    %c3_31 = arith.constant 3 : index
    %c0_32 = arith.constant 0 : index
    %89 = vector.load %arg5[%c3_31, %c0_32] : memref<8x128xf32, #tpu.memory_space<vmem>>, vector<1x128xf32>
    %90 = vector.broadcast %89 : vector<1x128xf32> to vector<2x128xf32>
    %91 = arith.addf %88, %90 : vector<2x128xf32>
    %c0_33 = arith.constant 0 : index
    %c0_34 = arith.constant 0 : index
    %92 = vector.load %arg1[%c0_33, %c0_34] : memref<8x16xf32, #tpu.memory_space<vmem>>, vector<8x16xf32>
    %c0_35 = arith.constant 0 : index
    %c0_36 = arith.constant 0 : index
    %93 = vector.load %arg2[%c0_35, %c0_36] : memref<8x8xf32, #tpu.memory_space<vmem>>, vector<8x8xf32>
    %cst_37 = arith.constant dense<0.000000e+00> : vector<128xf32>
    %94 = vector.multi_reduction <add>, %91, %cst_37 [0] : vector<2x128xf32> to vector<128xf32>
    %95 = vector.shape_cast %94 : vector<128xf32> to vector<1x128xf32>
    %cst_38 = arith.constant 2.000000e+00 : f32
    %96 = vector.broadcast %cst_38 : f32 to vector<1x128xf32>
    %97 = arith.divf %95, %96 : vector<1x128xf32>
    %cst_39 = arith.constant dense<0.000000e+00> : vector<8xf32>
    %98 = vector.multi_reduction <add>, %93, %cst_39 [1] : vector<8x8xf32> to vector<8xf32>
    %99 = vector.shape_cast %98 : vector<8xf32> to vector<8x1xf32>
    %cst_40 = arith.constant dense<0.000000e+00> : vector<8xf32>
    %100 = vector.multi_reduction <add>, %93, %cst_40 [0] : vector<8x8xf32> to vector<8xf32>
    %101 = vector.shape_cast %100 : vector<8xf32> to vector<1x8xf32>
    %cst_41 = arith.constant 0.000000e+00 : f32
    %102 = vector.broadcast %cst_41 : f32 to vector<8x1xf32>
    %103 = arith.cmpf ogt, %99, %102 : vector<8x1xf32>
    %104 = math.rsqrt %99 : vector<8x1xf32>
    %cst_42 = arith.constant 0.000000e+00 : f32
    %105 = vector.broadcast %cst_42 : f32 to vector<8x1xf32>
    %106 = arith.select %103, %104, %105 : vector<8x1xi1>, vector<8x1xf32>
    %cst_43 = arith.constant 0.000000e+00 : f32
    %107 = vector.broadcast %cst_43 : f32 to vector<1x8xf32>
    %108 = arith.cmpf ogt, %101, %107 : vector<1x8xf32>
    %109 = math.rsqrt %101 : vector<1x8xf32>
    %cst_44 = arith.constant 0.000000e+00 : f32
    %110 = vector.broadcast %cst_44 : f32 to vector<1x8xf32>
    %111 = arith.select %108, %109, %110 : vector<1x8xi1>, vector<1x8xf32>
    %112 = vector.broadcast %111 : vector<1x8xf32> to vector<8x8xf32>
    %113 = arith.mulf %93, %112 : vector<8x8xf32>
    %cst_45 = arith.constant dense<0.000000e+00> : vector<8x16xf32>
    %114 = tpu.matmul %113, %92, %cst_45 {dimension_numbers = #tpu.dot_dimension_numbers<[1], [0], [0], [1], [0, 0, 1, 1], [], []>, precision = #tpu.contract_precision<fp32>} : vector<8x8xf32>, vector<8x16xf32>, vector<8x16xf32> -> vector<8x16xf32>
    %115 = vector.broadcast %106 : vector<8x1xf32> to vector<8x16xf32>
    %116 = arith.mulf %115, %114 : vector<8x16xf32>
    %cst_46 = arith.constant dense<0.000000e+00> : vector<16xf32>
    %117 = vector.multi_reduction <add>, %116, %cst_46 [0] : vector<8x16xf32> to vector<16xf32>
    %118 = vector.shape_cast %117 : vector<16xf32> to vector<1x16xf32>
    %cst_47 = arith.constant 8.000000e+00 : f32
    %119 = vector.broadcast %cst_47 : f32 to vector<1x16xf32>
    %120 = arith.divf %118, %119 : vector<1x16xf32>
    %cst_48 = arith.constant dense<0.000000e+00> : vector<8xf32>
    %121 = vector.multi_reduction <add>, %113, %cst_48 [1] : vector<8x8xf32> to vector<8xf32>
    %122 = vector.shape_cast %121 : vector<8xf32> to vector<8x1xf32>
    %123 = arith.mulf %106, %122 : vector<8x1xf32>
    %cst_49 = arith.constant dense<0.000000e+00> : vector<1xf32>
    %124 = vector.multi_reduction <add>, %123, %cst_49 [0] : vector<8x1xf32> to vector<1xf32>
    %125 = vector.shape_cast %124 : vector<1xf32> to vector<1x1xf32>
    %cst_50 = arith.constant 8.000000e+00 : f32
    %126 = vector.broadcast %cst_50 : f32 to vector<1x1xf32>
    %127 = arith.divf %125, %126 : vector<1x1xf32>
    %c2048 = arith.constant 2048 : index
    %c0_51 = arith.constant 0 : index
    %128 = vector.load %arg4[%c2048, %c0_51] : memref<2448x128xf32, #tpu.memory_space<vmem>>, vector<16x128xf32>
    %cst_52 = arith.constant dense<0.000000e+00> : vector<1x128xf32>
    %129 = tpu.matmul %120, %128, %cst_52 {dimension_numbers = #tpu.dot_dimension_numbers<[1], [0], [0], [1], [0, 0, 1, 1], [], []>, precision = #tpu.contract_precision<fp32>} : vector<1x16xf32>, vector<16x128xf32>, vector<1x128xf32> -> vector<1x128xf32>
    %c1920 = arith.constant 1920 : index
    %c0_53 = arith.constant 0 : index
    %130 = vector.load %arg4[%c1920, %c0_53] : memref<2448x128xf32, #tpu.memory_space<vmem>>, vector<128x128xf32>
    %cst_54 = arith.constant dense<0.000000e+00> : vector<1x128xf32>
    %131 = tpu.matmul %97, %130, %cst_54 {dimension_numbers = #tpu.dot_dimension_numbers<[1], [0], [0], [1], [0, 0, 1, 1], [], []>, precision = #tpu.contract_precision<fp32>} : vector<1x128xf32>, vector<128x128xf32>, vector<1x128xf32> -> vector<1x128xf32>
    %132 = vector.broadcast %127 : vector<1x1xf32> to vector<1x128xf32>
    %133 = arith.mulf %132, %131 : vector<1x128xf32>
    %134 = arith.addf %129, %133 : vector<1x128xf32>
    %c4_55 = arith.constant 4 : index
    %c0_56 = arith.constant 0 : index
    %135 = vector.load %arg5[%c4_55, %c0_56] : memref<8x128xf32, #tpu.memory_space<vmem>>, vector<1x128xf32>
    %136 = arith.addf %134, %135 : vector<1x128xf32>
    %137 = vector.shape_cast %136 : vector<1x128xf32> to vector<1x128xf32>
    %138 = vector.broadcast %137 : vector<1x128xf32> to vector<2x128xf32>
    %c0_57 = arith.constant 0 : index
    %c0_58 = arith.constant 0 : index
    %139 = vector.load %arg3[%c0_57, %c0_58] : memref<2x128xf32, #tpu.memory_space<vmem>>, vector<2x128xf32>
    %140 = tpu.concatenate %139, %138 in 1 : vector<2x128xf32>, vector<2x128xf32> -> vector<2x256xf32>
    %c2064 = arith.constant 2064 : index
    %c0_59 = arith.constant 0 : index
    %141 = vector.load %arg4[%c2064, %c0_59] : memref<2448x128xf32, #tpu.memory_space<vmem>>, vector<256x128xf32>
    %cst_60 = arith.constant dense<0.000000e+00> : vector<2x128xf32>
    %142 = tpu.matmul %140, %141, %cst_60 {dimension_numbers = #tpu.dot_dimension_numbers<[1], [0], [0], [1], [0, 0, 1, 1], [], []>, precision = #tpu.contract_precision<fp32>} : vector<2x256xf32>, vector<256x128xf32>, vector<2x128xf32> -> vector<2x128xf32>
    %c5 = arith.constant 5 : index
    %c0_61 = arith.constant 0 : index
    %143 = vector.load %arg5[%c5, %c0_61] : memref<8x128xf32, #tpu.memory_space<vmem>>, vector<1x128xf32>
    %144 = vector.broadcast %143 : vector<1x128xf32> to vector<2x128xf32>
    %145 = arith.addf %142, %144 : vector<2x128xf32>
    %146 = arith.negf %145 : vector<2x128xf32>
    %147 = math.exp %146 : vector<2x128xf32>
    %cst_62 = arith.constant 1.000000e+00 : f32
    %148 = vector.broadcast %cst_62 : f32 to vector<2x128xf32>
    %149 = arith.addf %148, %147 : vector<2x128xf32>
    %150 = arith.divf %148, %149 : vector<2x128xf32>
    %151 = vector.extract_strided_slice %150 {offsets = [0, 0], sizes = [2, 1], strides = [1, 1]} : vector<2x128xf32> to vector<2x1xf32>
    %152 = vector.broadcast %151 : vector<2x1xf32> to vector<2x128xf32>
    %153 = arith.mulf %152, %139 : vector<2x128xf32>
    %154 = vector.extract_strided_slice %150 {offsets = [0, 1], sizes = [2, 1], strides = [1, 1]} : vector<2x128xf32> to vector<2x1xf32>
    %155 = vector.broadcast %154 : vector<2x1xf32> to vector<2x128xf32>
    %156 = arith.mulf %155, %138 : vector<2x128xf32>
    %157 = arith.addf %153, %156 : vector<2x128xf32>
    %c2320 = arith.constant 2320 : index
    %c0_63 = arith.constant 0 : index
    %158 = vector.load %arg4[%c2320, %c0_63] : memref<2448x128xf32, #tpu.memory_space<vmem>>, vector<128x128xf32>
    %cst_64 = arith.constant dense<0.000000e+00> : vector<2x128xf32>
    %159 = tpu.matmul %157, %158, %cst_64 {dimension_numbers = #tpu.dot_dimension_numbers<[1], [0], [0], [1], [0, 0, 1, 1], [], []>, precision = #tpu.contract_precision<fp32>} : vector<2x128xf32>, vector<128x128xf32>, vector<2x128xf32> -> vector<2x128xf32>
    %c6 = arith.constant 6 : index
    %c0_65 = arith.constant 0 : index
    %160 = vector.load %arg5[%c6, %c0_65] : memref<8x128xf32, #tpu.memory_space<vmem>>, vector<1x128xf32>
    %161 = vector.broadcast %160 : vector<1x128xf32> to vector<2x128xf32>
    %162 = arith.addf %159, %161 : vector<2x128xf32>
    %c0_66 = arith.constant 0 : index
    %c0_67 = arith.constant 0 : index
    %163 = vector.load %arg6[%c0_66, %c0_67] : memref<2x128xf32, #tpu.memory_space<vmem>>, vector<2x128xf32>
    tpu.vector_store %arg6[%c0_66, %c0_67], %162 {strides = array<i32>} : memref<2x128xf32, #tpu.memory_space<vmem>>, vector<2x128xf32>,
    return
  }
}

</mosaic_0001>

<bundles_post_ra>
// kernel: vgcn_bert_dynmm_forward.1
= control target key start
LH: loop header
LB: loop body
LE: loop exit
PB: predicated region body
PF: predicated region fallthrough
CT: control target
= control target key end

     0   :  { %11 = vsyncpa [#allocation3], 0  ;;  %s25013_s0 = inlined_call_operand.vmem [shape: s32[40,1], index: 0, kind: input, shape index: {}]   ;;  %s25014_s1 = inlined_call_operand.hbm [shape: f32[8,16], index: 1, kind: input, shape index: {}]   ;;  %s25015_s2 = inlined_call_operand.hbm [shape: f32[8,8], index: 2, kind: input, shape index: {}]   ;;  %s25016_s3 = inlined_call_operand.hbm [shape: f32[2,128], index: 3, kind: input, shape index: {}]   ;;  %s25017_s4 = inlined_call_operand.hbm [shape: f32[2448,128], index: 4, kind: input, shape index: {}]   ;;  %s25018_s5 = inlined_call_operand.hbm [shape: f32[8,128], index: 5, kind: input, shape index: {}]   ;;  %s25019_s6 = inlined_call_operand.hbm [shape: f32[2,128], index: 6, kind: output, shape index: {}]  }
   0x1   :  { %12 = vsyncpa [#allocation6], 0 }
   0x2   :  { %13 = vsyncpa [#allocation9], 0 }
   0x3   :  { %14 = vsyncpa [#allocation4], 0  ;;  %s18073_s21 = smov [#allocation5]   ;;  %s18074_s23 = smov [#allocation8]  }
   0x4   :  { %s33_s22 = sshll.u32 %s18073_s21, 4  ;;  %s52_s24 = sshll.u32 %s18074_s23, 4  ;;  %s34_s22 = int_to_ptr.vmem [resolvable:$true] %s33_s22  ;;  %s18122_s24 = int_to_ptr.vmem [resolvable:$true] %s52_s24 }
   0x5   :  { %s17933_s27 = scalar_lea.hbm %s25015_s2, 128 }
   0x6   :  { %p17934_p0 = scmp.ne.s32.totalorder %s25015_s2, %s17933_s27  ;;  %p17937_p1 = scmp.lt.u32.totalorder %s17933_s27, %s25015_s2 }
   0x8   :  { %p17939_p2 = pnand %p17937_p1, %p17934_p0 }
   0xa   :  { %17942 = shalt.err (!%p17939_p2)
}
   0xb   :  { %s17943_s8 = scalar_lea.vmem %s34_s22, 128  ;;  %p17948_p4 = scmp.lt.s32.totalorder %s34_s22, %s34_s22 }
   0xc   :  { %p17944_p3 = scmp.ne.s32.totalorder %s34_s22, %s17943_s8  ;;  %p17949_p5 = scmp.lt.s32.totalorder %s17943_s8, %s17943_s8 }
   0xe   :  { %p17950_p6 = por %p17949_p5, %p17948_p4 }
  0x10   :  { %p17951_p7 = pnand %p17950_p6, %p17944_p3 }
  0x12   :  { %17954 = shalt.err (!%p17951_p7)
}
  0x13   :  { %36 = dma.hbm_to_vmem [thread:$0]  %s25015_s2, 128, %s34_s22, [#allocation6]  }
  0x14   :  { %s17955_s13 = scalar_lea.hbm %s25017_s4, 39168 }
  0x15   :  { %p17956_p8 = scmp.ne.s32.totalorder %s25017_s4, %s17955_s13  ;;  %p17959_p9 = scmp.lt.u32.totalorder %s17955_s13, %s25017_s4 }
  0x17   :  { %p17961_p10 = pnand %p17959_p9, %p17956_p8 }
  0x19   :  { %17964 = shalt.err (!%p17961_p10)
}
  0x1a   :  { %s17965_s18 = scalar_lea.vmem %s18122_s24, 39168  ;;  %p17970_p12 = scmp.lt.s32.totalorder %s18122_s24, %s18122_s24 }
  0x1b   :  { %p17966_p11 = scmp.ne.s32.totalorder %s18122_s24, %s17965_s18  ;;  %p17971_p13 = scmp.lt.s32.totalorder %s17965_s18, %s17965_s18 }
  0x1d   :  { %p17972_p0 = por %p17971_p13, %p17970_p12 }
  0x1f   :  { %p17973_p1 = pnand %p17972_p0, %p17966_p11 }
  0x21   :  { %17976 = shalt.err (!%p17973_p1)
}
  0x22   :  { %s18075_s2 = smov 128   ;;  %s18076_s19 = smov 8  }
  0x23   :  { %58 = dma.hbm_to_vmem [thread:$0]  %s25017_s4, 39168, %s18122_s24, [#allocation9], %s18075_s2, %s18075_s2, %s18076_s19  }
  0x24   :  { %s18077_s22 = smov [#allocation2]   ;;  %s18078_s25 = smov [#allocation7]  }
  0x25   :  { %s23_s23 = sshll.u32 %s18077_s22, 4  ;;  %s43_s26 = sshll.u32 %s18078_s25, 4  ;;  %s24_s23 = int_to_ptr.vmem [resolvable:$true] %s23_s23  ;;  %s44_s26 = int_to_ptr.vmem [resolvable:$true] %s43_s26 }
  0x26   :  { %s17977_s29 = scalar_lea.hbm %s25014_s1, 128 }
  0x27   :  { %p17978_p2 = scmp.ne.s32.totalorder %s25014_s1, %s17977_s29  ;;  %p17981_p3 = scmp.lt.u32.totalorder %s17977_s29, %s25014_s1 }
  0x29   :  { %p17983_p4 = pnand %p17981_p3, %p17978_p2 }
  0x2b   :  { %17986 = shalt.err (!%p17983_p4)
}
  0x2c   :  { %s17987_s4 = scalar_lea.vmem %s24_s23, 128  ;;  %p17992_p6 = scmp.lt.s32.totalorder %s24_s23, %s24_s23 }
  0x2d   :  { %p17988_p5 = scmp.ne.s32.totalorder %s24_s23, %s17987_s4  ;;  %p17993_p7 = scmp.lt.s32.totalorder %s17987_s4, %s17987_s4 }
  0x2f   :  { %p17994_p8 = por %p17993_p7, %p17992_p6 }
  0x31   :  { %p17995_p9 = pnand %p17994_p8, %p17988_p5 }
  0x33   :  { %17998 = shalt.err (!%p17995_p9)
}
  0x34   :  { %26 = dma.hbm_to_vmem [thread:$0]  %s25014_s1, 128, %s24_s23, [#allocation3]  }
  0x35   :  { %s17999_s13 = scalar_lea.hbm %s25016_s3, 32 }
  0x36   :  { %p18000_p10 = scmp.ne.s32.totalorder %s25016_s3, %s17999_s13  ;;  %p18003_p11 = scmp.lt.u32.totalorder %s17999_s13, %s25016_s3 }
  0x38   :  { %p18005_p12 = pnand %p18003_p11, %p18000_p10 }
  0x3a   :  { %18008 = shalt.err (!%p18005_p12)
}
  0x3b   :  { %s18009_s18 = scalar_lea.vmem %s44_s26, 32  ;;  %p18014_p0 = scmp.lt.s32.totalorder %s44_s26, %s44_s26 }
  0x3c   :  { %p18010_p13 = scmp.ne.s32.totalorder %s44_s26, %s18009_s18  ;;  %p18015_p1 = scmp.lt.s32.totalorder %s18009_s18, %s18009_s18 }
  0x3e   :  { %p18016_p2 = por %p18015_p1, %p18014_p0 }
  0x40   :  { %p18017_p3 = pnand %p18016_p2, %p18010_p13 }
  0x42   :  { %18020 = shalt.err (!%p18017_p3)
}
  0x43   :  { %46 = dma.hbm_to_vmem [thread:$0]  %s25016_s3, 32, %s44_s26, [#allocation6]  }
  0x44   :  { %s18079_s19 = smov [#allocation10]   ;;  %s18021_s23 = scalar_lea.hbm %s25018_s5, 128 }
  0x45   :  { %s65_s20 = sshll.u32 %s18079_s19, 4  ;;  %p18022_p4 = scmp.ne.s32.totalorder %s25018_s5, %s18021_s23  ;;  %s66_s20 = int_to_ptr.vmem [resolvable:$true] %s65_s20 }
  0x46   :  { %p18025_p5 = scmp.lt.u32.totalorder %s18021_s23, %s25018_s5 }
  0x48   :  { %p18027_p6 = pnand %p18025_p5, %p18022_p4 }
  0x4a   :  { %18030 = shalt.err (!%p18027_p6)
}
  0x4b   :  { %s18031_s30 = scalar_lea.vmem %s66_s20, 128  ;;  %p18036_p8 = scmp.lt.s32.totalorder %s66_s20, %s66_s20 }
  0x4c   :  { %p18032_p7 = scmp.ne.s32.totalorder %s66_s20, %s18031_s30  ;;  %p18037_p9 = scmp.lt.s32.totalorder %s18031_s30, %s18031_s30 }
  0x4e   :  { %p18038_p10 = por %p18037_p9, %p18036_p8 }
  0x50   :  { %p18039_p11 = pnand %p18038_p10, %p18032_p7 }
  0x52   :  { %18042 = shalt.err (!%p18039_p11)
}
  0x53   :  { %68 = dma.hbm_to_vmem [thread:$0]  %s25018_s5, 128, %s66_s20, [#allocation9]  }
  0x54   :  { %18065 = dma.done.wait [#allocation3], 128  }
  0x55   :  { %18066 = vsyncadd [#allocation3], 4294967168 }
  0x56   :  { %18067 = dma.done.wait [#allocation6], 160  }
  0x57   :  { %18068 = vsyncadd [#allocation6], 4294967136 }
  0x58   :  { %18069 = dma.done.wait [#allocation9], 39296  }
  0x59   :  { %18070 = vsyncadd [#allocation9], 4294928000  ;;  %v18080_v0 = vmov 0   ;;  %v142_v1 = vld [vmem:[%s25013_s0 + $0x2] sm:$0xff]  ;;  %v143_v3 = vld [vmem:[%s25013_s0 + $0xa] sm:$0xff] }
  0x5a   :  { %17922 = vset.pattern.permute.xlu1 %v18080_v0  ;;  %17921 = vset.pattern.permute.xlu0 %v18080_v0  ;;  %v114_v2 = vld [vmem:[%s25013_s0 + $0x1] sm:$0xff]  ;;  %v115_v6 = vld [vmem:[%s25013_s0 + $0x9] sm:$0xff]  ;;  %v251_v7 = vld [vmem:[#allocation8 + $0x80] sm:$0xff] }
  0x5b   :  { %147 = vperm.xlu1 %17922, %v142_v1   ;;  %119 = vperm.xlu0 %17921, %v114_v2   ;;  %v86_v4 = vld [vmem:[%s25013_s0] sm:$0xff]  ;;  %v87_v5 = vld [vmem:[%s25013_s0 + $0x8] sm:$0xff]  ;;  %v337_v9 = vand.u32 4294901760, %v251_v7  ;;  %v18207_v10 = vld [vmem:[#allocation8 + $0x100] sm:$0xff] }
  0x5c   :  { %v252_v8 = vld [vmem:[#allocation8 + $0x88] sm:$0xff]  ;;  %v88_v12 = vld [vmem:[%s25013_s0 + $0x10] sm:$0xff]  ;;  %v25027_v15 = vand.u32 4294901760, %v18207_v10  ;;  %v253_v19 = vld [vmem:[#allocation8 + $0x90] sm:$0xff] }
  0x5d   :  { %v18209_v11 = vld [vmem:[#allocation8 + $0x108] sm:$0xff]  ;;  %v116_v13 = vld [vmem:[%s25013_s0 + $0x11] sm:$0xff]  ;;  %v340_v14 = vand.u32 4294901760, %v252_v8  ;;  %v18219_v20 = vsub.f32 %v251_v7, %v337_v9  ;;  %v343_v24 = vand.u32 4294901760, %v253_v19  ;;  %v18221_v25 = vld [vmem:[#allocation8 + $0x110] sm:$0xff] }
  0x5e   :  { %v25026_v16 = vand.u32 4294901760, %v18209_v11  ;;  %v235_v17 = vld [vmem:[#allocation8] sm:$0xff]  ;;  %v236_v18 = vld [vmem:[#allocation8 + $0x8] sm:$0xff]  ;;  %v254_v23 = vld [vmem:[#allocation8 + $0x98] sm:$0xff]  ;;  %v25025_v44 = vand.u32 4294901760, %v18221_v25 }
  0x5f   :  { %150 = vperm.xlu1 %17922, %v143_v3   ;;  %91 = vperm.xlu0 %17921, %v86_v4   ;;  %v289_v21 = vand.u32 4294901760, %v235_v17  ;;  %v292_v22 = vand.u32 4294901760, %v236_v18  ;;  %v18223_v26 = vld [vmem:[#allocation8 + $0x118] sm:$0xff]  ;;  %v18225_v27 = vpack.c.bf16 %v340_v14, %v337_v9  ;;  %v18227_v28 = vsub.f32 %v252_v8, %v340_v14  ;;  %v237_v31 = vld [vmem:[#allocation8 + $0x10] sm:$0xff]  ;;  %v255_v33 = vld [vmem:[#allocation8 + $0xa0] sm:$0xff] }
  0x60   :  { %v18233_v29 = vpack.c.bf16 %v25026_v16, %v25027_v15  ;;  %v346_v30 = vand.u32 4294901760, %v254_v23  ;;  %v238_v32 = vld [vmem:[#allocation8 + $0x18] sm:$0xff]  ;;  %v18241_v37 = vsub.f32 %v253_v19, %v343_v24  ;;  %v256_v38 = vld [vmem:[#allocation8 + $0xa8] sm:$0xff]  ;;  %v18243_v39 = vld [vmem:[#allocation8 + $0x120] sm:$0xff]  ;;  %v25024_v45 = vand.u32 4294901760, %v18223_v26 }
  0x61   :  { %26020 = vst [vmem:[#allocation16_spill] sm:$0xff] %v18225_v27  ;;  %v18235_v34 = vpack.c.bf16 %v292_v22, %v289_v21  ;;  %v18237_v35 = vsub.f32 %v235_v17, %v289_v21  ;;  %v18239_v36 = vsub.f32 %v236_v18, %v292_v22  ;;  %v18245_v40 = vld [vmem:[#allocation8 + $0x128] sm:$0xff]  ;;  %15642 = vmatprep.subr.bf16.mxu1 %v18225_v27  ;;  %v239_v46 = vld [vmem:[#allocation8 + $0x20] sm:$0xff]  ;;  %v295_v48 = vand.u32 4294901760, %v237_v31  ;;  %v257_v57 = vld [vmem:[#allocation8 + $0xb0] sm:$0xff] }
  0x62   :  { %26021 = vst [vmem:[#allocation17_spill] sm:$0xff] %v18233_v29  ;;  %v89_v41 = vld [vmem:[%s25013_s0 + $0x18] sm:$0xff]  ;;  %15834 = vmatprep.subr.bf16.mxu0 %v18233_v29  ;;  %v18252_v42 = vpack.c.bf16 %v346_v30, %v343_v24  ;;  %v18254_v43 = vsub.f32 %v254_v23, %v346_v30  ;;  %v298_v49 = vand.u32 4294901760, %v238_v32  ;;  %v349_v50 = vand.u32 4294901760, %v255_v33  ;;  %v258_v58 = vld [vmem:[#allocation8 + $0xb8] sm:$0xff]  ;;  %v18271_v59 = vld [vmem:[#allocation8 + $0x130] sm:$0xff] }
  0x63   :  { %94 = vperm.xlu1 %17922, %v87_v5   ;;  %122 = vperm.xlu0 %17921, %v115_v6   ;;  %26022 = vst [vmem:[#allocation18_spill] sm:$0xff] %v18235_v34  ;;  %v117_v47 = vld [vmem:[%s25013_s0 + $0x19] sm:$0xff]  ;;  %v352_v51 = vand.u32 4294901760, %v256_v38  ;;  %v18267_v53 = vpack.c.bf16 %v25024_v45, %v25025_v44  ;;  %v25023_v54 = vand.u32 4294901760, %v18243_v39  ;;  %v25022_v55 = vand.u32 4294901760, %v18245_v40  ;;  %v18282_v0 = vld [vmem:[#allocation8 + $0x138] sm:$0xff] }
  0x64   :  { %26023 = vst [vmem:[#allocation19_spill] sm:$0xff] %v18252_v42  ;;  %26024 = vst [vmem:[#allocation20_spill] sm:$0xff] %v18254_v43  ;;  %v240_v52 = vld [vmem:[#allocation8 + $0x28] sm:$0xff]  ;;  %15644 = vmatpush3.bf16.msra.mxu1 %v18235_v34  ;;  %15836 = vmatpush3.bf16.msra.mxu0 %v18233_v29  ;;  %v301_v56 = vand.u32 4294901760, %v239_v46  ;;  %v18274_v60 = vpack.c.bf16 %v298_v49, %v295_v48  ;;  %v18276_v61 = vsub.f32 %v237_v31, %v295_v48  ;;  %v241_v1 = vld [vmem:[#allocation8 + $0x30] sm:$0xff] }
  0x65   :  { %26025 = vst [vmem:[#allocation21_spill] sm:$0xff] %v18267_v53  ;;  %15646 = vmatprep.subr.bf16.mxu1 %v18252_v42  ;;  %v18278_v62 = vsub.f32 %v238_v32, %v298_v49  ;;  %v18280_v63 = vpack.c.bf16 %v352_v51, %v349_v50  ;;  %15838 = vmatprep.subr.bf16.mxu0 %v18267_v53  ;;  %v304_v5 = vand.u32 4294901760, %v240_v52  ;;  %v242_v6 = vld [vmem:[#allocation8 + $0x38] sm:$0xff]  ;;  %v145_v7 = vld [vmem:[%s25013_s0 + $0x1a] sm:$0xff]  ;;  %v355_v9 = vand.u32 4294901760, %v257_v57  ;;  %v259_v14 = vld [vmem:[#allocation8 + $0xc0] sm:$0xff] }
  0x66   :  { %26026 = vst [vmem:[#allocation22_spill] sm:$0xff] %v18274_v60  ;;  %v18285_v2 = vsub.f32 %v255_v33, %v349_v50  ;;  %v18287_v3 = vsub.f32 %v256_v38, %v352_v51  ;;  %v18293_v4 = vpack.c.bf16 %v25022_v55, %v25023_v54  ;;  %v18298_v8 = vsub.f32 %v239_v46, %v301_v56  ;;  %v260_v17 = vld [vmem:[#allocation8 + $0xc8] sm:$0xff]  ;;  %v144_v18 = vld [vmem:[%s25013_s0 + $0x12] sm:$0xff]  ;;  %v261_v51 = vld [vmem:[#allocation8 + $0xd0] sm:$0xff] }
  0x67   :  { %97 = vperm.xlu1 %17922, %v88_v12   ;;  %125 = vperm.xlu0 %17921, %v116_v13   ;;  %26027 = vst [vmem:[#allocation23_spill] sm:$0xff] %v18280_v63  ;;  %v358_v12 = vand.u32 4294901760, %v258_v58  ;;  %v25021_v13 = vand.u32 4294901760, %v18271_v59  ;;  %v18306_v19 = vpack.c.bf16 %v304_v5, %v301_v56  ;;  %v18308_v21 = vsub.f32 %v240_v52, %v304_v5  ;;  %v18311_v24 = vld [vmem:[#allocation8 + $0x140] sm:$0xff]  ;;  %v18313_v30 = vld [vmem:[#allocation8 + $0x148] sm:$0xff]  ;;  %v262_v52 = vld [vmem:[#allocation8 + $0xd8] sm:$0xff] }
  0x68   :  { %26028 = vst [vmem:[#allocation24_spill] sm:$0xff] %v18293_v4  ;;  %15648 = vmatpush3.bf16.msra.mxu1 %v18274_v60  ;;  %15840 = vmatpush3.bf16.msra.mxu0 %v18267_v53  ;;  %v25020_v22 = vand.u32 4294901760, %v18282_v0  ;;  %v307_v23 = vand.u32 4294901760, %v241_v1  ;;  %v18319_v32 = vsub.f32 %v257_v57, %v355_v9  ;;  %v310_v38 = vand.u32 4294901760, %v242_v6  ;;  %v244_v50 = vld [vmem:[#allocation8 + $0x48] sm:$0xff]  ;;  %v263_v16 = vld [vmem:[#allocation8 + $0xe0] sm:$0xff] }
  0x69   :  { %26029 = vst [vmem:[#allocation25_spill] sm:$0xff] %v18306_v19  ;;  %15650 = vmatprep.subr.bf16.mxu1 %v18280_v63  ;;  %15842 = vmatprep.subr.bf16.mxu0 %v18293_v4  ;;  %v18317_v31 = vpack.c.bf16 %v358_v12, %v355_v9  ;;  %v18321_v33 = vsub.f32 %v258_v58, %v358_v12  ;;  %v361_v48 = vand.u32 4294901760, %v259_v14  ;;  %v364_v49 = vand.u32 4294901760, %v260_v17  ;;  %v18337_v9 = vld [vmem:[#allocation8 + $0x150] sm:$0xff]  ;;  %v18339_v12 = vld [vmem:[#allocation8 + $0x158] sm:$0xff]  ;;  %v18376_v63 = vld [vmem:[#allocation8 + $0x160] sm:$0xff] }
  0x6a   :  { %v18327_v46 = vpack.c.bf16 %v25020_v22, %v25021_v13  ;;  %v18331_v56 = vpack.c.bf16 %v310_v38, %v307_v23  ;;  %v18333_v57 = vsub.f32 %v242_v6, %v310_v38  ;;  %v25031_v58 = vand.u32 4294901760, %v18311_v24  ;;  %v171_v22 = vld [vmem:[%s25013_s0 + $0xb] sm:$0xff]  ;;  %26037 = vst [vmem:[#allocation33_spill] sm:$0xff] %v18376_v63  ;;  %v18378_v60 = vld [vmem:[#allocation8 + $0x168] sm:$0xff]  ;;  %v265_v42 = vld [vmem:[#allocation8 + $0xf0] sm:$0xff] }
  0x6b   :  { %100 = vperm.xlu1 %17922, %v89_v41   ;;  %128 = vperm.xlu0 %17921, %v117_v47   ;;  %26030 = vst [vmem:[#allocation26_spill] sm:$0xff] %v18317_v31  ;;  %v243_v41 = vld [vmem:[#allocation8 + $0x40] sm:$0xff]  ;;  %v18329_v47 = vsub.f32 %v241_v1, %v307_v23  ;;  %v25030_v5 = vand.u32 4294901760, %v18313_v30  ;;  %v245_v1 = vld [vmem:[#allocation8 + $0x50] sm:$0xff]  ;;  %v18349_v6 = vpack.c.bf16 %v364_v49, %v361_v48  ;;  %v246_v13 = vld [vmem:[#allocation8 + $0x58] sm:$0xff]  ;;  %v316_v54 = vand.u32 4294901760, %v244_v50 }
  0x6c   :  { %26031 = vst [vmem:[#allocation27_spill] sm:$0xff] %v18327_v46  ;;  %26032 = vst [vmem:[#allocation28_spill] sm:$0xff] %v18331_v56  ;;  %15652 = vmatpush3.bf16.msra.mxu1 %v18306_v19  ;;  %15844 = vmatpush3.bf16.msra.mxu0 %v18293_v4  ;;  %v18353_v23 = vsub.f32 %v260_v17, %v364_v49  ;;  %v313_v38 = vand.u32 4294901760, %v243_v41  ;;  %v367_v45 = vand.u32 4294901760, %v261_v51  ;;  %v370_v44 = vand.u32 4294901760, %v262_v52  ;;  %v172_v49 = vld [vmem:[%s25013_s0 + $0x13] sm:$0xff] }
  0x6d   :  { %26033 = vst [vmem:[#allocation29_spill] sm:$0xff] %v18349_v6  ;;  %15654 = vmatprep.subr.bf16.mxu1 %v18317_v31  ;;  %15846 = vmatprep.subr.bf16.mxu0 %v18327_v46  ;;  %v18361_v55 = vpack.c.bf16 %v25030_v5, %v25031_v58  ;;  %v319_v15 = vand.u32 4294901760, %v245_v1  ;;  %v264_v31 = vld [vmem:[#allocation8 + $0xe8] sm:$0xff]  ;;  %v18372_v58 = vsub.f32 %v244_v50, %v316_v54  ;;  %v322_v4 = vand.u32 4294901760, %v246_v13 }
  0x6e   :  { %v18366_v17 = vsub.f32 %v243_v41, %v313_v38  ;;  %v18370_v5 = vpack.c.bf16 %v316_v54, %v313_v38  ;;  %v18374_v19 = vpack.c.bf16 %v370_v44, %v367_v45  ;;  %26038 = vst [vmem:[#allocation34_spill] sm:$0xff] %v18378_v60  ;;  %v247_v41 = vld [vmem:[#allocation8 + $0x60] sm:$0xff]  ;;  %v18387_v54 = vsub.f32 %v262_v52, %v370_v44  ;;  %v248_v53 = vld [vmem:[#allocation8 + $0x68] sm:$0xff]  ;;  %v18403_v52 = vld [vmem:[#allocation8 + $0x170] sm:$0xff] }
  0x6f   :  { %156 = vperm.xlu1 %17922, %v145_v7   ;;  %153 = vperm.xlu0 %17921, %v144_v18   ;;  %v170_v7 = vld [vmem:[%s25013_s0 + $0x3] sm:$0xff]  ;;  %v18351_v18 = vsub.f32 %v259_v14, %v361_v48  ;;  %26034 = vst [vmem:[#allocation30_spill] sm:$0xff] %v18361_v55  ;;  %v173_v14 = vld [vmem:[%s25013_s0 + $0x1b] sm:$0xff]  ;;  %v25050_v48 = vand.u32 4294901760, %v18337_v9  ;;  %v26039_v50 = vand.u32 4294901760, %v18339_v12  ;;  %v373_v38 = vand.u32 4294901760, %v263_v16 }
  0x70   :  { %26035 = vst [vmem:[#allocation31_spill] sm:$0xff] %v18370_v5  ;;  %26036 = vst [vmem:[#allocation32_spill] sm:$0xff] %v18374_v19  ;;  %15656 = vmatpush3.bf16.msra.mxu1 %v18331_v56  ;;  %15848 = vmatpush3.bf16.msra.mxu0 %v18327_v46  ;;  %v18397_v56 = vpack.c.bf16 %v322_v4, %v319_v15  ;;  %v18399_v46 = vsub.f32 %v245_v1, %v319_v15  ;;  %v376_v44 = vand.u32 4294901760, %v264_v31  ;;  %v249_v1 = vld [vmem:[#allocation8 + $0x70] sm:$0xff] }
  0x71   :  { %15658 = vmatprep.subr.bf16.mxu1 %v18349_v6  ;;  %15850 = vmatprep.subr.bf16.mxu0 %v18361_v55  ;;  %v18405_v34 = vsub.f32 %v263_v16, %v373_v38  ;;  %v325_v29 = vand.u32 4294901760, %v247_v41  ;;  %v18409_v6 = vld [vmem:[#allocation8 + $0x178] sm:$0xff] }
  0x72   :  { %26041 = vst [vmem:[#allocation36_spill] sm:$0xff] %v18397_v56  ;;  %26042 = vst [vmem:[#allocation37_spill] sm:$0xff] %v18399_v46  ;;  %v18411_v27 = vpack.c.bf16 %v376_v44, %v373_v38  ;;  %v18413_v15 = vsub.f32 %v264_v31, %v376_v44  ;;  %v199_v16 = vld [vmem:[%s25013_s0 + $0xc] sm:$0xff]  ;;  %v26047_v31 = vand.u32 4294901760, %v18378_v60  ;;  %v25069_v44 = vand.u32 4294901760, %v18403_v52 }
  0x73   :  { %178 = vperm.xlu1 %17922, %v171_v22   ;;  %175 = vperm.xlu0 %17921, %v170_v7   ;;  %v18385_v22 = vsub.f32 %v261_v51, %v367_v45  ;;  %v18393_v7 = vpack.c.bf16 %v26039_v50, %v25050_v48  ;;  %v18401_v45 = vsub.f32 %v246_v13, %v322_v4  ;;  %v266_v51 = vld [vmem:[#allocation8 + $0xf8] sm:$0xff]  ;;  %v25067_v50 = vand.u32 4294901760, %v18376_v63 }
  0x74   :  { %26044 = vst [vmem:[#allocation39_spill] sm:$0xff] %v18405_v34  ;;  %26045 = vst [vmem:[#allocation40_spill] sm:$0xff] %v18411_v27  ;;  %v328_v4 = vand.u32 4294901760, %v248_v53  ;;  %v379_v13 = vand.u32 4294901760, %v265_v42  ;;  %v198_v48 = vld [vmem:[%s25013_s0 + $0x4] sm:$0xff]  ;;  %15660 = vmatpush3.bf16.msra.mxu1 %v18370_v5  ;;  %15852 = vmatpush3.bf16.msra.mxu0 %v18361_v55  ;;  %v382_v38 = vand.u32 4294901760, %v266_v51 }
  0x75   :  { %26040 = vst [vmem:[#allocation35_spill] sm:$0xff] %v18393_v7  ;;  %26043 = vst [vmem:[#allocation38_spill] sm:$0xff] %v18401_v45  ;;  %v250_v45 = vld [vmem:[#allocation8 + $0x78] sm:$0xff]  ;;  %15662 = vmatprep.subr.bf16.mxu1 %v18374_v19  ;;  %15854 = vmatprep.subr.bf16.mxu0 %v18393_v7  ;;  %v25068_v63 = vand.u32 4294901760, %v18409_v6 }
  0x76   :  { %26046 = vst [vmem:[#allocation41_spill] sm:$0xff] %v18413_v15  ;;  %v18434_v15 = vpack.c.bf16 %v328_v4, %v325_v29  ;;  %v18436_v5 = vsub.f32 %v248_v53, %v328_v4  ;;  %v18438_v55 = vsub.f32 %v265_v42, %v379_v13  ;;  %v18441_v60 = vpack.c.bf16 %v382_v38, %v379_v13 }
  0x77   :  { %184 = vperm.xlu1 %17922, %v173_v14   ;;  %181 = vperm.xlu0 %17921, %v172_v49   ;;  %v18427_v14 = vpack.c.bf16 %v26047_v31, %v25067_v50  ;;  %v18429_v49 = vsub.f32 %v247_v41, %v325_v29  ;;  %v18443_v31 = vsub.f32 %v266_v51, %v382_v38  ;;  %v331_v41 = vand.u32 4294901760, %v249_v1  ;;  %v201_v51 = vld [vmem:[%s25013_s0 + $0x1c] sm:$0xff] }
  0x78   :  { %26050 = vst [vmem:[#allocation44_spill] sm:$0xff] %v18434_v15  ;;  %26051 = vst [vmem:[#allocation45_spill] sm:$0xff] %v18436_v5  ;;  %v334_v50 = vand.u32 4294901760, %v250_v45  ;;  %v18449_v29 = vpack.c.bf16 %v25068_v63, %v25069_v44  ;;  %v25074_v53 = vand.u32 4294901760, %v18219_v20  ;;  %v25075_v42 = vand.u32 4294901760, %v18227_v28  ;;  %15664 = vmatpush3.bf16.msra.mxu1 %v18397_v56  ;;  %15856 = vmatpush3.bf16.msra.mxu0 %v18393_v7 }
  0x79   :  { %26048 = vst [vmem:[#allocation42_spill] sm:$0xff] %v18427_v14  ;;  %26049 = vst [vmem:[#allocation43_spill] sm:$0xff] %v18429_v49  ;;  %v26056_v4 = vand.u32 4294901760, %v18207_v10  ;;  %v18468_v38 = vsub.f32 %v249_v1, %v331_v41  ;;  %15666 = vmatprep.subr.bf16.mxu1 %v18411_v27  ;;  %15858 = vmatprep.subr.bf16.mxu0 %v18427_v14  ;;  %v26061_v1 = vand.u32 4294901760, %v18209_v11  ;;  %v25083_v27 = vand.u32 4294901760, %v18241_v37 }
  0x7a   :  { %26052 = vst [vmem:[#allocation46_spill] sm:$0xff] %v18438_v55  ;;  %26053 = vst [vmem:[#allocation47_spill] sm:$0xff] %v18441_v60  ;;  %v18470_v63 = vsub.f32 %v250_v45, %v334_v50  ;;  %v568_v44 = vsub.f32 %v18227_v28, %v25075_v42 }
  0x7b   :  { %26054 = vst [vmem:[#allocation48_spill] sm:$0xff] %v18443_v31  ;;  %206 = vperm.xlu1 %17922, %v199_v16   ;;  %203 = vperm.xlu0 %17921, %v198_v48   ;;  %26055 = vst [vmem:[#allocation49_spill] sm:$0xff] %v18449_v29  ;;  %v18456_v13 = vsub.f32 %v18207_v10, %v26056_v4  ;;  %v200_v48 = vld [vmem:[%s25013_s0 + $0x14] sm:$0xff]  ;;  %v18466_v16 = vpack.c.bf16 %v334_v50, %v331_v41  ;;  %v25080_v10 = vand.u32 4294901760, %v18237_v35  ;;  %s18086_s0 = smov [#allocation11]  }
  0x7c   :  { %26059 = vst [vmem:[#allocation52_spill] sm:$0xff] %v18468_v38  ;;  %26060 = vst [vmem:[#allocation53_spill] sm:$0xff] %v18470_v63  ;;  %v561_v4 = vsub.f32 %v18219_v20, %v25074_v53  ;;  %v18485_v45 = vsub.f32 %v18209_v11, %v26061_v1  ;;  %v25081_v41 = vand.u32 4294901760, %v18239_v36  ;;  %v25088_v53 = vand.u32 4294901760, %v18254_v43  ;;  %15668 = vmatpush3.bf16.msra.mxu1 %v18434_v15  ;;  %s11985_s15 = sshll.u32 %s18086_s0, 4  ;;  %s11986_s15 = int_to_ptr.vmem [resolvable:$true] %s11985_s15 }
  0x7d   :  { %26057 = vst [vmem:[#allocation50_spill] sm:$0xff] %v18456_v13  ;;  %26058 = vst [vmem:[#allocation51_spill] sm:$0xff] %v18466_v16  ;;  %v25082_v56 = vand.u32 4294901760, %v18456_v13  ;;  %v449_v50 = vsub.f32 %v18237_v35, %v25080_v10  ;;  %v569_v7 = vand.u32 4294901760, %v568_v44  ;;  %15860 = vmatpush3.bf16.msra.mxu0 %v18427_v14  ;;  %15670 = vmatprep.subr.bf16.mxu1 %v18441_v60  ;;  %s18043_s16 = scalar_lea.vmem %s11986_s15, 32  ;;  %p18048_p13 = scmp.lt.s32.totalorder %s11986_s15, %s11986_s15 }
  0x7e   :  { %26062 = vst [vmem:[#allocation54_spill] sm:$0xff] %v18485_v45  ;;  %v562_v42 = vand.u32 4294901760, %v561_v4  ;;  %v25097_v11 = vand.u32 4294901760, %v18485_v45  ;;  %v456_v10 = vsub.f32 %v18239_v36, %v25081_v41  ;;  %v582_v44 = vsub.f32 %v18254_v43, %v25088_v53  ;;  %15862 = vmatprep.subr.bf16.mxu0 %v18449_v29  ;;  %p18044_p12 = scmp.ne.s32.totalorder %s11986_s15, %s18043_s16  ;;  %p18049_p0 = scmp.lt.s32.totalorder %s18043_s16, %s18043_s16 }
  0x7f   :  { %212 = vperm.xlu1 %17922, %v201_v51   ;;  %209 = vperm.xlu0 %17921, %v200_v48   ;;  %v1443_v19 = vsub.f32 %v18456_v13, %v25082_v56  ;;  %v450_v1 = vand.u32 4294901760, %v449_v50  ;;  %v575_v51 = vsub.f32 %v18241_v37, %v25083_v27  ;;  %v26063_v41 = vand.u32 4294901760, %v18221_v25 }
  0x80   :  { %v15673_v48 = vpack.c.bf16 %v569_v7, %v562_v42  ;;  %v1450_v50 = vsub.f32 %v18485_v45, %v25097_v11  ;;  %v457_v27 = vand.u32 4294901760, %v456_v10  ;;  %v583_v14 = vand.u32 4294901760, %v582_v44  ;;  %15672 = vmatpush3.bf16.msra.mxu1 %v18466_v16  ;;  %p18050_p1 = por %p18049_p0, %p18048_p13 }
  0x81   :  { %v1444_v4 = vand.u32 4294901760, %v1443_v19  ;;  %v18516_v56 = vsub.f32 %v18221_v25, %v26063_v41  ;;  %v576_v15 = vand.u32 4294901760, %v575_v51  ;;  %v26065_v53 = vand.u32 4294901760, %v18223_v26  ;;  %15864 = vmatpush3.bf16.msra.mxu0 %v18449_v29 }
  0x82   :  { %v1451_v43 = vand.u32 4294901760, %v1450_v50  ;;  %v25094_v7 = vand.u32 4294901760, %v18276_v61  ;;  %v25093_v42 = vand.u32 4294901760, %v18278_v62  ;;  %v18528_v25 = vpack.c.bf16 %v457_v27, %v450_v1  ;;  %15674 = vmatprep.subr.bf16.mxu1 %v15673_v48  ;;  %p18051_p2 = pnand %p18050_p1, %p18044_p12 }
  0x83   :  { %26064 = vst [vmem:[#allocation55_spill] sm:$0xff] %v18516_v56  ;;  %v18521_v60 = vsub.f32 %v18223_v26, %v26065_v53  ;;  %v25096_v19 = vand.u32 4294901760, %v18516_v56  ;;  %v18530_v10 = vpack.c.bf16 %v583_v14, %v576_v15  ;;  %v25098_v26 = vand.u32 4294901760, %v18285_v2 }
  0x84   :  { %26067 = vst [vmem:[#allocation57_spill] sm:$0xff] %v18528_v25  ;;  %v18534_v53 = vpack.c.bf16 %v1451_v43, %v1444_v4  ;;  %v463_v44 = vsub.f32 %v18276_v61, %v25094_v7  ;;  %v470_v27 = vsub.f32 %v18278_v62, %v25093_v42  ;;  %v25102_v14 = vand.u32 4294901760, %v18287_v3 }
  0x85   :  { %26066 = vst [vmem:[#allocation56_spill] sm:$0xff] %v18521_v60  ;;  %26068 = vst [vmem:[#allocation58_spill] sm:$0xff] %v18530_v10  ;;  %v25095_v41 = vand.u32 4294901760, %v18521_v60  ;;  %v1457_v51 = vsub.f32 %v18516_v56, %v25096_v19  ;;  %v589_v43 = vsub.f32 %v18285_v2, %v25098_v26  ;;  %v26070_v1 = vand.u32 4294901760, %v18243_v39 }
  0x86   :  { %26069 = vst [vmem:[#allocation59_spill] sm:$0xff] %v18534_v53  ;;  %15866 = vmatprep.subr.bf16.mxu0 %v18534_v53  ;;  %v464_v50 = vand.u32 4294901760, %v463_v44  ;;  %v471_v42 = vand.u32 4294901760, %v470_v27  ;;  %v26072_v7 = vand.u32 4294901760, %v18245_v40  ;;  %v596_v26 = vsub.f32 %v18287_v3, %v25102_v14 }
  0x87   :  { %v1464_v15 = vsub.f32 %v18521_v60, %v25095_v41  ;;  %v18555_v48 = vsub.f32 %v18243_v39, %v26070_v1  ;;  %v1458_v4 = vand.u32 4294901760, %v1457_v51  ;;  %v590_v11 = vand.u32 4294901760, %v589_v43 }
  0x88   :  { %v18561_v41 = vsub.f32 %v18245_v40, %v26072_v7  ;;  %v18567_v39 = vpack.c.bf16 %v471_v42, %v464_v50  ;;  %v25106_v51 = vand.u32 4294901760, %v18298_v8  ;;  %v25107_v44 = vand.u32 4294901760, %v18308_v21 }
  0x89   :  { %26071 = vst [vmem:[#allocation60_spill] sm:$0xff] %v18555_v48  ;;  %v1465_v19 = vand.u32 4294901760, %v1464_v15  ;;  %v25101_v16 = vand.u32 4294901760, %v18555_v48  ;;  %v597_v40 = vand.u32 4294901760, %v596_v26  ;;  %v25109_v15 = vand.u32 4294901760, %v18319_v32 }
  0x8a   :  { %26073 = vst [vmem:[#allocation61_spill] sm:$0xff] %v18561_v41  ;;  %26074 = vst [vmem:[#allocation62_spill] sm:$0xff] %v18567_v39  ;;  %v25103_v1 = vand.u32 4294901760, %v18561_v41  ;;  %v477_v43 = vsub.f32 %v18298_v8, %v25106_v51  ;;  %v25113_v26 = vand.u32 4294901760, %v18321_v33  ;;  %v26077_v14 = vand.u32 4294901760, %v18271_v59 }
  0x8b   :  { %v18572_v27 = vpack.c.bf16 %v1465_v19, %v1458_v4  ;;  %v1471_v7 = vsub.f32 %v18555_v48, %v25101_v16  ;;  %v484_v19 = vsub.f32 %v18308_v21, %v25107_v44  ;;  %v18588_v4 = vpack.c.bf16 %v597_v40, %v590_v11 }
  0x8c   :  { %v1478_v42 = vsub.f32 %v18561_v41, %v25103_v1  ;;  %v603_v16 = vsub.f32 %v18319_v32, %v25109_v15  ;;  %v18596_v1 = vsub.f32 %v18271_v59, %v26077_v14  ;;  %v478_v51 = vand.u32 4294901760, %v477_v43 }
  0x8d   :  { %26075 = vst [vmem:[#allocation63_spill] sm:$0xff] %v18572_v27  ;;  %26076 = vst [vmem:[#allocation64_spill] sm:$0xff] %v18588_v4  ;;  %v1472_v50 = vand.u32 4294901760, %v1471_v7  ;;  %v485_v39 = vand.u32 4294901760, %v484_v19  ;;  %v610_v44 = vsub.f32 %v18321_v33, %v25113_v26  ;;  %v26079_v40 = vand.u32 4294901760, %v18282_v0 }
  0x8e   :  { %26078 = vst [vmem:[#allocation65_spill] sm:$0xff] %v18596_v1  ;;  %v1479_v29 = vand.u32 4294901760, %v1478_v42  ;;  %v604_v27 = vand.u32 4294901760, %v603_v16  ;;  %v25110_v11 = vand.u32 4294901760, %v18596_v1  ;;  %v25111_v15 = vand.u32 4294901760, %v18329_v47 }
  0x8f   :  { %v18605_v7 = vsub.f32 %v18282_v0, %v26079_v40  ;;  %v18610_v59 = vpack.c.bf16 %v485_v39, %v478_v51  ;;  %v611_v14 = vand.u32 4294901760, %v610_v44  ;;  %v25112_v42 = vand.u32 4294901760, %v18333_v57 }
  0x90   :  { %v18608_v4 = vpack.c.bf16 %v1479_v29, %v1472_v50  ;;  %v1485_v16 = vsub.f32 %v18596_v1, %v25110_v11  ;;  %v491_v0 = vsub.f32 %v18329_v47, %v25111_v15  ;;  %v25115_v39 = vand.u32 4294901760, %v18351_v18 }
  0x91   :  { %26080 = vst [vmem:[#allocation66_spill] sm:$0xff] %v18605_v7  ;;  %26082 = vst [vmem:[#allocation68_spill] sm:$0xff] %v18610_v59  ;;  %v25114_v43 = vand.u32 4294901760, %v18605_v7  ;;  %v18620_v19 = vpack.c.bf16 %v611_v14, %v604_v27  ;;  %v498_v29 = vsub.f32 %v18333_v57, %v25112_v42  ;;  %v25118_v51 = vand.u32 4294901760, %v18353_v23 }
  0x92   :  { %26081 = vst [vmem:[#allocation67_spill] sm:$0xff] %v18608_v4  ;;  %v1486_v44 = vand.u32 4294901760, %v1485_v16  ;;  %v492_v40 = vand.u32 4294901760, %v491_v0  ;;  %v26084_v11 = vand.u32 4294901760, %v18311_v24  ;;  %v617_v14 = vsub.f32 %v18351_v18, %v25115_v39 }
  0x93   :  { %26083 = vst [vmem:[#allocation69_spill] sm:$0xff] %v18620_v19  ;;  %v1492_v50 = vsub.f32 %v18605_v7, %v25114_v43  ;;  %v499_v27 = vand.u32 4294901760, %v498_v29  ;;  %v624_v42 = vsub.f32 %v18353_v23, %v25118_v51  ;;  %v26086_v16 = vand.u32 4294901760, %v18313_v30 }
  0x94   :  { %v18633_v15 = vsub.f32 %v18311_v24, %v26084_v11  ;;  %v25119_v24 = vand.u32 4294901760, %v18366_v17  ;;  %v25120_v11 = vand.u32 4294901760, %v18372_v58  ;;  %v618_v19 = vand.u32 4294901760, %v617_v14 }
  0x95   :  { %v18644_v26 = vsub.f32 %v18313_v30, %v26086_v16  ;;  %v1493_v0 = vand.u32 4294901760, %v1492_v50  ;;  %v18649_v29 = vpack.c.bf16 %v499_v27, %v492_v40  ;;  %v625_v39 = vand.u32 4294901760, %v624_v42 }
  0x96   :  { %26085 = vst [vmem:[#allocation70_spill] sm:$0xff] %v18633_v15  ;;  %v25117_v43 = vand.u32 4294901760, %v18633_v15  ;;  %v505_v50 = vsub.f32 %v18366_v17, %v25119_v24  ;;  %v512_v16 = vsub.f32 %v18372_v58, %v25120_v11  ;;  %v25124_v27 = vand.u32 4294901760, %v18387_v54 }
  0x97   :  { %26087 = vst [vmem:[#allocation71_spill] sm:$0xff] %v18644_v26  ;;  %26088 = vst [vmem:[#allocation72_spill] sm:$0xff] %v18649_v29  ;;  %v25121_v59 = vand.u32 4294901760, %v18644_v26  ;;  %v18652_v4 = vpack.c.bf16 %v1493_v0, %v1486_v44  ;;  %v18663_v40 = vpack.c.bf16 %v625_v39, %v618_v19  ;;  %v25122_v44 = vand.u32 4294901760, %v18385_v22 }
  0x98   :  { %v1499_v30 = vsub.f32 %v18633_v15, %v25117_v43  ;;  %v506_v0 = vand.u32 4294901760, %v505_v50  ;;  %v513_v43 = vand.u32 4294901760, %v512_v16  ;;  %v26091_v51 = vand.u32 4294901760, %v18337_v9 }
  0x99   :  { %26089 = vst [vmem:[#allocation73_spill] sm:$0xff] %v18652_v4  ;;  %26090 = vst [vmem:[#allocation74_spill] sm:$0xff] %v18663_v40  ;;  %v1506_v42 = vsub.f32 %v18644_v26, %v25121_v59  ;;  %v631_v19 = vsub.f32 %v18385_v22, %v25122_v44  ;;  %v638_v39 = vsub.f32 %v18387_v54, %v25124_v27  ;;  %v26093_v11 = vand.u32 4294901760, %v18339_v12 }
  0x9a   :  { %v1500_v14 = vand.u32 4294901760, %v1499_v30  ;;  %v18673_v24 = vsub.f32 %v18337_v9, %v26091_v51  ;;  %v18686_v50 = vpack.c.bf16 %v513_v43, %v506_v0  ;;  %v25126_v9 = vand.u32 4294901760, %v18399_v46  ;;  %v26096_v51 = vld [vmem:[#allocation38_spill] sm:$0xff]  ;;  %v26099_v0 = vld [vmem:[#allocation41_spill] sm:$0xff] }
  0x9b   :  { %v1507_v29 = vand.u32 4294901760, %v1506_v42  ;;  %v18684_v30 = vsub.f32 %v18339_v12, %v26093_v11  ;;  %v25128_v42 = vand.u32 4294901760, %v26096_v51  ;;  %v632_v44 = vand.u32 4294901760, %v631_v19 }
  0x9c   :  { %26092 = vst [vmem:[#allocation75_spill] sm:$0xff] %v18673_v24  ;;  %26095 = vst [vmem:[#allocation77_spill] sm:$0xff] %v18686_v50  ;;  %v25125_v16 = vand.u32 4294901760, %v18673_v24  ;;  %v639_v40 = vand.u32 4294901760, %v638_v39  ;;  %v519_v12 = vsub.f32 %v18399_v46, %v25126_v9  ;;  %v25132_v11 = vand.u32 4294901760, %v18405_v34  ;;  %v26100_v39 = vld [vmem:[#allocation33_spill] sm:$0xff] }
  0x9d   :  { %26094 = vst [vmem:[#allocation76_spill] sm:$0xff] %v18684_v30  ;;  %v18691_v59 = vpack.c.bf16 %v1507_v29, %v1500_v14  ;;  %v25129_v4 = vand.u32 4294901760, %v18684_v30  ;;  %v526_v43 = vsub.f32 %v26096_v51, %v25128_v42  ;;  %v25131_v19 = vand.u32 4294901760, %v26099_v0  ;;  %v26177_v46 = vld [vmem:[#allocation62_spill] sm:$0xff] }
  0x9e   :  { %v1513_v27 = vsub.f32 %v18673_v24, %v25125_v16  ;;  %v18704_v29 = vpack.c.bf16 %v639_v40, %v632_v44  ;;  %v26101_v16 = vand.u32 4294901760, %v26100_v39  ;;  %v645_v42 = vsub.f32 %v18405_v34, %v25132_v11 }
  0x9f   :  { %26097 = vst [vmem:[#allocation38_spill] sm:$0xff] %v18691_v59  ;;  %v1520_v14 = vsub.f32 %v18684_v30, %v25129_v4  ;;  %v520_v59 = vand.u32 4294901760, %v519_v12  ;;  %v527_v10 = vand.u32 4294901760, %v526_v43  ;;  %v652_v44 = vsub.f32 %v26099_v0, %v25131_v19 }
  0xa0   :  { %26098 = vst [vmem:[#allocation78_spill] sm:$0xff] %v18704_v29  ;;  %v18713_v50 = vsub.f32 %v26100_v39, %v26101_v16  ;;  %v1514_v9 = vand.u32 4294901760, %v1513_v27  ;;  %v26103_v29 = vld [vmem:[#allocation34_spill] sm:$0xff]  ;;  %v646_v27 = vand.u32 4294901760, %v645_v42  ;;  %v25134_v12 = vand.u32 4294901760, %v18429_v49 }
  0xa1   :  { %v1521_v40 = vand.u32 4294901760, %v1520_v14  ;;  %v26104_v53 = vand.u32 4294901760, %v26103_v29  ;;  %v18727_v16 = vpack.c.bf16 %v527_v10, %v520_v59  ;;  %v25135_v43 = vand.u32 4294901760, %v18436_v5 }
  0xa2   :  { %26102 = vst [vmem:[#allocation33_spill] sm:$0xff] %v18713_v50  ;;  %v25133_v4 = vand.u32 4294901760, %v18713_v50  ;;  %v653_v14 = vand.u32 4294901760, %v652_v44  ;;  %v25137_v59 = vand.u32 4294901760, %v18438_v55  ;;  %v26109_v44 = vand.u32 4294901760, %v18403_v52 }
  0xa3   :  { %v18725_v25 = vsub.f32 %v26103_v29, %v26104_v53  ;;  %26106 = vst [vmem:[#allocation79_spill] sm:$0xff] %v18727_v16  ;;  %v18731_v39 = vpack.c.bf16 %v1521_v40, %v1514_v9  ;;  %v533_v53 = vsub.f32 %v18429_v49, %v25134_v12  ;;  %v540_v10 = vsub.f32 %v18436_v5, %v25135_v43 }
  0xa4   :  { %v1527_v19 = vsub.f32 %v18713_v50, %v25133_v4  ;;  %v25139_v9 = vand.u32 4294901760, %v18443_v31  ;;  %v18745_v42 = vpack.c.bf16 %v653_v14, %v646_v27  ;;  %v18753_v4 = vsub.f32 %v18403_v52, %v26109_v44 }
  0xa5   :  { %26105 = vst [vmem:[#allocation34_spill] sm:$0xff] %v18725_v25  ;;  %26107 = vst [vmem:[#allocation80_spill] sm:$0xff] %v18731_v39  ;;  %v25136_v11 = vand.u32 4294901760, %v18725_v25  ;;  %v534_v12 = vand.u32 4294901760, %v533_v53  ;;  %v541_v16 = vand.u32 4294901760, %v540_v10  ;;  %v659_v43 = vsub.f32 %v18438_v55, %v25137_v59 }
  0xa6   :  { %26108 = vst [vmem:[#allocation81_spill] sm:$0xff] %v18745_v42  ;;  %v1528_v29 = vand.u32 4294901760, %v1527_v19  ;;  %v666_v27 = vsub.f32 %v18443_v31, %v25139_v9  ;;  %v25142_v14 = vand.u32 4294901760, %v18753_v4  ;;  %v25140_v52 = vand.u32 4294901760, %v18468_v38 }
  0xa7   :  { %v1534_v40 = vsub.f32 %v18725_v25, %v25136_v11  ;;  %v26110_v11 = vand.u32 4294901760, %v18409_v6  ;;  %v18768_v53 = vpack.c.bf16 %v541_v16, %v534_v12  ;;  %v660_v10 = vand.u32 4294901760, %v659_v43 }
  0xa8   :  { %v667_v44 = vand.u32 4294901760, %v666_v27  ;;  %v25141_v59 = vand.u32 4294901760, %v18470_v63  ;;  %v18789_v43 = vpack.c.bf16 %v18485_v45, %v18456_v13  ;;  %v18800_v12 = vpack.c.bf16 %v18521_v60, %v18516_v56 }
  0xa9   :  { %v1535_v19 = vand.u32 4294901760, %v1534_v40  ;;  %v18765_v42 = vsub.f32 %v18409_v6, %v26110_v11  ;;  %v1541_v40 = vsub.f32 %v18753_v4, %v25142_v14  ;;  %v547_v6 = vsub.f32 %v18468_v38, %v25140_v52  ;;  %v26111_v52 = vld [vmem:[#allocation20_spill] sm:$0xff] }
  0xaa   :  { %v18780_v11 = vpack.c.bf16 %v667_v44, %v660_v10  ;;  %v554_v16 = vsub.f32 %v18470_v63, %v25141_v59  ;;  %v18836_v59 = vpack.c.bf16 %v18684_v30, %v18673_v24  ;;  %v18844_v14 = vpack.c.bf16 %v18725_v25, %v18713_v50 }
  0xab   :  { %v18771_v39 = vpack.c.bf16 %v1535_v19, %v1528_v29  ;;  %v25144_v9 = vand.u32 4294901760, %v18765_v42  ;;  %v1542_v29 = vand.u32 4294901760, %v1541_v40  ;;  %v548_v19 = vand.u32 4294901760, %v547_v6 }
  0xac   :  { %v555_v44 = vand.u32 4294901760, %v554_v16  ;;  %v18808_v6 = vpack.c.bf16 %v18561_v41, %v18555_v48  ;;  %v18828_v16 = vpack.c.bf16 %v18644_v26, %v18633_v15  ;;  %26112 = vst [vmem:[#allocation20_spill] sm:$0xff] %v18844_v14  ;;  %v25149_v30 = vlaneseq }
  0xad   :  { %v1548_v27 = vsub.f32 %v18765_v42, %v25144_v9  ;;  %v18818_v9 = vpack.c.bf16 %v18605_v7, %v18596_v1  ;;  %v26115_v50 = vmov 0  ;;  %v26126_v1 = vmov 0 }
  0xae   :  { %v18812_v10 = vpack.c.bf16 %v555_v44, %v548_v19  ;;  %v26118_v44 = vmov 0  ;;  %v25163_v19 = vmov 0.0   ;;  %v26133_v63 = vmov 0 }
  0xaf   :  { %v1549_v40 = vand.u32 4294901760, %v1548_v27  ;;  %v18852_v27 = vpack.c.bf16 %v18765_v42, %v18753_v4  ;;  %v26146_v14 = vand.u32 4294901760, %v18753_v4  ;;  %v26147_v34 = vand.u32 4294901760, %v18765_v42 }
  0xb1   :  { %v18822_v45 = vpack.c.bf16 %v1549_v40, %v1542_v29  ;;  %26113 = vst [vmem:[#allocation82_spill] sm:$0xff] %v18852_v27  ;;  %v18857_v40 = vand.u32 127, %v25149_v30  ;;  %v18949_v0 = vpack.c.bf16 %v26147_v34, %v26146_v14 }
  0xb3   :  { %26114 = vst [vmem:[#allocation83_spill] sm:$0xff] %v18857_v40  ;;  %26148 = vst [vmem:[#allocation102_spill] sm:$0xff] %v18949_v0 }
  0xda   :  { %v148_v24 = vpop.permute.xlu1 %147  ;;  %v120_v25 = vpop.permute.xlu0 %119 }
  0xdb   :  { %vm18860_vm0 = vcmp.eq.s32.totalorder %v18857_v40, %v148_v24  ;;  %vm18865_vm1 = vcmp.eq.s32.totalorder %v18857_v40, %v120_v25  ;;  %v26123_v25 = vmov 0 }
  0xdc   :  { %v26116_v50 = vsel %vm18860_vm0, 4294967295, %v26115_v50  ;;  %v26119_v44 = vsel %vm18865_vm1, 4294967295, %v26118_v44  ;;  %v12000_v29 = vsel %vm18865_vm1, 1.0, %v25163_v19  ;;  %v12004_v30 = vsel %vm18860_vm0, 1.0, %v25163_v19 }
  0xdd   :  { %26117 = vst [vmem:[#allocation84_spill] sm:$0xff] %v26116_v50  ;;  %26120 = vst [vmem:[#allocation85_spill] sm:$0xff] %v26119_v44  ;;  %v18875_v26 = vsub.f32 %v12000_v29, %v12000_v29  ;;  %v18877_v24 = vsub.f32 %v12004_v30, %v12004_v30 }
  0xde   :  { %v151_v15 = vpop.permute.xlu1 %150  ;;  %v92_v7 = vpop.permute.xlu0 %91 }
  0xdf   :  { %26121 = vst [vmem:[#allocation86_spill] sm:$0xff] %v18875_v26  ;;  %26122 = vst [vmem:[#allocation87_spill] sm:$0xff] %v18877_v24  ;;  %vm18880_vm2 = vcmp.eq.s32.totalorder %v18857_v40, %v151_v15  ;;  %vm18885_vm3 = vcmp.eq.s32.totalorder %v18857_v40, %v92_v7  ;;  %v18890_v41 = vand.u32 4294901760, %v18875_v26  ;;  %v18893_v29 = vand.u32 4294901760, %v18877_v24 }
  0xe0   :  { %v26124_v25 = vsel %vm18880_vm2, 4294967295, %v26123_v25  ;;  %v26127_v1 = vsel %vm18885_vm3, 4294967295, %v26126_v1  ;;  %v11996_v30 = vsel %vm18885_vm3, 1.0, %v25163_v19  ;;  %v12005_v15 = vsel %vm18880_vm2, 1.0, %v25163_v19 }
  0xe1   :  { %26125 = vst [vmem:[#allocation88_spill] sm:$0xff] %v26124_v25  ;;  %26128 = vst [vmem:[#allocation89_spill] sm:$0xff] %v26127_v1  ;;  %v387_v7 = vsub.f32 %v18875_v26, %v18890_v41  ;;  %v1402_v48 = vsub.f32 %v18877_v24, %v18893_v29  ;;  %v18905_v60 = vsub.f32 %v11996_v30, %v11996_v30  ;;  %v26136_v19 = vmov 0  ;;  %v2157_v1 = vld [vmem:[#allocation8 + $0x2c8] sm:$0xff] }
  0xe2   :  { %26129 = vst [vmem:[#allocation90_spill] sm:$0xff] %v18890_v41  ;;  %26130 = vst [vmem:[#allocation91_spill] sm:$0xff] %v18893_v29  ;;  %v18907_v56 = vsub.f32 %v12005_v15, %v12005_v15  ;;  %v95_v13 = vpop.permute.xlu1 %94  ;;  %v123_v38 = vpop.permute.xlu0 %122  ;;  %v26143_v29 = vmov 0.0  }
  0xe3   :  { %26131 = vst [vmem:[#allocation92_spill] sm:$0xff] %v18905_v60  ;;  %vm18910_vm4 = vcmp.eq.s32.totalorder %v18857_v40, %v95_v13  ;;  %vm18915_vm5 = vcmp.eq.s32.totalorder %v18857_v40, %v123_v38  ;;  %v18919_v41 = vand.u32 4294901760, %v387_v7  ;;  %v18921_v27 = vand.u32 4294901760, %v1402_v48 }
  0xe4   :  { %26132 = vst [vmem:[#allocation93_spill] sm:$0xff] %v18907_v56  ;;  %v26134_v63 = vsel %vm18910_vm4, 4294967295, %v26133_v63  ;;  %v26137_v19 = vsel %vm18915_vm5, 4294967295, %v26136_v19  ;;  %v18924_v30 = vand.u32 4294901760, %v18905_v60  ;;  %v18927_v15 = vand.u32 4294901760, %v18907_v56 }
  0xe5   :  { %26135 = vst [vmem:[#allocation94_spill] sm:$0xff] %v26134_v63  ;;  %26138 = vst [vmem:[#allocation95_spill] sm:$0xff] %v26137_v19  ;;  %v12001_v13 = vsel %vm18915_vm5, 1.0, %v26143_v29  ;;  %v11997_v38 = vsel %vm18910_vm4, 1.0, %v26143_v29  ;;  %389 = vmatprep.mubr.f32.mxu1 %v18919_v41  ;;  %14515 = vmatprep.mubr.f32.mxu0 %v18921_v27 }
  0xe6   :  { %26139 = vst [vmem:[#allocation96_spill] sm:$0xff] %v18919_v41  ;;  %26140 = vst [vmem:[#allocation97_spill] sm:$0xff] %v18921_v27  ;;  %v18937_v48 = vsub.f32 %v12001_v13, %v12001_v13  ;;  %v18939_v7 = vsub.f32 %v11997_v38, %v11997_v38  ;;  %v98_v55 = vpop.permute.xlu1 %97  ;;  %v126_v31 = vpop.permute.xlu0 %125  ;;  %v393_v49 = vsub.f32 %v18905_v60, %v18924_v30  ;;  %v26149_v13 = vmov 0 }
  0xe7   :  { %26141 = vst [vmem:[#allocation98_spill] sm:$0xff] %v18924_v30  ;;  %26142 = vst [vmem:[#allocation99_spill] sm:$0xff] %v18927_v15  ;;  %v1412_v5 = vsub.f32 %v18907_v56, %v18927_v15  ;;  %vm18952_vm6 = vcmp.eq.s32.totalorder %v18857_v40, %v98_v55  ;;  %vm18957_vm7 = vcmp.eq.s32.totalorder %v18857_v40, %v126_v31  ;;  %v26152_v38 = vmov 0  ;;  %v26161_v30 = vld [vmem:[#allocation57_spill] sm:$0xff]  ;;  %v26162_v56 = vld [vmem:[#allocation59_spill] sm:$0xff] }
  0xe8   :  { %26144 = vst [vmem:[#allocation100_spill] sm:$0xff] %v18937_v48  ;;  %26145 = vst [vmem:[#allocation101_spill] sm:$0xff] %v18939_v7  ;;  %v26150_v13 = vsel %vm18952_vm6, 4294967295, %v26149_v13  ;;  %v26153_v38 = vsel %vm18957_vm7, 4294967295, %v26152_v38  ;;  %v18962_v27 = vand.u32 4294901760, %v18937_v48  ;;  %v18965_v41 = vand.u32 4294901760, %v18939_v7 }
  0xe9   :  { %26151 = vst [vmem:[#allocation103_spill] sm:$0xff] %v26150_v13  ;;  %26154 = vst [vmem:[#allocation104_spill] sm:$0xff] %v26153_v38  ;;  %v18967_v4 = vand.u32 4294901760, %v393_v49  ;;  %v18969_v34 = vand.u32 4294901760, %v1412_v5  ;;  %v12002_v55 = vsel %vm18957_vm7, 1.0, %v26143_v29  ;;  %v11998_v31 = vsel %vm18952_vm6, 1.0, %v26143_v29 }
  0xea   :  { %26155 = vst [vmem:[#allocation105_spill] sm:$0xff] %v18962_v27  ;;  %26156 = vst [vmem:[#allocation106_spill] sm:$0xff] %v18965_v41  ;;  %v402_v42 = vsub.f32 %v18937_v48, %v18962_v27  ;;  %v408_v14 = vsub.f32 %v18939_v7, %v18965_v41  ;;  %v18981_v0 = vsub.f32 %v12002_v55, %v12002_v55  ;;  %v101_v5 = vpop.permute.xlu1 %100  ;;  %v129_v15 = vpop.permute.xlu0 %128  ;;  %v26163_v27 = vmov 0  ;;  %v26172_v41 = vld [vmem:[#allocation63_spill] sm:$0xff] }
  0xeb   :  { %26157 = vst [vmem:[#allocation107_spill] sm:$0xff] %v18967_v4  ;;  %26158 = vst [vmem:[#allocation108_spill] sm:$0xff] %v18969_v34  ;;  %v18983_v49 = vsub.f32 %v11998_v31, %v11998_v31  ;;  %395 = vmatmul.mubr.f32.vlgmr.msra.gmra.mrb[0].mxu1 %v18967_v4  ;;  %14516 = vmatmul.mubr.f32.vlgmr.msra.gmra.mrb[0].mxu0 %v18969_v34  ;;  %vm18990_vm8 = vcmp.eq.s32.totalorder %v18857_v40, %v101_v5  ;;  %v26166_v55 = vmov 0  ;;  %v26171_v34 = vld [vmem:[#allocation58_spill] sm:$0xff] }
  0xec   :  { %26159 = vst [vmem:[#allocation109_spill] sm:$0xff] %v18981_v0  ;;  %15676 = vmatpush3.bf16.msra.mxu1 %v26161_v30  ;;  %15868 = vmatpush3.bf16.msra.mxu0 %v26162_v56  ;;  %v26164_v27 = vsel %vm18990_vm8, 4294967295, %v26163_v27  ;;  %vm18995_vm9 = vcmp.eq.s32.totalorder %v18857_v40, %v129_v15  ;;  %v18999_v31 = vand.u32 4294901760, %v402_v42  ;;  %v19001_v4 = vand.u32 4294901760, %v408_v14  ;;  %v2158_v38 = vld [vmem:[#allocation8 + $0x2d0] sm:$0xff] }
  0xed   :  { %26160 = vst [vmem:[#allocation110_spill] sm:$0xff] %v18983_v49  ;;  %26165 = vst [vmem:[#allocation57_spill] sm:$0xff] %v26164_v27  ;;  %v26167_v55 = vsel %vm18995_vm9, 4294967295, %v26166_v55  ;;  %15678 = vmatprep.subr.bf16.mxu1 %v26171_v34  ;;  %15870 = vmatprep.subr.bf16.mxu0 %v26172_v41  ;;  %v19006_v56 = vand.u32 4294901760, %v18981_v0  ;;  %v19009_v30 = vand.u32 4294901760, %v18983_v49  ;;  %v12003_v15 = vsel %vm18995_vm9, 1.0, %v26143_v29 }
  0xee   :  { %26168 = vst [vmem:[#allocation59_spill] sm:$0xff] %v26167_v55  ;;  %26169 = vst [vmem:[#allocation111_spill] sm:$0xff] %v18999_v31  ;;  %v11999_v42 = vsel %vm18990_vm8, 1.0, %v26143_v29  ;;  %404 = vmatprep.mubr.f32.mxu1 %v18999_v31  ;;  %v19018_v14 = vsub.f32 %v12003_v15, %v12003_v15  ;;  %v157_v5 = vpop.permute.xlu1 %156  ;;  %v154_v7 = vpop.permute.xlu0 %153  ;;  %v26178_v15 = vmov 0  ;;  %v26260_v27 = vld [vmem:[#allocation35_spill] sm:$0xff] }
  0xef   :  { %26170 = vst [vmem:[#allocation112_spill] sm:$0xff] %v19001_v4  ;;  %26173 = vst [vmem:[#allocation58_spill] sm:$0xff] %v19006_v56  ;;  %v19020_v34 = vsub.f32 %v11999_v42, %v11999_v42  ;;  %410 = vmatmul.mubr.f32.gmra.mrb[2].mxu1 %v19001_v4  ;;  %v417_v48 = vsub.f32 %v18981_v0, %v19006_v56  ;;  %v423_v60 = vsub.f32 %v18983_v49, %v19009_v30  ;;  %v26181_v42 = vmov 0 }
  0xf0   :  { %26174 = vst [vmem:[#allocation63_spill] sm:$0xff] %v19009_v30  ;;  %26175 = vst [vmem:[#allocation113_spill] sm:$0xff] %v19018_v14  ;;  %15680 = vmatpush3.bf16.msra.mxu1 %v26177_v46  ;;  %15872 = vmatpush3.bf16.msra.mxu0 %v26172_v41  ;;  %vm19030_vm10 = vcmp.eq.s32.totalorder %v18857_v40, %v157_v5  ;;  %vm19035_vm11 = vcmp.eq.s32.totalorder %v18857_v40, %v154_v7  ;;  %v19040_v4 = vand.u32 4294901760, %v19018_v14  ;;  %v26186_v30 = vld [vmem:[#allocation64_spill] sm:$0xff]  ;;  %v26187_v46 = vld [vmem:[#allocation67_spill] sm:$0xff] }
  0xf1   :  { %26176 = vst [vmem:[#allocation114_spill] sm:$0xff] %v19020_v34  ;;  %v26179_v15 = vsel %vm19030_vm10, 4294967295, %v26178_v15  ;;  %v26182_v42 = vsel %vm19035_vm11, 4294967295, %v26181_v42  ;;  %v19043_v31 = vand.u32 4294901760, %v19020_v34  ;;  %15682 = vmatprep.subr.bf16.mxu1 %v26186_v30  ;;  %15874 = vmatprep.subr.bf16.mxu0 %v26187_v46  ;;  %v19047_v41 = vand.u32 4294901760, %v417_v48 }
  0xf2   :  { %26180 = vst [vmem:[#allocation62_spill] sm:$0xff] %v26179_v15  ;;  %26183 = vst [vmem:[#allocation115_spill] sm:$0xff] %v26182_v42  ;;  %v19049_v5 = vand.u32 4294901760, %v423_v60  ;;  %v12006_v7 = vsel %vm19035_vm11, 1.0, %v26143_v29  ;;  %v12007_v40 = vsel %vm19030_vm10, 1.0, %v26143_v29  ;;  %v432_v56 = vsub.f32 %v19018_v14, %v19040_v4  ;;  %v26192_v60 = vld [vmem:[#allocation68_spill] sm:$0xff] }
  0xf3   :  { %26184 = vst [vmem:[#allocation116_spill] sm:$0xff] %v19040_v4  ;;  %26185 = vst [vmem:[#allocation117_spill] sm:$0xff] %v19043_v31  ;;  %v438_v30 = vsub.f32 %v19020_v34, %v19043_v31  ;;  %v19061_v49 = vsub.f32 %v12006_v7, %v12006_v7  ;;  %v19063_v48 = vsub.f32 %v12007_v40, %v12007_v40  ;;  %419 = vmatprep.mubr.f32.mxu1 %v19047_v41  ;;  %v26194_v29 = vld [vmem:[#allocation69_spill] sm:$0xff] }
  0xf4   :  { %26188 = vst [vmem:[#allocation64_spill] sm:$0xff] %v19047_v41  ;;  %26189 = vst [vmem:[#allocation67_spill] sm:$0xff] %v19049_v5  ;;  %15684 = vmatpush3.bf16.msra.mxu1 %v26192_v60  ;;  %15876 = vmatpush3.bf16.msra.mxu0 %v26187_v46  ;;  %v19068_v0 = vand.u32 4294901760, %v432_v56  ;;  %v26198_v7 = vld [vmem:[#allocation73_spill] sm:$0xff]  ;;  %v26199_v60 = vld [vmem:[#allocation72_spill] sm:$0xff]  ;;  %v25234_v41 = vmov 1.0  }
  0xf5   :  { %26190 = vst [vmem:[#allocation118_spill] sm:$0xff] %v19061_v49  ;;  %26191 = vst [vmem:[#allocation119_spill] sm:$0xff] %v19063_v48  ;;  %425 = vmatmul.mubr.f32.gmra.mrb[4].mxu1 %v19049_v5  ;;  %15686 = vmatprep.subr.bf16.mxu1 %v26194_v29  ;;  %v19072_v4 = vand.u32 4294901760, %v438_v30  ;;  %v19075_v31 = vand.u32 4294901760, %v19061_v49  ;;  %v19078_v40 = vand.u32 4294901760, %v19063_v48  ;;  %v26200_v29 = vld [vmem:[#allocation74_spill] sm:$0xff] }
  0xf6   :  { %26193 = vst [vmem:[#allocation68_spill] sm:$0xff] %v19068_v0  ;;  %15878 = vmatprep.subr.bf16.mxu0 %v26198_v7  ;;  %434 = vmatprep.mubr.f32.mxu1 %v19068_v0  ;;  %v26203_v0 = vld [vmem:[#allocation38_spill] sm:$0xff] }
  0xf7   :  { %26195 = vst [vmem:[#allocation69_spill] sm:$0xff] %v19072_v4  ;;  %26196 = vst [vmem:[#allocation120_spill] sm:$0xff] %v19075_v31  ;;  %v1422_v56 = vsub.f32 %v19061_v49, %v19075_v31  ;;  %v1432_v46 = vsub.f32 %v19063_v48, %v19078_v40 }
  0xf8   :  { %26197 = vst [vmem:[#allocation121_spill] sm:$0xff] %v19078_v40  ;;  %15688 = vmatpush3.bf16.msra.mxu1 %v26199_v60  ;;  %15880 = vmatpush3.bf16.msra.mxu0 %v26198_v7  ;;  %v26204_v60 = vld [vmem:[#allocation77_spill] sm:$0xff]  ;;  %v26205_v7 = vld [vmem:[#allocation78_spill] sm:$0xff] }
  0xf9   :  { %440 = vmatmul.mubr.f32.gmra.mrb[6].mxu1 %v19072_v4  ;;  %15690 = vmatprep.subr.bf16.mxu1 %v26200_v29  ;;  %v19090_v30 = vand.u32 4294901760, %v1422_v56  ;;  %v19092_v5 = vand.u32 4294901760, %v1432_v46  ;;  %v26206_v56 = vld [vmem:[#allocation80_spill] sm:$0xff]  ;;  %v26207_v46 = vld [vmem:[#allocation79_spill] sm:$0xff]  ;;  %v26208_v29 = vld [vmem:[#allocation81_spill] sm:$0xff] }
  0xfa   :  { %12017 = vmatprep.mubr.msk.f32.mxu1 %vm18865_vm1, %v25234_v41  ;;  %15882 = vmatprep.subr.bf16.mxu0 %v26203_v0  ;;  %v26257_v4 = vld [vmem:[#allocation30_spill] sm:$0xff] }
  0xfb   :  { %26201 = vst [vmem:[#allocation73_spill] sm:$0xff] %v19090_v30  ;;  %26202 = vst [vmem:[#allocation72_spill] sm:$0xff] %v19092_v5  ;;  %14518 = vmatprep.mubr.f32.mxu0 %v19090_v30  ;;  %v26259_v30 = vld [vmem:[#allocation32_spill] sm:$0xff] }
  0xfc   :  { %15692 = vmatpush3.bf16.msra.mxu1 %v26204_v60  ;;  %15884 = vmatpush3.bf16.msra.mxu0 %v26203_v0  ;;  %v26209_v0 = vpack.c.bf16 %v18227_v28, %v18219_v20  ;;  %v26218_v60 = vpack.c.bf16 %v18372_v58, %v18366_v17 }
  0xfd   :  { %14519 = vmatmul.mubr.f32.gmra.mrb[2].mxu0 %v19092_v5  ;;  %15694 = vmatprep.subr.bf16.mxu1 %v26205_v7  ;;  %v26219_v7 = vpack.c.bf16 %v18387_v54, %v18385_v22  ;;  %v26255_v5 = vld [vmem:[#allocation28_spill] sm:$0xff] }
  0xfe   :  { %14553 = vmatprep.mubr.msk.f32.mxu0 %vm18860_vm0, %v25234_v41  ;;  %15886 = vmatprep.subr.bf16.mxu0 %v26206_v56 }
 0x100   :  { %15696 = vmatpush3.bf16.msra.mxu1 %v26207_v46  ;;  %15888 = vmatpush3.bf16.msra.mxu0 %v26206_v56  ;;  %v26222_v46 = vld [vmem:[#allocation41_spill] sm:$0xff] }
 0x101   :  { %15698 = vmatprep.subr.bf16.mxu1 %v26208_v29  ;;  %15890 = vmatprep.subr.bf16.mxu0 %v18771_v39  ;;  %v26223_v29 = vld [vmem:[#allocation39_spill] sm:$0xff] }
 0x104   :  { %15700 = vmatpush3.bf16.msra.mxu1 %v18768_v53  ;;  %15892 = vmatpush3.bf16.msra.mxu0 %v18771_v39  ;;  %v26211_v39 = vpack.c.bf16 %v26111_v52, %v18241_v37  ;;  %v26212_v53 = vpack.c.bf16 %v18278_v62, %v18276_v61 }
 0x105   :  { %15702 = vmatprep.subr.bf16.mxu1 %v18780_v11  ;;  %15894 = vmatprep.subr.bf16.mxu0 %v18822_v45  ;;  %v26213_v11 = vpack.c.bf16 %v18287_v3, %v18285_v2 }
 0x108   :  { %15704 = vmatpush3.bf16.msra.mxu1 %v18812_v10  ;;  %15896 = vmatpush3.bf16.msra.mxu0 %v18822_v45  ;;  %v26210_v45 = vpack.c.bf16 %v18239_v36, %v18237_v35  ;;  %v26216_v10 = vpack.c.bf16 %v18333_v57, %v18329_v47 }
 0x109   :  { %15706 = vmatprep.subr.bf16.mxu1 %v26209_v0  ;;  %15898 = vmatprep.subr.bf16.mxu0 %v18789_v43  ;;  %v26224_v0 = vpack.c.bf16 %v26222_v46, %v26223_v29 }
 0x10b   :  { %12018 = vmatmul.mubr.msk.f32.vlgmr.msra.gmra.mrb[8].mxu1 %vm18885_vm3, %v25234_v41  ;;  %14554 = vmatmul.mubr.msk.f32.vlgmr.msra.gmra.mrb[0].mxu0 %vm18880_vm2, %v25234_v41 }
 0x10c   :  { %12019 = vmatprep.mubr.msk.f32.mxu1 %vm18915_vm5, %v25234_v41  ;;  %15708 = vmatpush3.bf16.msra.mxu1 %v26210_v45  ;;  %v26225_v45 = vld [vmem:[#allocation20_spill] sm:$0xff] }
 0x10d   :  { %14556 = vmatprep.mubr.msk.f32.mxu0 %vm19035_vm11, %v25234_v41  ;;  %15900 = vmatpush3.bf16.msra.mxu0 %v18789_v43  ;;  %v26214_v43 = vpack.c.bf16 %v18308_v21, %v18298_v8 }
 0x10e   :  { %15710 = vmatprep.subr.bf16.mxu1 %v26211_v39  ;;  %15902 = vmatprep.subr.bf16.mxu0 %v18800_v12  ;;  %v26226_v39 = vld [vmem:[#allocation45_spill] sm:$0xff] }
 0x10f   :  { %12020 = vmatmul.mubr.msk.f32.gmra.mrb[10].mxu1 %vm18910_vm4, %v25234_v41  ;;  %14557 = vmatmul.mubr.msk.f32.gmra.mrb[2].mxu0 %vm19030_vm10, %v25234_v41 }
 0x110   :  { %12021 = vmatprep.mubr.msk.f32.mxu1 %vm18957_vm7, %v25234_v41  ;;  %15712 = vmatpush3.bf16.msra.mxu1 %v26212_v53 }
 0x111   :  { %15904 = vmatpush3.bf16.msra.mxu0 %v18800_v12  ;;  %14591 = vmatprep.mubr.f32.mxu0 %v18877_v24  ;;  %v26215_v12 = vpack.c.bf16 %v18321_v33, %v18319_v32  ;;  %v26250_v24 = vld [vmem:[#allocation24_spill] sm:$0xff] }
 0x112   :  { %15714 = vmatprep.subr.bf16.mxu1 %v26213_v11  ;;  %15906 = vmatprep.subr.bf16.mxu0 %v18808_v6  ;;  %v26229_v11 = vld [vmem:[#allocation48_spill] sm:$0xff] }
 0x113   :  { %12022 = vmatmul.mubr.msk.f32.gmra.mrb[12].mxu1 %vm18952_vm6, %v25234_v41 }
 0x114   :  { %12023 = vmatprep.mubr.msk.f32.mxu1 %vm18995_vm9, %v25234_v41  ;;  %15716 = vmatpush3.bf16.msra.mxu1 %v26214_v43  ;;  %v26230_v43 = vld [vmem:[#allocation46_spill] sm:$0xff] }
 0x115   :  { %15908 = vmatpush3.bf16.msra.mxu0 %v18808_v6  ;;  %15718 = vmatprep.subr.bf16.mxu1 %v26215_v12  ;;  %v26217_v6 = vpack.c.bf16 %v18353_v23, %v18351_v18  ;;  %v26231_v12 = vpack.c.bf16 %v26229_v11, %v26230_v43 }
 0x116   :  { %15910 = vmatprep.subr.bf16.mxu0 %v18818_v9 }
 0x117   :  { %12024 = vmatmul.mubr.msk.f32.gmra.mrb[14].mxu1 %vm18990_vm8, %v25234_v41  ;;  %v26241_v41 = vld [vmem:[#allocation18_spill] sm:$0xff] }
 0x118   :  { %15720 = vmatpush3.bf16.msra.mxu1 %v26216_v10  ;;  %828 = vmatprep.mubr.f32.mxu1 %v18875_v26  ;;  %v26232_v10 = vld [vmem:[#allocation82_spill] sm:$0xff]  ;;  %v26245_v26 = vld [vmem:[#allocation109_spill] sm:$0xff] }
 0x119   :  { %15912 = vmatpush3.bf16.msra.mxu0 %v18818_v9  ;;  %15722 = vmatprep.subr.bf16.mxu1 %v26217_v6  ;;  %v26220_v9 = vld [vmem:[#allocation37_spill] sm:$0xff] }
 0x11a   :  { %15914 = vmatprep.subr.bf16.mxu0 %v18828_v16  ;;  %v26221_v56 = vpack.c.bf16 %v26096_v51, %v26220_v9  ;;  %v26233_v6 = vld [vmem:[#allocation53_spill] sm:$0xff] }
 0x11c   :  { %15724 = vmatpush3.bf16.msra.mxu1 %v26218_v60 }
 0x11d   :  { %15916 = vmatpush3.bf16.msra.mxu0 %v18828_v16  ;;  %15726 = vmatprep.subr.bf16.mxu1 %v26219_v7  ;;  %v26227_v16 = vld [vmem:[#allocation43_spill] sm:$0xff]  ;;  %v26236_v7 = vld [vmem:[#allocation16_spill] sm:$0xff] }
 0x11e   :  { %15918 = vmatprep.subr.bf16.mxu0 %v18836_v59  ;;  %v26228_v53 = vpack.c.bf16 %v26226_v39, %v26227_v16 }
 0x120   :  { %15728 = vmatpush3.bf16.msra.mxu1 %v26221_v56  ;;  %v26237_v56 = vld [vmem:[#allocation17_spill] sm:$0xff] }
 0x121   :  { %15920 = vmatpush3.bf16.msra.mxu0 %v18836_v59  ;;  %15730 = vmatprep.subr.bf16.mxu1 %v26224_v0  ;;  %v26234_v59 = vld [vmem:[#allocation52_spill] sm:$0xff] }
 0x122   :  { %15922 = vmatprep.subr.bf16.mxu0 %v26225_v45  ;;  %v26235_v60 = vpack.c.bf16 %v26233_v6, %v26234_v59  ;;  %v26238_v0 = vld [vmem:[#allocation92_spill] sm:$0xff] }
 0x124   :  { %15732 = vmatpush3.bf16.msra.mxu1 %v26228_v53  ;;  %v26239_v53 = vld [vmem:[#allocation93_spill] sm:$0xff] }
 0x125   :  { %15924 = vmatpush3.bf16.msra.mxu0 %v26225_v45  ;;  %15734 = vmatprep.subr.bf16.mxu1 %v26231_v12  ;;  %v26240_v45 = vld [vmem:[#allocation100_spill] sm:$0xff]  ;;  %v26242_v12 = vld [vmem:[#allocation19_spill] sm:$0xff] }
 0x126   :  { %15926 = vmatprep.subr.bf16.mxu0 %v26232_v10 }
 0x128   :  { %15736 = vmatpush3.bf16.msra.mxu1 %v26235_v60  ;;  %v26243_v60 = vld [vmem:[#allocation101_spill] sm:$0xff] }
 0x129   :  { %15928 = vmatpush3.bf16.msra.mxu0 %v26232_v10  ;;  %15738 = vmatprep.subr.bf16.mxu1 %v26236_v7  ;;  %v26244_v10 = vld [vmem:[#allocation21_spill] sm:$0xff] }
 0x12a   :  { %15930 = vmatprep.subr.bf16.mxu0 %v26237_v56 }
 0x12b   :  { %831 = vmatmul.mubr.f32.vlgmr.msra.gmra.mrb[16].mxu1 %v26238_v0  ;;  %v26246_v0 = vld [vmem:[#allocation22_spill] sm:$0xff] }
 0x12c   :  { %14592 = vmatmul.mubr.f32.vlgmr.msra.gmra.mrb[0].mxu0 %v26239_v53  ;;  %837 = vmatprep.mubr.f32.mxu1 %v26240_v45  ;;  %v26247_v53 = vld [vmem:[#allocation91_spill] sm:$0xff] }
 0x12d   :  { %15740 = vmatpush3.bf16.msra.mxu1 %v26241_v41  ;;  %14594 = vmatprep.mubr.f32.mxu0 %v19061_v49  ;;  %v26248_v45 = vld [vmem:[#allocation23_spill] sm:$0xff]  ;;  %v26249_v49 = vld [vmem:[#allocation110_spill] sm:$0xff] }
 0x12e   :  { %15932 = vmatpush3.bf16.msra.mxu0 %v26237_v56  ;;  %15742 = vmatprep.subr.bf16.mxu1 %v26242_v12 }
 0x12f   :  { %840 = vmatmul.mubr.f32.gmra.mrb[18].mxu1 %v26243_v60  ;;  %15934 = vmatprep.subr.bf16.mxu0 %v26244_v10  ;;  %v26251_v60 = vld [vmem:[#allocation25_spill] sm:$0xff] }
 0x130   :  { %14595 = vmatmul.mubr.f32.gmra.mrb[2].mxu0 %v19063_v48  ;;  %846 = vmatprep.mubr.f32.mxu1 %v26245_v26  ;;  %v26252_v48 = vld [vmem:[#allocation26_spill] sm:$0xff]  ;;  %v26253_v26 = vld [vmem:[#allocation27_spill] sm:$0xff] }
 0x131   :  { %15744 = vmatpush3.bf16.msra.mxu1 %v26246_v0  ;;  %14629 = vmatprep.mubr.f32.mxu0 %v26247_v53  ;;  %v26254_v53 = vld [vmem:[#allocation90_spill] sm:$0xff] }
 0x132   :  { %15936 = vmatpush3.bf16.msra.mxu0 %v26244_v10  ;;  %15746 = vmatprep.subr.bf16.mxu1 %v26248_v45 }
 0x133   :  { %849 = vmatmul.mubr.f32.gmra.mrb[20].mxu1 %v26249_v49  ;;  %15938 = vmatprep.subr.bf16.mxu0 %v26250_v24  ;;  %v26256_v49 = vld [vmem:[#allocation29_spill] sm:$0xff] }
 0x134   :  { %855 = vmatprep.mubr.f32.mxu1 %v19018_v14  ;;  %v26258_v14 = vld [vmem:[#allocation31_spill] sm:$0xff] }
 0x135   :  { %15748 = vmatpush3.bf16.msra.mxu1 %v26251_v60 }
 0x136   :  { %15940 = vmatpush3.bf16.msra.mxu0 %v26250_v24  ;;  %15750 = vmatprep.subr.bf16.mxu1 %v26252_v48  ;;  %v26268_v48 = vld [vmem:[#allocation49_spill] sm:$0xff]  ;;  %v26273_v24 = vld [vmem:[#allocation51_spill] sm:$0xff] }
 0x137   :  { %858 = vmatmul.mubr.f32.gmra.mrb[22].mxu1 %v19020_v34  ;;  %15942 = vmatprep.subr.bf16.mxu0 %v26253_v26  ;;  %v26261_v34 = vld [vmem:[#allocation36_spill] sm:$0xff] }
 0x138   :  { %962 = vmatprep.mubr.f32.mxu1 %v26254_v53  ;;  %v26262_v53 = vld [vmem:[#allocation40_spill] sm:$0xff] }
 0x139   :  { %15752 = vmatpush3.bf16.msra.mxu1 %v26255_v5  ;;  %v26263_v5 = vld [vmem:[#allocation42_spill] sm:$0xff] }
 0x13a   :  { %15944 = vmatpush3.bf16.msra.mxu0 %v26253_v26  ;;  %15754 = vmatprep.subr.bf16.mxu1 %v26256_v49  ;;  %v26264_v26 = vld [vmem:[#allocation44_spill] sm:$0xff]  ;;  %v26265_v49 = vld [vmem:[#allocation47_spill] sm:$0xff] }
 0x13b   :  { %15946 = vmatprep.subr.bf16.mxu0 %v26257_v4 }
 0x13d   :  { %15756 = vmatpush3.bf16.msra.mxu1 %v26258_v14  ;;  %v26266_v14 = vand.u32 4294901760, %v18219_v20 }
 0x13e   :  { %15948 = vmatpush3.bf16.msra.mxu0 %v26257_v4  ;;  %15758 = vmatprep.subr.bf16.mxu1 %v26259_v30  ;;  %v26267_v30 = vand.u32 4294901760, %v18227_v28  ;;  %v26276_v28 = vand.u32 4294901760, %v18241_v37 }
 0x13f   :  { %15950 = vmatprep.subr.bf16.mxu0 %v26260_v27 }
 0x140   :  { %v15769_v4 = vpack.c.bf16 %v26267_v30, %v26266_v14  ;;  %v26277_v14 = vand.u32 4294901760, %v26111_v52  ;;  %v26288_v52 = vand.u32 4294901760, %v18287_v3  ;;  %v26297_v3 = vand.u32 4294901760, %v18308_v21 }
 0x141   :  { %15760 = vmatpush3.bf16.msra.mxu1 %v26261_v34  ;;  %v26269_v34 = vld [vmem:[#allocation50_spill] sm:$0xff]  ;;  %v26307_v21 = vand.u32 4294901760, %v18333_v57  ;;  %v26316_v57 = vand.u32 4294901760, %v18372_v58 }
 0x142   :  { %15952 = vmatpush3.bf16.msra.mxu0 %v26260_v27  ;;  %15762 = vmatprep.subr.bf16.mxu1 %v26262_v53  ;;  %v26270_v60 = vand.u32 4294901760, %v26269_v34  ;;  %v26271_v27 = vld [vmem:[#allocation54_spill] sm:$0xff]  ;;  %v15773_v30 = vpack.c.bf16 %v26277_v14, %v26276_v28  ;;  %v26290_v28 = vld [vmem:[#allocation60_spill] sm:$0xff] }
 0x143   :  { %15954 = vmatprep.subr.bf16.mxu0 %v26263_v5  ;;  %v26272_v55 = vand.u32 4294901760, %v26271_v27  ;;  %v26278_v34 = vld [vmem:[#allocation98_spill] sm:$0xff]  ;;  %v26279_v27 = vld [vmem:[#allocation55_spill] sm:$0xff]  ;;  %v26291_v14 = vand.u32 4294901760, %v26290_v28 }
 0x145   :  { %15764 = vmatpush3.bf16.msra.mxu1 %v26264_v26  ;;  %v15961_v53 = vpack.c.bf16 %v26272_v55, %v26270_v60  ;;  %v26274_v26 = vand.u32 4294901760, %v18237_v35  ;;  %v26280_v55 = vand.u32 4294901760, %v26279_v27  ;;  %v26281_v60 = vld [vmem:[#allocation56_spill] sm:$0xff]  ;;  %v26285_v35 = vand.u32 4294901760, %v18276_v61  ;;  %v26294_v61 = vld [vmem:[#allocation58_spill] sm:$0xff] }
 0x146   :  { %15956 = vmatpush3.bf16.msra.mxu0 %v26263_v5  ;;  %15766 = vmatprep.subr.bf16.mxu1 %v26265_v49  ;;  %v26275_v49 = vand.u32 4294901760, %v18239_v36  ;;  %v26286_v36 = vand.u32 4294901760, %v18278_v62  ;;  %v26295_v62 = vmov 1.0  }
 0x147   :  { %15958 = vmatprep.subr.bf16.mxu0 %v26268_v48 }
 0x148   :  { %v15771_v20 = vpack.c.bf16 %v26275_v49, %v26274_v26  ;;  %v15775_v37 = vpack.c.bf16 %v26286_v36, %v26285_v35  ;;  %v26287_v26 = vand.u32 4294901760, %v18285_v2  ;;  %v26296_v2 = vand.u32 4294901760, %v18298_v8  ;;  %v26300_v36 = vld [vmem:[#allocation63_spill] sm:$0xff] }
 0x149   :  { %15768 = vmatpush3.bf16.msra.mxu1 %v26273_v24  ;;  %v26282_v24 = vand.u32 4294901760, %v26281_v60  ;;  %v26299_v60 = vand.u32 4294901760, %v18321_v33  ;;  %v26306_v8 = vand.u32 4294901760, %v18329_v47  ;;  %v26309_v33 = vand.u32 4294901760, %v18353_v23 }
 0x14a   :  { %15960 = vmatpush3.bf16.msra.mxu0 %v26268_v48  ;;  %15770 = vmatprep.subr.bf16.mxu1 %v15769_v4  ;;  %v26283_v48 = vld [vmem:[#allocation99_spill] sm:$0xff]  ;;  %v26284_v4 = vld [vmem:[#allocation105_spill] sm:$0xff]  ;;  %v15777_v49 = vpack.c.bf16 %v26288_v52, %v26287_v26  ;;  %v26303_v52 = vld [vmem:[#allocation66_spill] sm:$0xff]  ;;  %v26315_v47 = vand.u32 4294901760, %v18366_v17  ;;  %v26317_v23 = vand.u32 4294901760, %v18385_v22  ;;  %v26324_v17 = vand.u32 4294901760, %v26096_v51 }
 0x14b   :  { %15962 = vmatprep.subr.bf16.mxu0 %v15961_v53  ;;  %v15965_v5 = vpack.c.bf16 %v26282_v24, %v26280_v55  ;;  %v26289_v24 = vld [vmem:[#allocation106_spill] sm:$0xff]  ;;  %v26304_v28 = vand.u32 4294901760, %v26303_v52  ;;  %v26321_v52 = vld [vmem:[#allocation76_spill] sm:$0xff]  ;;  %v26326_v22 = vand.u32 4294901760, %v26222_v46 }
 0x14c   :  { %966 = vmatmul.mubr.f32.vlgmr.msra.gmra.mrb[24].mxu1 %v26278_v34 }
 0x14d   :  { %14630 = vmatmul.mubr.f32.vlgmr.msra.gmra.mrb[0].mxu0 %v26283_v48  ;;  %973 = vmatprep.mubr.f32.mxu1 %v26284_v4 }
 0x14e   :  { %15772 = vmatpush3.bf16.msra.mxu1 %v15771_v20  ;;  %14632 = vmatprep.mubr.f32.mxu0 %v19075_v31  ;;  %v26292_v20 = vld [vmem:[#allocation61_spill] sm:$0xff] }
 0x14f   :  { %15964 = vmatpush3.bf16.msra.mxu0 %v15961_v53  ;;  %15774 = vmatprep.subr.bf16.mxu1 %v15773_v30  ;;  %v26293_v27 = vand.u32 4294901760, %v26292_v20  ;;  %v15779_v53 = vpack.c.bf16 %v26297_v3, %v26296_v2  ;;  %v26298_v30 = vand.u32 4294901760, %v18319_v32  ;;  %v26305_v20 = vld [vmem:[#allocation116_spill] sm:$0xff]  ;;  %v26308_v32 = vand.u32 4294901760, %v18351_v18  ;;  %v26311_v2 = vld [vmem:[#allocation70_spill] sm:$0xff] }
 0x150   :  { %977 = vmatmul.mubr.f32.gmra.mrb[26].mxu1 %v26289_v24  ;;  %15966 = vmatprep.subr.bf16.mxu0 %v15965_v5  ;;  %v26312_v3 = vand.u32 4294901760, %v26311_v2  ;;  %v15787_v18 = vpack.c.bf16 %v26316_v57, %v26315_v47  ;;  %v26335_v47 = vand.u32 4294901760, %v26234_v59  ;;  %v26336_v57 = vand.u32 4294901760, %v26233_v6 }
 0x151   :  { %v15969_v55 = vpack.c.bf16 %v26293_v27, %v26291_v14  ;;  %14633 = vmatmul.mubr.f32.gmra.mrb[2].mxu0 %v19078_v40  ;;  %984 = vmatprep.mubr.f32.mxu1 %v26294_v61  ;;  %v15781_v35 = vpack.c.bf16 %v26299_v60, %v26298_v30  ;;  %v26310_v27 = vld [vmem:[#allocation117_spill] sm:$0xff]  ;;  %v26313_v30 = vld [vmem:[#allocation71_spill] sm:$0xff]  ;;  %v26339_v6 = vmov 0  ;;  %v26342_v59 = vmov 0  ;;  %v26377_v61 = vld [vmem:[#allocation32_spill] sm:$0xff] }
 0x152   :  { %15776 = vmatpush3.bf16.msra.mxu1 %v15775_v37  ;;  %14667 = vmatprep.mubr.msk.f32.mxu0 %vm18860_vm0, %v26295_v62  ;;  %v26301_v37 = vld [vmem:[#allocation65_spill] sm:$0xff]  ;;  %v26314_v60 = vand.u32 4294901760, %v26313_v30  ;;  %v26333_v30 = vand.u32 4294901760, %v26230_v43  ;;  %v26338_v43 = vld [vmem:[#allocation83_spill] sm:$0xff] }
 0x153   :  { %15968 = vmatpush3.bf16.msra.mxu0 %v15965_v5  ;;  %15778 = vmatprep.subr.bf16.mxu1 %v15777_v49  ;;  %v26302_v26 = vand.u32 4294901760, %v26301_v37  ;;  %v15783_v5 = vpack.c.bf16 %v26307_v21, %v26306_v8  ;;  %v15785_v49 = vpack.c.bf16 %v26309_v33, %v26308_v32  ;;  %v26319_v37 = vld [vmem:[#allocation75_spill] sm:$0xff]  ;;  %v26323_v21 = vand.u32 4294901760, %v26220_v9  ;;  %v26329_v33 = vld [vmem:[#allocation34_spill] sm:$0xff] }
 0x154   :  { %988 = vmatmul.mubr.f32.gmra.mrb[28].mxu1 %v26300_v36  ;;  %15970 = vmatprep.subr.bf16.mxu0 %v15969_v55  ;;  %v26332_v9 = vand.u32 4294901760, %v26226_v39  ;;  %v26337_v39 = vld [vmem:[#allocation102_spill] sm:$0xff] }
 0x155   :  { %v15973_v14 = vpack.c.bf16 %v26304_v28, %v26302_v26  ;;  %995 = vmatprep.mubr.f32.mxu1 %v26305_v20  ;;  %v26320_v26 = vand.u32 4294901760, %v26319_v37  ;;  %v26322_v28 = vand.u32 4294901760, %v26321_v52  ;;  %v15791_v58 = vpack.c.bf16 %v26324_v17, %v26323_v21  ;;  %v2164_v21 = vld [vmem:[#allocation8 + $0x300] sm:$0xff]  ;;  %v2118_v40 = vld [vmem:[#allocation8 + $0x190] sm:$0xff] }
 0x156   :  { %15780 = vmatpush3.bf16.msra.mxu1 %v15779_v53  ;;  %v15977_v53 = vpack.c.bf16 %v26314_v60, %v26312_v3  ;;  %v26331_v3 = vand.u32 4294901760, %v26227_v16  ;;  %v176_v60 = vpop.permute.xlu0 %175  ;;  %v26358_v17 = vld [vmem:[#allocation25_spill] sm:$0xff]  ;;  %v2150_v36 = vld [vmem:[#allocation8 + $0x290] sm:$0xff] }
 0x157   :  { %15972 = vmatpush3.bf16.msra.mxu0 %v15969_v55  ;;  %15782 = vmatprep.subr.bf16.mxu1 %v15781_v35  ;;  %v26318_v55 = vand.u32 4294901760, %v18387_v54  ;;  %v15981_v8 = vpack.c.bf16 %v26322_v28, %v26320_v26  ;;  %vm19378_vm13 = vcmp.eq.s32.totalorder %v26338_v43, %v176_v60  ;;  %v26355_v28 = vld [vmem:[#allocation24_spill] sm:$0xff] }
 0x158   :  { %999 = vmatmul.mubr.f32.gmra.mrb[30].mxu1 %v26310_v27  ;;  %15974 = vmatprep.subr.bf16.mxu0 %v15973_v14  ;;  %v15795_v51 = vpack.c.bf16 %v26332_v9, %v26331_v3  ;;  %v26343_v59 = vsel %vm19378_vm13, 4294967295, %v26342_v59 }
 0x159   :  { %12025 = vmatprep.mubr.msk.f32.mxu1 %vm18865_vm1, %v26295_v62  ;;  %v15789_v35 = vpack.c.bf16 %v26318_v55, %v26317_v23  ;;  %26344 = vst [vmem:[#allocation38_spill] sm:$0xff] %v26343_v59  ;;  %v26348_v23 = vmov 0  ;;  %v26351_v55 = vmov 0.0  }
 0x15a   :  { %15784 = vmatpush3.bf16.msra.mxu1 %v15783_v5  ;;  %v26327_v5 = vld [vmem:[#allocation33_spill] sm:$0xff]  ;;  %v182_v16 = vpop.permute.xlu0 %181 }
 0x15b   :  { %15976 = vmatpush3.bf16.msra.mxu0 %v15973_v14  ;;  %15786 = vmatprep.subr.bf16.mxu1 %v15785_v49  ;;  %v26325_v14 = vand.u32 4294901760, %v26223_v29  ;;  %v26328_v32 = vand.u32 4294901760, %v26327_v5  ;;  %v26330_v49 = vand.u32 4294901760, %v26329_v33  ;;  %v26334_v29 = vand.u32 4294901760, %v26229_v11 }
 0x15c   :  { %15978 = vmatprep.subr.bf16.mxu0 %v15977_v53  ;;  %vm19383_vm14 = vcmp.eq.s32.totalorder %v26338_v43, %v182_v16  ;;  %v26367_v16 = vld [vmem:[#allocation29_spill] sm:$0xff] }
 0x15d   :  { %v15793_v54 = vpack.c.bf16 %v26326_v22, %v26325_v14  ;;  %v15985_v2 = vpack.c.bf16 %v26330_v49, %v26328_v32  ;;  %v15797_v46 = vpack.c.bf16 %v26334_v29, %v26333_v30  ;;  %v2116_v14 = vld [vmem:[#allocation8 + $0x180] sm:$0xff]  ;;  %v2117_v22 = vld [vmem:[#allocation8 + $0x188] sm:$0xff]  ;;  %v3264_v30 = vand.u32 4294901760, %v2164_v21  ;;  %v2146_v49 = vld [vmem:[#allocation8 + $0x270] sm:$0xff] }
 0x15e   :  { %15788 = vmatpush3.bf16.msra.mxu1 %v15787_v18  ;;  %v15799_v18 = vpack.c.bf16 %v26336_v57, %v26335_v47  ;;  %v2189_v60 = vand.u32 4294901760, %v2117_v22  ;;  %v2149_v47 = vld [vmem:[#allocation8 + $0x288] sm:$0xff]  ;;  %v26366_v57 = vld [vmem:[#allocation28_spill] sm:$0xff] }
 0x15f   :  { %15980 = vmatpush3.bf16.msra.mxu0 %v15977_v53  ;;  %15790 = vmatprep.subr.bf16.mxu1 %v15789_v35  ;;  %v179_v53 = vpop.permute.xlu1 %178  ;;  %v12008_v35 = vsel %vm19378_vm13, 1.0, %v26351_v55  ;;  %v19492_v27 = vsub.f32 %v2164_v21, %v3264_v30 }
 0x160   :  { %15982 = vmatprep.subr.bf16.mxu0 %v15981_v8  ;;  %vm19373_vm12 = vcmp.eq.s32.totalorder %v26338_v43, %v179_v53  ;;  %v19432_v37 = vsub.f32 %v12008_v35, %v12008_v35  ;;  %v2148_v53 = vld [vmem:[#allocation8 + $0x280] sm:$0xff]  ;;  %v19500_v4 = vsub.f32 %v2117_v22, %v2189_v60 }
 0x161   :  { %v26340_v6 = vsel %vm19373_vm12, 4294967295, %v26339_v6  ;;  %26375 = vst [vmem:[#allocation52_spill] sm:$0xff] %v19492_v27  ;;  %v2168_v22 = vld [vmem:[#allocation8 + $0x320] sm:$0xff] }
 0x162   :  { %15792 = vmatpush3.bf16.msra.mxu1 %v15791_v58  ;;  %26341 = vst [vmem:[#allocation74_spill] sm:$0xff] %v26340_v6  ;;  %26352 = vst [vmem:[#allocation80_spill] sm:$0xff] %v19432_v37  ;;  %v2165_v58 = vld [vmem:[#allocation8 + $0x308] sm:$0xff]  ;;  %v19451_v5 = vand.u32 4294901760, %v19432_v37 }
 0x163   :  { %15984 = vmatpush3.bf16.msra.mxu0 %v15981_v8  ;;  %15794 = vmatprep.subr.bf16.mxu1 %v15793_v54  ;;  %v185_v11 = vpop.permute.xlu1 %184  ;;  %v26359_v54 = vld [vmem:[#allocation26_spill] sm:$0xff]  ;;  %v3267_v29 = vand.u32 4294901760, %v2165_v58  ;;  %26379 = vst [vmem:[#allocation18_spill] sm:$0xff] %v19500_v4 }
 0x164   :  { %15986 = vmatprep.subr.bf16.mxu0 %v15985_v2  ;;  %vm19394_vm15 = vcmp.eq.s32.totalorder %v26338_v43, %v185_v11  ;;  %26360 = vst [vmem:[#allocation41_spill] sm:$0xff] %v19451_v5  ;;  %v2119_v43 = vld [vmem:[#allocation8 + $0x198] sm:$0xff] }
 0x165   :  { %v26349_v23 = vsel %vm19394_vm15, 4294967295, %v26348_v23  ;;  %v19494_v20 = vsub.f32 %v2165_v58, %v3267_v29 }
 0x166   :  { %15796 = vmatpush3.bf16.msra.mxu1 %v15795_v51  ;;  %26350 = vst [vmem:[#allocation78_spill] sm:$0xff] %v26349_v23 }
 0x167   :  { %15988 = vmatpush3.bf16.msra.mxu0 %v15985_v2  ;;  %15798 = vmatprep.subr.bf16.mxu1 %v15797_v46  ;;  %v26364_v2 = vld [vmem:[#allocation27_spill] sm:$0xff]  ;;  %v2186_v46 = vand.u32 4294901760, %v2116_v14  ;;  %26376 = vst [vmem:[#allocation16_spill] sm:$0xff] %v19494_v20 }
 0x168   :  { %15990 = vmatprep.subr.bf16.mxu0 %v26337_v39 }
 0x169   :  { %v19485_v11 = vpack.c.bf16 %v2189_v60, %v2186_v46  ;;  %v19498_v24 = vsub.f32 %v2116_v14, %v2186_v46  ;;  %v2169_v46 = vld [vmem:[#allocation8 + $0x328] sm:$0xff]  ;;  %v26385_v60 = vld [vmem:[#allocation36_spill] sm:$0xff] }
 0x16a   :  { %15800 = vmatpush3.bf16.msra.mxu1 %v15799_v18  ;;  %v2134_v18 = vld [vmem:[#allocation8 + $0x210] sm:$0xff] }
 0x16b   :  { %15992 = vmatpush3.bf16.msra.mxu0 %v26337_v39  ;;  %15802 = vmatprep.subr.bf16.mxu1 %v26236_v7  ;;  %v26345_v7 = vmov 0  ;;  %v2135_v39 = vld [vmem:[#allocation8 + $0x218] sm:$0xff]  ;;  %26371 = vst [vmem:[#allocation46_spill] sm:$0xff] %v19485_v11  ;;  %26378 = vst [vmem:[#allocation17_spill] sm:$0xff] %v19498_v24 }
 0x16c   :  { %15994 = vmatprep.subr.bf16.mxu0 %v26237_v56  ;;  %v26346_v7 = vsel %vm19383_vm14, 4294967295, %v26345_v7  ;;  %v2243_v35 = vand.u32 4294901760, %v2135_v39 }
 0x16d   :  { %12026 = vmatmul.mubr.msk.f32.vlgmr.msra.gmra.mrb[32].mxu1 %vm18885_vm3, %v26295_v62  ;;  %26347 = vst [vmem:[#allocation77_spill] sm:$0xff] %v26346_v7 }
 0x16e   :  { %14668 = vmatmul.mubr.msk.f32.vlgmr.msra.gmra.mrb[0].mxu0 %vm18880_vm2, %v26295_v62  ;;  %12027 = vmatprep.mubr.msk.f32.mxu1 %vm18915_vm5, %v26295_v62  ;;  %v19514_v7 = vsub.f32 %v2135_v39, %v2243_v35  ;;  %v3276_v39 = vand.u32 4294901760, %v2168_v22 }
 0x16f   :  { %15804 = vmatpush3.bf16.msra.mxu1 %v26241_v41  ;;  %14670 = vmatprep.mubr.msk.f32.mxu0 %vm19035_vm11, %v26295_v62  ;;  %v12009_v41 = vsel %vm19373_vm12, 1.0, %v26351_v55 }
 0x170   :  { %15996 = vmatpush3.bf16.msra.mxu0 %v26237_v56  ;;  %15806 = vmatprep.subr.bf16.mxu1 %v26242_v12  ;;  %v12010_v56 = vsel %vm19383_vm14, 1.0, %v26351_v55  ;;  %v12011_v12 = vsel %vm19394_vm15, 1.0, %v26351_v55  ;;  %v19434_v26 = vsub.f32 %v12009_v41, %v12009_v41  ;;  %v2240_v55 = vand.u32 4294901760, %v2134_v18  ;;  %v26372_v41 = vld [vmem:[#allocation31_spill] sm:$0xff]  ;;  %26387 = vst [vmem:[#allocation54_spill] sm:$0xff] %v19514_v7 }
 0x171   :  { %12028 = vmatmul.mubr.msk.f32.gmra.mrb[34].mxu1 %vm18910_vm4, %v26295_v62  ;;  %15998 = vmatprep.subr.bf16.mxu0 %v26244_v10  ;;  %v19436_v52 = vsub.f32 %v12010_v56, %v12010_v56  ;;  %v26368_v56 = vld [vmem:[#allocation30_spill] sm:$0xff] }
 0x172   :  { %14671 = vmatmul.mubr.msk.f32.gmra.mrb[2].mxu0 %vm19030_vm10, %v26295_v62  ;;  %12029 = vmatprep.mubr.msk.f32.mxu1 %vm18957_vm7, %v26295_v62  ;;  %26353 = vst [vmem:[#allocation79_spill] sm:$0xff] %v19434_v26  ;;  %v19454_v32 = vand.u32 4294901760, %v19434_v26  ;;  %v19512_v23 = vsub.f32 %v2134_v18, %v2240_v55 }
 0x173   :  { %15808 = vmatpush3.bf16.msra.mxu1 %v26246_v0  ;;  %14705 = vmatprep.mubr.msk.f32.mxu0 %vm18860_vm0, %v26295_v62  ;;  %26354 = vst [vmem:[#allocation81_spill] sm:$0xff] %v19436_v52  ;;  %v19442_v0 = vsub.f32 %v12011_v12, %v12011_v12  ;;  %v19457_v33 = vand.u32 4294901760, %v19436_v52 }
 0x174   :  { %16000 = vmatpush3.bf16.msra.mxu0 %v26244_v10  ;;  %15810 = vmatprep.subr.bf16.mxu1 %v26248_v45  ;;  %v2132_v10 = vld [vmem:[#allocation8 + $0x200] sm:$0xff]  ;;  %v2133_v45 = vld [vmem:[#allocation8 + $0x208] sm:$0xff]  ;;  %26361 = vst [vmem:[#allocation39_spill] sm:$0xff] %v19454_v32  ;;  %26386 = vst [vmem:[#allocation50_spill] sm:$0xff] %v19512_v23 }
 0x175   :  { %12030 = vmatmul.mubr.msk.f32.gmra.mrb[36].mxu1 %vm18952_vm6, %v26295_v62  ;;  %16002 = vmatprep.subr.bf16.mxu0 %v26355_v28  ;;  %26356 = vst [vmem:[#allocation37_spill] sm:$0xff] %v19442_v0  ;;  %26362 = vst [vmem:[#allocation20_spill] sm:$0xff] %v19457_v33  ;;  %v2234_v3 = vand.u32 4294901760, %v2132_v10  ;;  %v2237_v9 = vand.u32 4294901760, %v2133_v45  ;;  %v19464_v51 = vand.u32 4294901760, %v19442_v0  ;;  %v2153_v0 = vld [vmem:[#allocation8 + $0x2a8] sm:$0xff] }
 0x176   :  { %12031 = vmatprep.mubr.msk.f32.mxu1 %vm18995_vm9, %v26295_v62  ;;  %v2138_v33 = vld [vmem:[#allocation8 + $0x230] sm:$0xff] }
 0x177   :  { %15812 = vmatpush3.bf16.msra.mxu1 %v26358_v17  ;;  %26365 = vst [vmem:[#allocation45_spill] sm:$0xff] %v19464_v51  ;;  %v19479_v12 = vpack.c.bf16 %v2237_v9, %v2234_v3  ;;  %v3219_v17 = vand.u32 4294901760, %v2149_v47  ;;  %v19488_v31 = vsub.f32 %v2132_v10, %v2234_v3  ;;  %v19490_v48 = vsub.f32 %v2133_v45, %v2237_v9  ;;  %v2136_v10 = vld [vmem:[#allocation8 + $0x220] sm:$0xff]  ;;  %v2137_v3 = vld [vmem:[#allocation8 + $0x228] sm:$0xff]  ;;  %v26380_v45 = vld [vmem:[#allocation35_spill] sm:$0xff] }
 0x178   :  { %16004 = vmatpush3.bf16.msra.mxu0 %v26355_v28  ;;  %15814 = vmatprep.subr.bf16.mxu1 %v26359_v54  ;;  %v3216_v28 = vand.u32 4294901760, %v2148_v53  ;;  %v2166_v54 = vld [vmem:[#allocation8 + $0x310] sm:$0xff]  ;;  %v2192_v9 = vand.u32 4294901760, %v2118_v40  ;;  %v2246_v6 = vand.u32 4294901760, %v2136_v10  ;;  %v2249_v50 = vand.u32 4294901760, %v2137_v3  ;;  %v2152_v51 = vld [vmem:[#allocation8 + $0x2a0] sm:$0xff] }
 0x179   :  { %12032 = vmatmul.mubr.msk.f32.gmra.mrb[38].mxu1 %vm18990_vm8, %v26295_v62  ;;  %16006 = vmatprep.subr.bf16.mxu0 %v26364_v2  ;;  %26369 = vst [vmem:[#allocation43_spill] sm:$0xff] %v19479_v12  ;;  %26373 = vst [vmem:[#allocation82_spill] sm:$0xff] %v19488_v31  ;;  %v3270_v34 = vand.u32 4294901760, %v2166_v54  ;;  %v2252_v20 = vand.u32 4294901760, %v2138_v33 }
 0x17a   :  { %12033 = vmatprep.mubr.msk.f32.mxu1 %vm18865_vm1, %v26295_v62  ;;  %26374 = vst [vmem:[#allocation53_spill] sm:$0xff] %v19490_v48  ;;  %v19503_v21 = vpack.c.bf16 %v3219_v17, %v3216_v28  ;;  %v19505_v58 = vsub.f32 %v2148_v53, %v3216_v28  ;;  %v2120_v53 = vld [vmem:[#allocation8 + $0x1a0] sm:$0xff]  ;;  %v2121_v28 = vld [vmem:[#allocation8 + $0x1a8] sm:$0xff]  ;;  %v19527_v18 = vsub.f32 %v2118_v40, %v2192_v9 }
 0x17b   :  { %15816 = vmatpush3.bf16.msra.mxu1 %v26366_v57  ;;  %v2167_v57 = vld [vmem:[#allocation8 + $0x318] sm:$0xff]  ;;  %v19520_v59 = vsub.f32 %v2166_v54, %v3270_v34  ;;  %v2201_v54 = vand.u32 4294901760, %v2121_v28  ;;  %v19540_v40 = vsub.f32 %v2136_v10, %v2246_v6 }
 0x17c   :  { %16008 = vmatpush3.bf16.msra.mxu0 %v26364_v2  ;;  %15818 = vmatprep.subr.bf16.mxu1 %v26367_v16  ;;  %v19483_v16 = vpack.c.bf16 %v3267_v29, %v3264_v30  ;;  %v2151_v2 = vld [vmem:[#allocation8 + $0x298] sm:$0xff]  ;;  %26381 = vst [vmem:[#allocation19_spill] sm:$0xff] %v19503_v21  ;;  %26382 = vst [vmem:[#allocation21_spill] sm:$0xff] %v19505_v58  ;;  %v2195_v30 = vand.u32 4294901760, %v2119_v43  ;;  %v19507_v29 = vsub.f32 %v2149_v47, %v3219_v17 }
 0x17d   :  { %16010 = vmatprep.subr.bf16.mxu0 %v26368_v56  ;;  %v3225_v14 = vand.u32 4294901760, %v2151_v2  ;;  %v26388_v47 = vld [vmem:[#allocation40_spill] sm:$0xff]  ;;  %26390 = vst [vmem:[#allocation56_spill] sm:$0xff] %v19520_v59  ;;  %26394 = vst [vmem:[#allocation65_spill] sm:$0xff] %v19527_v18  ;;  %v19538_v59 = vpack.c.bf16 %v2249_v50, %v2246_v6  ;;  %v3231_v58 = vand.u32 4294901760, %v2153_v0  ;;  %v19549_v6 = vsub.f32 %v2168_v22, %v3276_v39  ;;  %v26410_v18 = vld [vmem:[#allocation51_spill] sm:$0xff] }
 0x17e   :  { %26370 = vst [vmem:[#allocation48_spill] sm:$0xff] %v19483_v16  ;;  %26383 = vst [vmem:[#allocation22_spill] sm:$0xff] %v19507_v29  ;;  %v19529_v52 = vsub.f32 %v2119_v43, %v2195_v30  ;;  %v2171_v29 = vld [vmem:[#allocation8 + $0x338] sm:$0xff]  ;;  %v19558_v7 = vsub.f32 %v2121_v28, %v2201_v54  ;;  %v2140_v22 = vld [vmem:[#allocation8 + $0x240] sm:$0xff] }
 0x17f   :  { %15820 = vmatpush3.bf16.msra.mxu1 %v26372_v41  ;;  %v3273_v41 = vand.u32 4294901760, %v2167_v57  ;;  %26400 = vst [vmem:[#allocation76_spill] sm:$0xff] %v19538_v59  ;;  %26401 = vst [vmem:[#allocation33_spill] sm:$0xff] %v19540_v40  ;;  %v26402_v43 = vld [vmem:[#allocation47_spill] sm:$0xff] }
 0x180   :  { %16012 = vmatpush3.bf16.msra.mxu0 %v26368_v56  ;;  %15822 = vmatprep.subr.bf16.mxu1 %v26377_v61  ;;  %v19509_v56 = vpack.c.bf16 %v2243_v35, %v2240_v55  ;;  %v3222_v61 = vand.u32 4294901760, %v2150_v36  ;;  %v19525_v55 = vpack.c.bf16 %v2195_v30, %v2192_v9  ;;  %v3279_v35 = vand.u32 4294901760, %v2169_v46  ;;  %26395 = vst [vmem:[#allocation66_spill] sm:$0xff] %v19529_v52  ;;  %v2170_v9 = vld [vmem:[#allocation8 + $0x330] sm:$0xff]  ;;  %v2155_v40 = vld [vmem:[#allocation8 + $0x2b8] sm:$0xff] }
 0x181   :  { %16014 = vmatprep.subr.bf16.mxu0 %v26380_v45  ;;  %v19518_v17 = vpack.c.bf16 %v3273_v41, %v3270_v34  ;;  %v19522_v44 = vsub.f32 %v2167_v57, %v3273_v41  ;;  %v2198_v34 = vand.u32 4294901760, %v2120_v53  ;;  %v26397_v57 = vld [vmem:[#allocation44_spill] sm:$0xff]  ;;  %v3228_v30 = vand.u32 4294901760, %v2152_v51  ;;  %v2122_v52 = vld [vmem:[#allocation8 + $0x1b0] sm:$0xff]  ;;  %26406 = vst [vmem:[#allocation24_spill] sm:$0xff] %v19549_v6 }
 0x182   :  { %26384 = vst [vmem:[#allocation23_spill] sm:$0xff] %v19509_v56  ;;  %26393 = vst [vmem:[#allocation61_spill] sm:$0xff] %v19525_v55  ;;  %v19534_v41 = vsub.f32 %v2150_v36, %v3222_v61  ;;  %v26403_v36 = vld [vmem:[#allocation49_spill] sm:$0xff]  ;;  %v19551_v10 = vsub.f32 %v2169_v46, %v3279_v35 }
 0x183   :  { %15824 = vmatpush3.bf16.msra.mxu1 %v26385_v60  ;;  %26389 = vst [vmem:[#allocation55_spill] sm:$0xff] %v19518_v17  ;;  %26391 = vst [vmem:[#allocation60_spill] sm:$0xff] %v19522_v44  ;;  %v26392_v60 = vld [vmem:[#allocation42_spill] sm:$0xff]  ;;  %v19536_v44 = vsub.f32 %v2151_v2, %v3225_v14  ;;  %v19545_v2 = vsub.f32 %v2137_v3, %v2249_v50  ;;  %v19560_v50 = vsub.f32 %v2152_v51, %v3228_v30 }
 0x184   :  { %16016 = vmatpush3.bf16.msra.mxu0 %v26380_v45  ;;  %15826 = vmatprep.subr.bf16.mxu1 %v26388_v47  ;;  %v2139_v45 = vld [vmem:[#allocation8 + $0x238] sm:$0xff]  ;;  %v19531_v47 = vpack.c.bf16 %v3225_v14, %v3222_v61  ;;  %26398 = vst [vmem:[#allocation71_spill] sm:$0xff] %v19534_v41  ;;  %v19547_v61 = vpack.c.bf16 %v3279_v35, %v3276_v39  ;;  %26407 = vst [vmem:[#allocation25_spill] sm:$0xff] %v19551_v10  ;;  %v2154_v41 = vld [vmem:[#allocation8 + $0x2b0] sm:$0xff]  ;;  %v2204_v3 = vand.u32 4294901760, %v2122_v52 }
 0x185   :  { %16018 = vmatprep.subr.bf16.mxu0 %v26392_v60  ;;  %26399 = vst [vmem:[#allocation75_spill] sm:$0xff] %v19536_v44  ;;  %v2255_v27 = vand.u32 4294901760, %v2139_v45  ;;  %26404 = vst [vmem:[#allocation34_spill] sm:$0xff] %v19545_v2  ;;  %v19553_v14 = vpack.c.bf16 %v2201_v54, %v2198_v34  ;;  %v3285_v44 = vand.u32 4294901760, %v2171_v29  ;;  %v2141_v39 = vld [vmem:[#allocation8 + $0x248] sm:$0xff]  ;;  %v19564_v46 = vpack.c.bf16 %v3231_v58, %v3228_v30  ;;  %v2124_v10 = vld [vmem:[#allocation8 + $0x1c0] sm:$0xff] }
 0x186   :  { %26396 = vst [vmem:[#allocation70_spill] sm:$0xff] %v19531_v47  ;;  %26405 = vst [vmem:[#allocation102_spill] sm:$0xff] %v19547_v61  ;;  %v19571_v51 = vsub.f32 %v2138_v33, %v2252_v20  ;;  %v3234_v54 = vand.u32 4294901760, %v2154_v41  ;;  %v2258_v30 = vand.u32 4294901760, %v2140_v22  ;;  %v2210_v25 = vand.u32 4294901760, %v2124_v10 }
 0x187   :  { %15828 = vmatpush3.bf16.msra.mxu1 %v26397_v57  ;;  %v2123_v57 = vld [vmem:[#allocation8 + $0x1b8] sm:$0xff]  ;;  %26408 = vst [vmem:[#allocation26_spill] sm:$0xff] %v19553_v14  ;;  %26411 = vst [vmem:[#allocation28_spill] sm:$0xff] %v19560_v50  ;;  %v19568_v35 = vpack.c.bf16 %v2255_v27, %v2252_v20  ;;  %v19573_v28 = vsub.f32 %v2139_v45, %v2255_v27  ;;  %v3237_v50 = vand.u32 4294901760, %v2155_v40 }
 0x188   :  { %16020 = vmatpush3.bf16.msra.mxu0 %v26392_v60  ;;  %15830 = vmatprep.subr.bf16.mxu1 %v26402_v43  ;;  %v19555_v60 = vsub.f32 %v2120_v53, %v2198_v34  ;;  %v3282_v43 = vand.u32 4294901760, %v2170_v9  ;;  %v2207_v2 = vand.u32 4294901760, %v2123_v57  ;;  %26412 = vst [vmem:[#allocation29_spill] sm:$0xff] %v19564_v46  ;;  %v19566_v53 = vsub.f32 %v2153_v0, %v3231_v58  ;;  %v2172_v34 = vld [vmem:[#allocation8 + $0x340] sm:$0xff] }
 0x189   :  { %16022 = vmatprep.subr.bf16.mxu0 %v26403_v36  ;;  %26414 = vst [vmem:[#allocation31_spill] sm:$0xff] %v19568_v35  ;;  %v19588_v20 = vsub.f32 %v2171_v29, %v3285_v44  ;;  %v3288_v33 = vand.u32 4294901760, %v2172_v34  ;;  %v2143_v29 = vld [vmem:[#allocation8 + $0x258] sm:$0xff]  ;;  %v19607_v42 = vpack.c.bf16 %v3237_v50, %v3234_v54 }
 0x18a   :  { %26409 = vst [vmem:[#allocation27_spill] sm:$0xff] %v19555_v60  ;;  %26413 = vst [vmem:[#allocation30_spill] sm:$0xff] %v19566_v53  ;;  %v19578_v0 = vpack.c.bf16 %v3285_v44, %v3282_v43  ;;  %v19580_v58 = vsub.f32 %v2170_v9, %v3282_v43  ;;  %v19590_v27 = vpack.c.bf16 %v2207_v2, %v2204_v3  ;;  %v2142_v44 = vld [vmem:[#allocation8 + $0x250] sm:$0xff] }
 0x18b   :  { %15832 = vmatpush3.bf16.msra.mxu1 %v26410_v18  ;;  %v2173_v18 = vld [vmem:[#allocation8 + $0x348] sm:$0xff]  ;;  %26417 = vst [vmem:[#allocation36_spill] sm:$0xff] %v19588_v20  ;;  %v19596_v9 = vsub.f32 %v2122_v52, %v2204_v3  ;;  %v19598_v43 = vsub.f32 %v2123_v57, %v2207_v2  ;;  %v26420_v20 = vsub.f32 %v19432_v37, %v19451_v5  ;;  %26422 = vst [vmem:[#allocation47_spill] sm:$0xff] %v19607_v42 }
 0x18c   :  { %16024 = vmatpush3.bf16.msra.mxu0 %v26403_v36  ;;  %16026 = vmatprep.subr.bf16.mxu1 %v19479_v12  ;;  %v2125_v36 = vld [vmem:[#allocation8 + $0x1c8] sm:$0xff]  ;;  %26415 = vst [vmem:[#allocation32_spill] sm:$0xff] %v19578_v0  ;;  %26416 = vst [vmem:[#allocation35_spill] sm:$0xff] %v19580_v58  ;;  %v2261_v12 = vand.u32 4294901760, %v2141_v39  ;;  %v3291_v45 = vand.u32 4294901760, %v2173_v18  ;;  %v19611_v52 = vsub.f32 %v2155_v40, %v3237_v50  ;;  %v3243_v5 = vand.u32 4294901760, %v2157_v1 }
 0x18d   :  { %16218 = vmatprep.subr.bf16.mxu0 %v19483_v16  ;;  %26418 = vst [vmem:[#allocation40_spill] sm:$0xff] %v19590_v27  ;;  %v2156_v16 = vld [vmem:[#allocation8 + $0x2c0] sm:$0xff]  ;;  %26419 = vst [vmem:[#allocation42_spill] sm:$0xff] %v19598_v43  ;;  %v2213_v19 = vand.u32 4294901760, %v2125_v36  ;;  %v19605_v58 = vand.u32 4294901760, %v26420_v20  ;;  %v19619_v2 = vsub.f32 %v2140_v22, %v2258_v30  ;;  %v2174_v20 = vld [vmem:[#allocation8 + $0x350] sm:$0xff] }
 0x18e   :  { %12034 = vmatmul.mubr.msk.f32.vlgmr.msra.gmra.mrb[40].mxu1 %vm18885_vm3, %v26295_v62  ;;  %26424 = vst [vmem:[#allocation51_spill] sm:$0xff] %v19611_v52  ;;  %v19617_v57 = vpack.c.bf16 %v2261_v12, %v2258_v30  ;;  %v3240_v3 = vand.u32 4294901760, %v2156_v16  ;;  %v19629_v40 = vpack.c.bf16 %v3291_v45, %v3288_v33  ;;  %v2264_v50 = vand.u32 4294901760, %v2142_v44  ;;  %v2126_v22 = vld [vmem:[#allocation8 + $0x1d0] sm:$0xff]  ;;  %v2127_v30 = vld [vmem:[#allocation8 + $0x1d8] sm:$0xff] }
 0x18f   :  { %14706 = vmatmul.mubr.msk.f32.vlgmr.msra.gmra.mrb[0].mxu0 %vm18880_vm2, %v26295_v62  ;;  %12035 = vmatprep.mubr.msk.f32.mxu1 %vm18915_vm5, %v26295_v62  ;;  %26421 = vst [vmem:[#allocation44_spill] sm:$0xff] %v19605_v58  ;;  %26426 = vst [vmem:[#allocation123_spill] sm:$0xff] %v19619_v2  ;;  %v19635_v15 = vsub.f32 %v2173_v18, %v3291_v45  ;;  %v3294_v63 = vand.u32 4294901760, %v2174_v20 }
 0x190   :  { %14708 = vmatprep.mubr.msk.f32.mxu0 %vm19035_vm11, %v26295_v62  ;;  %16028 = vmatpush3.bf16.msra.mxu1 %v19485_v11  ;;  %v19609_v11 = vsub.f32 %v2154_v41, %v3234_v54  ;;  %26425 = vst [vmem:[#allocation122_spill] sm:$0xff] %v19617_v57  ;;  %v19627_v41 = vsub.f32 %v2141_v39, %v2261_v12  ;;  %26427 = vst [vmem:[#allocation124_spill] sm:$0xff] %v19629_v40  ;;  %v2267_v54 = vand.u32 4294901760, %v2143_v29 }
 0x191   :  { %16220 = vmatpush3.bf16.msra.mxu0 %v19503_v21  ;;  %16030 = vmatprep.subr.bf16.mxu1 %v19509_v56  ;;  %v2175_v21 = vld [vmem:[#allocation8 + $0x358] sm:$0xff]  ;;  %26429 = vst [vmem:[#allocation126_spill] sm:$0xff] %v19635_v15  ;;  %v19637_v56 = vpack.c.bf16 %v2213_v19, %v2210_v25  ;;  %v19641_v12 = vsub.f32 %v2124_v10, %v2210_v25  ;;  %v2216_v25 = vand.u32 4294901760, %v2126_v22  ;;  %v2219_v10 = vand.u32 4294901760, %v2127_v30 }
 0x192   :  { %26423 = vst [vmem:[#allocation49_spill] sm:$0xff] %v19609_v11  ;;  %12036 = vmatmul.mubr.msk.f32.gmra.mrb[42].mxu1 %vm18910_vm4, %v26295_v62  ;;  %16222 = vmatprep.subr.bf16.mxu0 %v19518_v17  ;;  %v19633_v17 = vsub.f32 %v2172_v34, %v3288_v33  ;;  %v19643_v39 = vsub.f32 %v2125_v36, %v2213_v19  ;;  %v3297_v37 = vand.u32 4294901760, %v2175_v21  ;;  %v2145_v34 = vld [vmem:[#allocation8 + $0x268] sm:$0xff] }
 0x193   :  { %14709 = vmatmul.mubr.msk.f32.gmra.mrb[2].mxu0 %vm19030_vm10, %v26295_v62  ;;  %12037 = vmatprep.mubr.msk.f32.mxu1 %vm18957_vm7, %v26295_v62  ;;  %26430 = vst [vmem:[#allocation127_spill] sm:$0xff] %v19637_v56  ;;  %26431 = vst [vmem:[#allocation128_spill] sm:$0xff] %v19641_v12  ;;  %v19651_v18 = vpack.c.bf16 %v3243_v5, %v3240_v3  ;;  %v19653_v33 = vsub.f32 %v2156_v16, %v3240_v3  ;;  %v3246_v16 = vand.u32 4294901760, %v2158_v38 }
 0x194   :  { %16032 = vmatpush3.bf16.msra.mxu1 %v19525_v55  ;;  %3316 = vmatprep.mubr.f32.mxu0 %v19605_v58  ;;  %26428 = vst [vmem:[#allocation125_spill] sm:$0xff] %v19633_v17  ;;  %26432 = vst [vmem:[#allocation129_spill] sm:$0xff] %v19643_v39  ;;  %v19645_v55 = vld [vmem:[#allocation8 + $0x2d8] sm:$0xff]  ;;  %v2144_v58 = vld [vmem:[#allocation8 + $0x260] sm:$0xff]  ;;  %v19658_v19 = vsub.f32 %v2157_v1, %v3243_v5  ;;  %v19660_v36 = vpack.c.bf16 %v2267_v54, %v2264_v50  ;;  %v2273_v8 = vand.u32 4294901760, %v2145_v34 }
 0x195   :  { %16224 = vmatpush3.bf16.msra.mxu0 %v19531_v47  ;;  %16034 = vmatprep.subr.bf16.mxu1 %v19538_v59  ;;  %26433 = vst [vmem:[#allocation130_spill] sm:$0xff] %v19651_v18  ;;  %26434 = vst [vmem:[#allocation131_spill] sm:$0xff] %v19653_v33  ;;  %v19662_v45 = vsub.f32 %v2142_v44, %v2264_v50  ;;  %v19664_v47 = vsub.f32 %v2143_v29, %v2267_v54  ;;  %v19666_v59 = vld [vmem:[#allocation8 + $0x360] sm:$0xff]  ;;  %v2270_v13 = vand.u32 4294901760, %v2144_v58  ;;  %v2129_v1 = vld [vmem:[#allocation8 + $0x1e8] sm:$0xff] }
 0x196   :  { %12038 = vmatmul.mubr.msk.f32.gmra.mrb[44].mxu1 %vm18952_vm6, %v26295_v62  ;;  %16226 = vmatprep.subr.bf16.mxu0 %v19547_v61  ;;  %26435 = vst [vmem:[#allocation132_spill] sm:$0xff] %v19658_v19  ;;  %26436 = vst [vmem:[#allocation133_spill] sm:$0xff] %v19660_v36  ;;  %v19668_v61 = vld [vmem:[#allocation8 + $0x368] sm:$0xff]  ;;  %v2128_v33 = vld [vmem:[#allocation8 + $0x1e0] sm:$0xff]  ;;  %v19674_v5 = vpack.c.bf16 %v3297_v37, %v3294_v63  ;;  %v19676_v44 = vsub.f32 %v2174_v20, %v3294_v63 }
 0x197   :  { %12039 = vmatprep.mubr.msk.f32.mxu1 %vm18995_vm9, %v26295_v62  ;;  %26437 = vst [vmem:[#allocation134_spill] sm:$0xff] %v19662_v45  ;;  %26438 = vst [vmem:[#allocation135_spill] sm:$0xff] %v19664_v47  ;;  %v19678_v29 = vsub.f32 %v2175_v21, %v3297_v37  ;;  %v19680_v50 = vld [vmem:[#allocation8 + $0x2e0] sm:$0xff]  ;;  %v19682_v54 = vld [vmem:[#allocation8 + $0x2e8] sm:$0xff]  ;;  %v26445_v3 = vsub.f32 %v19434_v26, %v19454_v32  ;;  %v19695_v63 = vsub.f32 %v2126_v22, %v2216_v25 }
 0x198   :  { %26439 = vst [vmem:[#allocation136_spill] sm:$0xff] %v19668_v61  ;;  %16036 = vmatpush3.bf16.msra.mxu1 %v19553_v14  ;;  %26440 = vst [vmem:[#allocation137_spill] sm:$0xff] %v19674_v5  ;;  %v26449_v20 = vld [vmem:[#allocation96_spill] sm:$0xff]  ;;  %v2222_v32 = vand.u32 4294901760, %v2128_v33  ;;  %v2225_v26 = vand.u32 4294901760, %v2129_v1  ;;  %v26459_v37 = vand.u32 4294901760, %v19666_v59 }
 0x199   :  { %16228 = vmatpush3.bf16.msra.mxu0 %v19564_v46  ;;  %16038 = vmatprep.subr.bf16.mxu1 %v19568_v35  ;;  %26441 = vst [vmem:[#allocation138_spill] sm:$0xff] %v19676_v44  ;;  %26442 = vst [vmem:[#allocation139_spill] sm:$0xff] %v19678_v29  ;;  %v19687_v14 = vand.u32 4294901760, %v26445_v3  ;;  %v19693_v46 = vpack.c.bf16 %v2219_v10, %v2216_v25  ;;  %v19700_v35 = vsub.f32 %v2127_v30, %v2219_v10  ;;  %v2147_v29 = vld [vmem:[#allocation8 + $0x278] sm:$0xff]  ;;  %v19713_v30 = vld [vmem:[#allocation8 + $0x370] sm:$0xff] }
 0x19a   :  { %26443 = vst [vmem:[#allocation140_spill] sm:$0xff] %v19680_v50  ;;  %26444 = vst [vmem:[#allocation141_spill] sm:$0xff] %v19682_v54  ;;  %12040 = vmatmul.mubr.msk.f32.gmra.mrb[46].mxu1 %vm18990_vm8, %v26295_v62  ;;  %16230 = vmatprep.subr.bf16.mxu0 %v19578_v0  ;;  %v19702_v3 = vsub.f32 %v2158_v38, %v3246_v16  ;;  %v26452_v0 = vand.u32 4294901760, %v19645_v55  ;;  %v19709_v25 = vpack.c.bf16 %v2273_v8, %v2270_v13  ;;  %v19715_v38 = vld [vmem:[#allocation8 + $0x378] sm:$0xff]  ;;  %v19747_v44 = vld [vmem:[#allocation8 + $0x2f0] sm:$0xff] }
 0x19b   :  { %26446 = vst [vmem:[#allocation142_spill] sm:$0xff] %v19687_v14  ;;  %26447 = vst [vmem:[#allocation143_spill] sm:$0xff] %v19693_v46  ;;  %2286 = vmatprep.mubr.f32.mxu1 %v26449_v20  ;;  %v19719_v10 = vsub.f32 %v2144_v58, %v2270_v13  ;;  %v19721_v20 = vsub.f32 %v2145_v34, %v2273_v8  ;;  %v26460_v21 = vand.u32 4294901760, %v19668_v61  ;;  %v2279_v13 = vand.u32 4294901760, %v2147_v29 }
 0x19c   :  { %26448 = vst [vmem:[#allocation144_spill] sm:$0xff] %v19695_v63  ;;  %26450 = vst [vmem:[#allocation145_spill] sm:$0xff] %v19700_v35  ;;  %16040 = vmatpush3.bf16.msra.mxu1 %v19590_v27  ;;  %v19707_v22 = vpack.c.bf16 %v26452_v0, %v3246_v16  ;;  %v2130_v0 = vld [vmem:[#allocation8 + $0x1f0] sm:$0xff]  ;;  %v19734_v58 = vpack.c.bf16 %v2225_v26, %v2222_v32  ;;  %v19736_v8 = vsub.f32 %v2129_v1, %v2225_v26  ;;  %v2131_v16 = vld [vmem:[#allocation8 + $0x1f8] sm:$0xff] }
 0x19d   :  { %26451 = vst [vmem:[#allocation146_spill] sm:$0xff] %v19702_v3  ;;  %26454 = vst [vmem:[#allocation148_spill] sm:$0xff] %v19709_v25  ;;  %16232 = vmatpush3.bf16.msra.mxu0 %v19607_v42  ;;  %16042 = vmatprep.subr.bf16.mxu1 %v19617_v57  ;;  %v19730_v3 = vpack.c.bf16 %v26460_v21, %v26459_v37  ;;  %v19732_v42 = vsub.f32 %v2128_v33, %v2222_v32  ;;  %v2276_v57 = vand.u32 4294901760, %v2146_v49  ;;  %v19749_v32 = vld [vmem:[#allocation8 + $0x2f8] sm:$0xff] }
 0x19e   :  { %26453 = vst [vmem:[#allocation147_spill] sm:$0xff] %v19707_v22  ;;  %26455 = vst [vmem:[#allocation149_spill] sm:$0xff] %v19713_v30  ;;  %16234 = vmatprep.subr.bf16.mxu0 %v19629_v40  ;;  %v26465_v40 = vand.u32 4294901760, %v19680_v50  ;;  %v26466_v37 = vand.u32 4294901760, %v19682_v54  ;;  %v2228_v33 = vand.u32 4294901760, %v2130_v0  ;;  %v26468_v27 = vand.u32 4294901760, %v19488_v31 }
 0x19f   :  { %26456 = vst [vmem:[#allocation150_spill] sm:$0xff] %v19715_v38  ;;  %26457 = vst [vmem:[#allocation151_spill] sm:$0xff] %v19719_v10  ;;  %v26470_v54 = vld [vmem:[#allocation54_spill] sm:$0xff]  ;;  %v19764_v26 = vpack.c.bf16 %v2279_v13, %v2276_v57  ;;  %v19766_v1 = vsub.f32 %v2146_v49, %v2276_v57  ;;  %v26474_v61 = vand.u32 4294901760, %v19713_v30  ;;  %v26478_v49 = vand.u32 4294901760, %v19498_v24 }
 0x1a0   :  { %26458 = vst [vmem:[#allocation152_spill] sm:$0xff] %v19721_v20  ;;  %26461 = vst [vmem:[#allocation153_spill] sm:$0xff] %v19730_v3  ;;  %16044 = vmatpush3.bf16.msra.mxu1 %v19637_v56  ;;  %v19745_v21 = vpack.c.bf16 %v26466_v37, %v26465_v40  ;;  %v2458_v34 = vsub.f32 %v19488_v31, %v26468_v27  ;;  %v26469_v40 = vand.u32 4294901760, %v19490_v48  ;;  %v26475_v27 = vand.u32 4294901760, %v19715_v38 }
 0x1a1   :  { %26462 = vst [vmem:[#allocation154_spill] sm:$0xff] %v19732_v42  ;;  %26463 = vst [vmem:[#allocation155_spill] sm:$0xff] %v19734_v58  ;;  %16236 = vmatpush3.bf16.msra.mxu0 %v19651_v18  ;;  %16046 = vmatprep.subr.bf16.mxu1 %v19660_v36  ;;  %v19768_v18 = vsub.f32 %v2147_v29, %v2279_v13  ;;  %v2231_v36 = vand.u32 4294901760, %v2131_v16  ;;  %v2346_v57 = vsub.f32 %v19498_v24, %v26478_v49 }
 0x1a2   :  { %26464 = vst [vmem:[#allocation156_spill] sm:$0xff] %v19736_v8  ;;  %26467 = vst [vmem:[#allocation157_spill] sm:$0xff] %v19745_v21  ;;  %v2465_v37 = vsub.f32 %v19490_v48, %v26469_v40  ;;  %16238 = vmatprep.subr.bf16.mxu0 %v19674_v5  ;;  %v19774_v31 = vpack.c.bf16 %v26475_v27, %v26474_v61  ;;  %v19776_v40 = vsub.f32 %v2130_v0, %v2228_v33  ;;  %v26480_v5 = vld [vmem:[#allocation65_spill] sm:$0xff]  ;;  %v26481_v61 = vld [vmem:[#allocation66_spill] sm:$0xff] }
 0x1a3   :  { %26471 = vst [vmem:[#allocation158_spill] sm:$0xff] %v19764_v26  ;;  %26472 = vst [vmem:[#allocation159_spill] sm:$0xff] %v19766_v1  ;;  %v26479_v29 = vand.u32 4294901760, %v19500_v4  ;;  %v2459_v0 = vand.u32 4294901760, %v2458_v34  ;;  %v26482_v56 = vand.u32 4294901760, %v19512_v23  ;;  %v26483_v49 = vand.u32 4294901760, %v26470_v54 }
 0x1a4   :  { %26473 = vst [vmem:[#allocation160_spill] sm:$0xff] %v19768_v18  ;;  %26476 = vst [vmem:[#allocation161_spill] sm:$0xff] %v19774_v31  ;;  %16048 = vmatpush3.bf16.msra.mxu1 %v19693_v46  ;;  %v2466_v50 = vand.u32 4294901760, %v2465_v37  ;;  %v19800_v48 = vsub.f32 %v2131_v16, %v2231_v36  ;;  %v26486_v27 = vld [vmem:[#allocation33_spill] sm:$0xff]  ;;  %v26488_v34 = vand.u32 4294901760, %v19747_v44  ;;  %v26489_v37 = vand.u32 4294901760, %v19749_v32 }
 0x1a5   :  { %26477 = vst [vmem:[#allocation162_spill] sm:$0xff] %v19776_v40  ;;  %v2353_v13 = vsub.f32 %v19500_v4, %v26479_v29  ;;  %16240 = vmatpush3.bf16.msra.mxu0 %v19707_v22  ;;  %16050 = vmatprep.subr.bf16.mxu1 %v19709_v25  ;;  %v2472_v46 = vsub.f32 %v19512_v23, %v26482_v56  ;;  %v26487_v4 = vld [vmem:[#allocation34_spill] sm:$0xff]  ;;  %v26491_v56 = vld [vmem:[#allocation52_spill] sm:$0xff]  ;;  %v26493_v22 = vand.u32 4294901760, %v26480_v5 }
 0x1a6   :  { %v2479_v24 = vsub.f32 %v26470_v54, %v26483_v49  ;;  %16242 = vmatprep.subr.bf16.mxu0 %v19730_v3  ;;  %v19798_v29 = vpack.c.bf16 %v2231_v36, %v2228_v33  ;;  %26485 = vst [vmem:[#allocation164_spill] sm:$0xff] %v19800_v48  ;;  %v19808_v38 = vpack.c.bf16 %v26489_v37, %v26488_v34  ;;  %v26492_v23 = vld [vmem:[#allocation16_spill] sm:$0xff]  ;;  %v2347_v36 = vand.u32 4294901760, %v2346_v57  ;;  %v26495_v49 = vld [vmem:[#allocation21_spill] sm:$0xff]  ;;  %v26496_v54 = vld [vmem:[#allocation22_spill] sm:$0xff] }
 0x1a7   :  { %v16281_v30 = vpack.c.bf16 %v26492_v23, %v26491_v56  ;;  %v2354_v16 = vand.u32 4294901760, %v2353_v13  ;;  %v2360_v25 = vsub.f32 %v26480_v5, %v26493_v22  ;;  %v26494_v3 = vand.u32 4294901760, %v26481_v61  ;;  %v26501_v5 = vld [vmem:[#allocation71_spill] sm:$0xff] }
 0x1a8   :  { %26484 = vst [vmem:[#allocation163_spill] sm:$0xff] %v19798_v29  ;;  %26490 = vst [vmem:[#allocation165_spill] sm:$0xff] %v19808_v38  ;;  %16052 = vmatpush3.bf16.msra.mxu1 %v19734_v58  ;;  %v16057_v37 = vpack.c.bf16 %v2466_v50, %v2459_v0  ;;  %v16283_v33 = vpack.c.bf16 %v26496_v54, %v26495_v49  ;;  %v2473_v23 = vand.u32 4294901760, %v2472_v46  ;;  %v2480_v58 = vand.u32 4294901760, %v2479_v24  ;;  %v26499_v50 = vld [vmem:[#allocation56_spill] sm:$0xff]  ;;  %v26502_v46 = vld [vmem:[#allocation75_spill] sm:$0xff] }
 0x1a9   :  { %v2367_v34 = vsub.f32 %v26481_v61, %v26494_v3  ;;  %16244 = vmatpush3.bf16.msra.mxu0 %v19745_v21  ;;  %16054 = vmatprep.subr.bf16.mxu1 %v19764_v26  ;;  %v26497_v57 = vand.u32 4294901760, %v26486_v27  ;;  %v26498_v13 = vand.u32 4294901760, %v26487_v4  ;;  %v26500_v0 = vld [vmem:[#allocation60_spill] sm:$0xff]  ;;  %v16287_v24 = vpack.c.bf16 %v26502_v46, %v26501_v5 }
 0x1aa   :  { %16246 = vmatprep.subr.bf16.mxu0 %v19774_v31  ;;  %v16285_v61 = vpack.c.bf16 %v26500_v0, %v26499_v50  ;;  %v26503_v31 = vand.u32 4294901760, %v19555_v60  ;;  %v2361_v21 = vand.u32 4294901760, %v2360_v25  ;;  %v25427_v26 = vand.u32 4294901760, %v19596_v9 }
 0x1ab   :  { %v2486_v22 = vsub.f32 %v26486_v27, %v26497_v57  ;;  %v2493_v3 = vsub.f32 %v26487_v4, %v26498_v13  ;;  %v26504_v57 = vand.u32 4294901760, %v19558_v7  ;;  %v16059_v13 = vpack.c.bf16 %v2354_v16, %v2347_v36 }
 0x1ac   :  { %v2374_v54 = vsub.f32 %v19555_v60, %v26503_v31  ;;  %16056 = vmatpush3.bf16.msra.mxu1 %v19798_v29  ;;  %v2368_v4 = vand.u32 4294901760, %v2367_v34  ;;  %v16061_v0 = vpack.c.bf16 %v2480_v58, %v2473_v23  ;;  %v25431_v46 = vand.u32 4294901760, %v19598_v43  ;;  %v26507_v34 = vld [vmem:[#allocation107_spill] sm:$0xff]  ;;  %v26508_v31 = vld [vmem:[#allocation97_spill] sm:$0xff] }
 0x1ad   :  { %v2381_v27 = vsub.f32 %v19558_v7, %v26504_v57  ;;  %16248 = vmatpush3.bf16.msra.mxu0 %v19808_v38  ;;  %16058 = vmatprep.subr.bf16.mxu1 %v16057_v37  ;;  %v2487_v60 = vand.u32 4294901760, %v2486_v22  ;;  %v2494_v57 = vand.u32 4294901760, %v2493_v3  ;;  %v26505_v29 = vand.u32 4294901760, %v19571_v51  ;;  %v26516_v38 = vld [vmem:[#allocation25_spill] sm:$0xff] }
 0x1ae   :  { %16282 = vmatprep.subr.bf16.mxu0 %v16281_v30  ;;  %v26506_v36 = vand.u32 4294901760, %v19573_v28  ;;  %v2375_v23 = vand.u32 4294901760, %v2374_v54  ;;  %v26509_v30 = vld [vmem:[#allocation111_spill] sm:$0xff]  ;;  %v16063_v22 = vpack.c.bf16 %v2368_v4, %v2361_v21  ;;  %v26510_v54 = vld [vmem:[#allocation81_spill] sm:$0xff]  ;;  %v2395_v4 = vsub.f32 %v19598_v43, %v25431_v46 }
 0x1af   :  { %v2500_v25 = vsub.f32 %v19571_v51, %v26505_v29  ;;  %2292 = vmatmul.mubr.f32.vlgmr.msra.gmra.mrb[48].mxu1 %v26507_v34  ;;  %v2382_v58 = vand.u32 4294901760, %v2381_v27  ;;  %v2388_v29 = vsub.f32 %v19596_v9, %v25427_v26  ;;  %v26511_v27 = vld [vmem:[#allocation20_spill] sm:$0xff]  ;;  %v26514_v21 = vand.u32 4294901760, %v19619_v2  ;;  %v26519_v34 = vld [vmem:[#allocation45_spill] sm:$0xff] }
 0x1b0   :  { %v2507_v16 = vsub.f32 %v19573_v28, %v26506_v36  ;;  %3322 = vmatmul.mubr.f32.vlgmr.msra.gmra.mrb[4].mxu0 %v26508_v31  ;;  %2301 = vmatprep.mubr.f32.mxu1 %v26509_v30  ;;  %v26512_v37 = vsub.f32 %v26510_v54, %v26511_v27  ;;  %v26515_v3 = vand.u32 4294901760, %v19627_v41  ;;  %v16289_v27 = vpack.c.bf16 %v26516_v38, %v19549_v6  ;;  %v26517_v31 = vld [vmem:[#allocation112_spill] sm:$0xff]  ;;  %v26518_v30 = vld [vmem:[#allocation37_spill] sm:$0xff] }
 0x1b1   :  { %16060 = vmatpush3.bf16.msra.mxu1 %v16059_v13  ;;  %3331 = vmatprep.mubr.f32.mxu0 %v19687_v14  ;;  %v2514_v26 = vsub.f32 %v19619_v2, %v26514_v21  ;;  %v16065_v13 = vpack.c.bf16 %v2494_v57, %v2487_v60  ;;  %v16067_v46 = vpack.c.bf16 %v2382_v58, %v2375_v23  ;;  %v26522_v2 = vand.u32 4294901760, %v19641_v12  ;;  %v26524_v57 = vld [vmem:[#allocation108_spill] sm:$0xff]  ;;  %v26529_v58 = vld [vmem:[#allocation67_spill] sm:$0xff] }
 0x1b2   :  { %v19870_v5 = vand.u32 4294901760, %v26512_v37  ;;  %v2521_v36 = vsub.f32 %v19627_v41, %v26515_v3  ;;  %16284 = vmatpush3.bf16.msra.mxu0 %v16283_v33  ;;  %16062 = vmatprep.subr.bf16.mxu1 %v16061_v0  ;;  %v2501_v37 = vand.u32 4294901760, %v2500_v25  ;;  %v2508_v14 = vand.u32 4294901760, %v2507_v16  ;;  %v26525_v25 = vld [vmem:[#allocation64_spill] sm:$0xff] }
 0x1b3   :  { %2307 = vmatmul.mubr.f32.gmra.mrb[50].mxu1 %v26517_v31  ;;  %16286 = vmatprep.subr.bf16.mxu0 %v16285_v61  ;;  %v26520_v43 = vsub.f32 %v26518_v30, %v26519_v34  ;;  %v2402_v33 = vsub.f32 %v19641_v12, %v26522_v2  ;;  %v26523_v60 = vand.u32 4294901760, %v19643_v39  ;;  %v26526_v61 = vand.u32 4294901760, %v19662_v45  ;;  %v26531_v2 = vld [vmem:[#allocation36_spill] sm:$0xff] }
 0x1b4   :  { %26513 = vst [vmem:[#allocation166_spill] sm:$0xff] %v19870_v5  ;;  %3337 = vmatmul.mubr.f32.gmra.mrb[6].mxu0 %v26524_v57  ;;  %2316 = vmatprep.mubr.f32.mxu1 %v26525_v25  ;;  %v26527_v23 = vand.u32 4294901760, %v19664_v47  ;;  %v2389_v3 = vand.u32 4294901760, %v2388_v29  ;;  %v2515_v34 = vand.u32 4294901760, %v2514_v26  ;;  %v2522_v57 = vand.u32 4294901760, %v2521_v36  ;;  %v26528_v25 = vld [vmem:[#allocation28_spill] sm:$0xff] }
 0x1b5   :  { %v19887_v21 = vand.u32 4294901760, %v26520_v43  ;;  %v2409_v0 = vsub.f32 %v19643_v39, %v26523_v60  ;;  %v2528_v16 = vsub.f32 %v19662_v45, %v26526_v61  ;;  %16064 = vmatpush3.bf16.msra.mxu1 %v16063_v22  ;;  %3346 = vmatprep.mubr.f32.mxu0 %v19870_v5  ;;  %v2396_v60 = vand.u32 4294901760, %v2395_v4  ;;  %v26530_v22 = vld [vmem:[#allocation35_spill] sm:$0xff]  ;;  %v26532_v36 = vld [vmem:[#allocation73_spill] sm:$0xff]  ;;  %v26533_v4 = vld [vmem:[#allocation68_spill] sm:$0xff] }
 0x1b6   :  { %v2535_v43 = vsub.f32 %v19664_v47, %v26527_v23  ;;  %16288 = vmatpush3.bf16.msra.mxu0 %v16287_v24  ;;  %16066 = vmatprep.subr.bf16.mxu1 %v16065_v13  ;;  %v16291_v61 = vpack.c.bf16 %v19566_v53, %v26528_v25  ;;  %v16069_v31 = vpack.c.bf16 %v2508_v14, %v2501_v37  ;;  %v2403_v29 = vand.u32 4294901760, %v2402_v33 }
 0x1b7   :  { %26521 = vst [vmem:[#allocation167_spill] sm:$0xff] %v19887_v21  ;;  %2322 = vmatmul.mubr.f32.gmra.mrb[52].mxu1 %v26529_v58  ;;  %16290 = vmatprep.subr.bf16.mxu0 %v16289_v27  ;;  %v16293_v5 = vpack.c.bf16 %v26531_v2, %v26530_v22  ;;  %v16295_v26 = vpack.c.bf16 %v19611_v52, %v19609_v11  ;;  %v2410_v24 = vand.u32 4294901760, %v2409_v0  ;;  %v2529_v14 = vand.u32 4294901760, %v2528_v16 }
 0x1b8   :  { %3352 = vmatmul.mubr.f32.gmra.mrb[8].mxu0 %v26532_v36  ;;  %2331 = vmatprep.mubr.f32.mxu1 %v26533_v4  ;;  %v2536_v13 = vand.u32 4294901760, %v2535_v43  ;;  %v26534_v37 = vand.u32 4294901760, %v19695_v63  ;;  %v26535_v27 = vand.u32 4294901760, %v19700_v35  ;;  %v16071_v58 = vpack.c.bf16 %v2396_v60, %v2389_v3  ;;  %v26540_v3 = vld [vmem:[#allocation69_spill] sm:$0xff]  ;;  %v26541_v60 = vld [vmem:[#allocation131_spill] sm:$0xff] }
 0x1b9   :  { %16068 = vmatpush3.bf16.msra.mxu1 %v16067_v46  ;;  %3361 = vmatprep.mubr.f32.mxu0 %v19887_v21  ;;  %v16073_v33 = vpack.c.bf16 %v2522_v57, %v2515_v34  ;;  %v25440_v0 = vand.u32 4294901760, %v19732_v42  ;;  %v26536_v16 = vand.u32 4294901760, %v19719_v10  ;;  %v26538_v34 = vand.u32 4294901760, %v19645_v55 }
 0x1ba   :  { %v2416_v23 = vsub.f32 %v19695_v63, %v26534_v37  ;;  %v2423_v45 = vsub.f32 %v19700_v35, %v26535_v27  ;;  %16292 = vmatpush3.bf16.msra.mxu0 %v16291_v61  ;;  %16070 = vmatprep.subr.bf16.mxu1 %v16069_v31  ;;  %v26537_v37 = vand.u32 4294901760, %v19721_v20  ;;  %v16297_v31 = vpack.c.bf16 %v19635_v15, %v19633_v17 }
 0x1bb   :  { %v2542_v43 = vsub.f32 %v19719_v10, %v26536_v16  ;;  %v19937_v57 = vsub.f32 %v19645_v55, %v26538_v34  ;;  %2337 = vmatmul.mubr.f32.gmra.mrb[54].mxu1 %v26540_v3  ;;  %16294 = vmatprep.subr.bf16.mxu0 %v16293_v5  ;;  %v16299_v61 = vpack.c.bf16 %v19658_v19, %v26541_v60  ;;  %v26542_v16 = vld [vmem:[#allocation72_spill] sm:$0xff]  ;;  %v26545_v21 = vand.u32 4294901760, %v19736_v8 }
 0x1bc   :  { %v2549_v4 = vsub.f32 %v19721_v20, %v26537_v37  ;;  %3367 = vmatmul.mubr.f32.gmra.mrb[10].mxu0 %v26542_v16  ;;  %12054 = vmatprep.mubr.msk.f32.mxu1 %vm18865_vm1, %v26295_v62  ;;  %v16075_v27 = vpack.c.bf16 %v2410_v24, %v2403_v29  ;;  %v16077_v46 = vpack.c.bf16 %v2536_v13, %v2529_v14  ;;  %v2417_v36 = vand.u32 4294901760, %v2416_v23  ;;  %v26544_v34 = vld [vmem:[#allocation80_spill] sm:$0xff] }
 0x1bd   :  { %26539 = vst [vmem:[#allocation168_spill] sm:$0xff] %v19937_v57  ;;  %v2424_v55 = vand.u32 4294901760, %v2423_v45  ;;  %16072 = vmatpush3.bf16.msra.mxu1 %v16071_v58  ;;  %3755 = vmatprep.mubr.f32.mxu0 %v26544_v34  ;;  %v2430_v5 = vsub.f32 %v19732_v42, %v25440_v0  ;;  %v2437_v3 = vsub.f32 %v19736_v8, %v26545_v21  ;;  %v2543_v23 = vand.u32 4294901760, %v2542_v43  ;;  %v26550_v16 = vld [vmem:[#allocation136_spill] sm:$0xff] }
 0x1be   :  { %16296 = vmatpush3.bf16.msra.mxu0 %v16295_v26  ;;  %16074 = vmatprep.subr.bf16.mxu1 %v16073_v33  ;;  %v12199_v29 = vpop.f32.mrb[0].mxu1  ;;  %v2550_v45 = vand.u32 4294901760, %v2549_v4  ;;  %v26546_v58 = vand.u32 4294901760, %v19766_v1  ;;  %v26547_v14 = vand.u32 4294901760, %v19768_v18  ;;  %v26548_v0 = vand.u32 4294901760, %v19666_v59  ;;  %v26553_v4 = vld [vmem:[#allocation138_spill] sm:$0xff] }
 0x1bf   :  { %v26551_v37 = vand.u32 4294901760, %v26550_v16  ;;  %16298 = vmatprep.subr.bf16.mxu0 %v16297_v31  ;;  %v26554_v33 = vld [vmem:[#allocation139_spill] sm:$0xff]  ;;  %v12200_v34 = vpop.f32.mrb[1].mxu1  ;;  %v16079_v42 = vpack.c.bf16 %v2424_v55, %v2417_v36  ;;  %v2438_v31 = vand.u32 4294901760, %v2437_v3  ;;  %v26562_v10 = vand.u32 4294901760, %v19800_v48 }
 0x1c0   :  { %v2556_v24 = vsub.f32 %v19766_v1, %v26546_v58  ;;  %v2563_v13 = vsub.f32 %v19768_v18, %v26547_v14  ;;  %v19966_v21 = vsub.f32 %v19666_v59, %v26548_v0  ;;  %v16301_v43 = vpack.c.bf16 %v26554_v33, %v26553_v4  ;;  %v26555_v58 = vld [vmem:[#allocation140_spill] sm:$0xff]  ;;  %v26558_v14 = vld [vmem:[#allocation141_spill] sm:$0xff] }
 0x1c1   :  { %v19971_v26 = vsub.f32 %v26550_v16, %v26551_v37  ;;  %v26556_v1 = vand.u32 4294901760, %v26555_v58  ;;  %v26559_v18 = vand.u32 4294901760, %v26558_v14  ;;  %v19985_v0 = vadd.f32 %v12200_v34, %v12199_v29  ;;  %16076 = vmatpush3.bf16.msra.mxu1 %v16075_v27  ;;  %v26564_v27 = vld [vmem:[#allocation149_spill] sm:$0xff] }
 0x1c2   :  { %26549 = vst [vmem:[#allocation169_spill] sm:$0xff] %v19966_v21  ;;  %v2431_v16 = vand.u32 4294901760, %v2430_v5  ;;  %v26561_v37 = vand.u32 4294901760, %v19776_v40  ;;  %16300 = vmatpush3.bf16.msra.mxu0 %v16299_v61  ;;  %16078 = vmatprep.subr.bf16.mxu1 %v16077_v46  ;;  %v12202_v34 = vpop.f32.mrb[2].mxu1  ;;  %v2557_v29 = vand.u32 4294901760, %v2556_v24  ;;  %v2564_v36 = vand.u32 4294901760, %v2563_v13 }
 0x1c3   :  { %26552 = vst [vmem:[#allocation136_spill] sm:$0xff] %v19971_v26  ;;  %v19978_v8 = vsub.f32 %v26555_v58, %v26556_v1  ;;  %v19983_v59 = vsub.f32 %v26558_v14, %v26559_v18  ;;  %v2451_v1 = vsub.f32 %v19800_v48, %v26562_v10  ;;  %v26563_v58 = vld [vmem:[#allocation146_spill] sm:$0xff]  ;;  %v16081_v14 = vpack.c.bf16 %v2550_v45, %v2543_v23  ;;  %v12203_v46 = vpop.f32.mrb[3].mxu1 }
 0x1c4   :  { %v2444_v20 = vsub.f32 %v19776_v40, %v26561_v37  ;;  %v16303_v18 = vpack.c.bf16 %v19937_v57, %v26563_v58  ;;  %v26565_v55 = vand.u32 4294901760, %v26564_v27  ;;  %v26567_v5 = vld [vmem:[#allocation150_spill] sm:$0xff]  ;;  %16302 = vmatprep.subr.bf16.mxu0 %v16301_v43  ;;  %v16305_v10 = vpack.c.bf16 %v19971_v26, %v19966_v21 }
 0x1c5   :  { %26557 = vst [vmem:[#allocation140_spill] sm:$0xff] %v19978_v8  ;;  %26560 = vst [vmem:[#allocation141_spill] sm:$0xff] %v19983_v59  ;;  %v26568_v37 = vand.u32 4294901760, %v26567_v5  ;;  %v20007_v61 = vadd.f32 %v12203_v46, %v12202_v34  ;;  %v26570_v23 = vand.u32 4294901760, %v19747_v44  ;;  %16080 = vmatpush3.bf16.msra.mxu1 %v16079_v42  ;;  %v16083_v24 = vpack.c.bf16 %v2438_v31, %v2431_v16  ;;  %v26574_v16 = vld [vmem:[#allocation16_spill] sm:$0xff] }
 0x1c6   :  { %v19998_v3 = vsub.f32 %v26564_v27, %v26565_v55  ;;  %v2445_v13 = vand.u32 4294901760, %v2444_v20  ;;  %v2452_v27 = vand.u32 4294901760, %v2451_v1  ;;  %v26572_v55 = vand.u32 4294901760, %v19749_v32  ;;  %16304 = vmatpush3.bf16.msra.mxu0 %v16303_v18  ;;  %16082 = vmatprep.subr.bf16.mxu1 %v16081_v14  ;;  %v26575_v14 = vld [vmem:[#allocation82_spill] sm:$0xff] }
 0x1c7   :  { %v20003_v40 = vsub.f32 %v26567_v5, %v26568_v37  ;;  %v20012_v45 = vsub.f32 %v19747_v44, %v26570_v23  ;;  %v16307_v43 = vpack.c.bf16 %v19983_v59, %v19978_v8  ;;  %v16085_v34 = vpack.c.bf16 %v2564_v36, %v2557_v29  ;;  %16306 = vmatprep.subr.bf16.mxu0 %v16305_v10  ;;  %v26576_v29 = vld [vmem:[#allocation53_spill] sm:$0xff]  ;;  %v26577_v23 = vld [vmem:[#allocation22_spill] sm:$0xff] }
 0x1c8   :  { %26566 = vst [vmem:[#allocation149_spill] sm:$0xff] %v19998_v3  ;;  %v20017_v5 = vsub.f32 %v19749_v32, %v26572_v55  ;;  %v25457_v42 = vand.u32 4294901760, %v26491_v56  ;;  %v25456_v20 = vand.u32 4294901760, %v26574_v16  ;;  %v12205_v31 = vpop.f32.mrb[4].mxu1  ;;  %v16087_v1 = vpack.c.bf16 %v2452_v27, %v2445_v13  ;;  %v26578_v55 = vld [vmem:[#allocation60_spill] sm:$0xff]  ;;  %v26582_v16 = vld [vmem:[#allocation54_spill] sm:$0xff] }
 0x1c9   :  { %26569 = vst [vmem:[#allocation150_spill] sm:$0xff] %v20003_v40  ;;  %26571 = vst [vmem:[#allocation170_spill] sm:$0xff] %v20012_v45  ;;  %v16309_v44 = vpack.c.bf16 %v20003_v40, %v19998_v3  ;;  %16084 = vmatpush3.bf16.msra.mxu1 %v16083_v24  ;;  %v12206_v37 = vpop.f32.mrb[5].mxu1  ;;  %v16089_v36 = vpack.c.bf16 %v26576_v29, %v26575_v14  ;;  %v25460_v46 = vand.u32 4294901760, %v26495_v49  ;;  %v25459_v24 = vand.u32 4294901760, %v26577_v23  ;;  %v26583_v29 = vld [vmem:[#allocation71_spill] sm:$0xff] }
 0x1ca   :  { %26573 = vst [vmem:[#allocation171_spill] sm:$0xff] %v20017_v5  ;;  %16308 = vmatpush3.bf16.msra.mxu0 %v16307_v43  ;;  %16086 = vmatprep.subr.bf16.mxu1 %v16085_v34  ;;  %v16311_v32 = vpack.c.bf16 %v20017_v5, %v20012_v45  ;;  %v20027_v18 = vadd.f32 %v12206_v37, %v12205_v31  ;;  %v26579_v31 = vld [vmem:[#allocation17_spill] sm:$0xff]  ;;  %v26590_v14 = vld [vmem:[#allocation79_spill] sm:$0xff]  ;;  %v26592_v49 = vld [vmem:[#allocation66_spill] sm:$0xff] }
 0x1cb   :  { %16310 = vmatprep.subr.bf16.mxu0 %v16309_v44  ;;  %v16345_v10 = vpack.c.bf16 %v25456_v20, %v25457_v42  ;;  %v26580_v44 = vld [vmem:[#allocation18_spill] sm:$0xff]  ;;  %v16347_v20 = vpack.c.bf16 %v25459_v24, %v25460_v46  ;;  %v26588_v46 = vld [vmem:[#allocation87_spill] sm:$0xff]  ;;  %v26591_v43 = vld [vmem:[#allocation65_spill] sm:$0xff] }
 0x1cc   :  { %v12208_v13 = vpop.f32.mrb[6].mxu1  ;;  %v16091_v37 = vpack.c.bf16 %v26580_v44, %v26579_v31  ;;  %v26581_v42 = vld [vmem:[#allocation50_spill] sm:$0xff]  ;;  %v26595_v24 = vld [vmem:[#allocation33_spill] sm:$0xff]  ;;  %v26602_v23 = vld [vmem:[#allocation27_spill] sm:$0xff] }
 0x1cd   :  { %16088 = vmatpush3.bf16.msra.mxu1 %v16087_v1  ;;  %v12209_v34 = vpop.f32.mrb[7].mxu1  ;;  %v16093_v27 = vpack.c.bf16 %v26582_v16, %v26581_v42  ;;  %v26584_v1 = vld [vmem:[#allocation75_spill] sm:$0xff] }
 0x1ce   :  { %16312 = vmatpush3.bf16.msra.mxu0 %v16311_v32  ;;  %16090 = vmatprep.subr.bf16.mxu1 %v16089_v36  ;;  %v20041_v56 = vadd.f32 %v12209_v34, %v12208_v13  ;;  %v26586_v36 = vand.u32 4294901760, %v26499_v50  ;;  %v16095_v32 = vpack.c.bf16 %v26592_v49, %v26591_v43 }
 0x1cf   :  { %16346 = vmatprep.subr.bf16.mxu0 %v16345_v10  ;;  %v26587_v10 = vand.u32 4294901760, %v26578_v55  ;;  %v26596_v55 = vld [vmem:[#allocation34_spill] sm:$0xff] }
 0x1d0   :  { %12055 = vmatmul.mubr.msk.f32.vlgmr.msra.gmra.mrb[56].mxu1 %vm18885_vm3, %v26295_v62 }
 0x1d1   :  { %v16349_v13 = vpack.c.bf16 %v26587_v10, %v26586_v36  ;;  %3758 = vmatmul.mubr.f32.vlgmr.msra.gmra.mrb[12].mxu0 %v26588_v46  ;;  %12056 = vmatprep.mubr.msk.f32.mxu1 %vm18915_vm5, %v26295_v62  ;;  %v26593_v36 = vand.u32 4294901760, %v26583_v29  ;;  %v26594_v10 = vand.u32 4294901760, %v26584_v1  ;;  %v16097_v46 = vpack.c.bf16 %v26596_v55, %v26595_v24 }
 0x1d2   :  { %16092 = vmatpush3.bf16.msra.mxu1 %v16091_v37  ;;  %3764 = vmatprep.mubr.f32.mxu0 %v26590_v14  ;;  %v26655_v37 = vld [vmem:[#allocation101_spill] sm:$0xff] }
 0x1d3   :  { %16348 = vmatpush3.bf16.msra.mxu0 %v16347_v20  ;;  %16094 = vmatprep.subr.bf16.mxu1 %v16093_v27  ;;  %v16351_v34 = vpack.c.bf16 %v26594_v10, %v26593_v36  ;;  %v26598_v20 = vand.u32 4294901760, %v19549_v6  ;;  %v26599_v27 = vand.u32 4294901760, %v26516_v38  ;;  %v26600_v10 = vld [vmem:[#allocation93_spill] sm:$0xff]  ;;  %v16101_v36 = vpack.c.bf16 %v19573_v28, %v19571_v51 }
 0x1d4   :  { %12057 = vmatmul.mubr.msk.f32.gmra.mrb[58].mxu1 %vm18910_vm4, %v26295_v62  ;;  %16350 = vmatprep.subr.bf16.mxu0 %v16349_v13  ;;  %v16099_v13 = vpack.c.bf16 %v19558_v7, %v26602_v23  ;;  %v25490_v6 = vand.u32 4294901760, %v26563_v58  ;;  %v26630_v58 = vld [vmem:[#allocation156_spill] sm:$0xff] }
 0x1d5   :  { %v16353_v14 = vpack.c.bf16 %v26599_v27, %v26598_v20  ;;  %3767 = vmatmul.mubr.f32.gmra.mrb[14].mxu0 %v26600_v10  ;;  %12058 = vmatprep.mubr.msk.f32.mxu1 %vm18957_vm7, %v26295_v62  ;;  %v26603_v20 = vand.u32 4294901760, %v26528_v25  ;;  %v26604_v27 = vand.u32 4294901760, %v19566_v53 }
 0x1d6   :  { %16096 = vmatpush3.bf16.msra.mxu1 %v16095_v32  ;;  %3773 = vmatprep.mubr.f32.mxu0 %v26510_v54  ;;  %v26660_v32 = vld [vmem:[#allocation109_spill] sm:$0xff] }
 0x1d7   :  { %16352 = vmatpush3.bf16.msra.mxu0 %v16351_v34  ;;  %16098 = vmatprep.subr.bf16.mxu1 %v16097_v46  ;;  %v16355_v1 = vpack.c.bf16 %v26604_v27, %v26603_v20  ;;  %v26606_v34 = vand.u32 4294901760, %v26530_v22  ;;  %v26607_v46 = vand.u32 4294901760, %v26531_v2  ;;  %v26608_v27 = vld [vmem:[#allocation118_spill] sm:$0xff]  ;;  %v26612_v20 = vand.u32 4294901760, %v19611_v52 }
 0x1d8   :  { %12059 = vmatmul.mubr.msk.f32.gmra.mrb[60].mxu1 %vm18952_vm6, %v26295_v62  ;;  %16354 = vmatprep.subr.bf16.mxu0 %v16353_v14  ;;  %v26610_v14 = vld [vmem:[#allocation42_spill] sm:$0xff] }
 0x1d9   :  { %v16357_v54 = vpack.c.bf16 %v26607_v46, %v26606_v34  ;;  %3776 = vmatmul.mubr.f32.gmra.mrb[16].mxu0 %v26608_v27  ;;  %12060 = vmatprep.mubr.msk.f32.mxu1 %vm18995_vm9, %v26295_v62  ;;  %v16103_v38 = vpack.c.bf16 %v26610_v14, %v19596_v9  ;;  %v26611_v46 = vand.u32 4294901760, %v19609_v11  ;;  %v26613_v27 = vld [vmem:[#allocation123_spill] sm:$0xff]  ;;  %v20132_v22 = vld [vmem:[#allocation10] ss:$0 sm:$0xff] }
 0x1da   :  { %16100 = vmatpush3.bf16.msra.mxu1 %v16099_v13  ;;  %3782 = vmatprep.mubr.f32.mxu0 %v26518_v30  ;;  %v16105_v2 = vpack.c.bf16 %v19627_v41, %v26613_v27  ;;  %v16107_v30 = vpack.c.bf16 %v19643_v39, %v19641_v12  ;;  %v26624_v13 = vand.u32 4294901760, %v26554_v33  ;;  %v16111_v33 = vpack.c.bf16 %v19700_v35, %v19695_v63  ;;  %v20399_v39 = vld [vmem:[#allocation8 + $0x3e0] sm:$0xff]  ;;  %v26697_v63 = vld [vmem:[#allocation127_spill] sm:$0xff] }
 0x1db   :  { %16356 = vmatpush3.bf16.msra.mxu0 %v16355_v1  ;;  %16102 = vmatprep.subr.bf16.mxu1 %v16101_v36  ;;  %v16359_v53 = vpack.c.bf16 %v26612_v20, %v26611_v46  ;;  %v26615_v1 = vand.u32 4294901760, %v19633_v17  ;;  %v26616_v36 = vand.u32 4294901760, %v19635_v15  ;;  %v26617_v20 = vld [vmem:[#allocation119_spill] sm:$0xff]  ;;  %v26618_v46 = vld [vmem:[#allocation86_spill] sm:$0xff]  ;;  %v26621_v17 = vand.u32 4294901760, %v19658_v19 }
 0x1dc   :  { %12061 = vmatmul.mubr.msk.f32.gmra.mrb[62].mxu1 %vm18990_vm8, %v26295_v62  ;;  %16358 = vmatprep.subr.bf16.mxu0 %v16357_v54  ;;  %v26620_v54 = vand.u32 4294901760, %v26541_v60  ;;  %v397_v19 = vadd.f32 %v19985_v0, %v20132_v22  ;;  %v26625_v0 = vand.u32 4294901760, %v19937_v57  ;;  %v20177_v57 = vld [vmem:[#allocation8 + $0x400] sm:$0xff] }
 0x1dd   :  { %v16361_v34 = vpack.c.bf16 %v26616_v36, %v26615_v1  ;;  %3785 = vmatmul.mubr.f32.gmra.mrb[18].mxu0 %v26617_v20  ;;  %2725 = vmatprep.mubr.f32.mxu1 %v26618_v46  ;;  %v26622_v20 = vld [vmem:[#allocation134_spill] sm:$0xff] }
 0x1de   :  { %16104 = vmatpush3.bf16.msra.mxu1 %v16103_v38  ;;  %12086 = vmatprep.mubr.msk.f32.mxu0 %vm19378_vm13, %v26295_v62  ;;  %v16363_v15 = vpack.c.bf16 %v26621_v17, %v26620_v54  ;;  %v12243_v1 = vpop.f32.mrb[8].mxu1  ;;  %v16109_v52 = vpack.c.bf16 %v19664_v47, %v26622_v20  ;;  %v26623_v38 = vand.u32 4294901760, %v26553_v4  ;;  %v26631_v4 = vand.u32 4294901760, %v19978_v8  ;;  %v20203_v8 = vld [vmem:[#allocation8 + $0x388] sm:$0xff]  ;;  %v20408_v47 = vld [vmem:[#allocation8 + $0x478] sm:$0xff] }
 0x1df   :  { %16360 = vmatpush3.bf16.msra.mxu0 %v16359_v53  ;;  %16106 = vmatprep.subr.bf16.mxu1 %v16105_v2  ;;  %v12244_v36 = vpop.f32.mrb[9].mxu1  ;;  %v25493_v53 = vand.u32 4294901760, %v19966_v21  ;;  %v26635_v21 = vand.u32 4294901760, %v19998_v3  ;;  %26696 = vst [vmem:[#allocation173_spill] sm:$0xff] %v20408_v47 }
 0x1e0   :  { %v16365_v11 = vpack.c.bf16 %v26624_v13, %v26623_v38  ;;  %16362 = vmatprep.subr.bf16.mxu0 %v16361_v34  ;;  %v12245_v17 = vadd.f32 %v12244_v36, %v12243_v1  ;;  %v16367_v34 = vpack.c.bf16 %v26625_v0, %v25490_v6  ;;  %v26626_v36 = vld [vmem:[#allocation151_spill] sm:$0xff]  ;;  %v412_v38 = vadd.f32 %v20007_v61, %v20132_v22  ;;  %v20179_v0 = vld [vmem:[#allocation8 + $0x408] sm:$0xff] }
 0x1e1   :  { %v26640_v3 = vand.u32 4294901760, %v20179_v0 }
 0x1e2   :  { %16108 = vmatpush3.bf16.msra.mxu1 %v16107_v30  ;;  %v20157_v54 = vadd.f32 %v12245_v17, %v397_v19  ;;  %v12246_v13 = vpop.f32.mrb[10].mxu1  ;;  %v26627_v30 = vld [vmem:[#allocation152_spill] sm:$0xff]  ;;  %v26629_v17 = vld [vmem:[#allocation154_spill] sm:$0xff] }
 0x1e3   :  { %16364 = vmatpush3.bf16.msra.mxu0 %v16363_v15  ;;  %16110 = vmatprep.subr.bf16.mxu1 %v16109_v52  ;;  %v12247_v1 = vpop.f32.mrb[11].mxu1  ;;  %v16113_v19 = vpack.c.bf16 %v26627_v30, %v26626_v36  ;;  %v26628_v15 = vand.u32 4294901760, %v19971_v26  ;;  %v16115_v2 = vpack.c.bf16 %v26630_v58, %v26629_v17  ;;  %v26679_v58 = vld [vmem:[#allocation114_spill] sm:$0xff] }
 0x1e4   :  { %16366 = vmatprep.subr.bf16.mxu0 %v16365_v11  ;;  %v12248_v29 = vadd.f32 %v12247_v1, %v12246_v13  ;;  %v26632_v11 = vand.u32 4294901760, %v19983_v59  ;;  %v427_v59 = vadd.f32 %v20027_v18, %v20132_v22  ;;  %v20211_v18 = vld [vmem:[#allocation8 + $0x418] sm:$0xff]  ;;  %v20376_v30 = vld [vmem:[#allocation8 + $0x468] sm:$0xff] }
 0x1e5   :  { %v16369_v52 = vpack.c.bf16 %v26628_v15, %v25493_v53  ;;  %v26633_v15 = vld [vmem:[#allocation159_spill] sm:$0xff]  ;;  %v26634_v53 = vld [vmem:[#allocation160_spill] sm:$0xff]  ;;  %v26703_v12 = vand.u32 4294901760, %v20376_v30 }
 0x1e6   :  { %16112 = vmatpush3.bf16.msra.mxu1 %v16111_v33  ;;  %v20181_v6 = vadd.f32 %v12248_v29, %v412_v38  ;;  %v16371_v61 = vpack.c.bf16 %v26632_v11, %v26631_v4  ;;  %v12249_v13 = vpop.f32.mrb[12].mxu1  ;;  %v16117_v26 = vpack.c.bf16 %v26634_v53, %v26633_v15  ;;  %v26636_v33 = vand.u32 4294901760, %v20003_v40  ;;  %v20201_v11 = vld [vmem:[#allocation8 + $0x380] sm:$0xff]  ;;  %v20209_v38 = vld [vmem:[#allocation8 + $0x410] sm:$0xff] }
 0x1e7   :  { %16368 = vmatpush3.bf16.msra.mxu0 %v16367_v34  ;;  %16114 = vmatprep.subr.bf16.mxu1 %v16113_v19  ;;  %v12250_v1 = vpop.f32.mrb[13].mxu1  ;;  %v25507_v34 = vand.u32 4294901760, %v20177_v57 }
 0x1e8   :  { %v16373_v29 = vpack.c.bf16 %v26636_v33, %v26635_v21  ;;  %16370 = vmatprep.subr.bf16.mxu0 %v16369_v52  ;;  %v12251_v4 = vadd.f32 %v12250_v1, %v12249_v13  ;;  %v26637_v21 = vld [vmem:[#allocation162_spill] sm:$0xff]  ;;  %v26638_v52 = vand.u32 4294901760, %v20012_v45  ;;  %v26639_v13 = vand.u32 4294901760, %v20017_v5  ;;  %v20258_v5 = vld [vmem:[#allocation8 + $0x3a0] sm:$0xff]  ;;  %v20268_v45 = vld [vmem:[#allocation8 + $0x438] sm:$0xff] }
 0x1e9   :  { %v16119_v33 = vpack.c.bf16 %v19800_v48, %v26637_v21  ;;  %v20224_v25 = vpack.c.bf16 %v26640_v3, %v25507_v34  ;;  %v26642_v3 = vld [vmem:[#allocation43_spill] sm:$0xff]  ;;  %v26667_v48 = vld [vmem:[#allocation110_spill] sm:$0xff] }
 0x1ea   :  { %16116 = vmatpush3.bf16.msra.mxu1 %v16115_v2  ;;  %v20205_v40 = vadd.f32 %v12251_v4, %v427_v59  ;;  %v12252_v60 = vpop.f32.mrb[14].mxu1  ;;  %v16375_v1 = vpack.c.bf16 %v26639_v13, %v26638_v52  ;;  %v442_v59 = vadd.f32 %v20041_v56, %v20132_v22  ;;  %v25515_v52 = vand.u32 4294901760, %v20211_v18  ;;  %v20229_v13 = vld [vmem:[#allocation8 + $0x390] sm:$0xff]  ;;  %v20231_v2 = vld [vmem:[#allocation8 + $0x398] sm:$0xff]  ;;  %v20235_v22 = vld [vmem:[#allocation8 + $0x420] sm:$0xff] }
 0x1eb   :  { %16372 = vmatpush3.bf16.msra.mxu0 %v16371_v61  ;;  %16118 = vmatprep.subr.bf16.mxu1 %v16117_v26  ;;  %v12253_v19 = vpop.f32.mrb[15].mxu1  ;;  %26641 = vst [vmem:[#allocation17_spill] sm:$0xff] %v20224_v25  ;;  %v25512_v26 = vand.u32 4294901760, %v20203_v8  ;;  %v25516_v61 = vand.u32 4294901760, %v20209_v38  ;;  %v20266_v34 = vld [vmem:[#allocation8 + $0x430] sm:$0xff] }
 0x1ec   :  { %16374 = vmatprep.subr.bf16.mxu0 %v16373_v29  ;;  %v12254_v4 = vadd.f32 %v12253_v19, %v12252_v60  ;;  %v20237_v60 = vld [vmem:[#allocation8 + $0x428] sm:$0xff]  ;;  %v26643_v29 = vand.u32 4294901760, %v20201_v11  ;;  %v26675_v21 = vld [vmem:[#allocation31_spill] sm:$0xff] }
 0x1ee   :  { %16120 = vmatpush3.bf16.msra.mxu1 %v16119_v33  ;;  %v20233_v56 = vadd.f32 %v12254_v4, %v442_v59  ;;  %v20245_v19 = vpack.c.bf16 %v25512_v26, %v26643_v29  ;;  %v26645_v59 = vld [vmem:[#allocation92_spill] sm:$0xff]  ;;  %v20260_v29 = vld [vmem:[#allocation8 + $0x3a8] sm:$0xff]  ;;  %v26652_v4 = vand.u32 4294901760, %v20229_v13  ;;  %v26653_v26 = vand.u32 4294901760, %v20231_v2 }
 0x1ef   :  { %16376 = vmatpush3.bf16.msra.mxu0 %v16375_v1  ;;  %16122 = vmatprep.subr.bf16.mxu1 %v26642_v3  ;;  %v20254_v1 = vpack.c.bf16 %v25515_v52, %v25516_v61  ;;  %v26648_v33 = vld [vmem:[#allocation100_spill] sm:$0xff]  ;;  %v26649_v52 = vld [vmem:[#allocation46_spill] sm:$0xff]  ;;  %v26656_v61 = vand.u32 4294901760, %v20235_v22  ;;  %v26665_v50 = vand.u32 4294901760, %v20260_v29 }
 0x1f0   :  { %16410 = vmatprep.subr.bf16.mxu0 %v20224_v25  ;;  %26644 = vst [vmem:[#allocation18_spill] sm:$0xff] %v20245_v19  ;;  %v26651_v25 = vld [vmem:[#allocation23_spill] sm:$0xff]  ;;  %v20280_v10 = vpack.c.bf16 %v26653_v26, %v26652_v4 }
 0x1f1   :  { %2728 = vmatmul.mubr.f32.vlgmr.msra.gmra.mrb[64].mxu1 %v26645_v59  ;;  %26646 = vst [vmem:[#allocation50_spill] sm:$0xff] %v20254_v1  ;;  %v20294_v26 = vld [vmem:[#allocation8 + $0x3b0] sm:$0xff]  ;;  %v20296_v4 = vld [vmem:[#allocation8 + $0x3b8] sm:$0xff] }
 0x1f2   :  { %12087 = vmatmul.mubr.msk.f32.vlgmr.msra.gmra.mrb[20].mxu0 %vm18860_vm0, %v26295_v62  ;;  %2734 = vmatprep.mubr.f32.mxu1 %v26648_v33  ;;  %26654 = vst [vmem:[#allocation54_spill] sm:$0xff] %v20280_v10  ;;  %v26677_v3 = vand.u32 4294901760, %v20296_v4 }
 0x1f3   :  { %16124 = vmatpush3.bf16.msra.mxu1 %v26649_v52  ;;  %12088 = vmatprep.mubr.msk.f32.mxu0 %vm19373_vm12, %v26295_v62  ;;  %v26663_v52 = vld [vmem:[#allocation76_spill] sm:$0xff] }
 0x1f4   :  { %16412 = vmatpush3.bf16.msra.mxu0 %v20245_v19  ;;  %16126 = vmatprep.subr.bf16.mxu1 %v26651_v25  ;;  %v26657_v19 = vand.u32 4294901760, %v20237_v60  ;;  %v26664_v25 = vand.u32 4294901760, %v20258_v5 }
 0x1f5   :  { %2737 = vmatmul.mubr.f32.gmra.mrb[66].mxu1 %v26655_v37  ;;  %16414 = vmatprep.subr.bf16.mxu0 %v20254_v1  ;;  %v20302_v1 = vld [vmem:[#allocation8 + $0x440] sm:$0xff]  ;;  %v20304_v37 = vld [vmem:[#allocation8 + $0x448] sm:$0xff] }
 0x1f6   :  { %v20290_v33 = vpack.c.bf16 %v26657_v19, %v26656_v61  ;;  %12089 = vmatmul.mubr.msk.f32.gmra.mrb[22].mxu0 %vm18880_vm2, %v26295_v62  ;;  %2743 = vmatprep.mubr.f32.mxu1 %v26660_v32  ;;  %v26661_v61 = vld [vmem:[#allocation61_spill] sm:$0xff]  ;;  %v20316_v59 = vpack.c.bf16 %v26665_v50, %v26664_v25  ;;  %v26668_v19 = vand.u32 4294901760, %v20266_v34 }
 0x1f7   :  { %16128 = vmatpush3.bf16.msra.mxu1 %v26661_v61  ;;  %12090 = vmatprep.mubr.msk.f32.mxu0 %vm19383_vm14, %v26295_v62  ;;  %v20330_v50 = vld [vmem:[#allocation8 + $0x3c0] sm:$0xff]  ;;  %v20332_v25 = vld [vmem:[#allocation8 + $0x3c8] sm:$0xff] }
 0x1f8   :  { %26658 = vst [vmem:[#allocation65_spill] sm:$0xff] %v20290_v33  ;;  %16416 = vmatpush3.bf16.msra.mxu0 %v20280_v10  ;;  %16130 = vmatprep.subr.bf16.mxu1 %v26663_v52  ;;  %26666 = vst [vmem:[#allocation66_spill] sm:$0xff] %v20316_v59  ;;  %v26669_v10 = vand.u32 4294901760, %v20268_v45  ;;  %v26672_v32 = vld [vmem:[#allocation113_spill] sm:$0xff]  ;;  %v26676_v52 = vand.u32 4294901760, %v20294_v26  ;;  %v26689_v36 = vand.u32 4294901760, %v20330_v50 }
 0x1f9   :  { %2746 = vmatmul.mubr.f32.gmra.mrb[68].mxu1 %v26667_v48  ;;  %16418 = vmatprep.subr.bf16.mxu0 %v20290_v33  ;;  %v20338_v33 = vld [vmem:[#allocation8 + $0x450] sm:$0xff]  ;;  %v20340_v48 = vld [vmem:[#allocation8 + $0x458] sm:$0xff]  ;;  %v26690_v15 = vand.u32 4294901760, %v20332_v25 }
 0x1fa   :  { %v20326_v61 = vpack.c.bf16 %v26669_v10, %v26668_v19  ;;  %12091 = vmatmul.mubr.msk.f32.gmra.mrb[24].mxu0 %vm19035_vm11, %v26295_v62  ;;  %2752 = vmatprep.mubr.f32.mxu1 %v26672_v32  ;;  %v26673_v10 = vld [vmem:[#allocation26_spill] sm:$0xff]  ;;  %v20352_v53 = vpack.c.bf16 %v26677_v3, %v26676_v52  ;;  %v26680_v19 = vand.u32 4294901760, %v20302_v1  ;;  %v20368_v3 = vld [vmem:[#allocation8 + $0x3d8] sm:$0xff] }
 0x1fb   :  { %16132 = vmatpush3.bf16.msra.mxu1 %v26673_v10  ;;  %12092 = vmatprep.mubr.msk.f32.mxu0 %vm19394_vm15, %v26295_v62  ;;  %v20366_v52 = vld [vmem:[#allocation8 + $0x3d0] sm:$0xff]  ;;  %26683 = vst [vmem:[#allocation42_spill] sm:$0xff] %v20368_v3  ;;  %v20386_v35 = vpack.c.bf16 %v26690_v15, %v26689_v36  ;;  %v20401_v36 = vld [vmem:[#allocation8 + $0x3e8] sm:$0xff] }
 0x1fc   :  { %26670 = vst [vmem:[#allocation33_spill] sm:$0xff] %v20326_v61  ;;  %16420 = vmatpush3.bf16.msra.mxu0 %v20316_v59  ;;  %16134 = vmatprep.subr.bf16.mxu1 %v26675_v21  ;;  %26678 = vst [vmem:[#allocation34_spill] sm:$0xff] %v20352_v53  ;;  %v26681_v59 = vand.u32 4294901760, %v20304_v37  ;;  %v26685_v32 = vld [vmem:[#allocation90_spill] sm:$0xff]  ;;  %v26699_v20 = vand.u32 4294901760, %v20366_v52 }
 0x1fd   :  { %2755 = vmatmul.mubr.f32.gmra.mrb[70].mxu1 %v26679_v58  ;;  %16422 = vmatprep.subr.bf16.mxu0 %v20326_v61  ;;  %v20374_v58 = vld [vmem:[#allocation8 + $0x460] sm:$0xff]  ;;  %v26688_v21 = vld [vmem:[#allocation122_spill] sm:$0xff]  ;;  %26691 = vst [vmem:[#allocation123_spill] sm:$0xff] %v20386_v35 }
 0x1fe   :  { %v20362_v10 = vpack.c.bf16 %v26681_v59, %v26680_v19  ;;  %12093 = vmatmul.mubr.msk.f32.gmra.mrb[26].mxu0 %vm19030_vm10, %v26295_v62  ;;  %2859 = vmatprep.mubr.f32.mxu1 %v26685_v32  ;;  %v12287_v61 = vpop.f32.mrb[16].mxu1  ;;  %v26686_v59 = vld [vmem:[#allocation40_spill] sm:$0xff] }
 0x1ff   :  { %16136 = vmatpush3.bf16.msra.mxu1 %v26686_v59  ;;  %v26687_v19 = vld [vmem:[#allocation96_spill] sm:$0xff]  ;;  %v12288_v17 = vpop.f32.mrb[17].mxu1  ;;  %v26693_v59 = vand.u32 4294901760, %v20340_v48 }
 0x200   :  { %26682 = vst [vmem:[#allocation27_spill] sm:$0xff] %v20362_v10  ;;  %4458 = vmatprep.mubr.f32.mxu0 %v26687_v19  ;;  %16424 = vmatpush3.bf16.msra.mxu0 %v20352_v53  ;;  %v12289_v32 = vadd.f32 %v12288_v17, %v12287_v61  ;;  %v26692_v19 = vand.u32 4294901760, %v20338_v33  ;;  %v20406_v61 = vld [vmem:[#allocation8 + $0x470] sm:$0xff] }
 0x201   :  { %16138 = vmatprep.subr.bf16.mxu1 %v26688_v21  ;;  %16426 = vmatprep.subr.bf16.mxu0 %v20362_v10  ;;  %v26700_v21 = vand.u32 4294901760, %v20368_v3  ;;  %v20430_v3 = vld [vmem:[#allocation8 + $0x3f0] sm:$0xff] }
 0x202   :  { %v20395_v53 = vpack.c.bf16 %v26693_v59, %v26692_v19  ;;  %v20404_v17 = vadd.f32 %v12289_v32, %v20157_v54  ;;  %v12290_v15 = vpop.f32.mrb[18].mxu1  ;;  %v26698_v19 = vld [vmem:[#allocation133_spill] sm:$0xff]  ;;  %v26707_v54 = vld [vmem:[#allocation148_spill] sm:$0xff] }
 0x203   :  { %16140 = vmatpush3.bf16.msra.mxu1 %v26697_v63  ;;  %v12291_v59 = vpop.f32.mrb[19].mxu1  ;;  %v20417_v10 = vpack.c.bf16 %v26700_v21, %v26699_v20  ;;  %v26702_v63 = vand.u32 4294901760, %v20374_v58  ;;  %v20432_v20 = vld [vmem:[#allocation8 + $0x3f8] sm:$0xff] }
 0x204   :  { %26694 = vst [vmem:[#allocation96_spill] sm:$0xff] %v20395_v53  ;;  %26695 = vst [vmem:[#allocation172_spill] sm:$0xff] %v20404_v17  ;;  %16428 = vmatpush3.bf16.msra.mxu0 %v20386_v35  ;;  %16142 = vmatprep.subr.bf16.mxu1 %v26698_v19  ;;  %v12292_v32 = vadd.f32 %v12291_v59, %v12290_v15  ;;  %v26706_v59 = vld [vmem:[#allocation143_spill] sm:$0xff] }
 0x205   :  { %26701 = vst [vmem:[#allocation174_spill] sm:$0xff] %v20417_v10  ;;  %16430 = vmatprep.subr.bf16.mxu0 %v20395_v53  ;;  %v20426_v35 = vpack.c.bf16 %v26703_v12, %v26702_v63  ;;  %v26708_v12 = vand.u32 4294901760, %v20399_v39  ;;  %v26709_v63 = vand.u32 4294901760, %v20401_v36  ;;  %v26719_v53 = vld [vmem:[#allocation155_spill] sm:$0xff] }
 0x206   :  { %v20435_v21 = vadd.f32 %v12292_v32, %v20181_v6  ;;  %v12293_v15 = vpop.f32.mrb[20].mxu1  ;;  %v26711_v32 = vand.u32 4294901760, %v20177_v57 }
 0x207   :  { %26704 = vst [vmem:[#allocation175_spill] sm:$0xff] %v20426_v35  ;;  %16144 = vmatpush3.bf16.msra.mxu1 %v26706_v59  ;;  %v12294_v17 = vpop.f32.mrb[21].mxu1  ;;  %v20444_v46 = vpack.c.bf16 %v26709_v63, %v26708_v12  ;;  %v26715_v12 = vand.u32 4294901760, %v20406_v61 }
 0x208   :  { %26705 = vst [vmem:[#allocation176_spill] sm:$0xff] %v20435_v21  ;;  %16432 = vmatpush3.bf16.msra.mxu0 %v20417_v10  ;;  %16146 = vmatprep.subr.bf16.mxu1 %v26707_v54  ;;  %v12295_v19 = vadd.f32 %v12294_v17, %v12293_v15  ;;  %v20451_v59 = vsub.f32 %v20177_v57, %v26711_v32  ;;  %v26713_v10 = vand.u32 4294901760, %v20179_v0  ;;  %v26716_v17 = vand.u32 4294901760, %v20408_v47  ;;  %v26720_v32 = vld [vmem:[#allocation158_spill] sm:$0xff]  ;;  %v26726_v47 = vld [vmem:[#allocation53_spill] sm:$0xff] }
 0x209   :  { %26710 = vst [vmem:[#allocation177_spill] sm:$0xff] %v20444_v46  ;;  %16434 = vmatprep.subr.bf16.mxu0 %v20426_v35 }
 0x20a   :  { %26712 = vst [vmem:[#allocation178_spill] sm:$0xff] %v20451_v59  ;;  %v20456_v54 = vsub.f32 %v20179_v0, %v26713_v10  ;;  %v20463_v15 = vpack.c.bf16 %v26716_v17, %v26715_v12  ;;  %v20466_v63 = vadd.f32 %v12295_v19, %v20205_v40  ;;  %v12296_v6 = vpop.f32.mrb[22].mxu1  ;;  %v26721_v0 = vand.u32 4294901760, %v20430_v3  ;;  %v26724_v12 = vld [vmem:[#allocation82_spill] sm:$0xff] }
 0x20b   :  { %16148 = vmatpush3.bf16.msra.mxu1 %v26719_v53  ;;  %v12297_v57 = vpop.f32.mrb[23].mxu1  ;;  %v26722_v10 = vand.u32 4294901760, %v20432_v20  ;;  %v26725_v17 = vand.u32 4294901760, %v26724_v12  ;;  %v26727_v40 = vand.u32 4294901760, %v26726_v47 }
 0x20c   :  { %26714 = vst [vmem:[#allocation179_spill] sm:$0xff] %v20456_v54  ;;  %26717 = vst [vmem:[#allocation180_spill] sm:$0xff] %v20463_v15  ;;  %16436 = vmatpush3.bf16.msra.mxu0 %v20444_v46  ;;  %16150 = vmatprep.subr.bf16.mxu1 %v26720_v32  ;;  %v12298_v21 = vadd.f32 %v12297_v57, %v12296_v6  ;;  %v26730_v46 = vand.u32 4294901760, %v20203_v8  ;;  %v16473_v6 = vpack.c.bf16 %v20456_v54, %v20451_v59 }
 0x20d   :  { %26718 = vst [vmem:[#allocation181_spill] sm:$0xff] %v20466_v63  ;;  %v20475_v35 = vpack.c.bf16 %v26722_v10, %v26721_v0  ;;  %v16153_v19 = vpack.c.bf16 %v26727_v40, %v26725_v17  ;;  %v26728_v63 = vand.u32 4294901760, %v20201_v11  ;;  %16438 = vmatprep.subr.bf16.mxu0 %v20463_v15  ;;  %v26732_v57 = vand.u32 4294901760, %v20209_v38  ;;  %v20888_v15 = vld [vmem:[#allocation8 + $0x500] sm:$0xff] }
 0x20e   :  { %v20489_v32 = vsub.f32 %v20203_v8, %v26730_v46  ;;  %v26734_v0 = vand.u32 4294901760, %v20211_v18  ;;  %v26736_v8 = vld [vmem:[#allocation163_spill] sm:$0xff]  ;;  %v26737_v46 = vand.u32 4294901760, %v26579_v31  ;;  %v26738_v10 = vand.u32 4294901760, %v26580_v44 }
 0x20f   :  { %26723 = vst [vmem:[#allocation182_spill] sm:$0xff] %v20475_v35  ;;  %v20484_v53 = vsub.f32 %v20201_v11, %v26728_v63  ;;  %v20497_v47 = vsub.f32 %v20209_v38, %v26732_v57  ;;  %v20505_v63 = vadd.f32 %v12298_v21, %v20233_v56  ;;  %16152 = vmatpush3.bf16.msra.mxu1 %v26736_v8  ;;  %v26739_v38 = vand.u32 4294901760, %v20229_v13 }
 0x210   :  { %26731 = vst [vmem:[#allocation53_spill] sm:$0xff] %v20489_v32  ;;  %v20502_v11 = vsub.f32 %v20211_v18, %v26734_v0  ;;  %16440 = vmatpush3.bf16.msra.mxu0 %v20475_v35  ;;  %16154 = vmatprep.subr.bf16.mxu1 %v16153_v19  ;;  %v16155_v12 = vpack.c.bf16 %v26738_v10, %v26737_v46  ;;  %v26741_v18 = vand.u32 4294901760, %v20231_v2  ;;  %v26743_v40 = vand.u32 4294901760, %v26581_v42  ;;  %v26750_v46 = vld [vmem:[#allocation107_spill] sm:$0xff]  ;;  %v26751_v42 = vld [vmem:[#allocation105_spill] sm:$0xff] }
 0x211   :  { %26729 = vst [vmem:[#allocation82_spill] sm:$0xff] %v20484_v53  ;;  %26733 = vst [vmem:[#allocation183_spill] sm:$0xff] %v20497_v47  ;;  %v20516_v17 = vsub.f32 %v20229_v13, %v26739_v38  ;;  %16474 = vmatprep.subr.bf16.mxu0 %v16473_v6  ;;  %v16475_v21 = vpack.c.bf16 %v20489_v32, %v20484_v53  ;;  %v26744_v31 = vand.u32 4294901760, %v26582_v16  ;;  %v26745_v19 = vand.u32 4294901760, %v20235_v22 }
 0x212   :  { %26735 = vst [vmem:[#allocation184_spill] sm:$0xff] %v20502_v11  ;;  %v20521_v56 = vsub.f32 %v20231_v2, %v26741_v18  ;;  %v26747_v13 = vand.u32 4294901760, %v20237_v60  ;;  %v26749_v2 = vld [vmem:[#allocation98_spill] sm:$0xff]  ;;  %v16477_v6 = vpack.c.bf16 %v20502_v11, %v20497_v47  ;;  %v26752_v16 = vand.u32 4294901760, %v20258_v5 }
 0x213   :  { %26740 = vst [vmem:[#allocation163_spill] sm:$0xff] %v20516_v17  ;;  %v16157_v44 = vpack.c.bf16 %v26744_v31, %v26743_v40  ;;  %v20532_v57 = vsub.f32 %v20235_v22, %v26745_v19  ;;  %2863 = vmatmul.mubr.f32.vlgmr.msra.gmra.mrb[72].mxu1 %v26749_v2  ;;  %4464 = vmatmul.mubr.f32.vlgmr.msra.gmra.mrb[28].mxu0 %v26750_v46  ;;  %v26754_v22 = vld [vmem:[#allocation111_spill] sm:$0xff]  ;;  %v26756_v38 = vand.u32 4294901760, %v26592_v49  ;;  %v26757_v40 = vand.u32 4294901760, %v20260_v29  ;;  %v26881_v2 = vld [vmem:[#allocation52_spill] sm:$0xff] }
 0x214   :  { %26742 = vst [vmem:[#allocation185_spill] sm:$0xff] %v20521_v56  ;;  %v20537_v0 = vsub.f32 %v20237_v60, %v26747_v13  ;;  %2870 = vmatprep.mubr.f32.mxu1 %v26751_v42  ;;  %v20547_v10 = vsub.f32 %v20258_v5, %v26752_v16  ;;  %16156 = vmatpush3.bf16.msra.mxu1 %v16155_v12  ;;  %v26755_v60 = vand.u32 4294901760, %v26591_v43  ;;  %v26759_v5 = vand.u32 4294901760, %v26595_v24  ;;  %v26766_v24 = vld [vmem:[#allocation112_spill] sm:$0xff] }
 0x215   :  { %26746 = vst [vmem:[#allocation186_spill] sm:$0xff] %v20532_v57  ;;  %4473 = vmatprep.mubr.f32.mxu0 %v26754_v22  ;;  %v20557_v31 = vsub.f32 %v20260_v29, %v26757_v40  ;;  %16476 = vmatpush3.bf16.msra.mxu0 %v16475_v21  ;;  %v16479_v19 = vpack.c.bf16 %v20521_v56, %v20516_v17  ;;  %v26760_v12 = vand.u32 4294901760, %v26596_v55  ;;  %v26761_v43 = vand.u32 4294901760, %v20266_v34  ;;  %v26765_v21 = vld [vmem:[#allocation106_spill] sm:$0xff]  ;;  %v26770_v22 = vld [vmem:[#allocation64_spill] sm:$0xff] }
 0x216   :  { %26748 = vst [vmem:[#allocation187_spill] sm:$0xff] %v20537_v0  ;;  %26753 = vst [vmem:[#allocation107_spill] sm:$0xff] %v20547_v10  ;;  %v16159_v18 = vpack.c.bf16 %v26756_v38, %v26755_v60  ;;  %16158 = vmatprep.subr.bf16.mxu1 %v16157_v44  ;;  %v26763_v46 = vand.u32 4294901760, %v20268_v45  ;;  %16478 = vmatprep.subr.bf16.mxu0 %v16477_v6  ;;  %v16481_v44 = vpack.c.bf16 %v20537_v0, %v20532_v57  ;;  %v26767_v55 = vld [vmem:[#allocation58_spill] sm:$0xff] }
 0x217   :  { %26758 = vst [vmem:[#allocation111_spill] sm:$0xff] %v20557_v31  ;;  %v16161_v13 = vpack.c.bf16 %v26760_v12, %v26759_v5  ;;  %v20568_v49 = vsub.f32 %v20266_v34, %v26761_v43  ;;  %2874 = vmatmul.mubr.f32.gmra.mrb[74].mxu1 %v26765_v21  ;;  %4479 = vmatmul.mubr.f32.gmra.mrb[30].mxu0 %v26766_v24  ;;  %v26768_v16 = vand.u32 4294901760, %v20294_v26  ;;  %v26772_v60 = vand.u32 4294901760, %v19558_v7  ;;  %v26786_v24 = vld [vmem:[#allocation68_spill] sm:$0xff] }
 0x218   :  { %v20573_v29 = vsub.f32 %v20268_v45, %v26763_v46  ;;  %2881 = vmatprep.mubr.f32.mxu1 %v26767_v55  ;;  %16160 = vmatpush3.bf16.msra.mxu1 %v16159_v18  ;;  %v26771_v45 = vand.u32 4294901760, %v26602_v23  ;;  %v26773_v38 = vand.u32 4294901760, %v20296_v4  ;;  %v16483_v5 = vpack.c.bf16 %v20557_v31, %v20547_v10 }
 0x219   :  { %26762 = vst [vmem:[#allocation188_spill] sm:$0xff] %v20568_v49  ;;  %v20583_v34 = vsub.f32 %v20294_v26, %v26768_v16  ;;  %4488 = vmatprep.mubr.f32.mxu0 %v26770_v22  ;;  %16480 = vmatpush3.bf16.msra.mxu0 %v16479_v19  ;;  %v26775_v26 = vand.u32 4294901760, %v19571_v51  ;;  %v26776_v18 = vand.u32 4294901760, %v19573_v28  ;;  %v26777_v23 = vand.u32 4294901760, %v20302_v1  ;;  %v26781_v19 = vld [vmem:[#allocation63_spill] sm:$0xff]  ;;  %v26783_v28 = vld [vmem:[#allocation116_spill] sm:$0xff] }
 0x21a   :  { %26764 = vst [vmem:[#allocation189_spill] sm:$0xff] %v20573_v29  ;;  %v16163_v6 = vpack.c.bf16 %v26772_v60, %v26771_v45  ;;  %v20593_v40 = vsub.f32 %v20296_v4, %v26773_v38  ;;  %16162 = vmatprep.subr.bf16.mxu1 %v16161_v13  ;;  %v26779_v43 = vand.u32 4294901760, %v20304_v37  ;;  %16482 = vmatprep.subr.bf16.mxu0 %v16481_v44  ;;  %v26782_v51 = vld [vmem:[#allocation67_spill] sm:$0xff]  ;;  %v26784_v46 = vand.u32 4294901760, %v20330_v50 }
 0x21b   :  { %26769 = vst [vmem:[#allocation112_spill] sm:$0xff] %v20583_v34  ;;  %v16165_v12 = vpack.c.bf16 %v26776_v18, %v26775_v26  ;;  %v20604_v7 = vsub.f32 %v20302_v1, %v26777_v23  ;;  %2885 = vmatmul.mubr.f32.gmra.mrb[76].mxu1 %v26781_v19  ;;  %v16485_v13 = vpack.c.bf16 %v20573_v29, %v20568_v49  ;;  %v26788_v16 = vand.u32 4294901760, %v26610_v14 }
 0x21c   :  { %26774 = vst [vmem:[#allocation64_spill] sm:$0xff] %v20593_v40  ;;  %v20609_v4 = vsub.f32 %v20304_v37, %v26779_v43  ;;  %4494 = vmatmul.mubr.f32.gmra.mrb[32].mxu0 %v26782_v51  ;;  %2892 = vmatprep.mubr.f32.mxu1 %v26783_v28  ;;  %v20619_v1 = vsub.f32 %v20330_v50, %v26784_v46  ;;  %v26787_v37 = vand.u32 4294901760, %v19596_v9  ;;  %v26789_v22 = vand.u32 4294901760, %v20332_v25  ;;  %v26806_v46 = vld [vmem:[#allocation128_spill] sm:$0xff] }
 0x21d   :  { %26778 = vst [vmem:[#allocation190_spill] sm:$0xff] %v20604_v7  ;;  %16164 = vmatpush3.bf16.msra.mxu1 %v16163_v6  ;;  %4503 = vmatprep.mubr.f32.mxu0 %v26786_v24  ;;  %v16487_v60 = vpack.c.bf16 %v20593_v40, %v20583_v34  ;;  %v26791_v50 = vand.u32 4294901760, %v26613_v27  ;;  %v26792_v6 = vand.u32 4294901760, %v19627_v41  ;;  %v26793_v9 = vand.u32 4294901760, %v20338_v33  ;;  %v26798_v27 = vld [vmem:[#allocation69_spill] sm:$0xff] }
 0x21e   :  { %26780 = vst [vmem:[#allocation191_spill] sm:$0xff] %v20609_v4  ;;  %26785 = vst [vmem:[#allocation67_spill] sm:$0xff] %v20619_v1  ;;  %v16167_v44 = vpack.c.bf16 %v26788_v16, %v26787_v37  ;;  %v20629_v45 = vsub.f32 %v20332_v25, %v26789_v22  ;;  %16484 = vmatpush3.bf16.msra.mxu0 %v16483_v5  ;;  %16166 = vmatprep.subr.bf16.mxu1 %v16165_v12  ;;  %v26795_v26 = vand.u32 4294901760, %v20340_v48  ;;  %v26797_v5 = vld [vmem:[#allocation117_spill] sm:$0xff] }
 0x21f   :  { %v16169_v38 = vpack.c.bf16 %v26792_v6, %v26791_v50  ;;  %v20640_v14 = vsub.f32 %v20338_v33, %v26793_v9  ;;  %2896 = vmatmul.mubr.f32.gmra.mrb[78].mxu1 %v26797_v5  ;;  %16486 = vmatprep.subr.bf16.mxu0 %v16485_v13  ;;  %v16489_v18 = vpack.c.bf16 %v20609_v4, %v20604_v7  ;;  %v12331_v12 = vpop.f32.mrb[24].mxu1  ;;  %v26800_v33 = vand.u32 4294901760, %v20366_v52  ;;  %v26805_v13 = vld [vmem:[#allocation86_spill] sm:$0xff]  ;;  %v26808_v37 = vld [vmem:[#allocation129_spill] sm:$0xff] }
 0x220   :  { %26790 = vst [vmem:[#allocation68_spill] sm:$0xff] %v20629_v45  ;;  %v20645_v25 = vsub.f32 %v20340_v48, %v26795_v26  ;;  %4509 = vmatmul.mubr.f32.gmra.mrb[34].mxu0 %v26798_v27  ;;  %12062 = vmatprep.mubr.msk.f32.mxu1 %vm18865_vm1, %v26295_v62  ;;  %v26802_v48 = vld [vmem:[#allocation42_spill] sm:$0xff]  ;;  %v26807_v24 = vand.u32 4294901760, %v26806_v46  ;;  %v26809_v16 = vand.u32 4294901760, %v26808_v37  ;;  %v12332_v50 = vpop.f32.mrb[25].mxu1  ;;  %v26812_v27 = vld [vmem:[#allocation135_spill] sm:$0xff] }
 0x221   :  { %26794 = vst [vmem:[#allocation192_spill] sm:$0xff] %v20640_v14  ;;  %v20657_v23 = vsub.f32 %v20366_v52, %v26800_v33  ;;  %v26803_v43 = vand.u32 4294901760, %v26802_v48  ;;  %16168 = vmatpush3.bf16.msra.mxu1 %v16167_v44  ;;  %4897 = vmatprep.mubr.f32.mxu0 %v26805_v13  ;;  %v16491_v52 = vpack.c.bf16 %v20629_v45, %v20619_v1  ;;  %v26810_v9 = vld [vmem:[#allocation134_spill] sm:$0xff]  ;;  %v26813_v33 = vand.u32 4294901760, %v26812_v27 }
 0x222   :  { %26796 = vst [vmem:[#allocation193_spill] sm:$0xff] %v20645_v25  ;;  %v16171_v22 = vpack.c.bf16 %v26809_v16, %v26807_v24  ;;  %16488 = vmatpush3.bf16.msra.mxu0 %v16487_v60  ;;  %16170 = vmatprep.subr.bf16.mxu1 %v16169_v38  ;;  %v12333_v6 = vadd.f32 %v12332_v50, %v12331_v12  ;;  %v26811_v26 = vand.u32 4294901760, %v26810_v9  ;;  %v26814_v44 = vand.u32 4294901760, %v20374_v58  ;;  %v26818_v38 = vld [vmem:[#allocation172_spill] sm:$0xff]  ;;  %v26825_v9 = vld [vmem:[#allocation145_spill] sm:$0xff] }
 0x223   :  { %26801 = vst [vmem:[#allocation69_spill] sm:$0xff] %v20657_v23  ;;  %v20662_v51 = vsub.f32 %v26802_v48, %v26803_v43  ;;  %v26816_v13 = vand.u32 4294901760, %v20376_v30  ;;  %16490 = vmatprep.subr.bf16.mxu0 %v16489_v18  ;;  %v16493_v60 = vpack.c.bf16 %v20645_v25, %v20640_v14  ;;  %v12334_v24 = vpop.f32.mrb[26].mxu1  ;;  %v26819_v37 = vand.u32 4294901760, %v20399_v39 }
 0x224   :  { %v16173_v48 = vpack.c.bf16 %v26813_v33, %v26811_v26  ;;  %v20678_v43 = vsub.f32 %v20374_v58, %v26814_v44  ;;  %v20688_v12 = vadd.f32 %v12333_v6, %v26818_v38  ;;  %v26821_v58 = vand.u32 4294901760, %v20401_v36  ;;  %v12335_v33 = vpop.f32.mrb[27].mxu1  ;;  %v26829_v38 = vld [vmem:[#allocation152_spill] sm:$0xff] }
 0x225   :  { %26804 = vst [vmem:[#allocation42_spill] sm:$0xff] %v20662_v51  ;;  %v20683_v46 = vsub.f32 %v20376_v30, %v26816_v13  ;;  %v20693_v16 = vsub.f32 %v20399_v39, %v26819_v37  ;;  %16172 = vmatpush3.bf16.msra.mxu1 %v16171_v22  ;;  %v26823_v30 = vld [vmem:[#allocation144_spill] sm:$0xff]  ;;  %v26826_v26 = vand.u32 4294901760, %v26825_v9  ;;  %v16495_v6 = vpack.c.bf16 %v20662_v51, %v20657_v23  ;;  %v26827_v39 = vld [vmem:[#allocation151_spill] sm:$0xff] }
 0x226   :  { %26815 = vst [vmem:[#allocation86_spill] sm:$0xff] %v20678_v43  ;;  %v20698_v50 = vsub.f32 %v20401_v36, %v26821_v58  ;;  %v26824_v18 = vand.u32 4294901760, %v26823_v30  ;;  %16492 = vmatpush3.bf16.msra.mxu0 %v16491_v52  ;;  %16174 = vmatprep.subr.bf16.mxu1 %v16173_v48  ;;  %v12336_v44 = vadd.f32 %v12335_v33, %v12334_v24  ;;  %v26828_v13 = vand.u32 4294901760, %v26827_v39  ;;  %v26833_v58 = vld [vmem:[#allocation173_spill] sm:$0xff]  ;;  %v26836_v48 = vld [vmem:[#allocation176_spill] sm:$0xff] }
 0x227   :  { %26817 = vst [vmem:[#allocation128_spill] sm:$0xff] %v20683_v46  ;;  %26820 = vst [vmem:[#allocation129_spill] sm:$0xff] %v20693_v16  ;;  %v26830_v37 = vand.u32 4294901760, %v26829_v38  ;;  %v26831_v36 = vand.u32 4294901760, %v20406_v61  ;;  %v26834_v30 = vand.u32 4294901760, %v26833_v58  ;;  %16494 = vmatprep.subr.bf16.mxu0 %v16493_v60  ;;  %v16497_v52 = vpack.c.bf16 %v20683_v46, %v20678_v43  ;;  %v12337_v9 = vpop.f32.mrb[28].mxu1 }
 0x228   :  { %26822 = vst [vmem:[#allocation134_spill] sm:$0xff] %v20698_v50  ;;  %v16175_v27 = vpack.c.bf16 %v26826_v26, %v26824_v18  ;;  %v20723_v24 = vadd.f32 %v12336_v44, %v26836_v48  ;;  %v26837_v26 = vand.u32 4294901760, %v20430_v3  ;;  %v26843_v38 = vld [vmem:[#allocation156_spill] sm:$0xff]  ;;  %v16499_v44 = vpack.c.bf16 %v20698_v50, %v20693_v16 }
 0x229   :  { %v16177_v5 = vpack.c.bf16 %v26830_v37, %v26828_v13  ;;  %v20713_v22 = vsub.f32 %v20406_v61, %v26831_v36  ;;  %v20718_v18 = vsub.f32 %v26833_v58, %v26834_v30  ;;  %v26839_v61 = vand.u32 4294901760, %v20432_v20  ;;  %v26841_v13 = vld [vmem:[#allocation154_spill] sm:$0xff]  ;;  %v12338_v58 = vpop.f32.mrb[29].mxu1 }
 0x22a   :  { %v20728_v33 = vsub.f32 %v20430_v3, %v26837_v26  ;;  %16176 = vmatpush3.bf16.msra.mxu1 %v16175_v27  ;;  %v26842_v60 = vand.u32 4294901760, %v26841_v13  ;;  %v26844_v37 = vand.u32 4294901760, %v26843_v38  ;;  %16496 = vmatpush3.bf16.msra.mxu0 %v16495_v6  ;;  %v12339_v30 = vadd.f32 %v12338_v58, %v12337_v9  ;;  %v26845_v3 = vld [vmem:[#allocation159_spill] sm:$0xff]  ;;  %v26847_v26 = vld [vmem:[#allocation160_spill] sm:$0xff]  ;;  %v26849_v13 = vld [vmem:[#allocation181_spill] sm:$0xff] }
 0x22b   :  { %26832 = vst [vmem:[#allocation135_spill] sm:$0xff] %v20713_v22  ;;  %26835 = vst [vmem:[#allocation172_spill] sm:$0xff] %v20718_v18  ;;  %v20733_v39 = vsub.f32 %v20432_v20, %v26839_v61  ;;  %16178 = vmatprep.subr.bf16.mxu1 %v16177_v5  ;;  %v26846_v48 = vand.u32 4294901760, %v26845_v3  ;;  %v26848_v28 = vand.u32 4294901760, %v26847_v26  ;;  %16498 = vmatprep.subr.bf16.mxu0 %v16497_v52  ;;  %v25564_v27 = vand.u32 4294901760, %v20451_v59  ;;  %v12340_v5 = vpop.f32.mrb[30].mxu1 }
 0x22c   :  { %26838 = vst [vmem:[#allocation144_spill] sm:$0xff] %v20728_v33  ;;  %v16179_v36 = vpack.c.bf16 %v26844_v37, %v26842_v60  ;;  %v16501_v20 = vpack.c.bf16 %v20718_v18, %v20713_v22  ;;  %v25561_v61 = vand.u32 4294901760, %v20456_v54  ;;  %v20750_v6 = vadd.f32 %v12339_v30, %v26849_v13  ;;  %v26850_v60 = vld [vmem:[#allocation162_spill] sm:$0xff]  ;;  %v26852_v38 = vld [vmem:[#allocation164_spill] sm:$0xff]  ;;  %v12341_v3 = vpop.f32.mrb[31].mxu1  ;;  %v26854_v13 = vld [vmem:[#allocation43_spill] sm:$0xff] }
 0x22d   :  { %26840 = vst [vmem:[#allocation145_spill] sm:$0xff] %v20733_v39  ;;  %v16181_v19 = vpack.c.bf16 %v26848_v28, %v26846_v48  ;;  %v26851_v9 = vand.u32 4294901760, %v26850_v60  ;;  %v26853_v37 = vand.u32 4294901760, %v26852_v38  ;;  %v16503_v28 = vpack.c.bf16 %v20733_v39, %v20728_v33  ;;  %v21228_v59 = vld [vmem:[#allocation8 + $0x570] sm:$0xff] }
 0x22e   :  { %16180 = vmatpush3.bf16.msra.mxu1 %v16179_v36  ;;  %16500 = vmatpush3.bf16.msra.mxu0 %v16499_v44  ;;  %v12342_v52 = vadd.f32 %v12341_v3, %v12340_v5  ;;  %v16537_v30 = vpack.c.bf16 %v25561_v61, %v25564_v27  ;;  %v25560_v36 = vand.u32 4294901760, %v20484_v53  ;;  %v25555_v48 = vand.u32 4294901760, %v20489_v32  ;;  %v26872_v27 = vld [vmem:[#allocation31_spill] sm:$0xff]  ;;  %v26992_v32 = vld [vmem:[#allocation149_spill] sm:$0xff]  ;;  %v26994_v53 = vld [vmem:[#allocation150_spill] sm:$0xff] }
 0x22f   :  { %v16183_v58 = vpack.c.bf16 %v26853_v37, %v26851_v9  ;;  %16182 = vmatprep.subr.bf16.mxu1 %v16181_v19  ;;  %16502 = vmatprep.subr.bf16.mxu0 %v16501_v20  ;;  %v25554_v44 = vand.u32 4294901760, %v20497_v47  ;;  %v25553_v19 = vand.u32 4294901760, %v20502_v11  ;;  %v25557_v5 = vand.u32 4294901760, %v20516_v17  ;;  %v21208_v11 = vld [vmem:[#allocation8 + $0x4e0] sm:$0xff] }
 0x230   :  { %v20765_v26 = vadd.f32 %v12342_v52, %v20505_v63  ;;  %v16539_v20 = vpack.c.bf16 %v25555_v48, %v25560_v36  ;;  %v25556_v60 = vand.u32 4294901760, %v20521_v56  ;;  %v25559_v38 = vand.u32 4294901760, %v20532_v57  ;;  %v26859_v52 = vld [vmem:[#allocation100_spill] sm:$0xff] }
 0x231   :  { %v16541_v9 = vpack.c.bf16 %v25553_v19, %v25554_v44  ;;  %v25558_v37 = vand.u32 4294901760, %v20537_v0  ;;  %v26860_v19 = vld [vmem:[#allocation23_spill] sm:$0xff]  ;;  %v25570_v36 = vand.u32 4294901760, %v20604_v7  ;;  %v25569_v61 = vand.u32 4294901760, %v20609_v4  ;;  %v26967_v48 = vld [vmem:[#allocation136_spill] sm:$0xff] }
 0x232   :  { %16184 = vmatpush3.bf16.msra.mxu1 %v16183_v58  ;;  %16504 = vmatpush3.bf16.msra.mxu0 %v16503_v28  ;;  %v26856_v58 = vld [vmem:[#allocation92_spill] sm:$0xff]  ;;  %v26858_v28 = vld [vmem:[#allocation46_spill] sm:$0xff]  ;;  %v26878_v55 = vand.u32 4294901760, %v20645_v25  ;;  %v26882_v35 = vand.u32 4294901760, %v26881_v2  ;;  %v26889_v41 = vand.u32 4294901760, %v20678_v43  ;;  %v26995_v54 = vand.u32 4294901760, %v26994_v53 }
 0x233   :  { %16186 = vmatprep.subr.bf16.mxu1 %v26854_v13  ;;  %16538 = vmatprep.subr.bf16.mxu0 %v16537_v30  ;;  %v25563_v30 = vand.u32 4294901760, %v20547_v10  ;;  %v25562_v13 = vand.u32 4294901760, %v20557_v31  ;;  %v21108_v31 = vld [vmem:[#allocation8 + $0x550] sm:$0xff]  ;;  %v21110_v10 = vld [vmem:[#allocation8 + $0x558] sm:$0xff] }
 0x234   :  { %v21122_v57 = vld [vmem:[#allocation8 + $0x4d8] sm:$0xff] }
 0x235   :  { %12063 = vmatmul.mubr.msk.f32.vlgmr.msra.gmra.mrb[80].mxu1 %vm18885_vm3, %v26295_v62  ;;  %4900 = vmatmul.mubr.f32.vlgmr.msra.gmra.mrb[36].mxu0 %v26856_v58  ;;  %v16543_v58 = vpack.c.bf16 %v25556_v60, %v25557_v5  ;;  %v26864_v60 = vld [vmem:[#allocation61_spill] sm:$0xff]  ;;  %26960 = vst [vmem:[#allocation181_spill] sm:$0xff] %v21122_v57  ;;  %v26988_v56 = vld [vmem:[#allocation140_spill] sm:$0xff] }
 0x236   :  { %12064 = vmatprep.mubr.msk.f32.mxu1 %vm18915_vm5, %v26295_v62  ;;  %16188 = vmatpush3.bf16.msra.mxu1 %v26858_v28  ;;  %v16545_v28 = vpack.c.bf16 %v25558_v37, %v25559_v38  ;;  %v26865_v5 = vld [vmem:[#allocation109_spill] sm:$0xff]  ;;  %v26866_v37 = vld [vmem:[#allocation76_spill] sm:$0xff]  ;;  %v25568_v38 = vand.u32 4294901760, %v20583_v34  ;;  %v26920_v34 = vld [vmem:[#allocation30_spill] sm:$0xff] }
 0x237   :  { %4906 = vmatprep.mubr.f32.mxu0 %v26859_v52  ;;  %16540 = vmatpush3.bf16.msra.mxu0 %v16539_v20  ;;  %v25566_v52 = vand.u32 4294901760, %v20568_v49  ;;  %v25565_v20 = vand.u32 4294901760, %v20573_v29  ;;  %v21016_v49 = vld [vmem:[#allocation8 + $0x538] sm:$0xff] }
 0x238   :  { %16190 = vmatprep.subr.bf16.mxu1 %v26860_v19  ;;  %16542 = vmatprep.subr.bf16.mxu0 %v16541_v9  ;;  %v26862_v19 = vld [vmem:[#allocation101_spill] sm:$0xff]  ;;  %v16547_v9 = vpack.c.bf16 %v25562_v13, %v25563_v30  ;;  %v26870_v13 = vld [vmem:[#allocation26_spill] sm:$0xff] }
 0x239   :  { %12065 = vmatmul.mubr.msk.f32.gmra.mrb[82].mxu1 %vm18910_vm4, %v26295_v62  ;;  %4909 = vmatmul.mubr.f32.gmra.mrb[38].mxu0 %v26862_v19  ;;  %v25567_v19 = vand.u32 4294901760, %v20593_v40  ;;  %v26871_v30 = vld [vmem:[#allocation113_spill] sm:$0xff]  ;;  %v26918_v40 = vld [vmem:[#allocation28_spill] sm:$0xff] }
 0x23a   :  { %12066 = vmatprep.mubr.msk.f32.mxu1 %vm18957_vm7, %v26295_v62  ;;  %16192 = vmatpush3.bf16.msra.mxu1 %v26864_v60 }
 0x23b   :  { %4915 = vmatprep.mubr.f32.mxu0 %v26865_v5  ;;  %16544 = vmatpush3.bf16.msra.mxu0 %v16543_v58  ;;  %v16549_v5 = vpack.c.bf16 %v25565_v20, %v25566_v52  ;;  %v26868_v58 = vld [vmem:[#allocation110_spill] sm:$0xff]  ;;  %v25574_v20 = vand.u32 4294901760, %v20619_v1  ;;  %v25573_v52 = vand.u32 4294901760, %v20629_v45 }
 0x23c   :  { %16194 = vmatprep.subr.bf16.mxu1 %v26866_v37  ;;  %16546 = vmatprep.subr.bf16.mxu0 %v16545_v28  ;;  %v16551_v28 = vpack.c.bf16 %v25567_v19, %v25568_v38  ;;  %v26874_v38 = vld [vmem:[#allocation114_spill] sm:$0xff] }
 0x23d   :  { %12067 = vmatmul.mubr.msk.f32.gmra.mrb[84].mxu1 %vm18952_vm6, %v26295_v62  ;;  %4918 = vmatmul.mubr.f32.gmra.mrb[40].mxu0 %v26868_v58  ;;  %v16553_v58 = vpack.c.bf16 %v25569_v61, %v25570_v36  ;;  %v26875_v36 = vld [vmem:[#allocation40_spill] sm:$0xff] }
 0x23e   :  { %12068 = vmatprep.mubr.msk.f32.mxu1 %vm18995_vm9, %v26295_v62  ;;  %16196 = vmatpush3.bf16.msra.mxu1 %v26870_v13 }
 0x23f   :  { %4924 = vmatprep.mubr.f32.mxu0 %v26871_v30  ;;  %16548 = vmatpush3.bf16.msra.mxu0 %v16547_v9  ;;  %v26876_v30 = vld [vmem:[#allocation122_spill] sm:$0xff] }
 0x240   :  { %16198 = vmatprep.subr.bf16.mxu1 %v26872_v27  ;;  %16550 = vmatprep.subr.bf16.mxu0 %v16549_v5  ;;  %v12375_v61 = vpop.f32.mrb[32].mxu1 }
 0x241   :  { %12069 = vmatmul.mubr.msk.f32.gmra.mrb[86].mxu1 %vm18990_vm8, %v26295_v62  ;;  %4927 = vmatmul.mubr.f32.gmra.mrb[42].mxu0 %v26874_v38  ;;  %v12376_v5 = vpop.f32.mrb[33].mxu1  ;;  %v16555_v38 = vpack.c.bf16 %v25573_v52, %v25574_v20  ;;  %v3488_v52 = vsub.f32 %v26881_v2, %v26882_v35 }
 0x242   :  { %12070 = vmatprep.mubr.msk.f32.mxu1 %vm18865_vm1, %v26295_v62  ;;  %16200 = vmatpush3.bf16.msra.mxu1 %v26875_v36  ;;  %v12377_v19 = vadd.f32 %v12376_v5, %v12375_v61  ;;  %v26877_v36 = vand.u32 4294901760, %v20640_v14  ;;  %v26883_v61 = vld [vmem:[#allocation16_spill] sm:$0xff]  ;;  %v26899_v14 = vand.u32 4294901760, %v20718_v18 }
 0x243   :  { %12111 = vmatprep.mubr.msk.f32.mxu0 %vm18865_vm1, %v26295_v62  ;;  %16552 = vmatpush3.bf16.msra.mxu0 %v16551_v28  ;;  %v26879_v28 = vand.u32 4294901760, %v20657_v23  ;;  %v26884_v5 = vand.u32 4294901760, %v26883_v61  ;;  %v26891_v23 = vld [vmem:[#allocation22_spill] sm:$0xff] }
 0x244   :  { %16202 = vmatprep.subr.bf16.mxu1 %v26876_v30  ;;  %16554 = vmatprep.subr.bf16.mxu0 %v16553_v58  ;;  %v16557_v21 = vpack.c.bf16 %v26878_v55, %v26877_v36  ;;  %v26880_v30 = vand.u32 4294901760, %v20662_v51  ;;  %v20883_v58 = vadd.f32 %v12377_v19, %v20688_v12  ;;  %v12378_v27 = vpop.f32.mrb[34].mxu1  ;;  %v26886_v19 = vld [vmem:[#allocation21_spill] sm:$0xff]  ;;  %v26892_v2 = vand.u32 4294901760, %v26891_v23 }
 0x245   :  { %v3495_v20 = vsub.f32 %v26883_v61, %v26884_v5  ;;  %v12379_v35 = vpop.f32.mrb[35].mxu1  ;;  %v26887_v5 = vand.u32 4294901760, %v26886_v19  ;;  %v26888_v36 = vld [vmem:[#allocation133_spill] sm:$0xff]  ;;  %v3489_v12 = vand.u32 4294901760, %v3488_v52 }
 0x246   :  { %v16559_v42 = vpack.c.bf16 %v26880_v30, %v26879_v28  ;;  %v20890_v28 = vld [vmem:[#allocation8 + $0x508] sm:$0xff]  ;;  %v26885_v30 = vld [vmem:[#allocation127_spill] sm:$0xff]  ;;  %v12380_v55 = vadd.f32 %v12379_v35, %v12378_v27  ;;  %v3383_v61 = vsub.f32 %v26891_v23, %v26892_v2  ;;  %v26894_v35 = vand.u32 4294901760, %v20698_v50 }
 0x247   :  { %16204 = vmatpush3.bf16.msra.mxu1 %v26885_v30  ;;  %v20899_v9 = vsub.f32 %v26886_v19, %v26887_v5  ;;  %16556 = vmatpush3.bf16.msra.mxu0 %v16555_v38  ;;  %v26890_v30 = vand.u32 4294901760, %v20683_v46  ;;  %v3496_v25 = vand.u32 4294901760, %v3495_v20  ;;  %v20911_v38 = vld [vmem:[#allocation8 + $0x480] sm:$0xff]  ;;  %v26897_v2 = vld [vmem:[#allocation143_spill] sm:$0xff]  ;;  %v26898_v19 = vand.u32 4294901760, %v20713_v22  ;;  %v20968_v22 = vld [vmem:[#allocation8 + $0x528] sm:$0xff] }
 0x248   :  { %16206 = vmatprep.subr.bf16.mxu1 %v26888_v36  ;;  %16558 = vmatprep.subr.bf16.mxu0 %v16557_v21  ;;  %v20913_v36 = vld [vmem:[#allocation8 + $0x488] sm:$0xff]  ;;  %v20916_v27 = vadd.f32 %v12380_v55, %v20723_v24  ;;  %v12381_v23 = vpop.f32.mrb[36].mxu1  ;;  %v26895_v21 = vld [vmem:[#allocation56_spill] sm:$0xff]  ;;  %v26900_v24 = vand.u32 4294901760, %v20728_v33  ;;  %v26901_v55 = vand.u32 4294901760, %v20733_v39  ;;  %v26908_v33 = vld [vmem:[#allocation71_spill] sm:$0xff] }
 0x249   :  { %v16561_v51 = vpack.c.bf16 %v26890_v30, %v26889_v41  ;;  %v26893_v41 = vand.u32 4294901760, %v20693_v16  ;;  %v26896_v52 = vand.u32 4294901760, %v26895_v21  ;;  %v12382_v30 = vpop.f32.mrb[37].mxu1  ;;  %v16565_v46 = vpack.c.bf16 %v26899_v14, %v26898_v19  ;;  %v20959_v19 = vld [vmem:[#allocation8 + $0x498] sm:$0xff] }
 0x24a   :  { %v16567_v16 = vpack.c.bf16 %v26901_v55, %v26900_v24  ;;  %v12383_v18 = vadd.f32 %v12382_v30, %v12381_v23  ;;  %v3384_v14 = vand.u32 4294901760, %v3383_v61  ;;  %v20945_v24 = vld [vmem:[#allocation8 + $0x490] sm:$0xff]  ;;  %v26905_v55 = vand.u32 4294901760, %v20888_v15 }
 0x24b   :  { %v16563_v5 = vpack.c.bf16 %v26894_v35, %v26893_v41  ;;  %v3502_v20 = vsub.f32 %v26895_v21, %v26896_v52  ;;  %16208 = vmatpush3.bf16.msra.mxu1 %v26897_v2  ;;  %v3377_v41 = vand.u32 4294901760, %v20899_v9  ;;  %v26902_v35 = vld [vmem:[#allocation60_spill] sm:$0xff]  ;;  %v20938_v21 = vld [vmem:[#allocation8 + $0x510] sm:$0xff]  ;;  %16560 = vmatpush3.bf16.msra.mxu0 %v16559_v42  ;;  %v16249_v9 = vpack.c.bf16 %v3496_v25, %v3489_v12 }
 0x24c   :  { %v26903_v50 = vand.u32 4294901760, %v26902_v35  ;;  %v20940_v52 = vld [vmem:[#allocation8 + $0x518] sm:$0xff]  ;;  %16562 = vmatprep.subr.bf16.mxu0 %v16561_v51  ;;  %v26909_v42 = vand.u32 4294901760, %v26908_v33  ;;  %v20962_v39 = vadd.f32 %v12383_v18, %v20750_v6  ;;  %v12384_v25 = vpop.f32.mrb[38].mxu1  ;;  %v26915_v6 = vld [vmem:[#allocation25_spill] sm:$0xff]  ;;  %v25618_v7 = vand.u32 4294901760, %v20959_v19 }
 0x24d   :  { %v26904_v2 = vld [vmem:[#allocation148_spill] sm:$0xff]  ;;  %v26910_v23 = vld [vmem:[#allocation75_spill] sm:$0xff]  ;;  %v3503_v51 = vand.u32 4294901760, %v3502_v20  ;;  %v26916_v20 = vand.u32 4294901760, %v26915_v6 }
 0x24e   :  { %v3509_v43 = vsub.f32 %v26902_v35, %v26903_v50  ;;  %16210 = vmatprep.subr.bf16.mxu1 %v26904_v2  ;;  %v26906_v50 = vand.u32 4294901760, %v20890_v28  ;;  %v3390_v2 = vsub.f32 %v26908_v33, %v26909_v42  ;;  %v26911_v61 = vand.u32 4294901760, %v26910_v23  ;;  %v26912_v33 = vld [vmem:[#allocation155_spill] sm:$0xff]  ;;  %v12385_v42 = vpop.f32.mrb[39].mxu1 }
 0x24f   :  { %16212 = vmatpush3.bf16.msra.mxu1 %v26912_v33  ;;  %v3523_v12 = vsub.f32 %v26915_v6, %v26916_v20  ;;  %16564 = vmatpush3.bf16.msra.mxu0 %v16563_v5  ;;  %v12386_v4 = vadd.f32 %v12385_v42, %v12384_v25  ;;  %v26919_v33 = vand.u32 4294901760, %v26918_v40  ;;  %v16251_v25 = vpack.c.bf16 %v3384_v14, %v3377_v41  ;;  %v20991_v42 = vld [vmem:[#allocation8 + $0x4a0] sm:$0xff]  ;;  %v20993_v6 = vld [vmem:[#allocation8 + $0x4a8] sm:$0xff] }
 0x250   :  { %v20951_v35 = vpack.c.bf16 %v26906_v50, %v26905_v55  ;;  %v3397_v30 = vsub.f32 %v26910_v23, %v26911_v61  ;;  %v20966_v50 = vld [vmem:[#allocation8 + $0x520] sm:$0xff]  ;;  %v3510_v45 = vand.u32 4294901760, %v3509_v43  ;;  %v26917_v55 = vld [vmem:[#allocation158_spill] sm:$0xff]  ;;  %v26921_v23 = vand.u32 4294901760, %v26920_v34  ;;  %16566 = vmatprep.subr.bf16.mxu0 %v16565_v46 }
 0x251   :  { %v26913_v61 = vld [vmem:[#allocation24_spill] sm:$0xff]  ;;  %16214 = vmatprep.subr.bf16.mxu1 %v26917_v55  ;;  %v3404_v43 = vsub.f32 %v26918_v40, %v26919_v33  ;;  %v20989_v55 = vadd.f32 %v12386_v4, %v20765_v26  ;;  %v26922_v40 = vld [vmem:[#allocation35_spill] sm:$0xff]  ;;  %v26927_v4 = vand.u32 4294901760, %v20913_v36  ;;  %v26929_v41 = vand.u32 4294901760, %v20938_v21 }
 0x252   :  { %26907 = vst [vmem:[#allocation151_spill] sm:$0xff] %v20951_v35  ;;  %v26914_v1 = vand.u32 4294901760, %v26913_v61  ;;  %v3411_v29 = vsub.f32 %v26920_v34, %v26921_v23  ;;  %v26923_v20 = vand.u32 4294901760, %v26922_v40  ;;  %v26924_v34 = vld [vmem:[#allocation36_spill] sm:$0xff]  ;;  %v26930_v14 = vand.u32 4294901760, %v20940_v52 }
 0x253   :  { %v26925_v46 = vand.u32 4294901760, %v26924_v34  ;;  %16216 = vmatpush3.bf16.msra.mxu1 %v26736_v8  ;;  %16568 = vmatpush3.bf16.msra.mxu0 %v16567_v16  ;;  %v16253_v8 = vpack.c.bf16 %v3510_v45, %v3503_v51  ;;  %v26941_v45 = vld [vmem:[#allocation125_spill] sm:$0xff]  ;;  %v26943_v16 = vld [vmem:[#allocation126_spill] sm:$0xff] }
 0x254   :  { %v3516_v18 = vsub.f32 %v26913_v61, %v26914_v1  ;;  %v3391_v1 = vand.u32 4294901760, %v3390_v2  ;;  %v3398_v61 = vand.u32 4294901760, %v3397_v30  ;;  %v3530_v33 = vsub.f32 %v26922_v40, %v26923_v20  ;;  %v21014_v20 = vld [vmem:[#allocation8 + $0x530] sm:$0xff]  ;;  %16250 = vmatprep.subr.bf16.mxu1 %v16249_v9  ;;  %16602 = vmatprep.subr.bf16.mxu0 %v20951_v35  ;;  %v21070_v35 = vld [vmem:[#allocation8 + $0x540] sm:$0xff] }
 0x255   :  { %v3537_v2 = vsub.f32 %v26924_v34, %v26925_v46  ;;  %v26926_v30 = vand.u32 4294901760, %v20911_v38  ;;  %v21012_v23 = vpack.c.bf16 %v26930_v14, %v26929_v41  ;;  %v3524_v40 = vand.u32 4294901760, %v3523_v12 }
 0x256   :  { %v3517_v5 = vand.u32 4294901760, %v3516_v18  ;;  %v26932_v34 = vand.u32 4294901760, %v20945_v24  ;;  %v16255_v41 = vpack.c.bf16 %v3398_v61, %v3391_v1  ;;  %v26934_v12 = vand.u32 4294901760, %v20966_v50  ;;  %12071 = vmatmul.mubr.msk.f32.vlgmr.msra.gmra.mrb[88].mxu1 %vm18885_vm3, %v26295_v62  ;;  %12112 = vmatmul.mubr.msk.f32.vlgmr.msra.gmra.mrb[44].mxu0 %vm18885_vm3, %v26295_v62  ;;  %v26937_v61 = vld [vmem:[#allocation49_spill] sm:$0xff] }
 0x257   :  { %v21006_v26 = vpack.c.bf16 %v26927_v4, %v26926_v30  ;;  %26931 = vst [vmem:[#allocation173_spill] sm:$0xff] %v21012_v23  ;;  %v3405_v30 = vand.u32 4294901760, %v3404_v43  ;;  %v3412_v4 = vand.u32 4294901760, %v3411_v29  ;;  %v26935_v18 = vand.u32 4294901760, %v20968_v22  ;;  %12072 = vmatprep.mubr.msk.f32.mxu1 %vm18915_vm5, %v26295_v62  ;;  %v21052_v43 = vld [vmem:[#allocation8 + $0x4b8] sm:$0xff]  ;;  %16252 = vmatpush3.bf16.msra.mxu1 %v16251_v25 }
 0x258   :  { %v21022_v46 = vpack.c.bf16 %v25618_v7, %v26932_v34  ;;  %v3531_v9 = vand.u32 4294901760, %v3530_v33  ;;  %v3538_v51 = vand.u32 4294901760, %v3537_v2  ;;  %v16257_v1 = vpack.c.bf16 %v3524_v40, %v3517_v5  ;;  %v21050_v7 = vld [vmem:[#allocation8 + $0x4b0] sm:$0xff]  ;;  %12113 = vmatprep.mubr.msk.f32.mxu0 %vm18915_vm5, %v26295_v62  ;;  %16254 = vmatprep.subr.bf16.mxu1 %v16253_v8 }
 0x259   :  { %26928 = vst [vmem:[#allocation152_spill] sm:$0xff] %v21006_v26  ;;  %v21029_v14 = vpack.c.bf16 %v26935_v18, %v26934_v12  ;;  %v26938_v34 = vand.u32 4294901760, %v26937_v61  ;;  %v26939_v18 = vld [vmem:[#allocation51_spill] sm:$0xff]  ;;  %v16259_v29 = vpack.c.bf16 %v3412_v4, %v3405_v30  ;;  %v26942_v5 = vand.u32 4294901760, %v26941_v45  ;;  %16604 = vmatpush3.bf16.msra.mxu0 %v21006_v26  ;;  %v21072_v30 = vld [vmem:[#allocation8 + $0x548] sm:$0xff] }
 0x25a   :  { %26933 = vst [vmem:[#allocation176_spill] sm:$0xff] %v21022_v46  ;;  %v26940_v33 = vand.u32 4294901760, %v26939_v18  ;;  %v26946_v25 = vand.u32 4294901760, %v20993_v6  ;;  %v26948_v4 = vld [vmem:[#allocation131_spill] sm:$0xff]  ;;  %12073 = vmatmul.mubr.msk.f32.gmra.mrb[90].mxu1 %vm18910_vm4, %v26295_v62  ;;  %16606 = vmatprep.subr.bf16.mxu0 %v21012_v23  ;;  %v16261_v8 = vpack.c.bf16 %v3538_v51, %v3531_v9  ;;  %v26970_v60 = vand.u32 4294901760, %v21052_v43 }
 0x25b   :  { %26936 = vst [vmem:[#allocation154_spill] sm:$0xff] %v21029_v14  ;;  %v3418_v12 = vsub.f32 %v26937_v61, %v26938_v34  ;;  %v3544_v40 = vsub.f32 %v26941_v45, %v26942_v5  ;;  %v26944_v61 = vand.u32 4294901760, %v26943_v16  ;;  %v26949_v3 = vand.u32 4294901760, %v26948_v4  ;;  %v26950_v5 = vld [vmem:[#allocation132_spill] sm:$0xff]  ;;  %12114 = vmatmul.mubr.msk.f32.gmra.mrb[46].mxu0 %vm18910_vm4, %v26295_v62  ;;  %12074 = vmatprep.mubr.msk.f32.mxu1 %vm18957_vm7, %v26295_v62  ;;  %v26957_v26 = vld [vmem:[#allocation139_spill] sm:$0xff] }
 0x25c   :  { %v3425_v2 = vsub.f32 %v26939_v18, %v26940_v33  ;;  %v26945_v18 = vand.u32 4294901760, %v20991_v42  ;;  %v26951_v63 = vand.u32 4294901760, %v26950_v5  ;;  %16256 = vmatpush3.bf16.msra.mxu1 %v16255_v41  ;;  %12115 = vmatprep.mubr.msk.f32.mxu0 %vm18957_vm7, %v26295_v62  ;;  %v21120_v41 = vld [vmem:[#allocation8 + $0x4d0] sm:$0xff] }
 0x25d   :  { %v3551_v34 = vsub.f32 %v26943_v16, %v26944_v61  ;;  %v3432_v45 = vsub.f32 %v26948_v4, %v26949_v3  ;;  %v26952_v61 = vand.u32 4294901760, %v21014_v20  ;;  %v21092_v4 = vld [vmem:[#allocation8 + $0x4c0] sm:$0xff]  ;;  %v3419_v9 = vand.u32 4294901760, %v3418_v12  ;;  %16608 = vmatpush3.bf16.msra.mxu0 %v21022_v46  ;;  %16258 = vmatprep.subr.bf16.mxu1 %v16257_v1  ;;  %26959 = vst [vmem:[#allocation160_spill] sm:$0xff] %v21120_v41 }
 0x25e   :  { %v21068_v33 = vpack.c.bf16 %v26946_v25, %v26945_v18  ;;  %v3439_v16 = vsub.f32 %v26950_v5, %v26951_v63  ;;  %v26953_v18 = vand.u32 4294901760, %v21016_v49  ;;  %v21094_v63 = vld [vmem:[#allocation8 + $0x4c8] sm:$0xff]  ;;  %v3426_v51 = vand.u32 4294901760, %v3425_v2  ;;  %12075 = vmatmul.mubr.msk.f32.gmra.mrb[92].mxu1 %vm18952_vm6, %v26295_v62  ;;  %16610 = vmatprep.subr.bf16.mxu0 %v21029_v14 }
 0x25f   :  { %v26955_v5 = vld [vmem:[#allocation138_spill] sm:$0xff]  ;;  %v26958_v3 = vand.u32 4294901760, %v26957_v26  ;;  %v3545_v44 = vand.u32 4294901760, %v3544_v40  ;;  %v3552_v12 = vand.u32 4294901760, %v3551_v34  ;;  %12116 = vmatmul.mubr.msk.f32.gmra.mrb[48].mxu0 %vm18952_vm6, %v26295_v62  ;;  %12076 = vmatprep.mubr.msk.f32.mxu1 %vm18995_vm9, %v26295_v62  ;;  %v26965_v14 = vld [vmem:[#allocation169_spill] sm:$0xff]  ;;  %v26985_v37 = vand.u32 4294901760, %v21120_v41 }
 0x260   :  { %26947 = vst [vmem:[#allocation156_spill] sm:$0xff] %v21068_v33  ;;  %v21088_v25 = vpack.c.bf16 %v26953_v18, %v26952_v61  ;;  %v26956_v61 = vand.u32 4294901760, %v26955_v5  ;;  %v26961_v34 = vld [vmem:[#allocation146_spill] sm:$0xff]  ;;  %v26966_v1 = vand.u32 4294901760, %v26965_v14  ;;  %16260 = vmatpush3.bf16.msra.mxu1 %v16259_v29  ;;  %12117 = vmatprep.mubr.msk.f32.mxu0 %vm18995_vm9, %v26295_v62  ;;  %v26972_v29 = vand.u32 4294901760, %v21070_v35 }
 0x261   :  { %v3565_v23 = vsub.f32 %v26957_v26, %v26958_v3  ;;  %v3440_v26 = vand.u32 4294901760, %v3439_v16  ;;  %v26963_v3 = vld [vmem:[#allocation168_spill] sm:$0xff]  ;;  %16612 = vmatpush3.bf16.msra.mxu0 %v21068_v33  ;;  %16262 = vmatprep.subr.bf16.mxu1 %v16261_v8  ;;  %v21241_v41 = vld [vmem:[#allocation8 + $0x4f0] sm:$0xff] }
 0x262   :  { %26954 = vst [vmem:[#allocation159_spill] sm:$0xff] %v21088_v25  ;;  %v3558_v18 = vsub.f32 %v26955_v5, %v26956_v61  ;;  %v3433_v5 = vand.u32 4294901760, %v3432_v45  ;;  %v26962_v45 = vand.u32 4294901760, %v26961_v34  ;;  %v26964_v61 = vand.u32 4294901760, %v26963_v3  ;;  %12077 = vmatmul.mubr.msk.f32.gmra.mrb[94].mxu1 %vm18990_vm8, %v26295_v62  ;;  %16614 = vmatprep.subr.bf16.mxu0 %v21088_v25  ;;  %v26984_v25 = vld [vmem:[#allocation44_spill] sm:$0xff]  ;;  %v14707_v33 = vpop.f32.mrb[0].mxu0 }
 0x263   :  { %v3566_v40 = vand.u32 4294901760, %v3565_v23  ;;  %v3572_v46 = vsub.f32 %v26965_v14, %v26966_v1  ;;  %v26973_v1 = vand.u32 4294901760, %v21072_v30  ;;  %12118 = vmatmul.mubr.msk.f32.gmra.mrb[50].mxu0 %vm18990_vm8, %v26295_v62  ;;  %12078 = vmatprep.mubr.msk.f32.mxu1 %vm19378_vm13, %v26295_v62  ;;  %v21193_v23 = vld [vmem:[#allocation8 + $0x568] sm:$0xff]  ;;  %v2066_v47 = vpop.f32.mrb[1].mxu0 }
 0x264   :  { %v3446_v16 = vsub.f32 %v26961_v34, %v26962_v45  ;;  %v3453_v0 = vsub.f32 %v26963_v3, %v26964_v61  ;;  %v3559_v2 = vand.u32 4294901760, %v3558_v18  ;;  %v26968_v34 = vand.u32 4294901760, %v26967_v48  ;;  %5488 = vmatprep.mubr.f32.mxu0 %v26984_v25 }
 0x265   :  { %v16263_v3 = vpack.c.bf16 %v3426_v51, %v3419_v9  ;;  %v26969_v61 = vand.u32 4294901760, %v21050_v7  ;;  %v16267_v9 = vpack.c.bf16 %v3440_v26, %v3433_v5  ;;  %v26976_v51 = vand.u32 4294901760, %v21094_v63  ;;  %v12419_v26 = vpop.f32.mrb[40].mxu1 }
 0x266   :  { %v3579_v45 = vsub.f32 %v26967_v48, %v26968_v34  ;;  %v16265_v48 = vpack.c.bf16 %v3552_v12, %v3545_v44  ;;  %v21164_v34 = vpack.c.bf16 %v26973_v1, %v26972_v29  ;;  %v3447_v44 = vand.u32 4294901760, %v3446_v16  ;;  %v12420_v13 = vpop.f32.mrb[41].mxu1 }
 0x267   :  { %v21155_v18 = vpack.c.bf16 %v26970_v60, %v26969_v61  ;;  %v26975_v60 = vand.u32 4294901760, %v21092_v4  ;;  %v3454_v8 = vand.u32 4294901760, %v3453_v0  ;;  %v26978_v12 = vlaneseq  ;;  %16264 = vmatpush3.bf16.msra.mxu1 %v16263_v3  ;;  %v21210_v3 = vld [vmem:[#allocation8 + $0x4e8] sm:$0xff] }
 0x268   :  { %26974 = vst [vmem:[#allocation164_spill] sm:$0xff] %v21164_v34  ;;  %v16269_v29 = vpack.c.bf16 %v3566_v40, %v3559_v2  ;;  %v26981_v1 = vand.u32 4294901760, %v21108_v31  ;;  %v3573_v0 = vand.u32 4294901760, %v3572_v46  ;;  %v3580_v16 = vand.u32 4294901760, %v3579_v45  ;;  %v26990_v45 = vld [vmem:[#allocation141_spill] sm:$0xff]  ;;  %16266 = vmatprep.subr.bf16.mxu1 %v16265_v48 }
 0x269   :  { %26971 = vst [vmem:[#allocation162_spill] sm:$0xff] %v21155_v18  ;;  %v21174_v61 = vpack.c.bf16 %v26976_v51, %v26975_v60  ;;  %v21177_v14 = vshrl.u32 %v26978_v12, 7  ;;  %v26982_v60 = vand.u32 4294901760, %v21110_v10  ;;  %v21191_v12 = vld [vmem:[#allocation8 + $0x560] sm:$0xff]  ;;  %v26986_v2 = vand.u32 4294901760, %v21122_v57  ;;  %16616 = vmatpush3.bf16.msra.mxu0 %v21155_v18 }
 0x26a   :  { %v12421_v25 = vadd.f32 %v12420_v13, %v12419_v26  ;;  %16618 = vmatprep.subr.bf16.mxu0 %v21164_v34  ;;  %v12422_v26 = vpop.f32.mrb[42].mxu1  ;;  %v16273_v18 = vpack.c.bf16 %v3580_v16, %v3573_v0  ;;  %v26997_v34 = vld [vmem:[#allocation170_spill] sm:$0xff] }
 0x26b   :  { %26977 = vst [vmem:[#allocation43_spill] sm:$0xff] %v21174_v61  ;;  %26979 = vst [vmem:[#allocation92_spill] sm:$0xff] %v21177_v14  ;;  %v21189_v51 = vpack.c.bf16 %v26982_v60, %v26981_v1  ;;  %v21200_v40 = vpack.c.bf16 %v26986_v2, %v26985_v37  ;;  %v26989_v1 = vand.u32 4294901760, %v26988_v56  ;;  %v26991_v60 = vand.u32 4294901760, %v26990_v45  ;;  %16268 = vmatpush3.bf16.msra.mxu1 %v16267_v9 }
 0x26c   :  { %v26993_v37 = vand.u32 4294901760, %v26992_v32  ;;  %v1294_v13 = vadd.f32 %v12421_v25, %v20883_v58  ;;  %v26998_v48 = vand.u32 4294901760, %v26997_v34  ;;  %v26999_v25 = vld [vmem:[#allocation171_spill] sm:$0xff]  ;;  %16270 = vmatprep.subr.bf16.mxu1 %v16269_v29 }
 0x26d   :  { %26983 = vst [vmem:[#allocation46_spill] sm:$0xff] %v21189_v51  ;;  %26987 = vst [vmem:[#allocation100_spill] sm:$0xff] %v21200_v40  ;;  %v3460_v46 = vsub.f32 %v26988_v56, %v26989_v1  ;;  %v3467_v17 = vsub.f32 %v26990_v45, %v26991_v60  ;;  %v3593_v56 = vsub.f32 %v26994_v53, %v26995_v54  ;;  %v21221_v45 = vadd.s32 8, %v21177_v14  ;;  %v21230_v53 = vld [vmem:[#allocation8 + $0x578] sm:$0xff]  ;;  %v21232_v54 = vpop.f32.mrb[2].mxu0 }
 0x26e   :  { %v3586_v2 = vsub.f32 %v26992_v32, %v26993_v37  ;;  %v16271_v1 = vpack.c.bf16 %v3454_v8, %v3447_v44  ;;  %v12423_v44 = vpop.f32.mrb[43].mxu1  ;;  %v3474_v58 = vsub.f32 %v26997_v34, %v26998_v48  ;;  %v27000_v0 = vand.u32 4294901760, %v26999_v25  ;;  %16620 = vmatpush3.bf16.msra.mxu0 %v21174_v61  ;;  %v2078_v5 = vpop.f32.mrb[3].mxu0  ;;  %v21253_v29 = vld [vmem:[#allocation8 + $0x4f8] sm:$0xff] }
 0x26f   :  { %26996 = vst [vmem:[#allocation23_spill] sm:$0xff] %v21221_v45  ;;  %v3461_v8 = vand.u32 4294901760, %v3460_v46  ;;  %v3468_v60 = vand.u32 4294901760, %v3467_v17  ;;  %v17820_v37 = vadd.f32 %v2066_v47, %v1294_v13  ;;  %v12424_v32 = vadd.f32 %v12423_v44, %v12422_v26  ;;  %16622 = vmatprep.subr.bf16.mxu0 %v21189_v51 }
 0x270   :  { %v3481_v16 = vsub.f32 %v26999_v25, %v27000_v0  ;;  %v3587_v9 = vand.u32 4294901760, %v3586_v2  ;;  %v3594_v57 = vand.u32 4294901760, %v3593_v56  ;;  %v27001_v34 = vand.u32 4294901760, %v21191_v12  ;;  %16272 = vmatpush3.bf16.msra.mxu1 %v16271_v1 }
 0x271   :  { %v27002_v46 = vand.u32 4294901760, %v21193_v23  ;;  %v27004_v2 = vand.u32 4294901760, %v20888_v15  ;;  %v1301_v13 = vadd.f32 %v12424_v32, %v20916_v27  ;;  %v27005_v26 = vand.u32 4294901760, %v21208_v11  ;;  %16274 = vmatprep.subr.bf16.mxu1 %v16273_v18 }
 0x272   :  { %v27006_v44 = vand.u32 4294901760, %v21210_v3  ;;  %v3475_v47 = vand.u32 4294901760, %v3474_v58  ;;  %v3482_v17 = vand.u32 4294901760, %v3481_v16  ;;  %v25680_v51 = vand.u32 4294901760, %v21241_v41  ;;  %16624 = vmatpush3.bf16.msra.mxu0 %v21200_v40 }
 0x273   :  { %v21249_v48 = vpack.c.bf16 %v27002_v46, %v27001_v34  ;;  %v21258_v56 = vsub.f32 %v20888_v15, %v27004_v2  ;;  %v12425_v34 = vpop.f32.mrb[44].mxu1  ;;  %v16275_v46 = vpack.c.bf16 %v3468_v60, %v3461_v8  ;;  %v17819_v15 = vadd.f32 %v14707_v33, %v1301_v13 }
 0x274   :  { %v21265_v0 = vpack.c.bf16 %v27006_v44, %v27005_v26  ;;  %v12426_v25 = vpop.f32.mrb[45].mxu1  ;;  %v16277_v27 = vpack.c.bf16 %v3594_v57, %v3587_v9  ;;  %v25679_v32 = vand.u32 4294901760, %v21253_v29  ;;  %v27008_v61 = vand.u32 4294901760, %v20890_v28 }
 0x275   :  { %27003 = vst [vmem:[#allocation101_spill] sm:$0xff] %v21249_v48  ;;  %v12427_v2 = vadd.f32 %v12426_v25, %v12425_v34  ;;  %v27009_v1 = vand.u32 15, %v21221_v45  ;;  %16626 = vmatprep.subr.bf16.mxu0 %v21249_v48  ;;  %v27010_v60 = vand.u32 4294901760, %v21228_v59  ;;  %v27011_v8 = vand.u32 4294901760, %v21230_v53  ;;  %v12428_v16 = vpop.f32.mrb[46].mxu1  ;;  %16276 = vmatpush3.bf16.msra.mxu1 %v16275_v46 }
 0x276   :  { %27007 = vst [vmem:[#allocation61_spill] sm:$0xff] %v21265_v0  ;;  %v21273_v26 = vsub.f32 %v20890_v28, %v27008_v61  ;;  %v21285_v57 = vadd.s32 24, %v21177_v14  ;;  %v2089_v18 = vmax.f32 %v17819_v15, 0.0  ;;  %v27014_v28 = vand.u32 4294901760, %v20911_v38  ;;  %v12429_v13 = vpop.f32.mrb[47].mxu1  ;;  %16628 = vmatpush3.bf16.msra.mxu0 %v21265_v0  ;;  %16278 = vmatprep.subr.bf16.mxu1 %v16277_v27  ;;  %v27080_v0 = vld [vmem:[#allocation80_spill] sm:$0xff] }
 0x277   :  { %vm2093_vm8 = vcmp.lt.s32.totalorder %v27009_v1, 10  ;;  %v21282_v33 = vpack.c.bf16 %v27011_v8, %v27010_v60  ;;  %v1308_v58 = vadd.f32 %v12427_v2, %v20962_v39  ;;  %v2088_v9 = vmax.f32 %v17820_v37, 0.0 }
 0x278   :  { %27013 = vst [vmem:[#allocation76_spill] sm:$0xff] %v21285_v57  ;;  %v21291_v61 = vsub.f32 %v20911_v38, %v27014_v28  ;;  %v16279_v25 = vpack.c.bf16 %v3482_v17, %v3475_v47  ;;  %v2097_v44 = vsel %vm2093_vm8, %v2089_v18, 0.0  ;;  %v21298_v39 = vpack.c.bf16 %v25679_v32, %v25680_v51  ;;  %v27065_v51 = vld [vmem:[#allocation32_spill] sm:$0xff] }
 0x279   :  { %27012 = vst [vmem:[#allocation109_spill] sm:$0xff] %v21282_v33  ;;  %v17822_v34 = vadd.f32 %v2078_v5, %v1308_v58  ;;  %v12430_v15 = vadd.f32 %v12429_v13, %v12428_v16  ;;  %v27016_v2 = vand.u32 4294901760, %v20913_v36  ;;  %v2100_v37 = vmax.f32 %v2088_v9, %v2097_v44  ;;  %16630 = vmatprep.subr.bf16.mxu0 %v21282_v33  ;;  %v27107_v13 = vld [vmem:[#allocation161_spill] sm:$0xff] }
 0x27a   :  { %27015 = vst [vmem:[#allocation110_spill] sm:$0xff] %v21298_v39  ;;  %v25678_v17 = vand.u32 15, %v21285_v57  ;;  %v16665_v5 = vpack.c.bf16 %v21273_v26, %v21258_v56  ;;  %v27017_v47 = vand.u32 4294901760, %v20938_v21  ;;  %v27018_v27 = vand.u32 4294901760, %v20940_v52  ;;  %16280 = vmatpush3.bf16.msra.mxu1 %v16279_v25  ;;  %16632 = vmatpush3.bf16.msra.mxu0 %v21298_v39  ;;  %v27072_v57 = vld [vmem:[#allocation41_spill] sm:$0xff] }
 0x27b   :  { %v21303_v38 = vsub.f32 %v20913_v36, %v27016_v2  ;;  %v1315_v36 = vadd.f32 %v12430_v15, %v20989_v55  ;;  %v2101_v60 = vrot.slane %v2100_v37, 4  ;;  %v27019_v8 = vand.u32 4294901760, %v20945_v24  ;;  %v27029_v2 = vld [vmem:[#allocation97_spill] sm:$0xff] }
 0x27c   :  { %v21312_v46 = vsub.f32 %v20938_v21, %v27017_v47  ;;  %v21317_v1 = vsub.f32 %v20940_v52, %v27018_v27  ;;  %v27021_v21 = vld [vmem:[#allocation48_spill] sm:$0xff]  ;;  %v27022_v16 = vand.u32 4294901760, %v20959_v19  ;;  %vm2095_vm8 = vcmp.lt.s32.totalorder %v25678_v17, 10  ;;  %16666 = vmatprep.subr.bf16.mxu0 %v16665_v5  ;;  %v27033_v47 = vld [vmem:[#allocation19_spill] sm:$0xff]  ;;  %v27034_v27 = vld [vmem:[#allocation142_spill] sm:$0xff] }
 0x27d   :  { %v21323_v18 = vsub.f32 %v20945_v24, %v27019_v8  ;;  %v17821_v58 = vadd.f32 %v21232_v54, %v1315_v36  ;;  %16314 = vmatprep.subr.bf16.mxu1 %v27021_v21  ;;  %v2102_v28 = vmax.f32 %v2100_v37, %v2101_v60  ;;  %v16667_v24 = vpack.c.bf16 %v21303_v38, %v21291_v61 }
 0x27e   :  { %v21331_v52 = vsub.f32 %v20959_v19, %v27022_v16  ;;  %v27024_v55 = vand.u32 4294901760, %v20966_v50  ;;  %v27026_v54 = vand.u32 4294901760, %v20968_v22  ;;  %12079 = vmatmul.mubr.msk.f32.vlgmr.msra.gmra.mrb[96].mxu1 %vm18860_vm0, %v26295_v62  ;;  %v16669_v44 = vpack.c.bf16 %v21317_v1, %v21312_v46  ;;  %5494 = vmatmul.mubr.f32.vlgmr.msra.gmra.mrb[52].mxu0 %v27029_v2  ;;  %v27043_v2 = vld [vmem:[#allocation108_spill] sm:$0xff] }
 0x27f   :  { %27020 = vst [vmem:[#allocation26_spill] sm:$0xff] %v21323_v18  ;;  %v2091_v19 = vmax.f32 %v17821_v58, 0.0  ;;  %v2090_v15 = vmax.f32 %v17822_v34, 0.0  ;;  %12080 = vmatprep.mubr.msk.f32.mxu1 %vm19373_vm12, %v26295_v62  ;;  %16316 = vmatpush3.bf16.msra.mxu1 %v27033_v47  ;;  %v27035_v36 = vand.u32 4294901760, %v20993_v6  ;;  %v2103_v60 = vrot.slane %v2102_v28, 2  ;;  %v27037_v58 = vld [vmem:[#allocation55_spill] sm:$0xff] }
 0x280   :  { %27023 = vst [vmem:[#allocation113_spill] sm:$0xff] %v21331_v52  ;;  %v21340_v9 = vsub.f32 %v20966_v50, %v27024_v55  ;;  %v21345_v25 = vsub.f32 %v20968_v22, %v27026_v54  ;;  %v27031_v50 = vand.u32 4294901760, %v20991_v42  ;;  %5503 = vmatprep.mubr.f32.mxu0 %v27034_v27  ;;  %16668 = vmatpush3.bf16.msra.mxu0 %v16667_v24  ;;  %v27040_v54 = vand.u32 4294901760, %v21016_v49 }
 0x281   :  { %v2099_v5 = vsel %vm2095_vm8, %v2091_v19, 0.0  ;;  %v21366_v34 = vsub.f32 %v20993_v6, %v27035_v36  ;;  %16318 = vmatprep.subr.bf16.mxu1 %v27037_v58  ;;  %v16671_v16 = vpack.c.bf16 %v21331_v52, %v21323_v18  ;;  %16670 = vmatprep.subr.bf16.mxu0 %v16669_v44  ;;  %v27049_v44 = vld [vmem:[#allocation70_spill] sm:$0xff]  ;;  %vm25705_vm8 = vcmask 1040384  }
 0x282   :  { %27025 = vst [vmem:[#allocation31_spill] sm:$0xff] %v21340_v9  ;;  %27027 = vst [vmem:[#allocation114_spill] sm:$0xff] %v21345_v25  ;;  %v21359_v22 = vsub.f32 %v20991_v42, %v27031_v50  ;;  %v2107_v8 = vmax.f32 %v2090_v15, %v2099_v5  ;;  %v27038_v42 = vand.u32 4294901760, %v21014_v20  ;;  %v21379_v19 = vsub.f32 %v21016_v49, %v27040_v54  ;;  %v27050_v36 = vld [vmem:[#allocation166_spill] sm:$0xff] }
 0x283   :  { %27036 = vst [vmem:[#allocation122_spill] sm:$0xff] %v21366_v34  ;;  %12081 = vmatmul.mubr.msk.f32.gmra.mrb[98].mxu1 %vm18880_vm2, %v26295_v62  ;;  %v16673_v24 = vpack.c.bf16 %v21345_v25, %v21340_v9  ;;  %5509 = vmatmul.mubr.f32.gmra.mrb[54].mxu0 %v27043_v2  ;;  %v27047_v5 = vand.u32 4294901760, %v21052_v43  ;;  %v27051_v2 = vld [vmem:[#allocation102_spill] sm:$0xff]  ;;  %v12847_v48 = vpop.f32.mrb[4].mxu0 }
 0x284   :  { %27032 = vst [vmem:[#allocation40_spill] sm:$0xff] %v21359_v22  ;;  %v21374_v55 = vsub.f32 %v21014_v20, %v27038_v42  ;;  %27041 = vst [vmem:[#allocation16_spill] sm:$0xff] %v21379_v19  ;;  %v2108_v15 = vrot.slane %v2107_v8, 4  ;;  %12082 = vmatprep.mubr.msk.f32.mxu1 %vm19383_vm14, %v26295_v62  ;;  %v27045_v20 = vand.u32 4294901760, %v21050_v7  ;;  %16320 = vmatpush3.bf16.msra.mxu1 %v27049_v44 }
 0x285   :  { %v21398_v27 = vsub.f32 %v21052_v43, %v27047_v5  ;;  %5518 = vmatprep.mubr.f32.mxu0 %v27050_v36  ;;  %v2104_v42 = vmax.f32 %v2102_v28, %v2103_v60  ;;  %16672 = vmatpush3.bf16.msra.mxu0 %v16671_v16  ;;  %v16675_v17 = vpack.c.bf16 %v21366_v34, %v21359_v22  ;;  %v27054_v43 = vand.u32 4294901760, %v21072_v30  ;;  %v12848_v16 = vpop.f32.mrb[5].mxu0 }
 0x286   :  { %27039 = vst [vmem:[#allocation52_spill] sm:$0xff] %v21374_v55  ;;  %v21393_v49 = vsub.f32 %v21050_v7, %v27045_v20  ;;  %v2109_v54 = vmax.f32 %v2107_v8, %v2108_v15  ;;  %16322 = vmatprep.subr.bf16.mxu1 %v27051_v2  ;;  %v27052_v7 = vand.u32 4294901760, %v21070_v35  ;;  %16674 = vmatprep.subr.bf16.mxu0 %v16673_v24  ;;  %v27057_v8 = vld [vmem:[#allocation73_spill] sm:$0xff]  ;;  %v27061_v15 = vand.u32 4294901760, %v21094_v63 }
 0x287   :  { %27048 = vst [vmem:[#allocation21_spill] sm:$0xff] %v21398_v27  ;;  %v21413_v5 = vsub.f32 %v21072_v30, %v27054_v43  ;;  %12083 = vmatmul.mubr.msk.f32.gmra.mrb[100].mxu1 %vm19035_vm11, %v26295_v62  ;;  %v16677_v28 = vpack.c.bf16 %v21379_v19, %v21374_v55  ;;  %5524 = vmatmul.mubr.f32.gmra.mrb[56].mxu0 %v27057_v8  ;;  %v27063_v24 = vld [vmem:[#allocation29_spill] sm:$0xff]  ;;  %v27064_v43 = vld [vmem:[#allocation167_spill] sm:$0xff]  ;;  %v2105_v32 = vrot.slane %v2104_v42, 1 }
 0x288   :  { %27046 = vst [vmem:[#allocation127_spill] sm:$0xff] %v21393_v49  ;;  %v21408_v20 = vsub.f32 %v21070_v35, %v27052_v7  ;;  %v2110_v60 = vrot.slane %v2109_v54, 2  ;;  %12084 = vmatprep.mubr.msk.f32.mxu1 %vm19394_vm15, %v26295_v62  ;;  %v27059_v35 = vand.u32 4294901760, %v21092_v4  ;;  %v21432_v7 = vsub.f32 %v21094_v63, %v27061_v15  ;;  %16324 = vmatpush3.bf16.msra.mxu1 %v27063_v24 }
 0x289   :  { %27055 = vst [vmem:[#allocation22_spill] sm:$0xff] %v21413_v5  ;;  %5533 = vmatprep.mubr.f32.mxu0 %v27064_v43  ;;  %16676 = vmatpush3.bf16.msra.mxu0 %v16675_v17  ;;  %v16679_v14 = vpack.c.bf16 %v21398_v27, %v21393_v49  ;;  %v27068_v63 = vand.u32 4294901760, %v21110_v10  ;;  %v21483_v50 = vadd.f32 %v12848_v16, %v12847_v48  ;;  %v27093_v16 = vld [vmem:[#allocation137_spill] sm:$0xff] }
 0x28a   :  { %27053 = vst [vmem:[#allocation133_spill] sm:$0xff] %v21408_v20  ;;  %v21427_v30 = vsub.f32 %v21092_v4, %v27059_v35  ;;  %27062 = vst [vmem:[#allocation143_spill] sm:$0xff] %v21432_v7  ;;  %v2111_v8 = vmax.f32 %v2109_v54, %v2110_v60  ;;  %16326 = vmatprep.subr.bf16.mxu1 %v27065_v51  ;;  %v27066_v4 = vand.u32 4294901760, %v21108_v31  ;;  %16678 = vmatprep.subr.bf16.mxu0 %v16677_v28  ;;  %v27071_v60 = vld [vmem:[#allocation72_spill] sm:$0xff]  ;;  %v27079_v28 = vld [vmem:[#allocation47_spill] sm:$0xff] }
 0x28b   :  { %v21447_v15 = vsub.f32 %v21110_v10, %v27068_v63  ;;  %12085 = vmatmul.mubr.msk.f32.gmra.mrb[102].mxu1 %vm19030_vm10, %v26295_v62  ;;  %v16681_v17 = vpack.c.bf16 %v21413_v5, %v21408_v20  ;;  %5539 = vmatmul.mubr.f32.gmra.mrb[58].mxu0 %v27071_v60  ;;  %v27076_v10 = vld [vmem:[#allocation181_spill] sm:$0xff]  ;;  %27086 = vst [vmem:[#allocation25_spill] sm:$0xff] %v21483_v50  ;;  %v27102_v50 = vand.u32 4294901760, %v21253_v29 }
 0x28c   :  { %27060 = vst [vmem:[#allocation56_spill] sm:$0xff] %v21427_v30  ;;  %v21442_v35 = vsub.f32 %v21108_v31, %v27066_v4  ;;  %v2112_v54 = vrot.slane %v2111_v8, 1  ;;  %3889 = vmatprep.mubr.f32.mxu1 %v27072_v57  ;;  %v12583_v31 = vpop.f32.mrb[48].mxu1  ;;  %v27073_v4 = vld [vmem:[#allocation160_spill] sm:$0xff]  ;;  %v27077_v63 = vand.u32 4294901760, %v27076_v10  ;;  %16328 = vmatpush3.bf16.msra.mxu1 %v27079_v28  ;;  %v16683_v60 = vpack.c.bf16 %v21432_v7, %v21427_v30 }
 0x28d   :  { %27069 = vst [vmem:[#allocation148_spill] sm:$0xff] %v21447_v15  ;;  %v27074_v45 = vand.u32 4294901760, %v27073_v4  ;;  %5927 = vmatprep.mubr.f32.mxu0 %v27080_v0  ;;  %v12584_v40 = vpop.f32.mrb[49].mxu1  ;;  %v2106_v57 = vmax.f32 %v2104_v42, %v2105_v32  ;;  %16680 = vmatpush3.bf16.msra.mxu0 %v16679_v14  ;;  %v27084_v0 = vand.u32 4294901760, %v21193_v23  ;;  %v27088_v42 = vand.u32 4294901760, %v21208_v11 }
 0x28e   :  { %27067 = vst [vmem:[#allocation60_spill] sm:$0xff] %v21442_v35  ;;  %v21464_v33 = vsub.f32 %v27076_v10, %v27077_v63  ;;  %v2113_v43 = vmax.f32 %v2111_v8, %v2112_v54  ;;  %v27082_v10 = vand.u32 4294901760, %v21191_v12  ;;  %16682 = vmatprep.subr.bf16.mxu0 %v16681_v17  ;;  %v16685_v14 = vpack.c.bf16 %v21447_v15, %v21442_v35  ;;  %v12586_v32 = vpop.f32.mrb[50].mxu1  ;;  %v27090_v8 = vld [vmem:[#allocation130_spill] sm:$0xff]  ;;  %v12850_v54 = vpop.f32.mrb[6].mxu0 }
 0x28f   :  { %v21459_v39 = vsub.f32 %v27073_v4, %v27074_v45  ;;  %v27081_v45 = vld [vmem:[#allocation124_spill] sm:$0xff]  ;;  %v21471_v4 = vadd.f32 %v12584_v40, %v12583_v31  ;;  %v21481_v36 = vsub.f32 %v21193_v23, %v27084_v0  ;;  %v12587_v23 = vpop.f32.mrb[51].mxu1  ;;  %v27091_v17 = vand.u32 4294901760, %v21210_v3  ;;  %v12851_v31 = vpop.f32.mrb[7].mxu0 }
 0x290   :  { %27078 = vst [vmem:[#allocation75_spill] sm:$0xff] %v21464_v33  ;;  %16330 = vmatprep.subr.bf16.mxu1 %v27081_v45  ;;  %v21476_v63 = vsub.f32 %v21191_v12, %v27082_v10  ;;  %v21488_v40 = vsel %vm25705_vm8, %v2106_v57, %v2113_v43  ;;  %v21493_v12 = vsub.f32 %v21208_v11, %v27088_v42  ;;  %v27094_v11 = vand.u32 4294901760, %v21228_v59 }
 0x291   :  { %27075 = vst [vmem:[#allocation71_spill] sm:$0xff] %v21459_v39  ;;  %27085 = vst [vmem:[#allocation24_spill] sm:$0xff] %v21481_v36  ;;  %16332 = vmatpush3.bf16.msra.mxu1 %v27090_v8  ;;  %v21499_v48 = vsub.f32 %v21210_v3, %v27091_v17  ;;  %16684 = vmatpush3.bf16.msra.mxu0 %v16683_v60  ;;  %v16687_v57 = vpack.c.bf16 %v21464_v33, %v21459_v39  ;;  %v27096_v0 = vand.u32 4294901760, %v21230_v53  ;;  %v12589_v17 = vpop.f32.mrb[52].mxu1 }
 0x292   :  { %27083 = vst [vmem:[#allocation155_spill] sm:$0xff] %v21476_v63  ;;  %27087 = vst [vmem:[#allocation158_spill] sm:$0xff] %v21488_v40  ;;  %16334 = vmatprep.subr.bf16.mxu1 %v27093_v16  ;;  %v21504_v43 = vadd.f32 %v12587_v23, %v12586_v32  ;;  %v21509_v10 = vsub.f32 %v21228_v59, %v27094_v11  ;;  %16686 = vmatprep.subr.bf16.mxu0 %v16685_v14  ;;  %v27099_v32 = vand.u32 4294901760, %v21241_v41  ;;  %v27101_v40 = vld [vmem:[#allocation147_spill] sm:$0xff]  ;;  %v12853_v59 = vpop.f32.mrb[8].mxu0  ;;  %v12590_v11 = vpop.f32.mrb[53].mxu1 }
 0x293   :  { %27089 = vst [vmem:[#allocation28_spill] sm:$0xff] %v21493_v12  ;;  %27092 = vst [vmem:[#allocation30_spill] sm:$0xff] %v21499_v48  ;;  %v21514_v42 = vsub.f32 %v21230_v53, %v27096_v0  ;;  %v21516_v3 = vadd.f32 %v12851_v31, %v12850_v54  ;;  %v16689_v60 = vpack.c.bf16 %v21481_v36, %v21476_v63  ;;  %v27104_v14 = vld [vmem:[#allocation153_spill] sm:$0xff]  ;;  %v12854_v0 = vpop.f32.mrb[9].mxu0 }
 0x294   :  { %27095 = vst [vmem:[#allocation35_spill] sm:$0xff] %v21509_v10  ;;  %v21523_v23 = vsub.f32 %v21241_v41, %v27099_v32  ;;  %v21529_v53 = vsub.f32 %v21253_v29, %v27102_v50  ;;  %v16691_v54 = vpack.c.bf16 %v21499_v48, %v21493_v12  ;;  %v21534_v31 = vadd.f32 %v12590_v11, %v12589_v17  ;;  %v12592_v50 = vpop.f32.mrb[54].mxu1  ;;  %v12856_v6 = vpop.f32.mrb[10].mxu0 }
 0x295   :  { %27097 = vst [vmem:[#allocation36_spill] sm:$0xff] %v21514_v42  ;;  %27098 = vst [vmem:[#allocation49_spill] sm:$0xff] %v21516_v3  ;;  %16336 = vmatpush3.bf16.msra.mxu1 %v27101_v40  ;;  %16688 = vmatpush3.bf16.msra.mxu0 %v16687_v57  ;;  %v21536_v41 = vadd.f32 %v12854_v0, %v12853_v59  ;;  %v16693_v32 = vpack.c.bf16 %v21514_v42, %v21509_v10  ;;  %v25700_v3 = vand.u32 4294901760, %v21258_v56  ;;  %v27106_v57 = vld [vmem:[#allocation157_spill] sm:$0xff]  ;;  %v12593_v37 = vpop.f32.mrb[55].mxu1  ;;  %v12857_v59 = vpop.f32.mrb[11].mxu0 }
 0x296   :  { %27100 = vst [vmem:[#allocation51_spill] sm:$0xff] %v21523_v23  ;;  %27103 = vst [vmem:[#allocation125_spill] sm:$0xff] %v21529_v53  ;;  %16338 = vmatprep.subr.bf16.mxu1 %v27104_v14  ;;  %16690 = vmatprep.subr.bf16.mxu0 %v16689_v60  ;;  %v25695_v29 = vand.u32 4294901760, %v21273_v26  ;;  %v16695_v60 = vpack.c.bf16 %v21529_v53, %v21523_v23  ;;  %v21546_v17 = vadd.f32 %v12593_v37, %v12592_v50  ;;  %v27109_v14 = vld [vmem:[#allocation165_spill] sm:$0xff]  ;;  %v27110_v50 = vld [vmem:[#allocation91_spill] sm:$0xff] }
 0x297   :  { %27105 = vst [vmem:[#allocation126_spill] sm:$0xff] %v21536_v41  ;;  %v21548_v11 = vadd.f32 %v12857_v59, %v12856_v6  ;;  %v25699_v41 = vand.u32 4294901760, %v21291_v61  ;;  %v25702_v6 = vand.u32 4294901760, %v21323_v18 }
 0x298   :  { %v16729_v0 = vpack.c.bf16 %v25695_v29, %v25700_v3  ;;  %v27112_v29 = vld [vmem:[#allocation39_spill] sm:$0xff]  ;;  %v21584_v3 = vpop.permute.xlu1 %206 }
 0x299   :  { %16340 = vmatpush3.bf16.msra.mxu1 %v27106_v57  ;;  %16692 = vmatpush3.bf16.msra.mxu0 %v16691_v54  ;;  %27108 = vst [vmem:[#allocation131_spill] sm:$0xff] %v21548_v11  ;;  %v25696_v54 = vand.u32 4294901760, %v21303_v38  ;;  %v25697_v57 = vand.u32 4294901760, %v21317_v1 }
 0x29a   :  { %16342 = vmatprep.subr.bf16.mxu1 %v27107_v13  ;;  %16694 = vmatprep.subr.bf16.mxu0 %v16693_v32  ;;  %v25698_v13 = vand.u32 4294901760, %v21312_v46  ;;  %v25701_v32 = vand.u32 4294901760, %v21331_v52  ;;  %v27241_v52 = vld [vmem:[#allocation172_spill] sm:$0xff] }
 0x29b   :  { %v16731_v37 = vpack.c.bf16 %v25696_v54, %v25699_v41  ;;  %v27113_v54 = vld [vmem:[#allocation79_spill] sm:$0xff]  ;;  %v21597_v41 = vpop.permute.xlu0 %203  ;;  %v27242_v18 = vand.u32 4294901760, %v27241_v52 }
 0x29c   :  { %v16733_v59 = vpack.c.bf16 %v25697_v57, %v25698_v13  ;;  %v16735_v57 = vpack.c.bf16 %v25701_v32, %v25702_v6  ;;  %v25706_v13 = vand.u32 4294901760, %v21359_v22  ;;  %v27116_v32 = vld [vmem:[#allocation20_spill] sm:$0xff]  ;;  %v27117_v6 = vld [vmem:[#allocation81_spill] sm:$0xff]  ;;  %27118 = vst [vmem:[#allocation132_spill] sm:$0xff] %v21597_v41 }
 0x29d   :  { %16344 = vmatpush3.bf16.msra.mxu1 %v27109_v14  ;;  %16696 = vmatpush3.bf16.msra.mxu0 %v16695_v60  ;;  %v25704_v60 = vand.u32 4294901760, %v21340_v9 }
 0x29e   :  { %16378 = vmatprep.subr.bf16.mxu1 %v27021_v21  ;;  %16730 = vmatprep.subr.bf16.mxu0 %v16729_v0  ;;  %v25703_v21 = vand.u32 4294901760, %v21345_v25  ;;  %v27111_v0 = vld [vmem:[#allocation87_spill] sm:$0xff] }
 0x2a0   :  { %3893 = vmatmul.mubr.f32.vlgmr.msra.gmra.mrb[104].mxu1 %v27110_v50  ;;  %5930 = vmatmul.mubr.f32.vlgmr.msra.gmra.mrb[60].mxu0 %v27111_v0  ;;  %v27114_v0 = vld [vmem:[#allocation99_spill] sm:$0xff] }
 0x2a1   :  { %3900 = vmatprep.mubr.f32.mxu1 %v27112_v29  ;;  %16380 = vmatpush3.bf16.msra.mxu1 %v27033_v47  ;;  %v16737_v47 = vpack.c.bf16 %v25703_v21, %v25704_v60  ;;  %v25709_v60 = vand.u32 4294901760, %v21393_v49 }
 0x2a2   :  { %5936 = vmatprep.mubr.f32.mxu0 %v27113_v54  ;;  %16732 = vmatpush3.bf16.msra.mxu0 %v16731_v37  ;;  %v27115_v37 = vld [vmem:[#allocation93_spill] sm:$0xff]  ;;  %v27120_v54 = vld [vmem:[#allocation120_spill] sm:$0xff] }
 0x2a3   :  { %16382 = vmatprep.subr.bf16.mxu1 %v27037_v58  ;;  %16734 = vmatprep.subr.bf16.mxu0 %v16733_v59  ;;  %v25707_v58 = vand.u32 4294901760, %v21374_v55  ;;  %v27119_v59 = vand.u32 4294901760, %v21366_v34 }
 0x2a4   :  { %3904 = vmatmul.mubr.f32.gmra.mrb[106].mxu1 %v27114_v0  ;;  %5939 = vmatmul.mubr.f32.gmra.mrb[62].mxu0 %v27115_v37  ;;  %v25708_v37 = vand.u32 4294901760, %v21398_v27  ;;  %v27123_v0 = vld [vmem:[#allocation45_spill] sm:$0xff] }
 0x2a5   :  { %3911 = vmatprep.mubr.f32.mxu1 %v27116_v32  ;;  %16384 = vmatpush3.bf16.msra.mxu1 %v27049_v44  ;;  %v16739_v21 = vpack.c.bf16 %v27119_v59, %v25706_v13  ;;  %v27121_v44 = vand.u32 4294901760, %v21379_v19  ;;  %v27122_v32 = vld [vmem:[#allocation118_spill] sm:$0xff]  ;;  %v27124_v59 = vld [vmem:[#allocation83_spill] sm:$0xff]  ;;  %v21617_v13 = vpop.permute.xlu1 %212 }
 0x2a6   :  { %5945 = vmatprep.mubr.f32.mxu0 %v27117_v6  ;;  %16736 = vmatpush3.bf16.msra.mxu0 %v16735_v57  ;;  %v25712_v57 = vand.u32 4294901760, %v21408_v20  ;;  %vm27129_vm9 = vcmp.eq.s32.totalorder %v27124_v59, %v21597_v41 }
 0x2a7   :  { %16386 = vmatprep.subr.bf16.mxu1 %v27051_v2  ;;  %16738 = vmatprep.subr.bf16.mxu0 %v16737_v47  ;;  %v16741_v6 = vpack.c.bf16 %v27121_v44, %v25707_v58  ;;  %v27125_v47 = vld [vmem:[#allocation37_spill] sm:$0xff]  ;;  %v16743_v44 = vpack.c.bf16 %v25708_v37, %v25709_v60  ;;  %v21630_v2 = vld [vmem:[#allocation10 + $0x1] ss:$0 sm:$0xff]  ;;  %v27128_v60 = vmov 0.0   ;;  %v27133_v37 = vand.u32 4294901760, %v21432_v7 }
 0x2a8   :  { %3915 = vmatmul.mubr.f32.gmra.mrb[108].mxu1 %v27120_v54  ;;  %5948 = vmatmul.mubr.f32.gmra.mrb[64].mxu0 %v27122_v32  ;;  %v12012_v58 = vsel %vm27129_vm9, 1.0, %v27128_v60  ;;  %v21645_v32 = vpop.permute.xlu0 %209  ;;  %vm27134_vm9 = vcmp.eq.s32.totalorder %v27124_v59, %v21584_v3 }
 0x2a9   :  { %3922 = vmatprep.mubr.f32.mxu1 %v27123_v0  ;;  %16388 = vmatpush3.bf16.msra.mxu1 %v27063_v24  ;;  %v27126_v24 = vld [vmem:[#allocation121_spill] sm:$0xff]  ;;  %v21672_v29 = vsel %vm27134_vm9, 1.0, %v27128_v60  ;;  %v21674_v50 = vsub.f32 %v12012_v58, %v12012_v58  ;;  %vm25795_vm8 = vcmp.eq.s32.totalorder %v27124_v59, %v21645_v32  ;;  %v27140_v58 = vld [vmem:[#allocation179_spill] sm:$0xff]  ;;  %vm27142_vm9 = vcmp.eq.s32.totalorder %v27124_v59, %v21617_v13 }
 0x2aa   :  { %5954 = vmatprep.mubr.f32.mxu0 %v27125_v47  ;;  %16740 = vmatpush3.bf16.msra.mxu0 %v16739_v21  ;;  %v12935_v47 = vpop.f32.mrb[12].mxu0  ;;  %v27141_v7 = vand.u32 4294901760, %v27140_v58 }
 0x2ab   :  { %16390 = vmatprep.subr.bf16.mxu1 %v27065_v51  ;;  %16742 = vmatprep.subr.bf16.mxu0 %v16741_v6  ;;  %v27127_v51 = vand.u32 4294901760, %v21413_v5  ;;  %v27130_v6 = vld [vmem:[#allocation119_spill] sm:$0xff]  ;;  %v12936_v5 = vpop.f32.mrb[13].mxu0 }
 0x2ac   :  { %3926 = vmatmul.mubr.f32.gmra.mrb[110].mxu1 %v27126_v24  ;;  %5957 = vmatmul.mubr.f32.gmra.mrb[66].mxu0 %v27130_v6 }
 0x2ad   :  { %v16745_v21 = vpack.c.bf16 %v27127_v51, %v25712_v57  ;;  %12094 = vmatprep.mubr.msk.f32.mxu1 %vm19378_vm13, %v26295_v62  ;;  %v12627_v51 = vpop.f32.mrb[56].mxu1  ;;  %16392 = vmatpush3.bf16.msra.mxu1 %v27079_v28  ;;  %v2294_v57 = vadd.f32 %v21471_v4, %v21630_v2  ;;  %v27132_v28 = vand.u32 4294901760, %v21427_v30  ;;  %v21676_v4 = vadd.f32 %v12936_v5, %v12935_v47 }
 0x2ae   :  { %12135 = vmatprep.mubr.msk.f32.mxu0 %vm19378_vm13, %v26295_v62  ;;  %v12628_v0 = vpop.f32.mrb[57].mxu1  ;;  %16744 = vmatpush3.bf16.msra.mxu0 %v16743_v44  ;;  %v27137_v44 = vand.u32 4294901760, %v21447_v15  ;;  %v4637_v5 = vsub.f32 %v27140_v58, %v27141_v7  ;;  %v27147_v58 = vand.u32 4294901760, %v21493_v12 }
 0x2af   :  { %16394 = vmatprep.subr.bf16.mxu1 %v27081_v45  ;;  %v16747_v11 = vpack.c.bf16 %v27133_v37, %v27132_v28  ;;  %v12629_v24 = vadd.f32 %v12628_v0, %v12627_v51  ;;  %16746 = vmatprep.subr.bf16.mxu0 %v16745_v21  ;;  %27135 = vst [vmem:[#allocation138_spill] sm:$0xff] %v21676_v4  ;;  %v27136_v45 = vand.u32 4294901760, %v21442_v35  ;;  %v12630_v37 = vpop.f32.mrb[58].mxu1  ;;  %v27138_v51 = vld [vmem:[#allocation178_spill] sm:$0xff]  ;;  %v21696_v21 = vsel %vm27142_vm9, 1.0, %v27128_v60 }
 0x2b0   :  { %v27139_v28 = vand.u32 4294901760, %v27138_v51  ;;  %v27148_v4 = vand.u32 4294901760, %v21499_v48  ;;  %v27152_v48 = vld [vmem:[#allocation53_spill] sm:$0xff]  ;;  %v21760_v35 = vld [vmem:[#allocation8 + $0x590] sm:$0xff]  ;;  %vm27288_vm9 = vcmp.eq.s32.totalorder %v27124_v59, %v21597_v41 }
 0x2b1   :  { %v16749_v6 = vpack.c.bf16 %v27137_v44, %v27136_v45  ;;  %v21684_v0 = vadd.f32 %v12629_v24, %v2294_v57  ;;  %16396 = vmatpush3.bf16.msra.mxu1 %v27090_v8  ;;  %v27143_v57 = vand.u32 4294901760, %v21459_v39  ;;  %v27144_v24 = vand.u32 4294901760, %v21464_v33  ;;  %v12938_v45 = vpop.f32.mrb[14].mxu0  ;;  %v12631_v44 = vpop.f32.mrb[59].mxu1  ;;  %v21716_v39 = vld [vmem:[#allocation8 + $0x580] sm:$0xff] }
 0x2b2   :  { %v4630_v54 = vsub.f32 %v27138_v51, %v27139_v28  ;;  %v27145_v51 = vand.u32 4294901760, %v21476_v63  ;;  %v27146_v28 = vand.u32 4294901760, %v21481_v36  ;;  %v16755_v15 = vpack.c.bf16 %v27148_v4, %v27147_v58  ;;  %16748 = vmatpush3.bf16.msra.mxu0 %v16747_v11  ;;  %16398 = vmatprep.subr.bf16.mxu1 %v27093_v16  ;;  %v27150_v11 = vld [vmem:[#allocation82_spill] sm:$0xff] }
 0x2b3   :  { %v16751_v47 = vpack.c.bf16 %v27144_v24, %v27143_v57  ;;  %v2309_v8 = vadd.f32 %v21504_v43, %v21630_v2  ;;  %v12632_v33 = vadd.f32 %v12631_v44, %v12630_v37  ;;  %v12939_v57 = vpop.f32.mrb[15].mxu0  ;;  %16750 = vmatprep.subr.bf16.mxu0 %v16749_v6  ;;  %v27151_v58 = vand.u32 4294901760, %v27150_v11  ;;  %v12633_v44 = vpop.f32.mrb[60].mxu1 }
 0x2b4   :  { %v16753_v7 = vpack.c.bf16 %v27146_v28, %v27145_v51  ;;  %v21718_v51 = vld [vmem:[#allocation8 + $0x588] sm:$0xff]  ;;  %v21720_v28 = vadd.f32 %v12939_v57, %v12938_v45  ;;  %v4631_v63 = vand.u32 4294901760, %v4630_v54  ;;  %v4638_v24 = vand.u32 4294901760, %v4637_v5  ;;  %v12941_v45 = vpop.f32.mrb[16].mxu0  ;;  %v12634_v57 = vpop.f32.mrb[61].mxu1 }
 0x2b5   :  { %v21727_v16 = vsub.f32 %v27150_v11, %v27151_v58  ;;  %v21729_v37 = vadd.f32 %v12632_v33, %v2309_v8  ;;  %v27153_v12 = vand.u32 4294901760, %v27152_v48  ;;  %16400 = vmatpush3.bf16.msra.mxu1 %v27101_v40  ;;  %v27156_v8 = vld [vmem:[#allocation184_spill] sm:$0xff]  ;;  %v2324_v40 = vadd.f32 %v21534_v31, %v21630_v2  ;;  %v12942_v4 = vpop.f32.mrb[17].mxu0  ;;  %v27164_v31 = vld [vmem:[#allocation163_spill] sm:$0xff] }
 0x2b6   :  { %27149 = vst [vmem:[#allocation139_spill] sm:$0xff] %v21720_v28  ;;  %v27154_v28 = vld [vmem:[#allocation183_spill] sm:$0xff]  ;;  %v27157_v58 = vand.u32 4294901760, %v27156_v8  ;;  %16752 = vmatpush3.bf16.msra.mxu0 %v16751_v47  ;;  %v12635_v5 = vadd.f32 %v12634_v57, %v12633_v44  ;;  %v27159_v43 = vand.u32 4294901760, %v21509_v10  ;;  %v27165_v47 = vand.u32 4294901760, %v27164_v31  ;;  %v27166_v57 = vld [vmem:[#allocation185_spill] sm:$0xff] }
 0x2b7   :  { %v4525_v6 = vsub.f32 %v27152_v48, %v27153_v12  ;;  %v27155_v11 = vand.u32 4294901760, %v27154_v28  ;;  %v12014_v12 = vsel %vm25795_vm8, 1.0, %v27128_v60  ;;  %v27158_v48 = vld [vmem:[#allocation153_spill] sm:$0xff]  ;;  %16754 = vmatprep.subr.bf16.mxu0 %v16753_v7  ;;  %v27163_v60 = vand.u32 4294901760, %v21529_v53  ;;  %v12636_v7 = vpop.f32.mrb[62].mxu1 }
 0x2b8   :  { %v4651_v54 = vsub.f32 %v27156_v8, %v27157_v58  ;;  %16402 = vmatprep.subr.bf16.mxu1 %v27158_v48  ;;  %v21754_v8 = vadd.f32 %v12942_v4, %v12941_v45  ;;  %v27162_v58 = vand.u32 4294901760, %v21523_v23  ;;  %v4532_v44 = vsub.f32 %v27164_v31, %v27165_v47 }
 0x2b9   :  { %v4644_v33 = vsub.f32 %v27154_v28, %v27155_v11  ;;  %v27160_v28 = vand.u32 4294901760, %v21514_v42  ;;  %v27167_v48 = vand.u32 4294901760, %v27166_v57  ;;  %v21768_v42 = vadd.f32 %v12635_v5, %v2324_v40  ;;  %v27172_v5 = vld [vmem:[#allocation186_spill] sm:$0xff] }
 0x2ba   :  { %27161 = vst [vmem:[#allocation146_spill] sm:$0xff] %v21754_v8  ;;  %v16759_v36 = vpack.c.bf16 %v27163_v60, %v27162_v58  ;;  %v16441_v4 = vpack.c.bf16 %v4638_v24, %v4631_v63  ;;  %v4526_v45 = vand.u32 4294901760, %v4525_v6  ;;  %v27168_v60 = vld [vmem:[#allocation157_spill] sm:$0xff]  ;;  %v12944_v58 = vpop.f32.mrb[18].mxu0  ;;  %v12637_v8 = vpop.f32.mrb[63].mxu1  ;;  %v27169_v53 = vand.u32 4294901760, %v21716_v39  ;;  %16756 = vmatpush3.bf16.msra.mxu0 %v16755_v15 }
 0x2bb   :  { %v16757_v11 = vpack.c.bf16 %v27160_v28, %v27159_v43  ;;  %v4539_v10 = vsub.f32 %v27166_v57, %v27167_v48  ;;  %v4519_v43 = vand.u32 4294901760, %v21727_v16  ;;  %v21771_v28 = vld [vmem:[#allocation8 + $0x598] sm:$0xff]  ;;  %16404 = vmatpush3.bf16.msra.mxu1 %v27168_v60  ;;  %v27170_v31 = vand.u32 4294901760, %v21718_v51  ;;  %v21783_v24 = vld [vmem:[#allocation8 + $0x5a0] sm:$0xff]  ;;  %v21785_v16 = vld [vmem:[#allocation8 + $0x5a8] sm:$0xff]  ;;  %v12945_v30 = vpop.f32.mrb[19].mxu0 }
 0x2bc   :  { %v4645_v57 = vand.u32 4294901760, %v4644_v33  ;;  %v4652_v40 = vand.u32 4294901760, %v4651_v54  ;;  %v27173_v48 = vand.u32 4294901760, %v27172_v5  ;;  %v2339_v6 = vadd.f32 %v21546_v17, %v21630_v2  ;;  %v27174_v60 = vld [vmem:[#allocation161_spill] sm:$0xff]  ;;  %v27175_v33 = vld [vmem:[#allocation187_spill] sm:$0xff] }
 0x2bd   :  { %v21778_v47 = vpack.c.bf16 %v27170_v31, %v27169_v53  ;;  %16406 = vmatprep.subr.bf16.mxu1 %v27174_v60  ;;  %v12638_v23 = vadd.f32 %v12637_v8, %v12636_v7  ;;  %v25754_v53 = vand.u32 4294901760, %v21760_v35  ;;  %v27176_v54 = vand.u32 4294901760, %v27175_v33  ;;  %16758 = vmatprep.subr.bf16.mxu0 %v16757_v11  ;;  %v27178_v2 = vld [vmem:[#allocation107_spill] sm:$0xff] }
 0x2be   :  { %v4658_v63 = vsub.f32 %v27172_v5, %v27173_v48  ;;  %v21794_v5 = vadd.f32 %v12945_v30, %v12944_v58  ;;  %v25753_v48 = vand.u32 4294901760, %v21771_v28  ;;  %v4533_v20 = vand.u32 4294901760, %v4532_v44  ;;  %v27180_v60 = vld [vmem:[#allocation111_spill] sm:$0xff]  ;;  %v27182_v58 = vld [vmem:[#allocation188_spill] sm:$0xff]  ;;  %16760 = vmatpush3.bf16.msra.mxu0 %v16759_v36 }
 0x2bf   :  { %27171 = vst [vmem:[#allocation168_spill] sm:$0xff] %v21778_v47  ;;  %v4665_v31 = vsub.f32 %v27175_v33, %v27176_v54  ;;  %v4540_v27 = vand.u32 4294901760, %v4539_v10  ;;  %v21797_v49 = vadd.f32 %v12638_v23, %v2339_v6  ;;  %v25752_v15 = vand.u32 4294901760, %v21783_v24  ;;  %16408 = vmatpush3.bf16.msra.mxu1 %v27109_v14  ;;  %v27184_v23 = vld [vmem:[#allocation189_spill] sm:$0xff]  ;;  %16794 = vmatprep.subr.bf16.mxu0 %v21778_v47 }
 0x2c0   :  { %27177 = vst [vmem:[#allocation169_spill] sm:$0xff] %v21794_v5  ;;  %v25751_v17 = vand.u32 4294901760, %v21785_v16  ;;  %v27179_v8 = vand.u32 4294901760, %v27178_v2  ;;  %v27181_v11 = vand.u32 4294901760, %v27180_v60  ;;  %v27183_v33 = vand.u32 4294901760, %v27182_v58  ;;  %16442 = vmatprep.subr.bf16.mxu1 %v16441_v4 }
 0x2c1   :  { %v27185_v44 = vand.u32 4294901760, %v27184_v23  ;;  %v21816_v54 = vsub.f32 %v21672_v29, %v21672_v29  ;;  %v4659_v14 = vand.u32 4294901760, %v4658_v63  ;;  %12136 = vmatmul.mubr.msk.f32.vlgmr.msra.gmra.mrb[68].mxu0 %vm18860_vm0, %v26295_v62  ;;  %v21908_v29 = vld [vmem:[#allocation8 + $0x5d0] sm:$0xff] }
 0x2c2   :  { %v4546_v7 = vsub.f32 %v27178_v2, %v27179_v8  ;;  %v4553_v30 = vsub.f32 %v27180_v60, %v27181_v11  ;;  %v4672_v10 = vsub.f32 %v27182_v58, %v27183_v33  ;;  %v16443_v2 = vpack.c.bf16 %v4526_v45, %v4519_v43  ;;  %v21825_v33 = vld [vmem:[#allocation8 + $0x5b0] sm:$0xff]  ;;  %12095 = vmatmul.mubr.msk.f32.vlgmr.msra.gmra.mrb[112].mxu1 %vm18860_vm0, %v26295_v62 }
 0x2c3   :  { %v4679_v6 = vsub.f32 %v27184_v23, %v27185_v44  ;;  %27186 = vst [vmem:[#allocation136_spill] sm:$0xff] %v21816_v54  ;;  %v4666_v8 = vand.u32 4294901760, %v4665_v31  ;;  %v21820_v60 = vsub.f32 %v21696_v21, %v21696_v21  ;;  %v21822_v11 = vsub.f32 %v12014_v12, %v12014_v12  ;;  %v21827_v23 = vld [vmem:[#allocation8 + $0x5b8] sm:$0xff]  ;;  %12096 = vmatprep.mubr.msk.f32.mxu1 %vm19373_vm12, %v26295_v62 }
 0x2c4   :  { %v16445_v58 = vpack.c.bf16 %v4652_v40, %v4645_v57  ;;  %v21837_v21 = vpack.c.bf16 %v25753_v48, %v25754_v53  ;;  %v16447_v12 = vpack.c.bf16 %v4540_v27, %v4533_v20  ;;  %v21843_v4 = vpack.c.bf16 %v25751_v17, %v25752_v15  ;;  %v27193_v31 = vld [vmem:[#allocation112_spill] sm:$0xff]  ;;  %16444 = vmatpush3.bf16.msra.mxu1 %v16443_v2 }
 0x2c5   :  { %27187 = vst [vmem:[#allocation44_spill] sm:$0xff] %v21820_v60  ;;  %27188 = vst [vmem:[#allocation140_spill] sm:$0xff] %v21822_v11  ;;  %v4547_v43 = vand.u32 4294901760, %v4546_v7  ;;  %v4554_v57 = vand.u32 4294901760, %v4553_v30  ;;  %v4673_v40 = vand.u32 4294901760, %v4672_v10  ;;  %v4680_v63 = vand.u32 4294901760, %v4679_v6  ;;  %12137 = vmatprep.mubr.msk.f32.mxu0 %vm19373_vm12, %v26295_v62  ;;  %16796 = vmatpush3.bf16.msra.mxu0 %v21778_v47 }
 0x2c6   :  { %27190 = vst [vmem:[#allocation141_spill] sm:$0xff] %v21837_v21  ;;  %27191 = vst [vmem:[#allocation149_spill] sm:$0xff] %v21843_v4  ;;  %v27194_v27 = vand.u32 4294901760, %v27193_v31  ;;  %v16449_v7 = vpack.c.bf16 %v4666_v8, %v4659_v14  ;;  %v27195_v15 = vld [vmem:[#allocation64_spill] sm:$0xff]  ;;  %16446 = vmatprep.subr.bf16.mxu1 %v16445_v58  ;;  %v27197_v10 = vld [vmem:[#allocation190_spill] sm:$0xff]  ;;  %12097 = vmatmul.mubr.msk.f32.gmra.mrb[114].mxu1 %vm18880_vm2, %v26295_v62 }
 0x2c7   :  { %v27196_v48 = vand.u32 4294901760, %v27195_v15  ;;  %v27198_v6 = vand.u32 4294901760, %v27197_v10  ;;  %v27201_v14 = vld [vmem:[#allocation67_spill] sm:$0xff]  ;;  %16798 = vmatprep.subr.bf16.mxu0 %v21837_v21  ;;  %v27204_v58 = vld [vmem:[#allocation68_spill] sm:$0xff]  ;;  %12138 = vmatmul.mubr.msk.f32.gmra.mrb[70].mxu0 %vm18880_vm2, %v26295_v62  ;;  %v16451_v36 = vpack.c.bf16 %v4554_v57, %v4547_v43  ;;  %v16453_v19 = vpack.c.bf16 %v4680_v63, %v4673_v40  ;;  %v27215_v57 = vld [vmem:[#allocation69_spill] sm:$0xff] }
 0x2c8   :  { %v4560_v20 = vsub.f32 %v27193_v31, %v27194_v27  ;;  %v27199_v31 = vld [vmem:[#allocation191_spill] sm:$0xff]  ;;  %v27202_v8 = vand.u32 4294901760, %v27201_v14  ;;  %12098 = vmatprep.mubr.msk.f32.mxu1 %vm19383_vm14, %v26295_v62  ;;  %16448 = vmatpush3.bf16.msra.mxu1 %v16447_v12  ;;  %v27216_v40 = vand.u32 4294901760, %v27215_v57  ;;  %v27217_v12 = vld [vmem:[#allocation42_spill] sm:$0xff] }
 0x2c9   :  { %v4567_v30 = vsub.f32 %v27195_v15, %v27196_v48  ;;  %v4686_v2 = vsub.f32 %v27197_v10, %v27198_v6  ;;  %v27200_v27 = vand.u32 4294901760, %v27199_v31  ;;  %v21877_v48 = vld [vmem:[#allocation8 + $0x5c0] sm:$0xff]  ;;  %v21879_v15 = vld [vmem:[#allocation8 + $0x5c8] sm:$0xff]  ;;  %v27205_v10 = vand.u32 4294901760, %v27204_v58  ;;  %12139 = vmatprep.mubr.msk.f32.mxu0 %vm19383_vm14, %v26295_v62  ;;  %v21910_v43 = vld [vmem:[#allocation8 + $0x5d8] sm:$0xff]  ;;  %16800 = vmatpush3.bf16.msra.mxu0 %v21837_v21 }
 0x2ca   :  { %v4574_v44 = vsub.f32 %v27201_v14, %v27202_v8  ;;  %v27208_v8 = vld [vmem:[#allocation193_spill] sm:$0xff]  ;;  %v4561_v55 = vand.u32 4294901760, %v4560_v20  ;;  %v4588_v63 = vsub.f32 %v27215_v57, %v27216_v40  ;;  %v27218_v20 = vand.u32 4294901760, %v27217_v12  ;;  %16450 = vmatprep.subr.bf16.mxu1 %v16449_v7  ;;  %12099 = vmatmul.mubr.msk.f32.gmra.mrb[116].mxu1 %vm19035_vm11, %v26295_v62  ;;  %v27239_v21 = vld [vmem:[#allocation135_spill] sm:$0xff] }
 0x2cb   :  { %v4693_v53 = vsub.f32 %v27199_v31, %v27200_v27  ;;  %v4581_v6 = vsub.f32 %v27204_v58, %v27205_v10  ;;  %v27206_v31 = vld [vmem:[#allocation192_spill] sm:$0xff]  ;;  %v27209_v17 = vand.u32 4294901760, %v27208_v8  ;;  %v27211_v58 = vand.u32 4294901760, %v21674_v50  ;;  %16802 = vmatprep.subr.bf16.mxu0 %v21843_v4  ;;  %12140 = vmatmul.mubr.msk.f32.gmra.mrb[72].mxu0 %vm19035_vm11, %v26295_v62 }
 0x2cc   :  { %v27207_v27 = vand.u32 4294901760, %v27206_v31  ;;  %v4687_v45 = vand.u32 4294901760, %v4686_v2  ;;  %v4575_v57 = vand.u32 4294901760, %v4574_v44  ;;  %12100 = vmatprep.mubr.msk.f32.mxu1 %vm19394_vm15, %v26295_v62  ;;  %v27223_v44 = vld [vmem:[#allocation128_spill] sm:$0xff]  ;;  %16452 = vmatpush3.bf16.msra.mxu1 %v16451_v36  ;;  %v27225_v7 = vand.u32 4294901760, %v21716_v39 }
 0x2cd   :  { %v4707_v5 = vsub.f32 %v27208_v8, %v27209_v17  ;;  %v6501_v10 = vsub.f32 %v21674_v50, %v27211_v58  ;;  %v27212_v17 = vand.u32 4294901760, %v21825_v33  ;;  %v4568_v8 = vand.u32 4294901760, %v4567_v30  ;;  %12141 = vmatprep.mubr.msk.f32.mxu0 %vm19394_vm15, %v26295_v62  ;;  %16804 = vmatpush3.bf16.msra.mxu0 %v21843_v4 }
 0x2ce   :  { %v4700_v14 = vsub.f32 %v27206_v31, %v27207_v27  ;;  %v27213_v31 = vand.u32 4294901760, %v21827_v23  ;;  %v4595_v58 = vsub.f32 %v27217_v12, %v27218_v20  ;;  %v4694_v47 = vand.u32 4294901760, %v4693_v53  ;;  %v27221_v12 = vld [vmem:[#allocation86_spill] sm:$0xff]  ;;  %16454 = vmatprep.subr.bf16.mxu1 %v16453_v19  ;;  %12101 = vmatmul.mubr.msk.f32.gmra.mrb[118].mxu1 %vm19030_vm10, %v26295_v62 }
 0x2cf   :  { %v4582_v40 = vand.u32 4294901760, %v4581_v6  ;;  %v4708_v22 = vand.u32 4294901760, %v4707_v5  ;;  %v27222_v20 = vand.u32 4294901760, %v27221_v12  ;;  %v27224_v6 = vand.u32 4294901760, %v27223_v44  ;;  %12142 = vmatmul.mubr.msk.f32.gmra.mrb[74].mxu0 %vm19030_vm10, %v26295_v62  ;;  %12103 = vmatprep.mubr.msk.f32.mxu1 %vm18865_vm1, %v26295_v62 }
 0x2d0   :  { %v21906_v27 = vpack.c.bf16 %v27213_v31, %v27212_v17  ;;  %v4701_v34 = vand.u32 4294901760, %v4700_v14  ;;  %v16455_v14 = vpack.c.bf16 %v4568_v8, %v4561_v55  ;;  %v4589_v17 = vand.u32 4294901760, %v4588_v63  ;;  %v13023_v63 = vpop.f32.mrb[20].mxu0 }
 0x2d1   :  { %v4714_v30 = vsub.f32 %v27221_v12, %v27222_v20  ;;  %v4721_v5 = vsub.f32 %v27223_v44, %v27224_v6  ;;  %v4596_v31 = vand.u32 4294901760, %v4595_v58  ;;  %v21945_v2 = vsub.f32 %v21716_v39, %v27225_v7 }
 0x2d2   :  { %27214 = vst [vmem:[#allocation150_spill] sm:$0xff] %v21906_v27  ;;  %v6502_v12 = vand.u32 4294901760, %v6501_v10  ;;  %v16457_v20 = vpack.c.bf16 %v4694_v47, %v4687_v45  ;;  %v27226_v44 = vand.u32 4294901760, %v21877_v48  ;;  %v27227_v36 = vand.u32 4294901760, %v21879_v15  ;;  %16806 = vmatprep.subr.bf16.mxu0 %v21906_v27  ;;  %v21963_v47 = vld [vmem:[#allocation8 + $0x5e0] sm:$0xff]  ;;  %v21965_v45 = vld [vmem:[#allocation8 + $0x5e8] sm:$0xff]  ;;  %16456 = vmatpush3.bf16.msra.mxu1 %v16455_v14 }
 0x2d3   :  { %v27229_v55 = vand.u32 4294901760, %v21718_v51  ;;  %v16459_v39 = vpack.c.bf16 %v4582_v40, %v4575_v57  ;;  %v16461_v19 = vpack.c.bf16 %v4708_v22, %v4701_v34  ;;  %v27231_v10 = vld [vmem:[#allocation129_spill] sm:$0xff]  ;;  %v12671_v57 = vpop.f32.mrb[64].mxu1  ;;  %v27234_v22 = vand.u32 4294901760, %v21908_v29  ;;  %16808 = vmatpush3.bf16.msra.mxu0 %v21906_v27 }
 0x2d4   :  { %v21952_v6 = vpack.c.bf16 %v27227_v36, %v27226_v44  ;;  %v27232_v58 = vand.u32 4294901760, %v27231_v10  ;;  %v27235_v34 = vand.u32 4294901760, %v21910_v43  ;;  %v4715_v36 = vand.u32 4294901760, %v4714_v30  ;;  %14743 = vmatprep.mubr.f32.mxu0 %v6502_v12  ;;  %v12672_v53 = vpop.f32.mrb[65].mxu1  ;;  %16458 = vmatprep.subr.bf16.mxu1 %v16457_v20 }
 0x2d5   :  { %v21957_v8 = vsub.f32 %v21718_v51, %v27229_v55  ;;  %v4722_v55 = vand.u32 4294901760, %v4721_v5  ;;  %v16463_v4 = vpack.c.bf16 %v4596_v31, %v4589_v17  ;;  %v27240_v25 = vand.u32 4294901760, %v27239_v21  ;;  %v22000_v31 = vld [vmem:[#allocation8 + $0x5f0] sm:$0xff] }
 0x2d6   :  { %27228 = vst [vmem:[#allocation170_spill] sm:$0xff] %v21952_v6  ;;  %v4602_v7 = vsub.f32 %v27231_v10, %v27232_v58  ;;  %v21981_v40 = vpack.c.bf16 %v27235_v34, %v27234_v22  ;;  %v27237_v10 = vld [vmem:[#allocation134_spill] sm:$0xff]  ;;  %v4735_v22 = vsub.f32 %v27241_v52, %v27242_v18  ;;  %v12673_v5 = vadd.f32 %v12672_v53, %v12671_v57  ;;  %v13024_v34 = vpop.f32.mrb[21].mxu0 }
 0x2d7   :  { %v27238_v58 = vand.u32 4294901760, %v27237_v10  ;;  %v4728_v9 = vsub.f32 %v27239_v21, %v27240_v25  ;;  %16810 = vmatprep.subr.bf16.mxu0 %v21952_v6  ;;  %v21998_v25 = vadd.f32 %v13024_v34, %v13023_v63  ;;  %v27244_v18 = vand.u32 4294901760, %v21760_v35  ;;  %v22015_v34 = vld [vmem:[#allocation8 + $0x5f8] sm:$0xff]  ;;  %16460 = vmatpush3.bf16.msra.mxu1 %v16459_v39 }
 0x2d8   :  { %27236 = vst [vmem:[#allocation171_spill] sm:$0xff] %v21981_v40  ;;  %v4603_v21 = vand.u32 4294901760, %v4602_v7  ;;  %v27245_v53 = vand.u32 4294901760, %v21771_v28  ;;  %v22013_v57 = vadd.f32 %v12673_v5, %v21684_v0  ;;  %v27246_v7 = vld [vmem:[#allocation144_spill] sm:$0xff]  ;;  %v4736_v30 = vand.u32 4294901760, %v4735_v22  ;;  %16812 = vmatpush3.bf16.msra.mxu0 %v21952_v6  ;;  %16462 = vmatprep.subr.bf16.mxu1 %v16461_v19 }
 0x2d9   :  { %v4609_v44 = vsub.f32 %v27237_v10, %v27238_v58  ;;  %27243 = vst [vmem:[#allocation48_spill] sm:$0xff] %v21998_v25  ;;  %v22005_v52 = vsub.f32 %v21760_v35, %v27244_v18  ;;  %v12674_v10 = vpop.f32.mrb[66].mxu1  ;;  %v16465_v58 = vpack.c.bf16 %v4722_v55, %v4715_v36  ;;  %v27247_v17 = vand.u32 4294901760, %v27246_v7  ;;  %v13026_v35 = vpop.f32.mrb[22].mxu0  ;;  %v27248_v25 = vld [vmem:[#allocation145_spill] sm:$0xff]  ;;  %16814 = vmatprep.subr.bf16.mxu0 %v21981_v40 }
 0x2da   :  { %v22010_v20 = vsub.f32 %v21771_v28, %v27245_v53  ;;  %v12675_v18 = vpop.f32.mrb[67].mxu1  ;;  %v4729_v14 = vand.u32 4294901760, %v4728_v9  ;;  %v27249_v28 = vand.u32 4294901760, %v27248_v25  ;;  %v27250_v0 = vand.u32 4294901760, %v21945_v2  ;;  %v13027_v55 = vpop.f32.mrb[23].mxu0 }
 0x2db   :  { %v4610_v63 = vand.u32 4294901760, %v4609_v44  ;;  %v4616_v12 = vsub.f32 %v27246_v7, %v27247_v17  ;;  %v12676_v44 = vadd.f32 %v12675_v18, %v12674_v10  ;;  %v27251_v5 = vand.u32 4294901760, %v21963_v47  ;;  %16464 = vmatpush3.bf16.msra.mxu1 %v16463_v4 }
 0x2dc   :  { %v4623_v53 = vsub.f32 %v27248_v25, %v27249_v28  ;;  %v6542_v36 = vsub.f32 %v21945_v2, %v27250_v0  ;;  %v27252_v39 = vand.u32 4294901760, %v21965_v45  ;;  %v27254_v22 = vand.u32 4294901760, %v21957_v8  ;;  %16816 = vmatpush3.bf16.msra.mxu0 %v21981_v40  ;;  %16466 = vmatprep.subr.bf16.mxu1 %v16465_v58 }
 0x2dd   :  { %v22038_v7 = vadd.f32 %v13027_v55, %v13026_v35  ;;  %v22044_v28 = vadd.f32 %v12676_v44, %v21729_v37  ;;  %v16467_v0 = vpack.c.bf16 %v4610_v63, %v4603_v21  ;;  %v13029_v55 = vpop.f32.mrb[24].mxu0  ;;  %v16469_v19 = vpack.c.bf16 %v4736_v30, %v4729_v14 }
 0x2de   :  { %v22031_v17 = vpack.c.bf16 %v27252_v39, %v27251_v5  ;;  %v6549_v25 = vsub.f32 %v21957_v8, %v27254_v22  ;;  %v12677_v5 = vpop.f32.mrb[68].mxu1  ;;  %v27256_v39 = vand.u32 4294901760, %v21783_v24  ;;  %v27257_v22 = vand.u32 4294901760, %v21785_v16  ;;  %v13030_v63 = vpop.f32.mrb[25].mxu0 }
 0x2df   :  { %27255 = vst [vmem:[#allocation19_spill] sm:$0xff] %v22038_v7  ;;  %v12678_v10 = vpop.f32.mrb[69].mxu1  ;;  %v4617_v18 = vand.u32 4294901760, %v4616_v12  ;;  %v4624_v7 = vand.u32 4294901760, %v4623_v53  ;;  %v6543_v37 = vand.u32 4294901760, %v6542_v36  ;;  %v22068_v30 = vadd.f32 %v13030_v63, %v13029_v55  ;;  %16468 = vmatpush3.bf16.msra.mxu1 %v16467_v0 }
 0x2e0   :  { %27253 = vst [vmem:[#allocation97_spill] sm:$0xff] %v22031_v17  ;;  %v22049_v9 = vsub.f32 %v21783_v24, %v27256_v39  ;;  %v22054_v35 = vsub.f32 %v21785_v16, %v27257_v22  ;;  %v12679_v21 = vadd.f32 %v12678_v10, %v12677_v5  ;;  %v6550_v44 = vand.u32 4294901760, %v6549_v25  ;;  %16818 = vmatprep.subr.bf16.mxu0 %v22031_v17  ;;  %v12680_v10 = vpop.f32.mrb[70].mxu1 }
 0x2e1   :  { %v27258_v24 = vand.u32 4294901760, %v21825_v33  ;;  %v27259_v16 = vand.u32 4294901760, %v21827_v23  ;;  %27260 = vst [vmem:[#allocation142_spill] sm:$0xff] %v22068_v30  ;;  %v27261_v14 = vand.u32 4294901760, %v22000_v31  ;;  %v27262_v12 = vand.u32 4294901760, %v22015_v34  ;;  %16820 = vmatpush3.bf16.msra.mxu0 %v22031_v17  ;;  %16470 = vmatprep.subr.bf16.mxu1 %v16469_v19  ;;  %v27280_v30 = vld [vmem:[#allocation50_spill] sm:$0xff] }
 0x2e2   :  { %v27264_v53 = vand.u32 4294901760, %v22005_v52  ;;  %v27265_v36 = vand.u32 4294901760, %v22010_v20  ;;  %v27266_v55 = vand.u32 4294901760, %v21816_v54  ;;  %v16825_v22 = vpack.c.bf16 %v6550_v44, %v6543_v37 }
 0x2e3   :  { %v22060_v39 = vsub.f32 %v21825_v33, %v27258_v24  ;;  %v22065_v4 = vsub.f32 %v21827_v23, %v27259_v16  ;;  %v22074_v58 = vpack.c.bf16 %v27262_v12, %v27261_v14  ;;  %v22083_v23 = vadd.f32 %v12679_v21, %v21768_v42  ;;  %v13032_v16 = vpop.f32.mrb[26].mxu0  ;;  %v12681_v14 = vpop.f32.mrb[71].mxu1 }
 0x2e4   :  { %v6556_v33 = vsub.f32 %v22005_v52, %v27264_v53  ;;  %v6563_v25 = vsub.f32 %v22010_v20, %v27265_v36  ;;  %v6511_v63 = vsub.f32 %v21816_v54, %v27266_v55  ;;  %v16471_v24 = vpack.c.bf16 %v4624_v7, %v4617_v18  ;;  %v13033_v36 = vpop.f32.mrb[27].mxu0 }
 0x2e5   :  { %27263 = vst [vmem:[#allocation55_spill] sm:$0xff] %v22074_v58  ;;  %v27267_v12 = vand.u32 4294901760, %v21822_v11  ;;  %v12682_v21 = vadd.f32 %v12681_v14, %v12680_v10  ;;  %v25784_v5 = vand.u32 4294901760, %v22060_v39  ;;  %v25785_v55 = vand.u32 4294901760, %v22065_v4  ;;  %16822 = vmatprep.subr.bf16.mxu0 %v22074_v58 }
 0x2e6   :  { %v22098_v7 = vadd.f32 %v13033_v36, %v13032_v16  ;;  %v6557_v18 = vand.u32 4294901760, %v6556_v33  ;;  %v6564_v0 = vand.u32 4294901760, %v6563_v25  ;;  %v27270_v37 = vand.u32 4294901760, %v22049_v9  ;;  %16472 = vmatpush3.bf16.msra.mxu1 %v16471_v24  ;;  %16824 = vmatpush3.bf16.msra.mxu0 %v22074_v58 }
 0x2e7   :  { %v6521_v53 = vsub.f32 %v21822_v11, %v27267_v12  ;;  %v27269_v12 = vand.u32 4294901760, %v21877_v48  ;;  %v22106_v19 = vadd.f32 %v12682_v21, %v21797_v49  ;;  %v27271_v10 = vand.u32 4294901760, %v22054_v35  ;;  %16826 = vmatprep.subr.bf16.mxu0 %v16825_v22 }
 0x2e8   :  { %27268 = vst [vmem:[#allocation108_spill] sm:$0xff] %v22098_v7  ;;  %v6570_v44 = vsub.f32 %v22049_v9, %v27270_v37  ;;  %v27272_v16 = vand.u32 4294901760, %v21879_v15  ;;  %v6512_v25 = vand.u32 4294901760, %v6511_v63  ;;  %v27274_v49 = vand.u32 4294901760, %v21820_v60 }
 0x2e9   :  { %v22103_v42 = vsub.f32 %v21877_v48, %v27269_v12  ;;  %v6577_v14 = vsub.f32 %v22054_v35, %v27271_v10  ;;  %v27273_v48 = vld [vmem:[#allocation17_spill] sm:$0xff]  ;;  %v6584_v36 = vsub.f32 %v22060_v39, %v25784_v5  ;;  %v6591_v12 = vsub.f32 %v22065_v4, %v25785_v55  ;;  %12104 = vmatmul.mubr.msk.f32.vlgmr.msra.gmra.mrb[120].mxu1 %vm18885_vm3, %v26295_v62 }
 0x2ea   :  { %v22117_v33 = vsub.f32 %v21879_v15, %v27272_v16  ;;  %16506 = vmatprep.subr.bf16.mxu1 %v27273_v48  ;;  %v6531_v21 = vsub.f32 %v21820_v60, %v27274_v49  ;;  %v6522_v15 = vand.u32 4294901760, %v6521_v53  ;;  %v27275_v24 = vand.u32 4294901760, %v21908_v29  ;;  %14744 = vmatmul.mubr.f32.vlgmr.msra.gmra.mrb[76].mxu0 %v6512_v25 }
 0x2eb   :  { %v27276_v10 = vand.u32 4294901760, %v21910_v43  ;;  %v16829_v5 = vpack.c.bf16 %v6564_v0, %v6557_v18  ;;  %v6571_v55 = vand.u32 4294901760, %v6570_v44  ;;  %v6578_v7 = vand.u32 4294901760, %v6577_v14  ;;  %12105 = vmatprep.mubr.msk.f32.mxu1 %vm18915_vm5, %v26295_v62  ;;  %16828 = vmatpush3.bf16.msra.mxu0 %v16825_v22 }
 0x2ec   :  { %v22134_v37 = vsub.f32 %v21908_v29, %v27275_v24  ;;  %v27279_v29 = vld [vmem:[#allocation18_spill] sm:$0xff]  ;;  %14746 = vmatprep.mubr.f32.mxu0 %v6522_v15  ;;  %v6532_v24 = vand.u32 4294901760, %v6531_v21  ;;  %v27281_v18 = vand.u32 4294901760, %v22103_v42  ;;  %v27282_v25 = vand.u32 4294901760, %v21963_v47 }
 0x2ed   :  { %v22139_v16 = vsub.f32 %v21910_v43, %v27276_v10  ;;  %16508 = vmatpush3.bf16.msra.mxu1 %v27279_v29  ;;  %v6585_v43 = vand.u32 4294901760, %v6584_v36  ;;  %v6592_v10 = vand.u32 4294901760, %v6591_v12  ;;  %16830 = vmatprep.subr.bf16.mxu0 %v16829_v5  ;;  %v16833_v22 = vpack.c.bf16 %v6578_v7, %v6571_v55  ;;  %v27289_v7 = vld [vmem:[#allocation65_spill] sm:$0xff] }
 0x2ee   :  { %16510 = vmatprep.subr.bf16.mxu1 %v27280_v30  ;;  %v6598_v0 = vsub.f32 %v22103_v42, %v27281_v18  ;;  %v25788_v44 = vand.u32 4294901760, %v22134_v37  ;;  %v22158_v53 = vsub.f32 %v21963_v47, %v27282_v25  ;;  %12106 = vmatmul.mubr.msk.f32.gmra.mrb[122].mxu1 %vm18910_vm4, %v26295_v62  ;;  %v27284_v36 = vand.u32 4294901760, %v22117_v33  ;;  %v27287_v47 = vld [vmem:[#allocation54_spill] sm:$0xff] }
 0x2ef   :  { %v27285_v15 = vand.u32 4294901760, %v21965_v45  ;;  %14747 = vmatmul.mubr.f32.gmra.mrb[78].mxu0 %v6532_v24  ;;  %12107 = vmatprep.mubr.msk.f32.mxu1 %vm18957_vm7, %v26295_v62  ;;  %v16837_v55 = vpack.c.bf16 %v6592_v10, %v6585_v43  ;;  %v27290_v24 = vand.u32 4294901760, %v22139_v16  ;;  %v27292_v10 = vand.u32 4294901760, %v22000_v31 }
 0x2f0   :  { %v6605_v12 = vsub.f32 %v22117_v33, %v27284_v36  ;;  %14781 = vmatprep.mubr.msk.f32.mxu0 %vm27288_vm9, %v26295_v62  ;;  %16832 = vmatpush3.bf16.msra.mxu0 %v16829_v5  ;;  %v6599_v25 = vand.u32 4294901760, %v6598_v0  ;;  %v27298_v40 = vand.u32 4294901760, %v22158_v53  ;;  %vm27316_vm10 = vcmp.eq.s32.totalorder %v27124_v59, %v21584_v3 }
 0x2f1   :  { %v22169_v18 = vsub.f32 %v21965_v45, %v27285_v15  ;;  %16512 = vmatpush3.bf16.msra.mxu1 %v27287_v47  ;;  %v6612_v45 = vsub.f32 %v22134_v37, %v25788_v44  ;;  %v6619_v36 = vsub.f32 %v22139_v16, %v27290_v24  ;;  %16834 = vmatprep.subr.bf16.mxu0 %v16833_v22  ;;  %v27293_v44 = vand.u32 4294901760, %v22015_v34  ;;  %v27294_v24 = vld [vmem:[#allocation59_spill] sm:$0xff]  ;;  %v27296_v15 = vld [vmem:[#allocation66_spill] sm:$0xff] }
 0x2f2   :  { %16514 = vmatprep.subr.bf16.mxu1 %v27289_v7  ;;  %12108 = vmatmul.mubr.msk.f32.gmra.mrb[124].mxu1 %vm18952_vm6, %v26295_v62  ;;  %v6606_v43 = vand.u32 4294901760, %v6605_v12  ;;  %v22194_v0 = vsub.f32 %v22000_v31, %v27292_v10  ;;  %vm27295_vm9 = vnez %v27294_v24  ;;  %v27297_v12 = vld [vmem:[#allocation33_spill] sm:$0xff]  ;;  %v6626_v31 = vsub.f32 %v22158_v53, %v27298_v40  ;;  %v27303_v24 = vld [vmem:[#allocation34_spill] sm:$0xff]  ;;  %v13111_v40 = vpop.f32.mrb[28].mxu0 }
 0x2f3   :  { %v22199_v41 = vsub.f32 %v22015_v34, %v27293_v44  ;;  %12109 = vmatprep.mubr.msk.f32.mxu1 %vm27295_vm9, %v26295_v62  ;;  %v6613_v5 = vand.u32 4294901760, %v6612_v45  ;;  %v6620_v17 = vand.u32 4294901760, %v6619_v36  ;;  %v27299_v10 = vld [vmem:[#allocation57_spill] sm:$0xff]  ;;  %v27301_v44 = vand.u32 4294901760, %v22169_v18  ;;  %v27302_v45 = vld [vmem:[#allocation90_spill] sm:$0xff]  ;;  %v12715_v36 = vpop.f32.mrb[72].mxu1 }
 0x2f4   :  { %16836 = vmatpush3.bf16.msra.mxu0 %v16833_v22  ;;  %vm27300_vm8 = vnez %v27299_v10  ;;  %v16841_v34 = vpack.c.bf16 %v6606_v43, %v6599_v25  ;;  %v12716_v58 = vpop.f32.mrb[73].mxu1  ;;  %v27304_v10 = vld [vmem:[#allocation27_spill] sm:$0xff]  ;;  %v13112_v25 = vpop.f32.mrb[29].mxu0  ;;  %v6627_v60 = vand.u32 4294901760, %v6626_v31  ;;  %v27306_v27 = vand.u32 4294901760, %v22194_v0  ;;  %v27309_v31 = vld [vmem:[#allocation96_spill] sm:$0xff] }
 0x2f5   :  { %16516 = vmatpush3.bf16.msra.mxu1 %v27296_v15  ;;  %16838 = vmatprep.subr.bf16.mxu0 %v16837_v55  ;;  %v6633_v6 = vsub.f32 %v22169_v18, %v27301_v44  ;;  %v12717_v14 = vadd.f32 %v12716_v58, %v12715_v36  ;;  %v16845_v43 = vpack.c.bf16 %v6620_v17, %v6613_v5  ;;  %v27307_v21 = vand.u32 4294901760, %v22199_v41  ;;  %v12718_v63 = vpop.f32.mrb[74].mxu1  ;;  %v27308_v58 = vld [vmem:[#allocation123_spill] sm:$0xff]  ;;  %v13114_v17 = vpop.f32.mrb[30].mxu0 }
 0x2f6   :  { %16518 = vmatprep.subr.bf16.mxu1 %v27297_v12  ;;  %12110 = vmatmul.mubr.msk.f32.gmra.mrb[126].mxu1 %vm27300_vm8, %v26295_v62  ;;  %v22220_v44 = vadd.f32 %v13112_v25, %v13111_v40  ;;  %v12719_v5 = vpop.f32.mrb[75].mxu1  ;;  %v13115_v36 = vpop.f32.mrb[31].mxu0  ;;  %v27311_v17 = vld [vmem:[#allocation175_spill] sm:$0xff]  ;;  %vm27318_vm15 = vcmp.eq.s32.totalorder %v27124_v59, %v21645_v32 }
 0x2f7   :  { %5031 = vmatprep.mubr.f32.mxu1 %v27302_v45  ;;  %v6634_v22 = vand.u32 4294901760, %v6633_v6  ;;  %v6640_v45 = vsub.f32 %v22194_v0, %v27306_v27  ;;  %v6647_v11 = vsub.f32 %v22199_v41, %v27307_v21  ;;  %v12720_v6 = vadd.f32 %v12719_v5, %v12718_v63  ;;  %v12721_v21 = vpop.f32.mrb[76].mxu1 }
 0x2f8   :  { %16840 = vmatpush3.bf16.msra.mxu0 %v16837_v55  ;;  %27305 = vst [vmem:[#allocation70_spill] sm:$0xff] %v22220_v44  ;;  %v22229_v55 = vadd.f32 %v12717_v14, %v22013_v57  ;;  %v27310_v57 = vld [vmem:[#allocation174_spill] sm:$0xff]  ;;  %v13117_v14 = vpop.f32.mrb[32].mxu0  ;;  %v12722_v54 = vpop.f32.mrb[77].mxu1 }
 0x2f9   :  { %16520 = vmatpush3.bf16.msra.mxu1 %v27303_v24  ;;  %16842 = vmatprep.subr.bf16.mxu0 %v16841_v34  ;;  %v16849_v40 = vpack.c.bf16 %v6634_v22, %v6627_v60  ;;  %v6641_v27 = vand.u32 4294901760, %v6640_v45  ;;  %v6648_v25 = vand.u32 4294901760, %v6647_v11  ;;  %v22234_v44 = vadd.f32 %v12720_v6, %v22044_v28  ;;  %v13118_v49 = vpop.f32.mrb[33].mxu0  ;;  %v12724_v11 = vpop.f32.mrb[78].mxu1  ;;  %v27312_v28 = vld [vmem:[#allocation177_spill] sm:$0xff]  ;;  %v27313_v6 = vld [vmem:[#allocation180_spill] sm:$0xff] }
 0x2fa   :  { %16522 = vmatprep.subr.bf16.mxu1 %v27304_v10  ;;  %v22238_v63 = vadd.f32 %v13118_v49, %v13117_v14  ;;  %v13120_v22 = vpop.f32.mrb[34].mxu0  ;;  %v12725_v45 = vpop.f32.mrb[79].mxu1  ;;  %v27323_v14 = vld [vmem:[#allocation116_spill] sm:$0xff] }
 0x2fb   :  { %v16853_v5 = vpack.c.bf16 %v6648_v25, %v6641_v27  ;;  %v13121_v36 = vpop.f32.mrb[35].mxu0  ;;  %v27314_v27 = vld [vmem:[#allocation182_spill] sm:$0xff]  ;;  %v27317_v25 = vld [vmem:[#allocation105_spill] sm:$0xff] }
 0x2fc   :  { %16844 = vmatpush3.bf16.msra.mxu0 %v16841_v34  ;;  %v12723_v34 = vadd.f32 %v12722_v54, %v12721_v21  ;;  %v16857_v54 = vpack.c.bf16 %v21957_v8, %v21945_v2  ;;  %v16869_v21 = vpack.c.bf16 %v22065_v4, %v22060_v39 }
 0x2fd   :  { %16524 = vmatpush3.bf16.msra.mxu1 %v27308_v58  ;;  %16846 = vmatprep.subr.bf16.mxu0 %v16845_v43 }
 0x2fe   :  { %16526 = vmatprep.subr.bf16.mxu1 %v27309_v31  ;;  %v22241_v60 = vadd.f32 %v12723_v34, %v22083_v23  ;;  %v27315_v23 = vld [vmem:[#allocation98_spill] sm:$0xff]  ;;  %v27324_v34 = vld [vmem:[#allocation117_spill] sm:$0xff] }
 0x300   :  { %16848 = vmatpush3.bf16.msra.mxu0 %v16845_v43  ;;  %v12726_v43 = vadd.f32 %v12725_v45, %v12724_v11  ;;  %v16877_v45 = vpack.c.bf16 %v22139_v16, %v22134_v37 }
 0x301   :  { %16528 = vmatpush3.bf16.msra.mxu1 %v27310_v57  ;;  %16850 = vmatprep.subr.bf16.mxu0 %v16849_v40 }
 0x302   :  { %16530 = vmatprep.subr.bf16.mxu1 %v27311_v17  ;;  %v22248_v49 = vadd.f32 %v12726_v43, %v22106_v19  ;;  %v27319_v19 = vld [vmem:[#allocation106_spill] sm:$0xff] }
 0x304   :  { %16852 = vmatpush3.bf16.msra.mxu0 %v16849_v40  ;;  %v16861_v40 = vpack.c.bf16 %v22010_v20, %v22005_v52 }
 0x305   :  { %16532 = vmatpush3.bf16.msra.mxu1 %v27312_v28  ;;  %16854 = vmatprep.subr.bf16.mxu0 %v16853_v5 }
 0x306   :  { %16534 = vmatprep.subr.bf16.mxu1 %v27313_v6 }
 0x308   :  { %16856 = vmatpush3.bf16.msra.mxu0 %v16853_v5  ;;  %v13199_v5 = vpop.f32.mrb[36].mxu0 }
 0x309   :  { %16536 = vmatpush3.bf16.msra.mxu1 %v27314_v27  ;;  %16858 = vmatprep.subr.bf16.mxu0 %v16857_v54 }
 0x30a   :  { %16570 = vmatprep.subr.bf16.mxu1 %v27273_v48  ;;  %v16865_v48 = vpack.c.bf16 %v22054_v35, %v22049_v9 }
 0x30b   :  { %14782 = vmatmul.mubr.msk.f32.vlgmr.msra.gmra.mrb[76].mxu0 %vm27316_vm10, %v26295_v62  ;;  %vm27320_vm10 = vcmp.eq.s32.totalorder %v27124_v59, %v21617_v13 }
 0x30c   :  { %5035 = vmatmul.mubr.f32.vlgmr.msra.gmra.mrb[128].mxu1 %v27315_v23  ;;  %14784 = vmatprep.mubr.msk.f32.mxu0 %vm27318_vm15, %v26295_v62  ;;  %v27326_v23 = vand.u32 4294901760, %v21273_v26 }
 0x30d   :  { %5042 = vmatprep.mubr.f32.mxu1 %v27317_v25  ;;  %16572 = vmatpush3.bf16.msra.mxu1 %v27279_v29  ;;  %v27321_v29 = vld [vmem:[#allocation58_spill] sm:$0xff] }
 0x30e   :  { %16860 = vmatpush3.bf16.msra.mxu0 %v16857_v54  ;;  %16574 = vmatprep.subr.bf16.mxu1 %v27280_v30  ;;  %v27322_v30 = vld [vmem:[#allocation63_spill] sm:$0xff]  ;;  %v27325_v54 = vand.u32 4294901760, %v21258_v56 }
 0x30f   :  { %16862 = vmatprep.subr.bf16.mxu0 %v16861_v40  ;;  %14785 = vmatmul.mubr.msk.f32.gmra.mrb[78].mxu0 %vm27320_vm10, %v26295_v62 }
 0x310   :  { %5046 = vmatmul.mubr.f32.gmra.mrb[130].mxu1 %v27319_v19  ;;  %14819 = vmatprep.mubr.f32.mxu0 %v21674_v50 }
 0x311   :  { %5053 = vmatprep.mubr.f32.mxu1 %v27321_v29  ;;  %16576 = vmatpush3.bf16.msra.mxu1 %v27287_v47  ;;  %v16873_v47 = vpack.c.bf16 %v22117_v33, %v22103_v42  ;;  %v27327_v29 = vand.u32 4294901760, %v21291_v61 }
 0x312   :  { %16864 = vmatpush3.bf16.msra.mxu0 %v16861_v40  ;;  %16578 = vmatprep.subr.bf16.mxu1 %v27289_v7  ;;  %v12759_v7 = vpop.f32.mrb[80].mxu1  ;;  %v5667_v40 = vsub.f32 %v21273_v26, %v27326_v23 }
 0x313   :  { %16866 = vmatprep.subr.bf16.mxu0 %v16865_v48  ;;  %v12760_v11 = vpop.f32.mrb[81].mxu1 }
 0x314   :  { %5057 = vmatmul.mubr.f32.gmra.mrb[132].mxu1 %v27322_v30  ;;  %v12762_v51 = vpop.f32.mrb[82].mxu1 }
 0x315   :  { %5064 = vmatprep.mubr.f32.mxu1 %v27323_v14  ;;  %16580 = vmatpush3.bf16.msra.mxu1 %v27296_v15  ;;  %v12761_v15 = vadd.f32 %v12760_v11, %v12759_v7  ;;  %v12763_v36 = vpop.f32.mrb[83].mxu1  ;;  %v27328_v14 = vand.u32 4294901760, %v21303_v38  ;;  %v27331_v11 = vand.u32 4294901760, %v21317_v1 }
 0x316   :  { %16868 = vmatpush3.bf16.msra.mxu0 %v16865_v48  ;;  %16582 = vmatprep.subr.bf16.mxu1 %v27297_v12  ;;  %v13200_v12 = vpop.f32.mrb[37].mxu0  ;;  %v12764_v25 = vadd.f32 %v12763_v36, %v12762_v51  ;;  %v12765_v48 = vpop.f32.mrb[84].mxu1 }
 0x317   :  { %16870 = vmatprep.subr.bf16.mxu0 %v16869_v21  ;;  %v22291_v22 = vadd.f32 %v13200_v12, %v13199_v5  ;;  %v22296_v43 = vadd.f32 %v12761_v15, %v22229_v55  ;;  %v16881_v55 = vpack.c.bf16 %v22169_v18, %v22158_v53  ;;  %v12766_v30 = vpop.f32.mrb[85].mxu1  ;;  %v5681_v15 = vsub.f32 %v21317_v1, %v27331_v11 }
 0x318   :  { %5068 = vmatmul.mubr.f32.gmra.mrb[134].mxu1 %v27324_v34  ;;  %v5555_v34 = vsub.f32 %v21303_v38, %v27328_v14 }
 0x319   :  { %12119 = vmatprep.mubr.msk.f32.mxu1 %vm18865_vm1, %v26295_v62  ;;  %16584 = vmatpush3.bf16.msra.mxu1 %v27303_v24  ;;  %v13202_v24 = vpop.f32.mrb[38].mxu0 }
 0x31a   :  { %16872 = vmatpush3.bf16.msra.mxu0 %v16869_v21  ;;  %16586 = vmatprep.subr.bf16.mxu1 %v27304_v10  ;;  %v5660_v10 = vsub.f32 %v21258_v56, %v27325_v54  ;;  %v13203_v19 = vpop.f32.mrb[39].mxu0  ;;  %v5548_v56 = vsub.f32 %v21291_v61, %v27327_v29  ;;  %v16885_v61 = vpack.c.bf16 %v22199_v41, %v22194_v0  ;;  %v5556_v36 = vand.u32 4294901760, %v5555_v34  ;;  %v27332_v54 = vld [vmem:[#allocation26_spill] sm:$0xff] }
 0x31b   :  { %16874 = vmatprep.subr.bf16.mxu0 %v16873_v47  ;;  %v13205_v26 = vpop.f32.mrb[40].mxu0  ;;  %v27336_v19 = vld [vmem:[#allocation31_spill] sm:$0xff]  ;;  %v27338_v29 = vld [vmem:[#allocation114_spill] sm:$0xff] }
 0x31c   :  { %v5661_v21 = vand.u32 4294901760, %v5660_v10  ;;  %v5549_v12 = vand.u32 4294901760, %v5548_v56  ;;  %v27333_v10 = vand.u32 4294901760, %v27332_v54  ;;  %v27339_v56 = vand.u32 4294901760, %v27338_v29 }
 0x31d   :  { %16588 = vmatpush3.bf16.msra.mxu1 %v27308_v58  ;;  %v22309_v58 = vadd.f32 %v12764_v25, %v22234_v44  ;;  %v12767_v44 = vadd.f32 %v12766_v30, %v12765_v48  ;;  %v27337_v48 = vand.u32 4294901760, %v27336_v19 }
 0x31e   :  { %16876 = vmatpush3.bf16.msra.mxu0 %v16873_v47  ;;  %16590 = vmatprep.subr.bf16.mxu1 %v27309_v31  ;;  %v5668_v31 = vand.u32 4294901760, %v5667_v40  ;;  %v13206_v47 = vpop.f32.mrb[41].mxu0  ;;  %v5562_v23 = vsub.f32 %v27332_v54, %v27333_v10  ;;  %v27350_v10 = vld [vmem:[#allocation127_spill] sm:$0xff]  ;;  %v27369_v54 = vand.u32 4294901760, %v21674_v50  ;;  %v27375_v50 = vld [vmem:[#allocation149_spill] sm:$0xff] }
 0x31f   :  { %16878 = vmatprep.subr.bf16.mxu0 %v16877_v45  ;;  %v22319_v7 = vadd.f32 %v13206_v47, %v13205_v26  ;;  %v22330_v38 = vadd.f32 %v12767_v44, %v22241_v60  ;;  %v5695_v26 = vsub.f32 %v27338_v29, %v27339_v56  ;;  %v27340_v47 = vld [vmem:[#allocation40_spill] sm:$0xff] }
 0x320   :  { %v16633_v24 = vpack.c.bf16 %v5668_v31, %v5661_v21  ;;  %v5682_v21 = vand.u32 4294901760, %v5681_v15  ;;  %v27344_v15 = vld [vmem:[#allocation168_spill] sm:$0xff] }
 0x321   :  { %16592 = vmatpush3.bf16.msra.mxu1 %v27310_v57  ;;  %27329 = vst [vmem:[#allocation166_spill] sm:$0xff] %v22319_v7  ;;  %v27330_v57 = vand.u32 4294901760, %v21312_v46  ;;  %v5696_v44 = vand.u32 4294901760, %v5695_v26  ;;  %v27399_v7 = vld [vmem:[#allocation125_spill] sm:$0xff] }
 0x322   :  { %16880 = vmatpush3.bf16.msra.mxu0 %v16877_v45  ;;  %16594 = vmatprep.subr.bf16.mxu1 %v27311_v17  ;;  %v12768_v17 = vpop.f32.mrb[86].mxu1  ;;  %v13208_v45 = vpop.f32.mrb[42].mxu0 }
 0x323   :  { %16882 = vmatprep.subr.bf16.mxu0 %v16881_v55  ;;  %v5674_v5 = vsub.f32 %v21312_v46, %v27330_v57  ;;  %v12769_v51 = vpop.f32.mrb[87].mxu1  ;;  %v27334_v46 = vld [vmem:[#allocation113_spill] sm:$0xff]  ;;  %v13209_v60 = vpop.f32.mrb[43].mxu0  ;;  %v27341_v57 = vand.u32 4294901760, %v27340_v47 }
 0x324   :  { %v27335_v40 = vand.u32 4294901760, %v27334_v46  ;;  %v12770_v1 = vadd.f32 %v12769_v51, %v12768_v17  ;;  %v27342_v17 = vld [vmem:[#allocation122_spill] sm:$0xff]  ;;  %v27345_v51 = vld [vmem:[#allocation52_spill] sm:$0xff] }
 0x325   :  { %16596 = vmatpush3.bf16.msra.mxu1 %v27312_v28  ;;  %v5688_v28 = vsub.f32 %v27336_v19, %v27337_v48  ;;  %v5675_v30 = vand.u32 4294901760, %v5674_v5  ;;  %v5576_v11 = vsub.f32 %v27340_v47, %v27341_v57  ;;  %v27343_v45 = vand.u32 4294901760, %v27342_v17  ;;  %v27354_v60 = vld [vmem:[#allocation136_spill] sm:$0xff]  ;;  %v27357_v47 = vld [vmem:[#allocation133_spill] sm:$0xff] }
 0x326   :  { %v5569_v25 = vsub.f32 %v27334_v46, %v27335_v40  ;;  %16884 = vmatpush3.bf16.msra.mxu0 %v16881_v55  ;;  %16598 = vmatprep.subr.bf16.mxu1 %v27313_v6  ;;  %v22347_v31 = vadd.f32 %v12770_v1, %v22248_v49  ;;  %v16635_v55 = vpack.c.bf16 %v5556_v36, %v5549_v12  ;;  %v5563_v6 = vand.u32 4294901760, %v5562_v23  ;;  %v27347_v36 = vld [vmem:[#allocation16_spill] sm:$0xff]  ;;  %v27352_v40 = vld [vmem:[#allocation21_spill] sm:$0xff] }
 0x327   :  { %16886 = vmatprep.subr.bf16.mxu0 %v16885_v61  ;;  %v5689_v34 = vand.u32 4294901760, %v5688_v28  ;;  %v5583_v5 = vsub.f32 %v27342_v17, %v27343_v45  ;;  %v16637_v49 = vpack.c.bf16 %v5682_v21, %v5675_v30  ;;  %v27351_v23 = vand.u32 4294901760, %v27350_v10  ;;  %v27356_v48 = vld [vmem:[#allocation140_spill] sm:$0xff]  ;;  %v27359_v45 = vld [vmem:[#allocation22_spill] sm:$0xff] }
 0x328   :  { %v5570_v14 = vand.u32 4294901760, %v5569_v25  ;;  %v27353_v25 = vand.u32 4294901760, %v27352_v40  ;;  %v5577_v56 = vand.u32 4294901760, %v5576_v11  ;;  %v27358_v57 = vand.u32 4294901760, %v27357_v47  ;;  %v27377_v11 = vld [vmem:[#allocation71_spill] sm:$0xff] }
 0x329   :  { %16600 = vmatpush3.bf16.msra.mxu1 %v27314_v27  ;;  %v27346_v27 = vand.u32 4294901760, %v27345_v51  ;;  %v5590_v46 = vsub.f32 %v27350_v10, %v27351_v23  ;;  %v16641_v29 = vpack.c.bf16 %v5696_v44, %v5689_v34  ;;  %v5584_v26 = vand.u32 4294901760, %v5583_v5  ;;  %v27363_v44 = vld [vmem:[#allocation44_spill] sm:$0xff] }
 0x32a   :  { %16888 = vmatpush3.bf16.msra.mxu0 %v16885_v61  ;;  %16634 = vmatprep.subr.bf16.mxu1 %v16633_v24  ;;  %v27348_v61 = vand.u32 4294901760, %v27347_v36  ;;  %v5597_v1 = vsub.f32 %v27352_v40, %v27353_v25  ;;  %v16639_v28 = vpack.c.bf16 %v5570_v14, %v5563_v6  ;;  %v5716_v17 = vsub.f32 %v27357_v47, %v27358_v57  ;;  %v27362_v6 = vld [vmem:[#allocation141_spill] sm:$0xff]  ;;  %v27365_v5 = vld [vmem:[#allocation56_spill] sm:$0xff] }
 0x32b   :  { %16890 = vmatprep.subr.bf16.mxu0 %v27344_v15  ;;  %v5702_v12 = vsub.f32 %v27345_v51, %v27346_v27  ;;  %v27360_v51 = vand.u32 4294901760, %v27359_v45  ;;  %v5591_v14 = vand.u32 4294901760, %v5590_v46  ;;  %v16643_v10 = vpack.c.bf16 %v5584_v26, %v5577_v56  ;;  %v27370_v23 = vld [vmem:[#allocation60_spill] sm:$0xff] }
 0x32c   :  { %v5709_v24 = vsub.f32 %v27347_v36, %v27348_v61  ;;  %12120 = vmatmul.mubr.msk.f32.vlgmr.msra.gmra.mrb[136].mxu1 %vm18885_vm3, %v26295_v62  ;;  %v5598_v34 = vand.u32 4294901760, %v5597_v1  ;;  %v27367_v36 = vld [vmem:[#allocation143_spill] sm:$0xff]  ;;  %v27371_v46 = vand.u32 4294901760, %v27370_v23  ;;  %v27372_v25 = vld [vmem:[#allocation148_spill] sm:$0xff]  ;;  %v5717_v57 = vand.u32 4294901760, %v5716_v17 }
 0x32d   :  { %14820 = vmatmul.mubr.f32.vlgmr.msra.gmra.mrb[76].mxu0 %v27354_v60  ;;  %12121 = vmatprep.mubr.msk.f32.mxu1 %vm18915_vm5, %v26295_v62  ;;  %v5703_v30 = vand.u32 4294901760, %v5702_v12  ;;  %v5723_v27 = vsub.f32 %v27359_v45, %v27360_v51  ;;  %v27368_v61 = vand.u32 4294901760, %v27367_v36  ;;  %v27373_v1 = vand.u32 4294901760, %v27372_v25 }
 0x32e   :  { %16636 = vmatpush3.bf16.msra.mxu1 %v16635_v55  ;;  %14822 = vmatprep.mubr.f32.mxu0 %v27356_v48  ;;  %v5710_v21 = vand.u32 4294901760, %v5709_v24  ;;  %v5730_v40 = vsub.f32 %v27370_v23, %v27371_v46  ;;  %v16647_v56 = vpack.c.bf16 %v5598_v34, %v5591_v14  ;;  %v27383_v34 = vld [vmem:[#allocation24_spill] sm:$0xff]  ;;  %v27386_v46 = vld [vmem:[#allocation150_spill] sm:$0xff]  ;;  %vm27462_vm5 = vcmp.eq.s32.totalorder %v27124_v59, %v21584_v3 }
 0x32f   :  { %16892 = vmatpush3.bf16.msra.mxu0 %v27344_v15  ;;  %16638 = vmatprep.subr.bf16.mxu1 %v16637_v49  ;;  %v27366_v49 = vand.u32 4294901760, %v27365_v5  ;;  %v5611_v24 = vsub.f32 %v27367_v36, %v27368_v61  ;;  %v5737_v19 = vsub.f32 %v27372_v25, %v27373_v1  ;;  %v5724_v45 = vand.u32 4294901760, %v5723_v27  ;;  %v27381_v36 = vld [vmem:[#allocation155_spill] sm:$0xff]  ;;  %v12803_v25 = vpop.f32.mrb[88].mxu1 }
 0x330   :  { %12122 = vmatmul.mubr.msk.f32.gmra.mrb[138].mxu1 %vm18910_vm4, %v26295_v62  ;;  %16894 = vmatprep.subr.bf16.mxu0 %v27362_v6  ;;  %v16645_v47 = vpack.c.bf16 %v5710_v21, %v5703_v30  ;;  %v27379_v30 = vld [vmem:[#allocation75_spill] sm:$0xff]  ;;  %v5731_v27 = vand.u32 4294901760, %v5730_v40  ;;  %v27382_v61 = vand.u32 4294901760, %v27381_v36 }
 0x331   :  { %14823 = vmatmul.mubr.f32.gmra.mrb[78].mxu0 %v27363_v44  ;;  %12123 = vmatprep.mubr.msk.f32.mxu1 %vm18957_vm7, %v26295_v62  ;;  %v5604_v12 = vsub.f32 %v27365_v5, %v27366_v49  ;;  %v5612_v55 = vand.u32 4294901760, %v5611_v24  ;;  %v27378_v5 = vand.u32 4294901760, %v27377_v11  ;;  %v27380_v21 = vand.u32 4294901760, %v27379_v30  ;;  %vm27466_vm7 = vmmov %vm27320_vm10 }
 0x332   :  { %16640 = vmatpush3.bf16.msra.mxu1 %v16639_v28  ;;  %14857 = vmatprep.mubr.f32.mxu0 %v27369_v54  ;;  %v5738_v49 = vand.u32 4294901760, %v5737_v19  ;;  %v5744_v14 = vsub.f32 %v27381_v36, %v27382_v61  ;;  %v27384_v54 = vand.u32 4294901760, %v27383_v34  ;;  %v16649_v24 = vpack.c.bf16 %v5724_v45, %v5717_v57  ;;  %v27388_v28 = vld [vmem:[#allocation28_spill] sm:$0xff]  ;;  %v12804_v57 = vpop.f32.mrb[89].mxu1 }
 0x333   :  { %16896 = vmatpush3.bf16.msra.mxu0 %v27362_v6  ;;  %16642 = vmatprep.subr.bf16.mxu1 %v16641_v29  ;;  %v5605_v51 = vand.u32 4294901760, %v5604_v12  ;;  %v5618_v29 = vsub.f32 %v27377_v11, %v27378_v5  ;;  %v5625_v17 = vsub.f32 %v27379_v30, %v27380_v21  ;;  %v27389_v26 = vand.u32 4294901760, %v27388_v28  ;;  %v27390_v21 = vld [vmem:[#allocation30_spill] sm:$0xff] }
 0x334   :  { %12124 = vmatmul.mubr.msk.f32.gmra.mrb[140].mxu1 %vm18952_vm6, %v26295_v62  ;;  %16898 = vmatprep.subr.bf16.mxu0 %v27375_v50  ;;  %v5751_v12 = vsub.f32 %v27383_v34, %v27384_v54  ;;  %v16653_v45 = vpack.c.bf16 %v5738_v49, %v5731_v27  ;;  %v5745_v5 = vand.u32 4294901760, %v5744_v14  ;;  %v27391_v36 = vand.u32 4294901760, %v27390_v21  ;;  %v27394_v54 = vld [vmem:[#allocation36_spill] sm:$0xff]  ;;  %v27396_v27 = vld [vmem:[#allocation170_spill] sm:$0xff]  ;;  %vm27464_vm6 = vmmov %vm27318_vm15 }
 0x335   :  { %12125 = vmatprep.mubr.msk.f32.mxu1 %vm27295_vm9, %v26295_v62  ;;  %v16651_v40 = vpack.c.bf16 %v5612_v55, %v5605_v51  ;;  %v5619_v1 = vand.u32 4294901760, %v5618_v29  ;;  %v5626_v19 = vand.u32 4294901760, %v5625_v17  ;;  %v5632_v11 = vsub.f32 %v27388_v28, %v27389_v26  ;;  %v27392_v29 = vld [vmem:[#allocation35_spill] sm:$0xff]  ;;  %v12806_v28 = vpop.f32.mrb[90].mxu1 }
 0x336   :  { %16644 = vmatpush3.bf16.msra.mxu1 %v16643_v10  ;;  %v5752_v30 = vand.u32 4294901760, %v5751_v12  ;;  %v5639_v61 = vsub.f32 %v27390_v21, %v27391_v36  ;;  %v12805_v51 = vadd.f32 %v12804_v57, %v12803_v25  ;;  %v27393_v17 = vand.u32 4294901760, %v27392_v29  ;;  %v12807_v25 = vpop.f32.mrb[91].mxu1  ;;  %v27397_v36 = vld [vmem:[#allocation51_spill] sm:$0xff] }
 0x337   :  { %16900 = vmatpush3.bf16.msra.mxu0 %v27375_v50  ;;  %16646 = vmatprep.subr.bf16.mxu1 %v16645_v47  ;;  %v13287_v47 = vpop.f32.mrb[44].mxu0  ;;  %v16655_v12 = vpack.c.bf16 %v5626_v19, %v5619_v1  ;;  %v5633_v26 = vand.u32 4294901760, %v5632_v11  ;;  %vm8782_vm10 = vcmask 64512  }
 0x338   :  { %12126 = vmatmul.mubr.msk.f32.gmra.mrb[142].mxu1 %vm27300_vm8, %v26295_v62  ;;  %16902 = vmatprep.subr.bf16.mxu0 %v27386_v46  ;;  %v13288_v55 = vpop.f32.mrb[45].mxu0  ;;  %v5758_v34 = vsub.f32 %v27392_v29, %v27393_v17  ;;  %v3191_v14 = vadd.f32 %v12805_v51, %v22296_v43  ;;  %v16657_v57 = vpack.c.bf16 %v5752_v30, %v5745_v5  ;;  %v5640_v21 = vand.u32 4294901760, %v5639_v61  ;;  %v27402_v5 = vld [vmem:[#allocation171_spill] sm:$0xff]  ;;  %v12809_v61 = vpop.f32.mrb[92].mxu1  ;;  %vm27482_vm8 = vmmov %vm27464_vm6 }
 0x339   :  { %12127 = vmatprep.mubr.msk.f32.mxu1 %vm19378_vm13, %v26295_v62  ;;  %v22448_v49 = vadd.f32 %v13288_v55, %v13287_v47  ;;  %v27398_v29 = vand.u32 4294901760, %v27397_v36  ;;  %v12808_v43 = vadd.f32 %v12807_v25, %v12806_v28  ;;  %v27403_v28 = vld [vmem:[#allocation49_spill] sm:$0xff] }
 0x33a   :  { %16648 = vmatpush3.bf16.msra.mxu1 %v16647_v56  ;;  %v27395_v56 = vand.u32 4294901760, %v27394_v54  ;;  %v5759_v19 = vand.u32 4294901760, %v5758_v34  ;;  %v16659_v51 = vpack.c.bf16 %v5640_v21, %v5633_v26  ;;  %v27404_v25 = vld [vmem:[#allocation97_spill] sm:$0xff] }
 0x33b   :  { %16904 = vmatpush3.bf16.msra.mxu0 %v27386_v46  ;;  %16650 = vmatprep.subr.bf16.mxu1 %v16649_v24  ;;  %v13290_v24 = vpop.f32.mrb[46].mxu0  ;;  %v5646_v17 = vsub.f32 %v27397_v36, %v27398_v29  ;;  %v3198_v30 = vadd.f32 %v12808_v43, %v22309_v58 }
 0x33c   :  { %v5765_v23 = vsub.f32 %v27394_v54, %v27395_v56  ;;  %16906 = vmatprep.subr.bf16.mxu0 %v27396_v27  ;;  %v27400_v54 = vand.u32 4294901760, %v27399_v7  ;;  %v13291_v1 = vpop.f32.mrb[47].mxu0  ;;  %v12810_v24 = vpop.f32.mrb[93].mxu1 }
 0x33d   :  { %v13293_v55 = vpop.f32.mrb[48].mxu0  ;;  %v27406_v1 = vld [vmem:[#allocation55_spill] sm:$0xff] }
 0x33e   :  { %16652 = vmatpush3.bf16.msra.mxu1 %v16651_v40  ;;  %v5653_v56 = vsub.f32 %v27399_v7, %v27400_v54  ;;  %v5766_v11 = vand.u32 4294901760, %v5765_v23  ;;  %v27401_v40 = vld [vmem:[#allocation25_spill] sm:$0xff]  ;;  %v5647_v7 = vand.u32 4294901760, %v5646_v17  ;;  %v13294_v34 = vpop.f32.mrb[49].mxu0 }
 0x33f   :  { %16908 = vmatpush3.bf16.msra.mxu0 %v27396_v27  ;;  %16654 = vmatprep.subr.bf16.mxu1 %v16653_v45  ;;  %v22459_v47 = vadd.f32 %v27401_v40, %v3191_v14  ;;  %v12811_v45 = vadd.f32 %v12810_v24, %v12809_v61  ;;  %v22465_v14 = vadd.f32 %v27403_v28, %v3198_v30  ;;  %v13296_v21 = vpop.f32.mrb[50].mxu0  ;;  %v27409_v30 = vld [vmem:[#allocation151_spill] sm:$0xff]  ;;  %v27422_v28 = vand.u32 4294901760, %v27363_v44 }
 0x340   :  { %16910 = vmatprep.subr.bf16.mxu0 %v27402_v5  ;;  %v5654_v36 = vand.u32 4294901760, %v5653_v56  ;;  %v16661_v23 = vpack.c.bf16 %v5766_v11, %v5759_v19  ;;  %v22468_v29 = vadd.f32 %v13294_v34, %v13293_v55  ;;  %v13297_v54 = vpop.f32.mrb[51].mxu0  ;;  %v27405_v56 = vld [vmem:[#allocation126_spill] sm:$0xff]  ;;  %v27407_v19 = vand.u32 4294901760, %v21945_v2  ;;  %v27410_v61 = vld [vmem:[#allocation131_spill] sm:$0xff]  ;;  %v27418_v34 = vld [vmem:[#allocation173_spill] sm:$0xff] }
 0x341   :  { %v3205_v58 = vadd.f32 %v12811_v45, %v22330_v38  ;;  %v27408_v11 = vand.u32 4294901760, %v21957_v8  ;;  %v27412_v2 = vand.u32 4294901760, %v22005_v52  ;;  %v27413_v8 = vand.u32 4294901760, %v22010_v20  ;;  %v27434_v54 = vld [vmem:[#allocation159_spill] sm:$0xff] }
 0x342   :  { %16656 = vmatpush3.bf16.msra.mxu1 %v16655_v12  ;;  %v12812_v12 = vpop.f32.mrb[94].mxu1  ;;  %v16663_v26 = vpack.c.bf16 %v5654_v36, %v5647_v7  ;;  %v27416_v36 = vld [vmem:[#allocation152_spill] sm:$0xff]  ;;  %v27417_v45 = vand.u32 4294901760, %v27356_v48  ;;  %v27420_v20 = vand.u32 4294901760, %v22049_v9  ;;  %v27430_v44 = vand.u32 4294901760, %v22065_v4 }
 0x343   :  { %16912 = vmatpush3.bf16.msra.mxu0 %v27402_v5  ;;  %16658 = vmatprep.subr.bf16.mxu1 %v16657_v57  ;;  %v12813_v17 = vpop.f32.mrb[95].mxu1  ;;  %v22473_v43 = vadd.f32 %v27405_v56, %v3205_v58  ;;  %v16921_v38 = vpack.c.bf16 %v27408_v11, %v27407_v19  ;;  %v16925_v24 = vpack.c.bf16 %v27413_v8, %v27412_v2  ;;  %v27424_v48 = vld [vmem:[#allocation176_spill] sm:$0xff]  ;;  %v27435_v56 = vld [vmem:[#allocation62_spill] sm:$0xff]  ;;  %v27437_v19 = vand.u32 4294901760, %v22103_v42  ;;  %v27439_v11 = vld [vmem:[#allocation41_spill] sm:$0xff] }
 0x344   :  { %16914 = vmatprep.subr.bf16.mxu0 %v27404_v25  ;;  %v12814_v57 = vadd.f32 %v12813_v17, %v12812_v12  ;;  %v27425_v12 = vld [vmem:[#allocation132_spill] sm:$0xff]  ;;  %v27431_v17 = vld [vmem:[#allocation78_spill] sm:$0xff]  ;;  %vm27436_vm4 = vnez %v27435_v56  ;;  %v27443_v42 = vand.u32 4294901760, %v22134_v37  ;;  %v27448_v37 = vand.u32 4294901760, %v22158_v53 }
 0x345   :  { %vm27426_vm1 = vcmp.eq.s32.totalorder %v27124_v59, %v27425_v12  ;;  %vm27432_vm3 = vnez %v27431_v17  ;;  %v27441_v8 = vld [vmem:[#allocation164_spill] sm:$0xff]  ;;  %v22566_v53 = vld [vmem:[#allocation8 + $0x688] sm:$0xff] }
 0x346   :  { %16660 = vmatpush3.bf16.msra.mxu1 %v16659_v51  ;;  %v3212_v40 = vadd.f32 %v12814_v57, %v22347_v31  ;;  %v27414_v31 = vand.u32 4294901760, %v27354_v60  ;;  %v27421_v60 = vand.u32 4294901760, %v22054_v35  ;;  %v27429_v35 = vand.u32 4294901760, %v22060_v39  ;;  %v27433_v57 = vld [vmem:[#allocation156_spill] sm:$0xff]  ;;  %vm27468_vm15 = vmmov %vm27426_vm1 }
 0x347   :  { %16916 = vmatpush3.bf16.msra.mxu0 %v27404_v25  ;;  %16662 = vmatprep.subr.bf16.mxu1 %v16661_v23  ;;  %v27438_v39 = vand.u32 4294901760, %v22117_v33  ;;  %v27444_v33 = vand.u32 4294901760, %v22139_v16  ;;  %v27449_v16 = vand.u32 4294901760, %v22169_v18  ;;  %v22753_v7 = vld [vmem:[#allocation8 + $0x638] sm:$0xff] }
 0x348   :  { %16918 = vmatprep.subr.bf16.mxu0 %v27406_v1  ;;  %v22484_v51 = vadd.f32 %v27410_v61, %v3212_v40  ;;  %v16929_v23 = vpack.c.bf16 %v27421_v60, %v27420_v20  ;;  %v16933_v21 = vpack.c.bf16 %v27430_v44, %v27429_v35  ;;  %v27440_v40 = vld [vmem:[#allocation162_spill] sm:$0xff]  ;;  %v22823_v17 = vld [vmem:[#allocation8 + $0x658] sm:$0xff] }
 0x349   :  { %v16937_v4 = vpack.c.bf16 %v27438_v39, %v27437_v19  ;;  %v16941_v20 = vpack.c.bf16 %v27444_v33, %v27443_v42  ;;  %v27451_v42 = vld [vmem:[#allocation101_spill] sm:$0xff] }
 0x34a   :  { %16664 = vmatpush3.bf16.msra.mxu1 %v16663_v26  ;;  %v27427_v26 = vld [vmem:[#allocation154_spill] sm:$0xff] }
 0x34b   :  { %16920 = vmatpush3.bf16.msra.mxu0 %v27406_v1  ;;  %16698 = vmatprep.subr.bf16.mxu1 %v27409_v30 }
 0x34c   :  { %16922 = vmatprep.subr.bf16.mxu0 %v16921_v38 }
 0x34d   :  { %12128 = vmatmul.mubr.msk.f32.vlgmr.msra.gmra.mrb[144].mxu1 %vm18860_vm0, %v26295_v62 }
 0x34e   :  { %14858 = vmatmul.mubr.f32.vlgmr.msra.gmra.mrb[76].mxu0 %v27414_v31  ;;  %12129 = vmatprep.mubr.msk.f32.mxu1 %vm19373_vm12, %v26295_v62 }
 0x34f   :  { %16700 = vmatpush3.bf16.msra.mxu1 %v27416_v36  ;;  %14860 = vmatprep.mubr.f32.mxu0 %v27417_v45 }
 0x350   :  { %16924 = vmatpush3.bf16.msra.mxu0 %v16921_v38  ;;  %16702 = vmatprep.subr.bf16.mxu1 %v27418_v34 }
 0x351   :  { %12130 = vmatmul.mubr.msk.f32.gmra.mrb[146].mxu1 %vm18880_vm2, %v26295_v62  ;;  %16926 = vmatprep.subr.bf16.mxu0 %v16925_v24  ;;  %v12891_v38 = vpop.f32.mrb[96].mxu1  ;;  %v13375_v61 = vpop.f32.mrb[52].mxu0 }
 0x352   :  { %14861 = vmatmul.mubr.f32.gmra.mrb[78].mxu0 %v27422_v28  ;;  %12131 = vmatprep.mubr.msk.f32.mxu1 %vm19383_vm14, %v26295_v62  ;;  %v12892_v2 = vpop.f32.mrb[97].mxu1  ;;  %v13376_v31 = vpop.f32.mrb[53].mxu0  ;;  %v27445_v28 = vld [vmem:[#allocation43_spill] sm:$0xff] }
 0x353   :  { %16704 = vmatpush3.bf16.msra.mxu1 %v27424_v48  ;;  %14895 = vmatprep.mubr.msk.f32.mxu0 %vm27426_vm1, %v26295_v62  ;;  %v22542_v45 = vadd.f32 %v13376_v31, %v13375_v61  ;;  %v16945_v61 = vpack.c.bf16 %v27449_v16, %v27448_v37  ;;  %v27456_v37 = vld [vmem:[#allocation61_spill] sm:$0xff] }
 0x354   :  { %16928 = vmatpush3.bf16.msra.mxu0 %v16925_v24  ;;  %16706 = vmatprep.subr.bf16.mxu1 %v27427_v26  ;;  %v12893_v24 = vadd.f32 %v12892_v2, %v12891_v38 }
 0x355   :  { %12132 = vmatmul.mubr.msk.f32.gmra.mrb[148].mxu1 %vm19035_vm11, %v26295_v62  ;;  %16930 = vmatprep.subr.bf16.mxu0 %v16929_v23  ;;  %27442 = vst [vmem:[#allocation102_spill] sm:$0xff] %v22542_v45 }
 0x356   :  { %12133 = vmatprep.mubr.msk.f32.mxu1 %vm27432_vm3, %v26295_v62  ;;  %v3601_v60 = vadd.f32 %v12893_v24, %v22459_v47  ;;  %v13378_v35 = vpop.f32.mrb[54].mxu0  ;;  %v27450_v24 = vld [vmem:[#allocation100_spill] sm:$0xff] }
 0x357   :  { %16708 = vmatpush3.bf16.msra.mxu1 %v27433_v57  ;;  %v13379_v39 = vpop.f32.mrb[55].mxu0 }
 0x358   :  { %16932 = vmatpush3.bf16.msra.mxu0 %v16929_v23  ;;  %16710 = vmatprep.subr.bf16.mxu1 %v27434_v54  ;;  %v12894_v23 = vpop.f32.mrb[98].mxu1 }
 0x359   :  { %12134 = vmatmul.mubr.msk.f32.gmra.mrb[150].mxu1 %vm27436_vm4, %v26295_v62  ;;  %16934 = vmatprep.subr.bf16.mxu0 %v16933_v21  ;;  %v12895_v44 = vpop.f32.mrb[99].mxu1 }
 0x35a   :  { %6061 = vmatprep.mubr.f32.mxu1 %v27439_v11  ;;  %v12896_v19 = vadd.f32 %v12895_v44, %v12894_v23  ;;  %v27447_v11 = vld [vmem:[#allocation138_spill] sm:$0xff]  ;;  %v12897_v2 = vpop.f32.mrb[100].mxu1  ;;  %v13381_v31 = vpop.f32.mrb[56].mxu0  ;;  %v22564_v44 = vld [vmem:[#allocation8 + $0x680] sm:$0xff] }
 0x35b   :  { %16712 = vmatpush3.bf16.msra.mxu1 %v27440_v40  ;;  %v22552_v38 = vadd.f32 %v27447_v11, %v3601_v60  ;;  %v13382_v23 = vpop.f32.mrb[57].mxu0  ;;  %v27452_v60 = vld [vmem:[#allocation139_spill] sm:$0xff] }
 0x35c   :  { %16936 = vmatpush3.bf16.msra.mxu0 %v16933_v21  ;;  %16714 = vmatprep.subr.bf16.mxu1 %v27441_v8  ;;  %v27446_v21 = vld [vmem:[#allocation46_spill] sm:$0xff]  ;;  %v3608_v47 = vadd.f32 %v12896_v19, %v22465_v14  ;;  %v22568_v18 = vadd.f32 %v13382_v23, %v13381_v31  ;;  %v27454_v14 = vand.u32 4294901760, %v22194_v0  ;;  %v27455_v19 = vand.u32 4294901760, %v22199_v41 }
 0x35d   :  { %16938 = vmatprep.subr.bf16.mxu0 %v16937_v4  ;;  %v27458_v0 = vld [vmem:[#allocation146_spill] sm:$0xff] }
 0x35e   :  { %v22562_v35 = vadd.f32 %v27452_v60, %v3608_v47  ;;  %27453 = vst [vmem:[#allocation73_spill] sm:$0xff] %v22568_v18  ;;  %v16949_v39 = vpack.c.bf16 %v27455_v19, %v27454_v14  ;;  %v13384_v16 = vpop.f32.mrb[58].mxu0  ;;  %v27457_v60 = vld [vmem:[#allocation109_spill] sm:$0xff] }
 0x35f   :  { %16716 = vmatpush3.bf16.msra.mxu1 %v27445_v28  ;;  %v13385_v23 = vpop.f32.mrb[59].mxu0  ;;  %v27460_v19 = vld [vmem:[#allocation169_spill] sm:$0xff] }
 0x360   :  { %16940 = vmatpush3.bf16.msra.mxu0 %v16937_v4  ;;  %16718 = vmatprep.subr.bf16.mxu1 %v27446_v21  ;;  %v12898_v4 = vpop.f32.mrb[101].mxu1 }
 0x361   :  { %16942 = vmatprep.subr.bf16.mxu0 %v16941_v20  ;;  %v12899_v33 = vadd.f32 %v12898_v4, %v12897_v2  ;;  %v12900_v11 = vpop.f32.mrb[102].mxu1  ;;  %v7316_v2 = vand.u32 4294901760, %v22564_v44  ;;  %v7319_v4 = vand.u32 4294901760, %v22566_v53 }
 0x362   :  { %v12901_v47 = vpop.f32.mrb[103].mxu1 }
 0x363   :  { %16720 = vmatpush3.bf16.msra.mxu1 %v27450_v24  ;;  %v12902_v31 = vadd.f32 %v12901_v47, %v12900_v11  ;;  %v22585_v41 = vsub.f32 %v22564_v44, %v7316_v2  ;;  %v27461_v11 = vld [vmem:[#allocation91_spill] sm:$0xff]  ;;  %v22696_v44 = vld [vmem:[#allocation8 + $0x6a8] sm:$0xff] }
 0x364   :  { %16944 = vmatpush3.bf16.msra.mxu0 %v16941_v20  ;;  %16722 = vmatprep.subr.bf16.mxu1 %v27451_v42  ;;  %v3615_v20 = vadd.f32 %v12899_v33, %v22473_v43  ;;  %v22590_v43 = vsub.f32 %v22566_v53, %v7319_v4  ;;  %v27459_v33 = vld [vmem:[#allocation110_spill] sm:$0xff]  ;;  %v27478_v53 = vld [vmem:[#allocation108_spill] sm:$0xff] }
 0x365   :  { %16946 = vmatprep.subr.bf16.mxu0 %v16945_v61 }
 0x366   :  { %v22580_v18 = vadd.f32 %v27458_v0, %v3615_v20 }
 0x367   :  { %16724 = vmatpush3.bf16.msra.mxu1 %v27456_v37 }
 0x368   :  { %16948 = vmatpush3.bf16.msra.mxu0 %v16945_v61  ;;  %16726 = vmatprep.subr.bf16.mxu1 %v27457_v60  ;;  %v3622_v61 = vadd.f32 %v12902_v31, %v22484_v51  ;;  %v27463_v51 = vld [vmem:[#allocation39_spill] sm:$0xff] }
 0x369   :  { %16950 = vmatprep.subr.bf16.mxu0 %v16949_v39 }
 0x36a   :  { %v22598_v20 = vadd.f32 %v27460_v19, %v3622_v61  ;;  %v27474_v61 = vld [vmem:[#allocation19_spill] sm:$0xff] }
 0x36b   :  { %16728 = vmatpush3.bf16.msra.mxu1 %v27459_v33 }
 0x36c   :  { %16952 = vmatpush3.bf16.msra.mxu0 %v16949_v39  ;;  %16762 = vmatprep.subr.bf16.mxu1 %v27409_v30  ;;  %v27465_v30 = vld [vmem:[#allocation99_spill] sm:$0xff]  ;;  %v27467_v39 = vld [vmem:[#allocation20_spill] sm:$0xff] }
 0x36d   :  { %16954 = vmatprep.subr.bf16.mxu0 %v27344_v15 }
 0x36e   :  { %6065 = vmatmul.mubr.f32.vlgmr.msra.gmra.mrb[152].mxu1 %v27461_v11  ;;  %v22660_v11 = vld [vmem:[#allocation8 + $0x600] sm:$0xff] }
 0x36f   :  { %14896 = vmatmul.mubr.msk.f32.vlgmr.msra.gmra.mrb[76].mxu0 %vm27462_vm5, %v26295_v62  ;;  %6072 = vmatprep.mubr.f32.mxu1 %v27463_v51 }
 0x370   :  { %16764 = vmatpush3.bf16.msra.mxu1 %v27416_v36  ;;  %14898 = vmatprep.mubr.msk.f32.mxu0 %vm27464_vm6, %v26295_v62  ;;  %v27470_v36 = vld [vmem:[#allocation45_spill] sm:$0xff] }
 0x371   :  { %16956 = vmatpush3.bf16.msra.mxu0 %v27344_v15  ;;  %16766 = vmatprep.subr.bf16.mxu1 %v27418_v34  ;;  %v27469_v15 = vld [vmem:[#allocation120_spill] sm:$0xff]  ;;  %v27471_v34 = vld [vmem:[#allocation121_spill] sm:$0xff] }
 0x372   :  { %6076 = vmatmul.mubr.f32.gmra.mrb[154].mxu1 %v27465_v30  ;;  %16958 = vmatprep.subr.bf16.mxu0 %v27362_v6 }
 0x373   :  { %14899 = vmatmul.mubr.msk.f32.gmra.mrb[78].mxu0 %vm27466_vm7, %v26295_v62  ;;  %6083 = vmatprep.mubr.f32.mxu1 %v27467_v39  ;;  %v22668_v39 = vld [vmem:[#allocation8 + $0x690] sm:$0xff] }
 0x374   :  { %16768 = vmatpush3.bf16.msra.mxu1 %v27424_v48  ;;  %14933 = vmatprep.mubr.msk.f32.mxu0 %vm27468_vm15, %v26295_v62  ;;  %v13463_v48 = vpop.f32.mrb[60].mxu0 }
 0x375   :  { %16960 = vmatpush3.bf16.msra.mxu0 %v27362_v6  ;;  %16770 = vmatprep.subr.bf16.mxu1 %v27427_v26  ;;  %v12979_v6 = vpop.f32.mrb[104].mxu1  ;;  %v13464_v26 = vpop.f32.mrb[61].mxu0 }
 0x376   :  { %6087 = vmatmul.mubr.f32.gmra.mrb[156].mxu1 %v27469_v15  ;;  %16962 = vmatprep.subr.bf16.mxu0 %v27375_v50  ;;  %v12980_v12 = vpop.f32.mrb[105].mxu1 }
 0x377   :  { %6094 = vmatprep.mubr.f32.mxu1 %v27470_v36  ;;  %v12982_v16 = vpop.f32.mrb[106].mxu1  ;;  %v13466_v10 = vpop.f32.mrb[62].mxu0  ;;  %v25827_v36 = vand.u32 4294901760, %v22660_v11 }
 0x378   :  { %16772 = vmatpush3.bf16.msra.mxu1 %v27433_v57  ;;  %v22643_v57 = vadd.f32 %v13464_v26, %v13463_v48  ;;  %v12983_v47 = vpop.f32.mrb[107].mxu1  ;;  %v27476_v48 = vld [vmem:[#allocation142_spill] sm:$0xff]  ;;  %v22691_v26 = vld [vmem:[#allocation8 + $0x618] sm:$0xff] }
 0x379   :  { %16964 = vmatpush3.bf16.msra.mxu0 %v27375_v50  ;;  %16774 = vmatprep.subr.bf16.mxu1 %v27434_v54  ;;  %v12981_v50 = vadd.f32 %v12980_v12, %v12979_v6  ;;  %v25818_v10 = vand.u32 4294901760, %v22691_v26 }
 0x37a   :  { %6098 = vmatmul.mubr.f32.gmra.mrb[158].mxu1 %v27471_v34  ;;  %16966 = vmatprep.subr.bf16.mxu0 %v27386_v46  ;;  %27472 = vst [vmem:[#allocation29_spill] sm:$0xff] %v22643_v57 }
 0x37b   :  { %12143 = vmatprep.mubr.msk.f32.mxu1 %vm19378_vm13, %v26295_v62  ;;  %v3895_v54 = vadd.f32 %v12981_v50, %v22552_v38  ;;  %v12985_v0 = vpop.f32.mrb[108].mxu1  ;;  %v25823_v50 = vand.u32 4294901760, %v22668_v39  ;;  %vm27481_vm13 = vmmov %vm27462_vm5  ;;  %vm8772_vm5 = vcmask 1041408  }
 0x37c   :  { %16776 = vmatpush3.bf16.msra.mxu1 %v27440_v40  ;;  %v13467_v40 = vpop.f32.mrb[63].mxu0 }
 0x37d   :  { %16968 = vmatpush3.bf16.msra.mxu0 %v27386_v46  ;;  %16778 = vmatprep.subr.bf16.mxu1 %v27441_v8  ;;  %v12984_v46 = vadd.f32 %v12983_v47, %v12982_v16  ;;  %v27473_v8 = vld [vmem:[#allocation48_spill] sm:$0xff]  ;;  %v13469_v38 = vpop.f32.mrb[64].mxu0  ;;  %v25816_v47 = vand.u32 4294901760, %v22696_v44  ;;  %v22722_v40 = vld [vmem:[#allocation8 + $0x628] sm:$0xff] }
 0x37e   :  { %16970 = vmatprep.subr.bf16.mxu0 %v27396_v27  ;;  %v22650_v31 = vadd.f32 %v27473_v8, %v3895_v54  ;;  %v22694_v16 = vld [vmem:[#allocation8 + $0x6a0] sm:$0xff]  ;;  %v22727_v8 = vld [vmem:[#allocation8 + $0x6b0] sm:$0xff] }
 0x37f   :  { %v3906_v23 = vadd.f32 %v12984_v46, %v22562_v35  ;;  %v22665_v35 = vld [vmem:[#allocation8 + $0x608] sm:$0xff]  ;;  %v22720_v46 = vld [vmem:[#allocation8 + $0x620] sm:$0xff] }
 0x380   :  { %16780 = vmatpush3.bf16.msra.mxu1 %v27445_v28  ;;  %v12986_v28 = vpop.f32.mrb[109].mxu1  ;;  %v25815_v3 = vand.u32 4294901760, %v22720_v46 }
 0x381   :  { %16972 = vmatpush3.bf16.msra.mxu0 %v27396_v27  ;;  %16782 = vmatprep.subr.bf16.mxu1 %v27446_v21  ;;  %v12987_v27 = vadd.f32 %v12986_v28, %v12985_v0  ;;  %v13470_v21 = vpop.f32.mrb[65].mxu0  ;;  %v22658_v19 = vadd.f32 %v27474_v61, %v3906_v23  ;;  %v12988_v30 = vpop.f32.mrb[110].mxu1  ;;  %v22729_v23 = vld [vmem:[#allocation8 + $0x6b8] sm:$0xff]  ;;  %v25814_v0 = vand.u32 4294901760, %v22722_v40  ;;  %v25813_v28 = vand.u32 4294901760, %v22727_v8  ;;  %v22769_v61 = vld [vmem:[#allocation8 + $0x6c8] sm:$0xff] }
 0x382   :  { %16974 = vmatprep.subr.bf16.mxu0 %v27402_v5  ;;  %v22663_v51 = vadd.f32 %v13470_v21, %v13469_v38  ;;  %v12989_v15 = vpop.f32.mrb[111].mxu1  ;;  %v22751_v38 = vld [vmem:[#allocation8 + $0x630] sm:$0xff]  ;;  %v22767_v21 = vld [vmem:[#allocation8 + $0x6c0] sm:$0xff]  ;;  %v25819_v58 = vand.u32 4294901760, %v22769_v61 }
 0x383   :  { %v12990_v34 = vadd.f32 %v12989_v15, %v12988_v30  ;;  %v25811_v30 = vand.u32 4294901760, %v22753_v7  ;;  %v22785_v52 = vpack.c.bf16 %v25814_v0, %v25815_v3  ;;  %v25820_v59 = vand.u32 4294901760, %v22767_v21  ;;  %v22798_v15 = vld [vmem:[#allocation8 + $0x648] sm:$0xff] }
 0x384   :  { %16784 = vmatpush3.bf16.msra.mxu1 %v27450_v24  ;;  %27475 = vst [vmem:[#allocation167_spill] sm:$0xff] %v22663_v51  ;;  %v3917_v24 = vadd.f32 %v12987_v27, %v22580_v18  ;;  %v22683_v18 = vpack.c.bf16 %v7319_v4, %v7316_v2  ;;  %v25810_v27 = vand.u32 4294901760, %v22729_v23 }
 0x385   :  { %16976 = vmatpush3.bf16.msra.mxu0 %v27402_v5  ;;  %16786 = vmatprep.subr.bf16.mxu1 %v27451_v42  ;;  %v22670_v5 = vld [vmem:[#allocation8 + $0x698] sm:$0xff]  ;;  %v13472_v42 = vpop.f32.mrb[66].mxu0  ;;  %v3928_v54 = vadd.f32 %v12990_v34, %v22598_v20  ;;  %27486 = vst [vmem:[#allocation80_spill] sm:$0xff] %v22785_v52  ;;  %v22800_v34 = vld [vmem:[#allocation8 + $0x6d0] sm:$0xff] }
 0x386   :  { %16978 = vmatprep.subr.bf16.mxu0 %v27404_v25  ;;  %v13473_v6 = vpop.f32.mrb[67].mxu0  ;;  %v22677_v12 = vadd.f32 %v27476_v48, %v3917_v24  ;;  %27477 = vst [vmem:[#allocation32_spill] sm:$0xff] %v22683_v18  ;;  %v25812_v24 = vand.u32 4294901760, %v22751_v38  ;;  %v22787_v42 = vld [vmem:[#allocation8 + $0x640] sm:$0xff]  ;;  %v22794_v13 = vpack.c.bf16 %v25810_v27, %v25813_v28  ;;  %v25829_v14 = vand.u32 4294901760, %v22800_v34  ;;  %v22821_v27 = vld [vmem:[#allocation8 + $0x650] sm:$0xff] }
 0x387   :  { %v22701_v2 = vadd.f32 %v27478_v53, %v3928_v54  ;;  %v22802_v6 = vld [vmem:[#allocation8 + $0x6d8] sm:$0xff]  ;;  %v25826_v54 = vand.u32 4294901760, %v22787_v42  ;;  %v25825_v53 = vand.u32 4294901760, %v22798_v15  ;;  %v22837_v28 = vld [vmem:[#allocation8 + $0x6e8] sm:$0xff]  ;;  %v25830_v3 = vand.u32 4294901760, %v22821_v27 }
 0x388   :  { %16788 = vmatpush3.bf16.msra.mxu1 %v27456_v37  ;;  %v25824_v37 = vand.u32 4294901760, %v22665_v35  ;;  %27487 = vst [vmem:[#allocation124_spill] sm:$0xff] %v22794_v13  ;;  %v22814_v48 = vpack.c.bf16 %v25811_v30, %v25812_v24  ;;  %v25828_v9 = vand.u32 4294901760, %v22802_v6  ;;  %v22830_v30 = vpack.c.bf16 %v25819_v58, %v25820_v59  ;;  %v22832_v24 = vld [vmem:[#allocation8 + $0x6e0] sm:$0xff] }
 0x389   :  { %16980 = vmatpush3.bf16.msra.mxu0 %v27404_v25  ;;  %16790 = vmatprep.subr.bf16.mxu1 %v27457_v60  ;;  %v25822_v25 = vand.u32 4294901760, %v22670_v5  ;;  %v22689_v60 = vld [vmem:[#allocation8 + $0x610] sm:$0xff]  ;;  %v22846_v58 = vpack.c.bf16 %v25825_v53, %v25826_v54  ;;  %v22855_v59 = vld [vmem:[#allocation8 + $0x660] sm:$0xff]  ;;  %v22863_v54 = vld [vmem:[#allocation8 + $0x6f8] sm:$0xff] }
 0x38a   :  { %16982 = vmatprep.subr.bf16.mxu0 %v27406_v1  ;;  %v22708_v4 = vpack.c.bf16 %v25824_v37, %v25827_v36  ;;  %v25821_v20 = vand.u32 4294901760, %v22689_v60  ;;  %27488 = vst [vmem:[#allocation130_spill] sm:$0xff] %v22814_v48  ;;  %27489 = vst [vmem:[#allocation137_spill] sm:$0xff] %v22830_v30  ;;  %v22861_v53 = vld [vmem:[#allocation8 + $0x6f0] sm:$0xff]  ;;  %v27498_v36 = vand.u32 4294901760, %v22585_v41 }
 0x38b   :  { %27490 = vst [vmem:[#allocation147_spill] sm:$0xff] %v22846_v58 }
 0x38c   :  { %16792 = vmatpush3.bf16.msra.mxu1 %v27459_v33  ;;  %27479 = vst [vmem:[#allocation72_spill] sm:$0xff] %v22708_v4  ;;  %v25817_v33 = vand.u32 4294901760, %v22694_v16  ;;  %v22747_v55 = vpack.c.bf16 %v25818_v10, %v25821_v20  ;;  %v22857_v20 = vld [vmem:[#allocation8 + $0x668] sm:$0xff] }
 0x38d   :  { %16984 = vmatpush3.bf16.msra.mxu0 %v27406_v1  ;;  %16986 = vmatprep.subr.bf16.mxu1 %v22683_v18  ;;  %v22716_v1 = vpack.c.bf16 %v25822_v25, %v25823_v50 }
 0x38e   :  { %27483 = vst [vmem:[#allocation181_spill] sm:$0xff] %v22747_v55  ;;  %v22760_v32 = vpack.c.bf16 %v25816_v47, %v25817_v33 }
 0x38f   :  { %27480 = vst [vmem:[#allocation160_spill] sm:$0xff] %v22716_v1  ;;  %12144 = vmatmul.mubr.msk.f32.vlgmr.msra.gmra.mrb[160].mxu1 %vm18860_vm0, %v26295_v62  ;;  %vm27485_vm0 = vmmov %vm27466_vm7 }
 0x390   :  { %14934 = vmatmul.mubr.msk.f32.vlgmr.msra.gmra.mrb[76].mxu0 %vm27481_vm13, %v26295_v62  ;;  %12145 = vmatprep.mubr.msk.f32.mxu1 %vm19373_vm12, %v26295_v62  ;;  %27484 = vst [vmem:[#allocation47_spill] sm:$0xff] %v22760_v32  ;;  %vm27544_vm12 = vcmask 1040384  }
 0x391   :  { %14936 = vmatprep.mubr.msk.f32.mxu0 %vm27482_vm8, %v26295_v62  ;;  %16988 = vmatpush3.bf16.msra.mxu1 %v22708_v4  ;;  %vm27675_vm9 = vmmov %vm27544_vm12 }
 0x392   :  { %16990 = vmatprep.subr.bf16.mxu1 %v22716_v1 }
 0x393   :  { %12146 = vmatmul.mubr.msk.f32.gmra.mrb[162].mxu1 %vm18880_vm2, %v26295_v62 }
 0x394   :  { %14937 = vmatmul.mubr.msk.f32.gmra.mrb[78].mxu0 %vm27485_vm0, %v26295_v62  ;;  %12147 = vmatprep.mubr.msk.f32.mxu1 %vm19383_vm14, %v26295_v62  ;;  %v13551_v33 = vpop.f32.mrb[68].mxu0  ;;  %vm18084_vm14 = vmmov 0  }
 0x395   :  { %16992 = vmatpush3.bf16.msra.mxu1 %v22747_v55  ;;  %v13067_v0 = vpop.f32.mrb[112].mxu1  ;;  %v13552_v50 = vpop.f32.mrb[69].mxu0 }
 0x396   :  { %16994 = vmatprep.subr.bf16.mxu1 %v22760_v32  ;;  %v13068_v10 = vpop.f32.mrb[113].mxu1 }
 0x397   :  { %12148 = vmatmul.mubr.msk.f32.gmra.mrb[164].mxu1 %vm19035_vm11, %v26295_v62  ;;  %v13069_v25 = vadd.f32 %v13068_v10, %v13067_v0  ;;  %v27493_v10 = vand.u32 4294901760, %v22823_v17 }
 0x398   :  { %12149 = vmatprep.mubr.msk.f32.mxu1 %vm27432_vm3, %v26295_v62 }
 0x399   :  { %16996 = vmatpush3.bf16.msra.mxu1 %v22785_v52  ;;  %v4221_v56 = vadd.f32 %v13069_v25, %v22650_v31  ;;  %v13070_v47 = vpop.f32.mrb[114].mxu1  ;;  %v22874_v0 = vpack.c.bf16 %v27493_v10, %v25830_v3  ;;  %v27496_v10 = vand.u32 4294901760, %v22837_v28  ;;  %v22888_v3 = vld [vmem:[#allocation8 + $0x670] sm:$0xff] }
 0x39a   :  { %16998 = vmatprep.subr.bf16.mxu1 %v22794_v13  ;;  %v13554_v37 = vpop.f32.mrb[70].mxu0  ;;  %v13071_v51 = vpop.f32.mrb[115].mxu1 }
 0x39b   :  { %12150 = vmatmul.mubr.msk.f32.gmra.mrb[166].mxu1 %vm27436_vm4, %v26295_v62  ;;  %v22852_v62 = vpack.c.bf16 %v25828_v9, %v25829_v14  ;;  %v22867_v14 = vadd.f32 %v13552_v50, %v13551_v33  ;;  %27494 = vst [vmem:[#allocation79_spill] sm:$0xff] %v22874_v0  ;;  %v13072_v31 = vadd.f32 %v13071_v51, %v13070_v47  ;;  %v13555_v25 = vpop.f32.mrb[71].mxu0  ;;  %v27495_v9 = vand.u32 4294901760, %v22832_v24 }
 0x39c   :  { %v7495_v50 = vsub.f32 %v22585_v41, %v27498_v36  ;;  %v27499_v33 = vand.u32 4294901760, %v22590_v43  ;;  %v27500_v25 = vld [vmem:[#allocation23_spill] sm:$0xff]  ;;  %v27506_v36 = vand.u32 4294901760, %v22855_v59  ;;  %v4245_v18 = vmax.f32 %v4221_v56, 0.0 }
 0x39d   :  { %17000 = vmatpush3.bf16.msra.mxu1 %v22814_v48  ;;  %27491 = vst [vmem:[#allocation165_spill] sm:$0xff] %v22852_v62  ;;  %27492 = vst [vmem:[#allocation87_spill] sm:$0xff] %v22867_v14  ;;  %v22886_v37 = vpack.c.bf16 %v27496_v10, %v27495_v9  ;;  %v22890_v14 = vld [vmem:[#allocation8 + $0x678] sm:$0xff]  ;;  %v4228_v47 = vadd.f32 %v13072_v31, %v22658_v19  ;;  %v27501_v57 = vand.u32 15, %v27500_v25  ;;  %v13073_v9 = vpop.f32.mrb[116].mxu1  ;;  %v27504_v10 = vld [vmem:[#allocation158_spill] sm:$0xff] }
 0x39e   :  { %17002 = vmatprep.subr.bf16.mxu1 %v22830_v30  ;;  %v7502_v51 = vsub.f32 %v22590_v43, %v27499_v33  ;;  %v13557_v30 = vpop.f32.mrb[72].mxu0  ;;  %v13074_v48 = vpop.f32.mrb[117].mxu1  ;;  %v27507_v33 = vand.u32 4294901760, %v22857_v20  ;;  %v27509_v19 = vand.u32 4294901760, %v22861_v53  ;;  %v25856_v52 = vand.u32 4294901760, %v22890_v14 }
 0x39f   :  { %27497 = vst [vmem:[#allocation93_spill] sm:$0xff] %v22886_v37  ;;  %vm22901_vm2 = vcmp.lt.s32.totalorder %v27501_v57, 9  ;;  %v27510_v57 = vand.u32 4294901760, %v22863_v54  ;;  %v4246_v32 = vmax.f32 %v4228_v47, 0.0  ;;  %v13075_v55 = vadd.f32 %v13074_v48, %v13073_v9  ;;  %v13558_v1 = vpop.f32.mrb[73].mxu0 }
 0x3a0   :  { %v22913_v13 = vpack.c.bf16 %v27507_v33, %v27506_v36  ;;  %v7503_v4 = vand.u32 4294901760, %v7502_v51  ;;  %v22924_v36 = vadd.f32 %v13558_v1, %v13557_v30  ;;  %v27516_v51 = vld [vmem:[#allocation76_spill] sm:$0xff]  ;;  %vm9249_vm4 = vcmask 130048  }
 0x3a1   :  { %17004 = vmatpush3.bf16.msra.mxu1 %v22846_v58  ;;  %v22906_v58 = vand.u32 4294901760, %v27504_v10  ;;  %v22919_v31 = vpack.c.bf16 %v27510_v57, %v27509_v19  ;;  %v4254_v33 = vsel %vm22901_vm2, %v4246_v32, 0.0  ;;  %v4235_v19 = vadd.f32 %v13075_v55, %v22677_v12  ;;  %v13076_v57 = vpop.f32.mrb[118].mxu1 }
 0x3a2   :  { %17006 = vmatprep.subr.bf16.mxu1 %v22852_v62  ;;  %27508 = vst [vmem:[#allocation118_spill] sm:$0xff] %v22913_v13  ;;  %27512 = vst [vmem:[#allocation37_spill] sm:$0xff] %v22924_v36  ;;  %v4257_v47 = vmax.f32 %v4245_v18, %v4254_v33  ;;  %v13560_v48 = vpop.f32.mrb[74].mxu0  ;;  %v13077_v9 = vpop.f32.mrb[119].mxu1 }
 0x3a3   :  { %27505 = vst [vmem:[#allocation81_spill] sm:$0xff] %v22906_v58  ;;  %27511 = vst [vmem:[#allocation83_spill] sm:$0xff] %v22919_v31  ;;  %v22931_v25 = vsub.f32 %v27504_v10, %v22906_v58  ;;  %v13078_v30 = vadd.f32 %v13077_v9, %v13076_v57  ;;  %v13561_v32 = vpop.f32.mrb[75].mxu0  ;;  %v27517_v10 = vand.u32 15, %v27516_v51  ;;  %v4247_v48 = vmax.f32 %v4235_v19, 0.0 }
 0x3a4   :  { %v4258_v55 = vrot.slane %v4257_v47, 4  ;;  %v27519_v19 = vand.u32 4294901760, %v22660_v11 }
 0x3a5   :  { %17008 = vmatpush3.bf16.msra.mxu1 %v22874_v0  ;;  %v7496_v0 = vand.u32 4294901760, %v7495_v50  ;;  %27513 = vst [vmem:[#allocation119_spill] sm:$0xff] %v22931_v25  ;;  %v27514_v50 = vand.u32 4294901760, %v22888_v3  ;;  %v4242_v62 = vadd.f32 %v13078_v30, %v22701_v2  ;;  %v25855_v18 = vand.u32 4294901760, %v22931_v25  ;;  %v12102_v2 = vld [vmem:[#allocation10 + $0x2] ss:$0 sm:$0xff] }
 0x3a6   :  { %17010 = vmatprep.subr.bf16.mxu1 %v22886_v37  ;;  %v4259_v56 = vmax.f32 %v4257_v47, %v4258_v55  ;;  %vm4252_vm11 = vcmp.lt.s32.totalorder %v27517_v10, 9  ;;  %v27518_v30 = vld [vmem:[#allocation70_spill] sm:$0xff]  ;;  %v22954_v55 = vadd.f32 %v22238_v63, %v12102_v2  ;;  %v22959_v51 = vsub.f32 %v22660_v11, %v27519_v19 }
 0x3a7   :  { %v22938_v1 = vpack.c.bf16 %v25856_v52, %v27514_v50  ;;  %v17017_v12 = vpack.c.bf16 %v7503_v4, %v7496_v0  ;;  %v4248_v33 = vmax.f32 %v4242_v62, 0.0  ;;  %v22949_v57 = vsub.f32 %v22931_v25, %v25855_v18 }
 0x3a8   :  { %v4260_v4 = vrot.slane %v4259_v56, 2  ;;  %v4466_v32 = vadd.f32 %v27518_v30, %v12102_v2  ;;  %v27520_v10 = vand.u32 4294901760, %v22665_v35  ;;  %v27522_v63 = vand.u32 4294901760, %v22670_v5 }
 0x3a9   :  { %17012 = vmatpush3.bf16.msra.mxu1 %v22913_v13  ;;  %27515 = vst [vmem:[#allocation178_spill] sm:$0xff] %v22938_v1  ;;  %v4256_v50 = vsel %vm4252_vm11, %v4248_v33, 0.0  ;;  %v27524_v2 = vand.u32 4294901760, %v22691_v26  ;;  %v27526_v30 = vand.u32 4294901760, %v22696_v44  ;;  %v27527_v19 = vand.u32 4294901760, %v22720_v46 }
 0x3aa   :  { %17014 = vmatprep.subr.bf16.mxu1 %v22919_v31  ;;  %v4264_v0 = vmax.f32 %v4247_v48, %v4256_v50  ;;  %v4261_v62 = vmax.f32 %v4259_v56, %v4260_v4  ;;  %v22964_v33 = vsub.f32 %v22665_v35, %v27520_v10  ;;  %v27521_v48 = vand.u32 4294901760, %v22668_v39 }
 0x3ab   :  { %v22974_v56 = vsub.f32 %v22670_v5, %v27522_v63  ;;  %v22984_v35 = vsub.f32 %v22691_v26, %v27524_v2  ;;  %v22994_v5 = vsub.f32 %v22696_v44, %v27526_v30  ;;  %v27528_v10 = vand.u32 4294901760, %v22722_v40 }
 0x3ac   :  { %v4265_v9 = vrot.slane %v4264_v0, 4  ;;  %v22969_v50 = vsub.f32 %v22668_v39, %v27521_v48  ;;  %v27529_v48 = vand.u32 4294901760, %v22727_v8  ;;  %v4262_v63 = vrot.slane %v4261_v62, 1 }
 0x3ad   :  { %17016 = vmatpush3.bf16.msra.mxu1 %v22938_v1  ;;  %v23004_v26 = vsub.f32 %v22722_v40, %v27528_v10  ;;  %v27530_v44 = vand.u32 4294901760, %v22729_v23  ;;  %v27532_v40 = vand.u32 4294901760, %v22753_v7 }
 0x3ae   :  { %17018 = vmatprep.subr.bf16.mxu1 %v17017_v12  ;;  %v4266_v12 = vmax.f32 %v4264_v0, %v4265_v9  ;;  %v27523_v0 = vand.u32 4294901760, %v22689_v60  ;;  %v27525_v9 = vand.u32 4294901760, %v22694_v16 }
 0x3af   :  { %v23014_v2 = vsub.f32 %v22729_v23, %v27530_v44  ;;  %v23024_v30 = vsub.f32 %v22753_v7, %v27532_v40  ;;  %v27533_v23 = vand.u32 4294901760, %v22767_v21  ;;  %v27535_v44 = vand.u32 4294901760, %v22787_v42 }
 0x3b0   :  { %v4267_v4 = vrot.slane %v4266_v12, 2  ;;  %v22979_v11 = vsub.f32 %v22689_v60, %v27523_v0  ;;  %v22989_v39 = vsub.f32 %v22694_v16, %v27525_v9  ;;  %v22999_v60 = vsub.f32 %v22720_v46, %v27527_v19 }
 0x3b1   :  { %v23009_v16 = vsub.f32 %v22727_v8, %v27529_v48  ;;  %v27531_v46 = vand.u32 4294901760, %v22751_v38  ;;  %v25857_v8 = vand.u32 4294901760, %v22959_v51  ;;  %v25858_v19 = vand.u32 4294901760, %v22964_v33 }
 0x3b2   :  { %v4268_v0 = vmax.f32 %v4266_v12, %v4267_v4  ;;  %v23032_v10 = vsub.f32 %v22767_v21, %v27533_v23  ;;  %v27536_v40 = vand.u32 4294901760, %v22798_v15  ;;  %v27537_v21 = vand.u32 4294901760, %v22800_v34 }
 0x3b3   :  { %v23019_v9 = vsub.f32 %v22751_v38, %v27531_v46  ;;  %v27534_v38 = vand.u32 4294901760, %v22769_v61  ;;  %v23043_v46 = vsub.f32 %v22787_v42, %v27535_v44  ;;  %v27539_v7 = vand.u32 4294901760, %v22802_v6 }
 0x3b4   :  { %v4269_v4 = vrot.slane %v4268_v0, 1  ;;  %v23048_v18 = vsub.f32 %v22798_v15, %v27536_v40  ;;  %v23053_v23 = vsub.f32 %v22800_v34, %v27537_v21  ;;  %v27541_v15 = vand.u32 4294901760, %v22821_v27 }
 0x3b5   :  { %v23037_v48 = vsub.f32 %v22769_v61, %v27534_v38  ;;  %v25861_v61 = vand.u32 4294901760, %v22979_v11  ;;  %v4263_v38 = vmax.f32 %v4261_v62, %v4262_v63  ;;  %v23059_v42 = vsub.f32 %v22802_v6, %v27539_v7 }
 0x3b6   :  { %27538 = vst [vmem:[#allocation179_spill] sm:$0xff] %v23053_v23  ;;  %v4270_v52 = vmax.f32 %v4268_v0, %v4269_v4  ;;  %v23065_v40 = vsub.f32 %v22821_v27, %v27541_v15  ;;  %v7383_v34 = vsub.f32 %v22959_v51, %v25857_v8  ;;  %v7390_v62 = vsub.f32 %v22964_v33, %v25858_v19 }
 0x3b7   :  { %27540 = vst [vmem:[#allocation82_spill] sm:$0xff] %v23059_v42  ;;  %v27543_v63 = vand.u32 4294901760, %v22969_v50  ;;  %v27545_v7 = vand.u32 4294901760, %v22974_v56  ;;  %v27546_v15 = vand.u32 4294901760, %v22823_v17  ;;  %v27548_v19 = vand.u32 4294901760, %v22832_v24 }
 0x3b8   :  { %27542 = vst [vmem:[#allocation53_spill] sm:$0xff] %v23065_v40  ;;  %v4271_v4 = vsel %vm27544_vm12, %v4263_v38, %v4270_v52  ;;  %v7397_v52 = vsub.f32 %v22979_v11, %v25861_v61  ;;  %v27550_v38 = vand.u32 4294901760, %v22837_v28  ;;  %v7384_v36 = vand.u32 4294901760, %v7383_v34 }
 0x3b9   :  { %v7509_v6 = vsub.f32 %v22969_v50, %v27543_v63  ;;  %v7516_v27 = vsub.f32 %v22974_v56, %v27545_v7  ;;  %v23084_v8 = vsub.f32 %v22823_v17, %v27546_v15  ;;  %v23089_v44 = vsub.f32 %v22832_v24, %v27548_v19 }
 0x3ba   :  { %v23091_v63 = vand.u32 4294901760, %v4271_v4  ;;  %v23099_v7 = vsub.f32 %v22837_v28, %v27550_v38  ;;  %v27552_v17 = vand.u32 4294901760, %v22984_v35  ;;  %v25868_v24 = vand.u32 4294901760, %v22994_v5 }
 0x3bb   :  { %27547 = vst [vmem:[#allocation183_spill] sm:$0xff] %v23084_v8  ;;  %27549 = vst [vmem:[#allocation184_spill] sm:$0xff] %v23089_v44  ;;  %v7391_v1 = vand.u32 4294901760, %v7390_v62  ;;  %v27553_v61 = vand.u32 4294901760, %v22989_v39  ;;  %v7398_v34 = vand.u32 4294901760, %v7397_v52  ;;  %v27555_v52 = vand.u32 4294901760, %v22999_v60 }
 0x3bc   :  { %v13155_v47 = vpop.f32.mrb[120].mxu1  ;;  %27551 = vst [vmem:[#allocation153_spill] sm:$0xff] %v23099_v7  ;;  %v7404_v15 = vsub.f32 %v22984_v35, %v27552_v17  ;;  %v23106_v21 = vsub.f32 %v4271_v4, %v23091_v63  ;;  %v27554_v17 = vand.u32 4294901760, %v22855_v59  ;;  %v25873_v45 = vand.u32 4294901760, %v23032_v10 }
 0x3bd   :  { %v13156_v12 = vpop.f32.mrb[121].mxu1  ;;  %v7523_v28 = vsub.f32 %v22989_v39, %v27553_v61  ;;  %v7411_v62 = vsub.f32 %v22999_v60, %v27555_v52 }
 0x3be   :  { %v13157_v0 = vadd.f32 %v13156_v12, %v13155_v47  ;;  %v25871_v4 = vand.u32 4294901760, %v23106_v21 }
 0x3bf   :  { %v7524_v37 = vand.u32 4294901760, %v7523_v28 }
 0x3c0   :  { %v4743_v47 = vadd.f32 %v13157_v0, %v4466_v32  ;;  %v7510_v0 = vand.u32 4294901760, %v7509_v6  ;;  %v7405_v6 = vand.u32 4294901760, %v7404_v15  ;;  %v27557_v15 = vand.u32 4294901760, %v23009_v16 }
 0x3c1   :  { %v13158_v12 = vpop.f32.mrb[122].mxu1 }
 0x3c2   :  { %v13159_v19 = vpop.f32.mrb[123].mxu1  ;;  %v7517_v12 = vand.u32 4294901760, %v7516_v27  ;;  %v23113_v38 = vadd.f32 %v22291_v22, %v4743_v47  ;;  %v7530_v27 = vsub.f32 %v22994_v5, %v25868_v24  ;;  %v25872_v24 = vand.u32 4294901760, %v23024_v30 }
 0x3c3   :  { %v23118_v19 = vsub.f32 %v22855_v59, %v27554_v17  ;;  %v7366_v59 = vsub.f32 %v23106_v21, %v25871_v4  ;;  %v17019_v17 = vpack.c.bf16 %v7391_v1, %v7384_v36  ;;  %v27556_v22 = vand.u32 4294901760, %v23004_v26 }
 0x3c4   :  { %v17021_v13 = vpack.c.bf16 %v7517_v12, %v7510_v0  ;;  %v7531_v52 = vand.u32 4294901760, %v7530_v27  ;;  %v27558_v0 = vand.u32 4294901760, %v23014_v2  ;;  %v25876_v27 = vand.u32 4294901760, %v23053_v23 }
 0x3c5   :  { %v13161_v32 = vpop.f32.mrb[124].mxu1  ;;  %v7367_v61 = vand.u32 4294901760, %v7366_v59  ;;  %v7418_v25 = vsub.f32 %v23004_v26, %v27556_v22  ;;  %v7412_v22 = vand.u32 4294901760, %v7411_v62  ;;  %v27559_v59 = vand.u32 4294901760, %v23019_v9 }
 0x3c6   :  { %v13162_v47 = vpop.f32.mrb[125].mxu1  ;;  %v7544_v12 = vsub.f32 %v23014_v2, %v27558_v0  ;;  %v27561_v0 = vld [vmem:[#allocation166_spill] sm:$0xff]  ;;  %v7432_v62 = vsub.f32 %v23024_v30, %v25872_v24 }
 0x3c7   :  { %v13163_v31 = vadd.f32 %v13162_v47, %v13161_v32  ;;  %v7537_v32 = vsub.f32 %v23009_v16, %v27557_v15  ;;  %7368 = vmatprep.mubr.f32.mxu1 %v7367_v61  ;;  %v17023_v47 = vpack.c.bf16 %v7405_v6, %v7398_v34  ;;  %v7425_v36 = vsub.f32 %v23019_v9, %v27559_v59 }
 0x3c8   :  { %v7419_v34 = vand.u32 4294901760, %v7418_v25  ;;  %v27562_v6 = vand.u32 4294901760, %v23037_v48  ;;  %v27563_v59 = vand.u32 4294901760, %v22857_v20 }
 0x3c9   :  { %v4757_v1 = vadd.f32 %v13163_v31, %v22954_v55  ;;  %v13164_v4 = vpop.f32.mrb[126].mxu1  ;;  %v25874_v31 = vand.u32 4294901760, %v23043_v46  ;;  %v27560_v55 = vand.u32 4294901760, %v22949_v57  ;;  %v7551_v57 = vsub.f32 %v23032_v10, %v25873_v45 }
 0x3ca   :  { %v13165_v28 = vpop.f32.mrb[127].mxu1  ;;  %v25875_v4 = vand.u32 4294901760, %v23048_v18  ;;  %v7558_v61 = vsub.f32 %v23037_v48, %v27562_v6  ;;  %v7538_v25 = vand.u32 4294901760, %v7537_v32  ;;  %v7426_v15 = vand.u32 4294901760, %v7425_v36 }
 0x3cb   :  { %7374 = vmatmul.mubr.f32.vlgmr.msra.gmra.mrb[168].mxu1 %v27560_v55  ;;  %v23157_v28 = vadd.f32 %v27561_v0, %v4757_v1  ;;  %v23172_v1 = vsub.f32 %v22857_v20, %v27563_v59  ;;  %v7545_v55 = vand.u32 4294901760, %v7544_v12  ;;  %v27565_v0 = vand.u32 4294901760, %v22861_v53 }
 0x3cc   :  { %17020 = vmatpush3.bf16.msra.mxu1 %v17019_v17  ;;  %7604 = vmatprep.mubr.f32.mxu1 %v23091_v63  ;;  %v17025_v17 = vpack.c.bf16 %v7531_v52, %v7524_v37  ;;  %v7439_v45 = vsub.f32 %v23043_v46, %v25874_v31  ;;  %v7446_v20 = vsub.f32 %v23048_v18, %v25875_v4  ;;  %v27567_v37 = vand.u32 4294901760, %v23059_v42 }
 0x3cd   :  { %27564 = vst [vmem:[#allocation163_spill] sm:$0xff] %v23172_v1  ;;  %17022 = vmatprep.subr.bf16.mxu1 %v17021_v13  ;;  %v23177_v24 = vsub.f32 %v22861_v53, %v27565_v0  ;;  %v7565_v13 = vsub.f32 %v23053_v23, %v25876_v27  ;;  %v17027_v52 = vpack.c.bf16 %v7419_v34, %v7412_v22  ;;  %v7433_v32 = vand.u32 4294901760, %v7432_v62 }
 0x3ce   :  { %v7572_v53 = vsub.f32 %v23059_v42, %v27567_v37  ;;  %v7552_v12 = vand.u32 4294901760, %v7551_v57  ;;  %v7559_v59 = vand.u32 4294901760, %v7558_v61  ;;  %v27568_v0 = vand.u32 4294901760, %v22863_v54 }
 0x3cf   :  { %27566 = vst [vmem:[#allocation185_spill] sm:$0xff] %v23177_v24  ;;  %v17029_v4 = vpack.c.bf16 %v7545_v55, %v7538_v25  ;;  %v25883_v27 = vand.u32 4294901760, %v23089_v44  ;;  %v25877_v6 = vand.u32 4294901760, %v23099_v7  ;;  %v27570_v37 = vand.u32 4294901760, %v22888_v3 }
 0x3d0   :  { %17024 = vmatpush3.bf16.msra.mxu1 %v17023_v47  ;;  %v23196_v31 = vsub.f32 %v22863_v54, %v27568_v0  ;;  %v27572_v47 = vand.u32 4294901760, %v22890_v14  ;;  %v7440_v34 = vand.u32 4294901760, %v7439_v45  ;;  %v27574_v54 = vand.u32 4294901760, %v23065_v40 }
 0x3d1   :  { %17026 = vmatprep.subr.bf16.mxu1 %v17025_v17  ;;  %v23203_v36 = vsub.f32 %v22888_v3, %v27570_v37  ;;  %v7447_v57 = vand.u32 4294901760, %v7446_v20  ;;  %v7566_v61 = vand.u32 4294901760, %v7565_v13  ;;  %v7573_v17 = vand.u32 4294901760, %v7572_v53 }
 0x3d2   :  { %27569 = vst [vmem:[#allocation157_spill] sm:$0xff] %v23196_v31  ;;  %v23208_v22 = vsub.f32 %v22890_v14, %v27572_v47  ;;  %v7453_v62 = vsub.f32 %v23065_v40, %v27574_v54  ;;  %v27575_v25 = vand.u32 4294901760, %v23084_v8  ;;  %v17031_v3 = vpack.c.bf16 %v7433_v32, %v7426_v15 }
 0x3d3   :  { %27571 = vst [vmem:[#allocation186_spill] sm:$0xff] %v23203_v36  ;;  %v17033_v0 = vpack.c.bf16 %v7559_v59, %v7552_v12  ;;  %v25880_v37 = vand.u32 4294901760, %v23118_v19  ;;  %v25879_v14 = vand.u32 4294901760, %v23172_v1  ;;  %v7579_v45 = vsub.f32 %v23089_v44, %v25883_v27 }
 0x3d4   :  { %27573 = vst [vmem:[#allocation161_spill] sm:$0xff] %v23208_v22  ;;  %v7460_v55 = vsub.f32 %v23084_v8, %v27575_v25  ;;  %17028 = vmatpush3.bf16.msra.mxu1 %v17027_v52  ;;  %v7586_v20 = vsub.f32 %v23099_v7, %v25877_v6  ;;  %v25878_v13 = vand.u32 4294901760, %v23177_v24  ;;  %v25882_v53 = vand.u32 4294901760, %v23196_v31 }
 0x3d5   :  { %17030 = vmatprep.subr.bf16.mxu1 %v17029_v4  ;;  %v17035_v52 = vpack.c.bf16 %v7447_v57, %v7440_v34  ;;  %v17037_v15 = vpack.c.bf16 %v7573_v17, %v7566_v61  ;;  %v7454_v32 = vand.u32 4294901760, %v7453_v62  ;;  %v7467_v4 = vsub.f32 %v23118_v19, %v25880_v37 }
 0x3d6   :  { %v7461_v12 = vand.u32 4294901760, %v7460_v55  ;;  %v7474_v59 = vsub.f32 %v23172_v1, %v25879_v14  ;;  %v25881_v47 = vand.u32 4294901760, %v23203_v36  ;;  %v25884_v54 = vand.u32 4294901760, %v23208_v22 }
 0x3d7   :  { %v7580_v25 = vand.u32 4294901760, %v7579_v45  ;;  %v7587_v6 = vand.u32 4294901760, %v7586_v20  ;;  %v7593_v34 = vsub.f32 %v23177_v24, %v25878_v13  ;;  %v7600_v62 = vsub.f32 %v23196_v31, %v25882_v53 }
 0x3d8   :  { %17032 = vmatpush3.bf16.msra.mxu1 %v17031_v3  ;;  %v17039_v57 = vpack.c.bf16 %v7461_v12, %v7454_v32  ;;  %v7468_v61 = vand.u32 4294901760, %v7467_v4  ;;  %v7475_v17 = vand.u32 4294901760, %v7474_v59  ;;  %v7481_v55 = vsub.f32 %v23203_v36, %v25881_v47 }
 0x3d9   :  { %17034 = vmatprep.subr.bf16.mxu1 %v17033_v0  ;;  %v7488_v3 = vsub.f32 %v23208_v22, %v25884_v54  ;;  %v17041_v0 = vpack.c.bf16 %v7587_v6, %v7580_v25  ;;  %v7594_v45 = vand.u32 4294901760, %v7593_v34  ;;  %v7601_v20 = vand.u32 4294901760, %v7600_v62  ;;  %v7255_v54 = vld [vmem:[#allocation8 + $0x748] sm:$0xff] }
 0x3da   :  { %v17043_v32 = vpack.c.bf16 %v7475_v17, %v7468_v61  ;;  %v17055_v61 = vpack.c.bf16 %v22984_v35, %v22979_v11 }
 0x3db   :  { %v7489_v12 = vand.u32 4294901760, %v7488_v3  ;;  %v17045_v4 = vpack.c.bf16 %v7601_v20, %v7594_v45  ;;  %v25905_v3 = vmov 0.0|0.0   ;;  %v23282_v45 = vld [vmem:[#allocation8 + $0x718] sm:$0xff] }
 0x3dc   :  { %17036 = vmatpush3.bf16.msra.mxu1 %v17035_v52  ;;  %v7482_v52 = vand.u32 4294901760, %v7481_v55  ;;  %v17057_v55 = vpack.c.bf16 %v22994_v5, %v22989_v39  ;;  %17177 = vmatprep.subr.bf16.mxu0 %v25905_v3  ;;  %v25885_v20 = vand.u32 4294901760, %v23282_v45 }
 0x3dd   :  { %17038 = vmatprep.subr.bf16.mxu1 %v17037_v15 }
 0x3de   :  { %v17047_v27 = vpack.c.bf16 %v7489_v12, %v7482_v52  ;;  %v17061_v12 = vpack.c.bf16 %v23014_v2, %v23009_v16 }
 0x3df   :  { %v13243_v13 = vpop.f32.mrb[128].mxu1 }
 0x3e0   :  { %v13244_v14 = vpop.f32.mrb[129].mxu1  ;;  %17040 = vmatpush3.bf16.msra.mxu1 %v17039_v57 }
 0x3e1   :  { %v13245_v37 = vadd.f32 %v13244_v14, %v13243_v13  ;;  %17042 = vmatprep.subr.bf16.mxu1 %v17041_v0  ;;  %v17051_v14 = vpack.c.bf16 %v22964_v33, %v22959_v51  ;;  %v27576_v13 = vpack.c.bf16 %v22590_v43, %v22585_v41  ;;  %v23280_v0 = vld [vmem:[#allocation8 + $0x710] sm:$0xff] }
 0x3e3   :  { %v5037_v59 = vadd.f32 %v13245_v37, %v23113_v38  ;;  %v13246_v47 = vpop.f32.mrb[130].mxu1  ;;  %v17053_v38 = vpack.c.bf16 %v22974_v56, %v22969_v50  ;;  %v23257_v37 = vld [vmem:[#allocation8 + $0x700] sm:$0xff] }
 0x3e4   :  { %v13247_v53 = vpop.f32.mrb[131].mxu1  ;;  %17044 = vmatpush3.bf16.msra.mxu1 %v17043_v32  ;;  %v25888_v62 = vand.u32 4294901760, %v23257_v37  ;;  %v17059_v32 = vpack.c.bf16 %v23004_v26, %v22999_v60 }
 0x3e5   :  { %v23248_v15 = vadd.f32 %v22448_v49, %v5037_v59  ;;  %17046 = vmatprep.subr.bf16.mxu1 %v17045_v4  ;;  %v23259_v53 = vld [vmem:[#allocation8 + $0x708] sm:$0xff]  ;;  %v7250_v4 = vld [vmem:[#allocation8 + $0x720] sm:$0xff] }
 0x3e6   :  { %v7251_v59 = vld [vmem:[#allocation8 + $0x728] sm:$0xff] }
 0x3e7   :  { %v13249_v6 = vpop.f32.mrb[132].mxu1 }
 0x3e8   :  { %v13250_v25 = vpop.f32.mrb[133].mxu1  ;;  %17048 = vmatpush3.bf16.msra.mxu1 %v17047_v27  ;;  %v25887_v27 = vand.u32 4294901760, %v23259_v53 }
 0x3e9   :  { %v13251_v34 = vadd.f32 %v13250_v25, %v13249_v6  ;;  %17050 = vmatprep.subr.bf16.mxu1 %v27576_v13  ;;  %v8142_v6 = vand.u32 4294901760, %v7250_v4  ;;  %v8145_v25 = vand.u32 4294901760, %v7251_v59  ;;  %v17065_v13 = vpack.c.bf16 %v23037_v48, %v23032_v10 }
 0x3eb   :  { %v5059_v49 = vadd.f32 %v13251_v34, %v23157_v28  ;;  %v13252_v47 = vpop.f32.mrb[134].mxu1  ;;  %7606 = vmatmul.mubr.f32.vlgmr.msra.gmra.mrb[170].mxu1 %v22906_v58  ;;  %v23275_v28 = vpack.c.bf16 %v25887_v27, %v25888_v62  ;;  %v17063_v34 = vpack.c.bf16 %v23024_v30, %v23019_v9  ;;  %v7256_v62 = vld [vmem:[#allocation8 + $0x750] sm:$0xff] }
 0x3ec   :  { %v13253_v57 = vpop.f32.mrb[135].mxu1  ;;  %17052 = vmatpush3.bf16.msra.mxu1 %v17051_v14  ;;  %7741 = vmatprep.mubr.f32.mxu1 %v23106_v21  ;;  %v23302_v14 = vpack.c.bf16 %v8145_v25, %v8142_v6 }
 0x3ed   :  { %v23269_v17 = vadd.f32 %v22468_v29, %v5059_v49  ;;  %27577 = vst [vmem:[#allocation187_spill] sm:$0xff] %v23275_v28  ;;  %17054 = vmatprep.subr.bf16.mxu1 %v17053_v38  ;;  %17179 = vmatpush3.bf16.msra.mxu0 %v23275_v28  ;;  %v25886_v29 = vand.u32 4294901760, %v23280_v0  ;;  %v7252_v38 = vld [vmem:[#allocation8 + $0x730] sm:$0xff]  ;;  %v7253_v49 = vld [vmem:[#allocation8 + $0x738] sm:$0xff] }
 0x3ee   :  { %17180 = vmatprep.subr.bf16.mxu0 %v25905_v3  ;;  %27579 = vst [vmem:[#allocation111_spill] sm:$0xff] %v23302_v14  ;;  %v8148_v47 = vand.u32 4294901760, %v7252_v38  ;;  %v8151_v57 = vand.u32 4294901760, %v7253_v49 }
 0x3ef   :  { %v23294_v52 = vpack.c.bf16 %v25885_v20, %v25886_v29  ;;  %v8157_v29 = vand.u32 4294901760, %v7255_v54 }
 0x3f0   :  { %17056 = vmatpush3.bf16.msra.mxu1 %v17055_v61  ;;  %v17067_v61 = vpack.c.bf16 %v23048_v18, %v23043_v46 }
 0x3f1   :  { %27578 = vst [vmem:[#allocation107_spill] sm:$0xff] %v23294_v52  ;;  %17058 = vmatprep.subr.bf16.mxu1 %v17057_v55  ;;  %17182 = vmatpush3.bf16.msra.mxu0 %v23294_v52  ;;  %v23310_v55 = vpack.c.bf16 %v8151_v57, %v8148_v47  ;;  %v8160_v52 = vand.u32 4294901760, %v7256_v62 }
 0x3f2   :  { %17183 = vmatprep.subr.bf16.mxu0 %v25905_v3 }
 0x3f3   :  { %27580 = vst [vmem:[#allocation188_spill] sm:$0xff] %v23310_v55 }
 0x3f4   :  { %17060 = vmatpush3.bf16.msra.mxu1 %v17059_v32  ;;  %v17069_v32 = vpack.c.bf16 %v23059_v42, %v23053_v23 }
 0x3f5   :  { %17062 = vmatprep.subr.bf16.mxu1 %v17061_v12  ;;  %17185 = vmatpush3.bf16.msra.mxu0 %v23302_v14  ;;  %v7254_v12 = vld [vmem:[#allocation8 + $0x740] sm:$0xff]  ;;  %v7257_v14 = vld [vmem:[#allocation8 + $0x758] sm:$0xff] }
 0x3f6   :  { %17186 = vmatprep.subr.bf16.mxu0 %v25905_v3  ;;  %v8154_v20 = vand.u32 4294901760, %v7254_v12 }
 0x3f8   :  { %17064 = vmatpush3.bf16.msra.mxu1 %v17063_v34  ;;  %v17071_v34 = vpack.c.bf16 %v23084_v8, %v23065_v40  ;;  %v23318_v27 = vpack.c.bf16 %v8157_v29, %v8154_v20  ;;  %v7259_v40 = vld [vmem:[#allocation8 + $0x768] sm:$0xff] }
 0x3f9   :  { %17066 = vmatprep.subr.bf16.mxu1 %v17065_v13  ;;  %17188 = vmatpush3.bf16.msra.mxu0 %v23310_v55  ;;  %v17073_v13 = vpack.c.bf16 %v23099_v7, %v23089_v44  ;;  %v8163_v55 = vand.u32 4294901760, %v7257_v14  ;;  %v17077_v7 = vpack.c.bf16 %v23196_v31, %v23177_v24  ;;  %v7258_v44 = vld [vmem:[#allocation8 + $0x760] sm:$0xff]  ;;  %v8169_v42 = vand.u32 4294901760, %v7259_v40 }
 0x3fa   :  { %17189 = vmatprep.subr.bf16.mxu0 %v25905_v3  ;;  %27581 = vst [vmem:[#allocation189_spill] sm:$0xff] %v23318_v27  ;;  %v27585_v31 = vand.u32 4294901760, %v23280_v0  ;;  %v23364_v24 = vsub.f32 %v7253_v49, %v8151_v57 }
 0x3fb   :  { %v23326_v8 = vpack.c.bf16 %v8163_v55, %v8160_v52 }
 0x3fc   :  { %17068 = vmatpush3.bf16.msra.mxu1 %v17067_v61  ;;  %v17075_v61 = vpack.c.bf16 %v23172_v1, %v23118_v19  ;;  %v27583_v1 = vand.u32 4294901760, %v23257_v37 }
 0x3fd   :  { %17070 = vmatprep.subr.bf16.mxu1 %v17069_v32  ;;  %17191 = vmatpush3.bf16.msra.mxu0 %v23318_v27  ;;  %27582 = vst [vmem:[#allocation112_spill] sm:$0xff] %v23326_v8  ;;  %v17079_v27 = vpack.c.bf16 %v23208_v22, %v23203_v36  ;;  %v23347_v22 = vsub.f32 %v23280_v0, %v27585_v31  ;;  %v27588_v31 = vld [vmem:[#allocation102_spill] sm:$0xff] }
 0x3fe   :  { %17192 = vmatprep.subr.bf16.mxu0 %v25905_v3  ;;  %v8166_v3 = vand.u32 4294901760, %v7258_v44 }
 0x3ff   :  { %v13331_v28 = vpop.f32.mrb[136].mxu1 }
 0x400   :  { %v13332_v58 = vpop.f32.mrb[137].mxu1  ;;  %17072 = vmatpush3.bf16.msra.mxu1 %v17071_v34 }
 0x401   :  { %v13333_v32 = vadd.f32 %v13332_v58, %v13331_v28  ;;  %17074 = vmatprep.subr.bf16.mxu1 %v17073_v13  ;;  %17194 = vmatpush3.bf16.msra.mxu0 %v23326_v8  ;;  %v23337_v58 = vsub.f32 %v23257_v37, %v27583_v1  ;;  %v27584_v28 = vand.u32 4294901760, %v23259_v53  ;;  %v27586_v8 = vmov 0.0|0.0  }
 0x402   :  { %17195 = vmatprep.subr.bf16.mxu0 %v27586_v8  ;;  %v23355_v1 = vsub.f32 %v7250_v4, %v8142_v6  ;;  %v23357_v37 = vsub.f32 %v7251_v59, %v8145_v25  ;;  %v23372_v4 = vsub.f32 %v7257_v14, %v8163_v55  ;;  %v23374_v59 = vpack.c.bf16 %v8169_v42, %v8166_v3  ;;  %v27593_v55 = vld [vmem:[#allocation119_spill] sm:$0xff] }
 0x403   :  { %v5363_v34 = vadd.f32 %v13333_v32, %v23248_v15  ;;  %v13334_v23 = vpop.f32.mrb[138].mxu1  ;;  %v23342_v13 = vsub.f32 %v23259_v53, %v27584_v28  ;;  %v23359_v53 = vsub.f32 %v7252_v38, %v8148_v47  ;;  %v7260_v32 = vld [vmem:[#allocation8 + $0x770] sm:$0xff]  ;;  %v7261_v28 = vld [vmem:[#allocation8 + $0x778] sm:$0xff]  ;;  %v23376_v6 = vsub.f32 %v7258_v44, %v8166_v3 }
 0x404   :  { %v13335_v36 = vpop.f32.mrb[139].mxu1  ;;  %17076 = vmatpush3.bf16.msra.mxu1 %v17075_v61  ;;  %v27587_v23 = vand.u32 4294901760, %v23282_v45  ;;  %v23368_v61 = vsub.f32 %v7255_v54, %v8157_v29  ;;  %27589 = vst [vmem:[#allocation64_spill] sm:$0xff] %v23374_v59  ;;  %v23378_v38 = vsub.f32 %v7259_v40, %v8169_v42  ;;  %v8175_v47 = vand.u32 4294901760, %v7261_v28 }
 0x405   :  { %17078 = vmatprep.subr.bf16.mxu1 %v17077_v7  ;;  %v23362_v0 = vadd.f32 %v27588_v31, %v5363_v34  ;;  %v23366_v36 = vsub.f32 %v7254_v12, %v8154_v20  ;;  %v8172_v7 = vand.u32 4294901760, %v7260_v32  ;;  %17197 = vmatpush3.bf16.msra.mxu0 %v23374_v59  ;;  %v25919_v54 = vand.u32 4294901760, %v23337_v58  ;;  %v27590_v20 = vld [vmem:[#allocation32_spill] sm:$0xff]  ;;  %v27605_v59 = vld [vmem:[#allocation130_spill] sm:$0xff] }
 0x406   :  { %v23353_v15 = vsub.f32 %v23282_v45, %v27587_v23  ;;  %v23370_v45 = vsub.f32 %v7256_v62, %v8160_v52  ;;  %v25918_v62 = vand.u32 4294901760, %v23342_v13  ;;  %17198 = vmatprep.subr.bf16.mxu0 %v27586_v8  ;;  %v23389_v42 = vsub.f32 %v7261_v28, %v8175_v47 }
 0x407   :  { %v13337_v25 = vpop.f32.mrb[140].mxu1  ;;  %v23385_v44 = vpack.c.bf16 %v8175_v47, %v8172_v7  ;;  %v23387_v3 = vsub.f32 %v7260_v32, %v8172_v7  ;;  %v27592_v40 = vmov 0.0   ;;  %v25917_v14 = vand.u32 4294901760, %v23347_v22  ;;  %v27594_v32 = vld [vmem:[#allocation72_spill] sm:$0xff] }
 0x408   :  { %v13338_v34 = vpop.f32.mrb[141].mxu1  ;;  %17080 = vmatpush3.bf16.msra.mxu1 %v17079_v27  ;;  %14971 = vmatprep.mubr.msk.f32.mxu0 %vm18084_vm14, %v27592_v40  ;;  %v8224_v27 = vsub.f32 %v23337_v58, %v25919_v54  ;;  %v8231_v52 = vsub.f32 %v23342_v13, %v25918_v62  ;;  %v25916_v12 = vand.u32 4294901760, %v23353_v15  ;;  %v27595_v28 = vand.u32 4294901760, %v23106_v21  ;;  %v27596_v47 = vld [vmem:[#allocation160_spill] sm:$0xff] }
 0x409   :  { %v13339_v29 = vadd.f32 %v13338_v34, %v13337_v25  ;;  %17082 = vmatprep.subr.bf16.mxu1 %v27590_v20  ;;  %27591 = vst [vmem:[#allocation190_spill] sm:$0xff] %v23385_v44  ;;  %v8238_v7 = vsub.f32 %v23347_v22, %v25917_v14  ;;  %17200 = vmatpush3.bf16.msra.mxu0 %v23385_v44  ;;  %v25927_v14 = vand.u32 4294901760, %v23359_v53  ;;  %v27602_v62 = vld [vmem:[#allocation80_spill] sm:$0xff]  ;;  %v25929_v44 = vand.u32 4294901760, %v23368_v61 }
 0x40a   :  { %v8225_v31 = vand.u32 4294901760, %v8224_v27  ;;  %v8232_v25 = vand.u32 4294901760, %v8231_v52  ;;  %17201 = vmatprep.subr.bf16.mxu0 %v27586_v8  ;;  %v25920_v52 = vand.u32 4294901760, %v23355_v1  ;;  %v27608_v8 = vld [vmem:[#allocation147_spill] sm:$0xff] }
 0x40b   :  { %v5377_v49 = vadd.f32 %v13339_v29, %v23269_v17  ;;  %v13340_v57 = vpop.f32.mrb[142].mxu1  ;;  %7744 = vmatmul.mubr.f32.vlgmr.msra.gmra.mrb[172].mxu1 %v27593_v55  ;;  %v27597_v17 = vld [vmem:[#allocation73_spill] sm:$0xff]  ;;  %v8245_v29 = vsub.f32 %v23353_v15, %v25916_v12  ;;  %v8239_v27 = vand.u32 4294901760, %v8238_v7  ;;  %v27600_v12 = vld [vmem:[#allocation47_spill] sm:$0xff] }
 0x40c   :  { %v13341_v23 = vpop.f32.mrb[143].mxu1  ;;  %17084 = vmatpush3.bf16.msra.mxu1 %v27594_v32  ;;  %7848 = vmatprep.mubr.f32.mxu1 %v27595_v28  ;;  %v23418_v21 = vpack.c.bf16 %v8232_v25, %v8225_v31  ;;  %v25921_v57 = vand.u32 4294901760, %v23357_v37  ;;  %v27599_v28 = vld [vmem:[#allocation181_spill] sm:$0xff] }
 0x40d   :  { %17086 = vmatprep.subr.bf16.mxu1 %v27596_v47  ;;  %v23411_v34 = vadd.f32 %v27597_v17, %v5377_v49  ;;  %v8246_v23 = vand.u32 4294901760, %v8245_v29  ;;  %v8252_v49 = vsub.f32 %v23355_v1, %v25920_v52  ;;  %v25926_v29 = vand.u32 4294901760, %v23364_v24 }
 0x40e   :  { %27598 = vst [vmem:[#allocation191_spill] sm:$0xff] %v23418_v21  ;;  %v8259_v17 = vsub.f32 %v23357_v37, %v25921_v57  ;;  %v8266_v52 = vsub.f32 %v23359_v53, %v25927_v14  ;;  %v27607_v14 = vld [vmem:[#allocation137_spill] sm:$0xff]  ;;  %v25934_v21 = vand.u32 4294901760, %v23378_v38 }
 0x40f   :  { %v23430_v31 = vpack.c.bf16 %v8246_v23, %v8239_v27  ;;  %v8253_v25 = vand.u32 4294901760, %v8252_v49  ;;  %v8273_v57 = vsub.f32 %v23364_v24, %v25926_v29  ;;  %v27604_v27 = vld [vmem:[#allocation124_spill] sm:$0xff]  ;;  %v8287_v29 = vsub.f32 %v23368_v61, %v25929_v44 }
 0x410   :  { %17088 = vmatpush3.bf16.msra.mxu1 %v27599_v28  ;;  %v8260_v7 = vand.u32 4294901760, %v8259_v17  ;;  %v8267_v23 = vand.u32 4294901760, %v8266_v52  ;;  %v25930_v17 = vand.u32 4294901760, %v23366_v36 }
 0x411   :  { %17090 = vmatprep.subr.bf16.mxu1 %v27600_v12  ;;  %27601 = vst [vmem:[#allocation67_spill] sm:$0xff] %v23430_v31  ;;  %v8274_v49 = vand.u32 4294901760, %v8273_v57  ;;  %v8288_v57 = vand.u32 4294901760, %v8287_v29  ;;  %v25931_v31 = vand.u32 4294901760, %v23372_v4 }
 0x412   :  { %v23435_v54 = vpack.c.bf16 %v8260_v7, %v8253_v25  ;;  %v8280_v7 = vsub.f32 %v23366_v36, %v25930_v17  ;;  %v27610_v17 = vld [vmem:[#allocation165_spill] sm:$0xff] }
 0x413   :  { %v23447_v25 = vpack.c.bf16 %v8274_v49, %v8267_v23  ;;  %v8301_v44 = vsub.f32 %v23372_v4, %v25931_v31  ;;  %v8315_v31 = vsub.f32 %v23378_v38, %v25934_v21 }
 0x414   :  { %17092 = vmatpush3.bf16.msra.mxu1 %v27602_v62  ;;  %27603 = vst [vmem:[#allocation68_spill] sm:$0xff] %v23435_v54  ;;  %v8281_v52 = vand.u32 4294901760, %v8280_v7  ;;  %v25932_v54 = vand.u32 4294901760, %v23370_v45 }
 0x415   :  { %17094 = vmatprep.subr.bf16.mxu1 %v27604_v27  ;;  %27606 = vst [vmem:[#allocation192_spill] sm:$0xff] %v23447_v25  ;;  %v8302_v29 = vand.u32 4294901760, %v8301_v44  ;;  %v25933_v25 = vand.u32 4294901760, %v23376_v6 }
 0x416   :  { %v23459_v23 = vpack.c.bf16 %v8288_v57, %v8281_v52  ;;  %v8294_v49 = vsub.f32 %v23370_v45, %v25932_v54 }
 0x417   :  { %v8308_v57 = vsub.f32 %v23376_v6, %v25933_v25 }
 0x418   :  { %17096 = vmatpush3.bf16.msra.mxu1 %v27605_v59  ;;  %27609 = vst [vmem:[#allocation193_spill] sm:$0xff] %v23459_v23  ;;  %v8295_v7 = vand.u32 4294901760, %v8294_v49  ;;  %v27613_v49 = vld [vmem:[#allocation93_spill] sm:$0xff] }
 0x419   :  { %17098 = vmatprep.subr.bf16.mxu1 %v27607_v14  ;;  %v8309_v23 = vand.u32 4294901760, %v8308_v57  ;;  %v25935_v14 = vand.u32 4294901760, %v23387_v3  ;;  %v27619_v57 = vld [vmem:[#allocation29_spill] sm:$0xff] }
 0x41a   :  { %v23471_v52 = vpack.c.bf16 %v8302_v29, %v8295_v7 }
 0x41b   :  { %v8322_v21 = vsub.f32 %v23387_v3, %v25935_v14  ;;  %v27622_v14 = vand.u32 4294901760, %v22964_v33  ;;  %v27627_v33 = vand.u32 4294901760, %v22984_v35  ;;  %v27632_v35 = vand.u32 4294901760, %v23004_v26 }
 0x41c   :  { %17100 = vmatpush3.bf16.msra.mxu1 %v27608_v8  ;;  %v27611_v8 = vld [vmem:[#allocation79_spill] sm:$0xff]  ;;  %27612 = vst [vmem:[#allocation69_spill] sm:$0xff] %v23471_v52  ;;  %v27614_v52 = vld [vmem:[#allocation118_spill] sm:$0xff]  ;;  %v27638_v26 = vand.u32 4294901760, %v23037_v48  ;;  %v27645_v48 = vld [vmem:[#allocation53_spill] sm:$0xff] }
 0x41d   :  { %17102 = vmatprep.subr.bf16.mxu1 %v27610_v17  ;;  %v8316_v17 = vand.u32 4294901760, %v8315_v31 }
 0x41f   :  { %v23484_v25 = vpack.c.bf16 %v8316_v17, %v8309_v23  ;;  %v8323_v17 = vand.u32 4294901760, %v8322_v21  ;;  %v27625_v21 = vand.u32 4294901760, %v27593_v55  ;;  %v27629_v55 = vand.u32 4294901760, %v22994_v5 }
 0x420   :  { %v13419_v40 = vpop.f32.mrb[144].mxu1  ;;  %17104 = vmatpush3.bf16.msra.mxu1 %v27611_v8  ;;  %v25936_v8 = vand.u32 4294901760, %v23389_v42  ;;  %v17232_v5 = vpack.c.bf16 %v23357_v37, %v23355_v1 }
 0x421   :  { %v13420_v54 = vpop.f32.mrb[145].mxu1  ;;  %17106 = vmatprep.subr.bf16.mxu1 %v27613_v49  ;;  %27615 = vst [vmem:[#allocation42_spill] sm:$0xff] %v23484_v25  ;;  %v27616_v49 = vld [vmem:[#allocation83_spill] sm:$0xff]  ;;  %v27620_v25 = vld [vmem:[#allocation178_spill] sm:$0xff] }
 0x422   :  { %v13421_v44 = vadd.f32 %v13420_v54, %v13419_v40  ;;  %v27617_v54 = vand.u32 4294901760, %v22585_v41  ;;  %v27618_v40 = vand.u32 4294901760, %v22590_v43  ;;  %v27623_v43 = vand.u32 4294901760, %v22969_v50 }
 0x424   :  { %v5773_v7 = vadd.f32 %v13421_v44, %v23362_v0  ;;  %v13422_v29 = vpop.f32.mrb[146].mxu1  ;;  %17108 = vmatpush3.bf16.msra.mxu1 %v27614_v52  ;;  %v17113_v31 = vpack.c.bf16 %v27618_v40, %v27617_v54  ;;  %v8329_v0 = vsub.f32 %v23389_v42, %v25936_v8  ;;  %v27624_v54 = vand.u32 4294901760, %v22974_v56 }
 0x425   :  { %v13423_v59 = vpop.f32.mrb[147].mxu1  ;;  %17110 = vmatprep.subr.bf16.mxu1 %v27616_v49  ;;  %v17226_v56 = vpack.c.bf16 %v23342_v13, %v23337_v58 }
 0x426   :  { %v5932_v44 = vadd.f32 %v27619_v57, %v5773_v7  ;;  %v8330_v23 = vand.u32 4294901760, %v8329_v0  ;;  %v27621_v59 = vand.u32 4294901760, %v22959_v51  ;;  %v17117_v40 = vpack.c.bf16 %v27624_v54, %v27623_v43 }
 0x427   :  { %v27626_v51 = vand.u32 4294901760, %v22979_v11  ;;  %v27631_v11 = vand.u32 4294901760, %v22999_v60  ;;  %v27635_v43 = vand.u32 4294901760, %v23019_v9  ;;  %v27636_v54 = vand.u32 4294901760, %v23024_v30  ;;  %v27641_v9 = vld [vmem:[#allocation179_spill] sm:$0xff]  ;;  %v27643_v30 = vld [vmem:[#allocation82_spill] sm:$0xff] }
 0x428   :  { %v13425_v29 = vpop.f32.mrb[148].mxu1  ;;  %17112 = vmatpush3.bf16.msra.mxu1 %v27620_v25  ;;  %v17115_v49 = vpack.c.bf16 %v27622_v14, %v27621_v59  ;;  %v23507_v8 = vpack.c.bf16 %v8330_v23, %v8323_v17  ;;  %v27633_v59 = vand.u32 4294901760, %v23009_v16  ;;  %v27637_v60 = vand.u32 4294901760, %v23032_v10 }
 0x429   :  { %v13426_v41 = vpop.f32.mrb[149].mxu1  ;;  %17114 = vmatprep.subr.bf16.mxu1 %v17113_v31  ;;  %v17119_v50 = vpack.c.bf16 %v27627_v33, %v27626_v51  ;;  %v27628_v31 = vand.u32 4294901760, %v22989_v39  ;;  %v17235_v16 = vpack.c.bf16 %v23364_v24, %v23359_v53  ;;  %v27644_v51 = vand.u32 4294901760, %v27643_v30  ;;  %v27662_v30 = vld [vmem:[#allocation161_spill] sm:$0xff] }
 0x42a   :  { %v13427_v7 = vadd.f32 %v13426_v41, %v13425_v29  ;;  %v17123_v29 = vpack.c.bf16 %v27632_v35, %v27631_v11  ;;  %v27634_v41 = vand.u32 4294901760, %v23014_v2  ;;  %v27639_v2 = vand.u32 4294901760, %v23043_v46  ;;  %v27649_v46 = vld [vmem:[#allocation184_spill] sm:$0xff] }
 0x42b   :  { %7852 = vmatmul.mubr.f32.vlgmr.msra.gmra.mrb[174].mxu1 %v27625_v21  ;;  %v17121_v17 = vpack.c.bf16 %v27629_v55, %v27628_v31  ;;  %v27640_v21 = vand.u32 4294901760, %v23048_v18  ;;  %v17238_v10 = vpack.c.bf16 %v23368_v61, %v23366_v36  ;;  %v27651_v18 = vld [vmem:[#allocation153_spill] sm:$0xff]  ;;  %v17241_v35 = vpack.c.bf16 %v23372_v4, %v23370_v45 }
 0x42c   :  { %v5787_v0 = vadd.f32 %v13427_v7, %v23411_v34  ;;  %v13428_v57 = vpop.f32.mrb[150].mxu1  ;;  %17116 = vmatpush3.bf16.msra.mxu1 %v17115_v49  ;;  %8018 = vmatprep.mubr.f32.mxu1 %v23091_v63  ;;  %v27630_v34 = vld [vmem:[#allocation167_spill] sm:$0xff]  ;;  %v17229_v49 = vpack.c.bf16 %v23353_v15, %v23347_v22  ;;  %v17125_v39 = vpack.c.bf16 %v27634_v41, %v27633_v59 }
 0x42d   :  { %v13429_v14 = vpop.f32.mrb[151].mxu1  ;;  %17118 = vmatprep.subr.bf16.mxu1 %v17117_v40  ;;  %v17127_v40 = vpack.c.bf16 %v27636_v54, %v27635_v43  ;;  %v17129_v7 = vpack.c.bf16 %v27638_v26, %v27637_v60  ;;  %v27642_v57 = vand.u32 4294901760, %v27641_v9  ;;  %v27654_v59 = vld [vmem:[#allocation163_spill] sm:$0xff]  ;;  %v27656_v54 = vld [vmem:[#allocation185_spill] sm:$0xff]  ;;  %v27660_v9 = vld [vmem:[#allocation186_spill] sm:$0xff] }
 0x42e   :  { %v5950_v23 = vadd.f32 %v27630_v34, %v5787_v0  ;;  %v17131_v0 = vpack.c.bf16 %v27640_v21, %v27639_v2  ;;  %v27647_v14 = vld [vmem:[#allocation183_spill] sm:$0xff]  ;;  %v27652_v34 = vand.u32 4294901760, %v27651_v18  ;;  %v27655_v41 = vand.u32 4294901760, %v27654_v59  ;;  %v27658_v60 = vld [vmem:[#allocation157_spill] sm:$0xff] }
 0x42f   :  { %v17133_v33 = vpack.c.bf16 %v27644_v51, %v27642_v57  ;;  %v27648_v31 = vand.u32 4294901760, %v27647_v14  ;;  %v27659_v26 = vand.u32 4294901760, %v27658_v60  ;;  %v27661_v57 = vand.u32 4294901760, %v27660_v9  ;;  %v27664_v14 = vld [vmem:[#allocation87_spill] sm:$0xff]  ;;  %v27666_v59 = vld [vmem:[#allocation37_spill] sm:$0xff] }
 0x430   :  { %17120 = vmatpush3.bf16.msra.mxu1 %v17119_v50  ;;  %v27646_v50 = vand.u32 4294901760, %v27645_v48  ;;  %v27674_v9 = vmov 0.0  }
 0x431   :  { %17122 = vmatprep.subr.bf16.mxu1 %v17121_v17  ;;  %v27650_v17 = vand.u32 4294901760, %v27649_v46 }
 0x432   :  { %v17135_v55 = vpack.c.bf16 %v27648_v31, %v27646_v50 }
 0x433   :  { %v17137_v11 = vpack.c.bf16 %v27652_v34, %v27650_v17  ;;  %v27665_v34 = vld [vmem:[#allocation81_spill] sm:$0xff] }
 0x434   :  { %17124 = vmatpush3.bf16.msra.mxu1 %v17123_v29  ;;  %v27653_v29 = vand.u32 4294901760, %v23118_v19  ;;  %v27663_v19 = vand.u32 4294901760, %v27662_v30 }
 0x435   :  { %17126 = vmatprep.subr.bf16.mxu1 %v17125_v39 }
 0x436   :  { %v17139_v39 = vpack.c.bf16 %v27655_v41, %v27653_v29  ;;  %v17143_v51 = vpack.c.bf16 %v27663_v19, %v27661_v57 }
 0x438   :  { %17128 = vmatpush3.bf16.msra.mxu1 %v17127_v40  ;;  %v27657_v40 = vand.u32 4294901760, %v27656_v54 }
 0x439   :  { %17130 = vmatprep.subr.bf16.mxu1 %v17129_v7 }
 0x43a   :  { %v17141_v7 = vpack.c.bf16 %v27659_v26, %v27657_v40 }
 0x43c   :  { %17132 = vmatpush3.bf16.msra.mxu1 %v17131_v0  ;;  %v17244_v0 = vpack.c.bf16 %v23378_v38, %v23376_v6 }
 0x43d   :  { %17134 = vmatprep.subr.bf16.mxu1 %v17133_v33 }
 0x440   :  { %17136 = vmatpush3.bf16.msra.mxu1 %v17135_v55  ;;  %v17247_v55 = vpack.c.bf16 %v23389_v42, %v23387_v3 }
 0x441   :  { %v13507_v43 = vpop.f32.mrb[152].mxu1  ;;  %17138 = vmatprep.subr.bf16.mxu1 %v17137_v11 }
 0x442   :  { %v13508_v2 = vpop.f32.mrb[153].mxu1 }
 0x443   :  { %v13509_v21 = vadd.f32 %v13508_v2, %v13507_v43 }
 0x444   :  { %17140 = vmatpush3.bf16.msra.mxu1 %v17139_v39  ;;  %v27672_v39 = vld [vmem:[#allocation93_spill] sm:$0xff] }
 0x445   :  { %v6067_v33 = vadd.f32 %v13509_v21, %v5932_v44  ;;  %v13510_v48 = vpop.f32.mrb[154].mxu1  ;;  %17142 = vmatprep.subr.bf16.mxu1 %v17141_v7 }
 0x446   :  { %v13511_v50 = vpop.f32.mrb[155].mxu1 }
 0x447   :  { %v6268_v31 = vadd.f32 %v27664_v14, %v6067_v33 }
 0x448   :  { %17144 = vmatpush3.bf16.msra.mxu1 %v17143_v51 }
 0x449   :  { %v13513_v46 = vpop.f32.mrb[156].mxu1  ;;  %17146 = vmatprep.subr.bf16.mxu1 %v27590_v20  ;;  %v27667_v20 = vld [vmem:[#allocation130_spill] sm:$0xff] }
 0x44a   :  { %v13514_v17 = vpop.f32.mrb[157].mxu1 }
 0x44b   :  { %v13515_v18 = vadd.f32 %v13514_v17, %v13513_v46  ;;  %8020 = vmatmul.mubr.f32.vlgmr.msra.gmra.mrb[176].mxu1 %v27665_v34 }
 0x44c   :  { %17148 = vmatpush3.bf16.msra.mxu1 %v27594_v32  ;;  %8122 = vmatprep.mubr.f32.mxu1 %v23091_v63  ;;  %v27668_v32 = vld [vmem:[#allocation137_spill] sm:$0xff]  ;;  %v27669_v63 = vld [vmem:[#allocation147_spill] sm:$0xff] }
 0x44d   :  { %v6089_v44 = vadd.f32 %v13515_v18, %v5950_v23  ;;  %v13516_v11 = vpop.f32.mrb[158].mxu1  ;;  %17150 = vmatprep.subr.bf16.mxu1 %v27596_v47  ;;  %v27670_v23 = vld [vmem:[#allocation165_spill] sm:$0xff]  ;;  %v27671_v47 = vld [vmem:[#allocation79_spill] sm:$0xff] }
 0x44e   :  { %v13517_v29 = vpop.f32.mrb[159].mxu1 }
 0x44f   :  { %v6282_v41 = vadd.f32 %v27666_v59, %v6089_v44 }
 0x450   :  { %17152 = vmatpush3.bf16.msra.mxu1 %v27599_v28 }
 0x451   :  { %17154 = vmatprep.subr.bf16.mxu1 %v27600_v12 }
 0x454   :  { %17156 = vmatpush3.bf16.msra.mxu1 %v27602_v62  ;;  %v27673_v62 = vld [vmem:[#allocation83_spill] sm:$0xff] }
 0x455   :  { %17158 = vmatprep.subr.bf16.mxu1 %v27604_v27 }
 0x458   :  { %17160 = vmatpush3.bf16.msra.mxu1 %v27667_v20 }
 0x459   :  { %17162 = vmatprep.subr.bf16.mxu1 %v27668_v32 }
 0x45c   :  { %17164 = vmatpush3.bf16.msra.mxu1 %v27669_v63 }
 0x45d   :  { %17166 = vmatprep.subr.bf16.mxu1 %v27670_v23 }
 0x460   :  { %17168 = vmatpush3.bf16.msra.mxu1 %v27671_v47 }
 0x461   :  { %17170 = vmatprep.subr.bf16.mxu1 %v27672_v39 }
 0x462   :  { %v13595_v43 = vpop.f32.mrb[160].mxu1 }
 0x463   :  { %v14935_v28 = vpop.f32.mrb[76].mxu0  ;;  %v13596_v54 = vpop.f32.mrb[161].mxu1 }
 0x464   :  { %v13597_v12 = vadd.f32 %v13596_v54, %v13595_v43  ;;  %v7165_v40 = vpop.f32.mrb[77].mxu0  ;;  %17172 = vmatpush3.bf16.msra.mxu1 %v27614_v52 }
 0x465   :  { %17174 = vmatprep.subr.bf16.mxu1 %v27673_v62  ;;  %v27678_v62 = vld [vmem:[#allocation67_spill] sm:$0xff] }
 0x466   :  { %v6393_v27 = vadd.f32 %v13597_v12, %v6268_v31  ;;  %v13598_v60 = vpop.f32.mrb[162].mxu1  ;;  %v27676_v12 = vld [vmem:[#allocation191_spill] sm:$0xff] }
 0x467   :  { %v14938_v26 = vpop.f32.mrb[78].mxu0  ;;  %v13599_v7 = vpop.f32.mrb[163].mxu1  ;;  %v27680_v60 = vld [vmem:[#allocation192_spill] sm:$0xff] }
 0x468   :  { %v17823_v2 = vadd.f32 %v7165_v40, %v6393_v27  ;;  %v7177_v21 = vpop.f32.mrb[79].mxu0  ;;  %17176 = vmatpush3.bf16.msra.mxu1 %v27620_v25  ;;  %v27677_v40 = vmov 0.0|0.0   ;;  %v27679_v27 = vld [vmem:[#allocation68_spill] sm:$0xff]  ;;  %v27681_v26 = vld [vmem:[#allocation193_spill] sm:$0xff] }
 0x469   :  { %15149 = vmatprep.subr.mxu1 %v27674_v9 }
 0x46a   :  { %v7187_v57 = vmax.f32 %v17823_v2, 0.0  ;;  %v13601_v30 = vpop.f32.mrb[164].mxu1 }
 0x46b   :  { %v13602_v19 = vpop.f32.mrb[165].mxu1  ;;  %8124 = vmatmul.mubr.f32.vlgmr.msra.gmra.mrb[178].mxu1 %v27665_v34 }
 0x46c   :  { %v7199_v51 = vmax.f32 %v7187_v57, 0.0  ;;  %v13603_v33 = vadd.f32 %v13602_v19, %v13601_v30  ;;  %15151 = vmatprep.mubr.msk.f32.mxu1 %vm18084_vm14, %v27674_v9  ;;  %v27682_v57 = vld [vmem:[#allocation69_spill] sm:$0xff]  ;;  %v27683_v30 = vld [vmem:[#allocation42_spill] sm:$0xff]  ;;  %v8771_v19 = vld [vmem:[#allocation5] sm:$0xff] }
 0x46e   :  { %v7200_v52 = vrot.slane %v7199_v51, 4  ;;  %v6407_v48 = vadd.f32 %v13603_v33, %v6282_v41  ;;  %v13604_v50 = vpop.f32.mrb[166].mxu1 }
 0x46f   :  { %v13605_v14 = vpop.f32.mrb[167].mxu1 }
 0x470   :  { %v7201_v31 = vmax.f32 %v7199_v51, %v7200_v52  ;;  %v17824_v46 = vadd.f32 %v7177_v21, %v6407_v48  ;;  %v8783_v51 = vsel %vm8782_vm10, %v8771_v19, 0.0 }
 0x471   :  { %v8786_v33 = vrot.slane %v8783_v51, 4  ;;  %8784 = vadd.xlane.f32.xlu0 %v8783_v51 }
 0x472   :  { %v7189_v17 = vmax.f32 %v17824_v46, 0.0  ;;  %v7202_v25 = vrot.slane %v7201_v31, 2 }
 0x473   :  { %v8787_v52 = vadd.f32 %v8786_v33, %v8783_v51  ;;  %v27689_v51 = vld [vmem:[#allocation112_spill] sm:$0xff] }
 0x474   :  { %v7206_v18 = vmax.f32 %v7189_v17, 0.0  ;;  %v7203_v11 = vmax.f32 %v7201_v31, %v7202_v25  ;;  %v8770_v17 = vld [vmem:[#allocation2] sm:$0xff]  ;;  %v23658_v25 = vld [vmem:[#allocation8 + $0x780] sm:$0xff] }
 0x475   :  { %v8788_v48 = vrot.slane %v8787_v52, 2 }
 0x476   :  { %v7207_v44 = vrot.slane %v7206_v18, 4  ;;  %v7204_v20 = vrot.slane %v7203_v11, 1 }
 0x478   :  { %v7208_v29 = vmax.f32 %v7206_v18, %v7207_v44  ;;  %v7205_v63 = vmax.f32 %v7203_v11, %v7204_v20  ;;  %v23660_v18 = vld [vmem:[#allocation8 + $0x788] sm:$0xff]  ;;  %v23662_v44 = vand.u32 4294901760, %v8770_v17 }
 0x47a   :  { %v7209_v59 = vrot.slane %v7208_v29, 2  ;;  %15150 = vmatpush3.msra.mxu1 %v23662_v44  ;;  %v8880_v20 = vsub.f32 %v8770_v17, %v23662_v44 }
 0x47b   :  { %15154 = vmatprep.subr.mxu1 %v27674_v9 }
 0x47c   :  { %v7210_v34 = vmax.f32 %v7208_v29, %v7209_v59  ;;  %v9289_v29 = vand.u32 4294901760, %v23658_v25  ;;  %v9292_v59 = vand.u32 4294901760, %v23660_v18 }
 0x47e   :  { %v7211_v32 = vrot.slane %v7210_v34, 1 }
 0x480   :  { %v7212_v23 = vmax.f32 %v7210_v34, %v7211_v32  ;;  %v23676_v32 = vsub.f32 %v23658_v25, %v9289_v29 }
 0x482   :  { %v7213_v47 = vsel %vm27675_vm9, %v7205_v63, %v7212_v23  ;;  %v8881_v23 = vand.u32 4294901760, %v8880_v20 }
 0x483   :  { %v23607_v39 = vand.u32 4294901760, %v7213_v47 }
 0x485   :  { %v23610_v41 = vsub.f32 %v7213_v47, %v23607_v39 }
 0x487   :  { %v8212_v43 = vand.u32 4294901760, %v23610_v41 }
 0x489   :  { %v8213_v28 = vsub.f32 %v23610_v41, %v8212_v43 }
 0x48b   :  { %v8214_v54 = vand.u32 4294901760, %v8213_v28 }
 0x48d   :  { %14972 = vmatmul.mubr.f32.vlgmr.msra.gmra.mrb[80].mxu0 %v8214_v54 }
 0x48e   :  { %17203 = vmatpush3.bf16.msra.mxu0 %v27676_v12  ;;  %15006 = vmatprep.mubr.msk.f32.mxu0 %vm18084_vm14, %v27674_v9  ;;  %v8882_v12 = vsub.f32 %v8880_v20, %v8881_v23 }
 0x48f   :  { %17204 = vmatprep.subr.bf16.mxu0 %v27677_v40 }
 0x492   :  { %17206 = vmatpush3.bf16.msra.mxu0 %v27678_v62 }
 0x493   :  { %17207 = vmatprep.subr.bf16.mxu0 %v27677_v40 }
 0x496   :  { %17209 = vmatpush3.bf16.msra.mxu0 %v27679_v27 }
 0x497   :  { %17210 = vmatprep.subr.bf16.mxu0 %v27677_v40 }
 0x49a   :  { %17212 = vmatpush3.bf16.msra.mxu0 %v27680_v60  ;;  %v8883_v60 = vand.u32 4294901760, %v8882_v12  ;;  %v9276_v12 = vld [vmem:[#allocation8 + $0x7a0] sm:$0xff] }
 0x49b   :  { %17213 = vmatprep.subr.bf16.mxu0 %v27677_v40 }
 0x49e   :  { %17215 = vmatpush3.bf16.msra.mxu0 %v27681_v26  ;;  %v13759_v7 = vpop.f32.mrb[168].mxu1 }
 0x49f   :  { %17216 = vmatprep.subr.bf16.mxu0 %v27677_v40  ;;  %v13760_v2 = vpop.f32.mrb[169].mxu1 }
 0x4a0   :  { %v13761_v21 = vadd.f32 %v13760_v2, %v13759_v7  ;;  %v27686_v7 = vld [vmem:[#allocation111_spill] sm:$0xff]  ;;  %v27687_v2 = vld [vmem:[#allocation188_spill] sm:$0xff] }
 0x4a2   :  { %17218 = vmatpush3.bf16.msra.mxu0 %v27682_v57 }
 0x4a3   :  { %17219 = vmatprep.subr.bf16.mxu0 %v27677_v40 }
 0x4a6   :  { %17221 = vmatpush3.bf16.msra.mxu0 %v27683_v30 }
 0x4a7   :  { %17222 = vmatprep.subr.bf16.mxu0 %v27677_v40 }
 0x4aa   :  { %17224 = vmatpush3.bf16.msra.mxu0 %v23507_v8  ;;  %v8789_v8 = vadd.f32 %v8788_v48, %v8787_v52  ;;  %v27690_v52 = vld [vmem:[#allocation64_spill] sm:$0xff]  ;;  %v27691_v48 = vld [vmem:[#allocation190_spill] sm:$0xff] }
 0x4ab   :  { %17225 = vmatprep.subr.bf16.mxu0 %v27677_v40 }
 0x4ac   :  { %v8790_v50 = vrot.slane %v8789_v8, 1 }
 0x4ad   :  { %15007 = vmatmul.mubr.f32.vlgmr.msra.gmra.mrb[80].mxu0 %v23607_v39 }
 0x4ae   :  { %17227 = vmatpush3.bf16.msra.mxu0 %v17226_v56  ;;  %15041 = vmatprep.mubr.msk.f32.mxu0 %vm18084_vm14, %v27674_v9  ;;  %v8791_v14 = vadd.f32 %v8790_v50, %v8789_v8  ;;  %v12163_v56 = vld [vmem:[#allocation10 + $0x3] ss:$0 sm:$0xff]  ;;  %v27692_v8 = vand.u32 4294901760, %v23337_v58  ;;  %v27693_v50 = vand.u32 4294901760, %v23342_v13  ;;  %v27696_v58 = vand.u32 4294901760, %v23355_v1 }
 0x4af   :  { %17228 = vmatprep.subr.bf16.mxu0 %v27677_v40  ;;  %v7376_v46 = vadd.f32 %v13761_v21, %v12163_v56  ;;  %v27688_v21 = vld [vmem:[#allocation189_spill] sm:$0xff]  ;;  %v27694_v56 = vand.u32 4294901760, %v23347_v22  ;;  %v27697_v22 = vand.u32 4294901760, %v23357_v37  ;;  %v27700_v1 = vand.u32 4294901760, %v23366_v36 }
 0x4b0   :  { %17925 = vrsqrt.f32 %v8791_v14  ;;  %vm8795_vm1 = vcmp.gt.f32.partialorder %v8791_v14, 0.0  ;;  %v17274_v14 = vpack.c.bf16 %v27693_v50, %v27692_v8  ;;  %v27701_v37 = vand.u32 4294901760, %v23368_v61 }
 0x4b1   :  { %v17280_v13 = vpack.c.bf16 %v27697_v22, %v27696_v58  ;;  %v27704_v61 = vand.u32 4294901760, %v23376_v6 }
 0x4b2   :  { %17230 = vmatpush3.bf16.msra.mxu0 %v17229_v49 }
 0x4b3   :  { %17231 = vmatprep.subr.bf16.mxu0 %v27677_v40 }
 0x4b6   :  { %17233 = vmatpush3.bf16.msra.mxu0 %v17232_v5 }
 0x4b7   :  { %17234 = vmatprep.subr.bf16.mxu0 %v27677_v40 }
 0x4ba   :  { %17236 = vmatpush3.bf16.msra.mxu0 %v17235_v16  ;;  %v17926_v16 = vpop.eup %17925 }
 0x4bb   :  { %17237 = vmatprep.subr.bf16.mxu0 %v27677_v40  ;;  %v8797_v11 = vsel %vm8795_vm1, %v17926_v16, 0.0 }
 0x4bc   :  { %v8798_v34 = vmul.f32 %v8797_v11, %v8771_v19 }
 0x4be   :  { %17239 = vmatpush3.bf16.msra.mxu0 %v17238_v10  ;;  %v13794_v49 = vpop.f32.mrb[170].mxu1  ;;  %v8800_v63 = vsel %vm8782_vm10, %v8798_v34, 0  ;;  %v9259_v47 = vsel %vm8782_vm10, %v8798_v34, 0.0 }
 0x4bf   :  { %17240 = vmatprep.subr.bf16.mxu0 %v27677_v40  ;;  %v13795_v31 = vpop.f32.mrb[171].mxu1  ;;  %v23688_v28 = vand.u32 4294901760, %v8800_v63  ;;  %9260 = vadd.xlane.f32.xlu1 %v9259_v47 }
 0x4c0   :  { %v13796_v5 = vadd.f32 %v13795_v31, %v13794_v49  ;;  %v27695_v49 = vand.u32 4294901760, %v23353_v15  ;;  %v23756_v15 = vpack.c.bf16 %v9292_v59, %v9289_v29 }
 0x4c1   :  { %v8869_v54 = vsub.f32 %v8800_v63, %v23688_v28  ;;  %v9274_v63 = vld [vmem:[#allocation8 + $0x790] sm:$0xff] }
 0x4c2   :  { %17242 = vmatpush3.bf16.msra.mxu0 %v17241_v35  ;;  %v7608_v10 = vadd.f32 %v13796_v5, %v7376_v46  ;;  %v23681_v35 = vsub.f32 %v23660_v18, %v9292_v59  ;;  %v17277_v31 = vpack.c.bf16 %v27695_v49, %v27694_v56  ;;  %v17286_v5 = vpack.c.bf16 %v27701_v37, %v27700_v1  ;;  %v9285_v56 = vld [vmem:[#allocation8 + $0x7e8] sm:$0xff]  ;;  %v9287_v1 = vld [vmem:[#allocation8 + $0x7f8] sm:$0xff] }
 0x4c3   :  { %17243 = vmatprep.subr.bf16.mxu0 %v27677_v40  ;;  %v8870_v62 = vand.u32 4294901760, %v8869_v54  ;;  %v9295_v47 = vand.u32 4294901760, %v9274_v63 }
 0x4c5   :  { %v8871_v27 = vsub.f32 %v8869_v54, %v8870_v62  ;;  %v23835_v22 = vsub.f32 %v9274_v63, %v9295_v47 }
 0x4c6   :  { %17245 = vmatpush3.bf16.msra.mxu0 %v17244_v0  ;;  %v27684_v0 = vld [vmem:[#allocation187_spill] sm:$0xff] }
 0x4c7   :  { %17246 = vmatprep.subr.bf16.mxu0 %v27677_v40  ;;  %v8872_v26 = vand.u32 4294901760, %v8871_v27  ;;  %v9301_v27 = vand.u32 4294901760, %v9276_v12 }
 0x4c9   :  { %15152 = vmatmul.mubr.f32.vlgmr.msra.gmra.mrb[180].mxu1 %v8872_v26  ;;  %v9279_v26 = vld [vmem:[#allocation8 + $0x7b8] sm:$0xff] }
 0x4ca   :  { %17248 = vmatpush3.bf16.msra.mxu0 %v17247_v55  ;;  %15155 = vmatpush3.msra.mxu1 %v8883_v60  ;;  %v27685_v55 = vld [vmem:[#allocation107_spill] sm:$0xff] }
 0x4cb   :  { %17249 = vmatprep.subr.bf16.mxu0 %v27677_v40  ;;  %15156 = vmatprep.mubr.msk.f32.mxu1 %vm18084_vm14, %v27674_v9 }
 0x4cc   :  { %15159 = vmatprep.subr.mxu1 %v27674_v9 }
 0x4cd   :  { %15042 = vmatmul.mubr.f32.vlgmr.msra.gmra.mrb[80].mxu0 %v23610_v41  ;;  %v27698_v41 = vand.u32 4294901760, %v23359_v53  ;;  %v27703_v53 = vand.u32 4294901760, %v23372_v4  ;;  %v27707_v4 = vand.u32 4294901760, %v23389_v42 }
 0x4ce   :  { %17251 = vmatpush3.bf16.msra.mxu0 %v27684_v0  ;;  %15076 = vmatprep.mubr.msk.f32.mxu0 %vm18084_vm14, %v27674_v9 }
 0x4cf   :  { %17252 = vmatprep.subr.bf16.mxu0 %v27677_v40 }
 0x4d1   :  { %15157 = vmatmul.mubr.f32.vlgmr.msra.gmra.mrb[180].mxu1 %v23688_v28 }
 0x4d2   :  { %17254 = vmatpush3.bf16.msra.mxu0 %v27685_v55  ;;  %15160 = vmatpush3.msra.mxu1 %v8880_v20 }
 0x4d3   :  { %17255 = vmatprep.subr.bf16.mxu0 %v27677_v40  ;;  %15161 = vmatprep.mubr.msk.f32.mxu1 %vm18084_vm14, %v27674_v9 }
 0x4d4   :  { %15164 = vmatprep.subr.mxu1 %v27674_v9 }
 0x4d6   :  { %17257 = vmatpush3.bf16.msra.mxu0 %v27686_v7 }
 0x4d7   :  { %17258 = vmatprep.subr.bf16.mxu0 %v27677_v40 }
 0x4d9   :  { %15162 = vmatmul.mubr.f32.vlgmr.msra.gmra.mrb[180].mxu1 %v8869_v54 }
 0x4da   :  { %17260 = vmatpush3.bf16.msra.mxu0 %v27687_v2  ;;  %15165 = vmatpush3.msra.mxu1 %v23662_v44 }
 0x4db   :  { %17261 = vmatprep.subr.bf16.mxu0 %v27677_v40  ;;  %15166 = vmatprep.mubr.msk.f32.mxu1 %vm18084_vm14, %v27674_v9 }
 0x4dc   :  { %15169 = vmatprep.subr.mxu1 %v27674_v9 }
 0x4de   :  { %17263 = vmatpush3.bf16.msra.mxu0 %v27688_v21  ;;  %v13829_v57 = vpop.f32.mrb[172].mxu1 }
 0x4df   :  { %17264 = vmatprep.subr.bf16.mxu0 %v27677_v40  ;;  %v13830_v30 = vpop.f32.mrb[173].mxu1 }
 0x4e0   :  { %v13831_v19 = vadd.f32 %v13830_v30, %v13829_v57  ;;  %v9281_v57 = vld [vmem:[#allocation8 + $0x7c8] sm:$0xff] }
 0x4e1   :  { %15167 = vmatmul.mubr.f32.vlgmr.msra.gmra.mrb[180].mxu1 %v8870_v62  ;;  %v9277_v62 = vld [vmem:[#allocation8 + $0x7a8] sm:$0xff] }
 0x4e2   :  { %17266 = vmatpush3.bf16.msra.mxu0 %v27689_v51  ;;  %v7746_v33 = vadd.f32 %v13831_v19, %v7608_v10  ;;  %15170 = vmatpush3.msra.mxu1 %v8881_v23  ;;  %v9275_v23 = vld [vmem:[#allocation8 + $0x798] sm:$0xff]  ;;  %v9316_v19 = vand.u32 4294901760, %v9281_v57 }
 0x4e3   :  { %17267 = vmatprep.subr.bf16.mxu0 %v27677_v40  ;;  %15171 = vmatprep.mubr.msk.f32.mxu1 %vm18084_vm14, %v27674_v9 }
 0x4e4   :  { %15174 = vmatprep.subr.mxu1 %v27674_v9 }
 0x4e6   :  { %17269 = vmatpush3.bf16.msra.mxu0 %v27690_v52 }
 0x4e7   :  { %17270 = vmatprep.subr.bf16.mxu0 %v27677_v40 }
 0x4e9   :  { %15172 = vmatmul.mubr.f32.vlgmr.msra.gmra.mrb[180].mxu1 %v23688_v28 }
 0x4ea   :  { %17272 = vmatpush3.bf16.msra.mxu0 %v27691_v48  ;;  %15175 = vmatpush3.msra.mxu1 %v23662_v44  ;;  %v27705_v44 = vand.u32 4294901760, %v23378_v38 }
 0x4eb   :  { %17273 = vmatprep.subr.bf16.mxu0 %v27677_v40  ;;  %15176 = vmatprep.mubr.msk.f32.mxu1 %vm18084_vm14, %v27674_v9 }
 0x4ec   :  { %17321 = vmatprep.subr.bf16.mxu1 %v27677_v40  ;;  %v17292_v10 = vpack.c.bf16 %v27705_v44, %v27704_v61  ;;  %v9334_v61 = vand.u32 4294901760, %v9287_v1  ;;  %v25952_v44 = vand.u32 4294901760, %v23676_v32 }
 0x4ed   :  { %15077 = vmatmul.mubr.f32.vlgmr.msra.gmra.mrb[80].mxu0 %v8212_v43  ;;  %v27699_v43 = vand.u32 4294901760, %v23364_v24  ;;  %v27702_v24 = vand.u32 4294901760, %v23370_v45  ;;  %v27706_v45 = vand.u32 4294901760, %v23387_v3 }
 0x4ee   :  { %17275 = vmatpush3.bf16.msra.mxu0 %v17274_v14  ;;  %15111 = vmatprep.mubr.msk.f32.mxu0 %vm18084_vm14, %v27674_v9  ;;  %v9284_v14 = vld [vmem:[#allocation8 + $0x7e0] sm:$0xff] }
 0x4ef   :  { %17276 = vmatprep.subr.bf16.mxu0 %v27677_v40  ;;  %v17283_v46 = vpack.c.bf16 %v27699_v43, %v27698_v41  ;;  %v17289_v17 = vpack.c.bf16 %v27703_v53, %v27702_v24  ;;  %v17295_v11 = vpack.c.bf16 %v27707_v4, %v27706_v45  ;;  %v9325_v49 = vand.u32 4294901760, %v9284_v14 }
 0x4f0   :  { %v23839_v41 = vsub.f32 %v9276_v12, %v9301_v27  ;;  %v23850_v53 = vsub.f32 %v9281_v57, %v9316_v19 }
 0x4f1   :  { %15177 = vmatmul.mubr.f32.vlgmr.msra.gmra.mrb[180].mxu1 %v23688_v28  ;;  %v9298_v28 = vand.u32 4294901760, %v9275_v23 }
 0x4f2   :  { %17278 = vmatpush3.bf16.msra.mxu0 %v17277_v31  ;;  %17323 = vmatpush3.bf16.msra.mxu1 %v23756_v15  ;;  %v9328_v31 = vand.u32 4294901760, %v9285_v56 }
 0x4f3   :  { %17279 = vmatprep.subr.bf16.mxu0 %v27677_v40  ;;  %15211 = vmatprep.mubr.msk.f32.mxu1 %vm18084_vm14, %v27674_v9  ;;  %v23813_v54 = vpack.c.bf16 %v9298_v28, %v9295_v47 }
 0x4f4   :  { %17324 = vmatprep.subr.bf16.mxu1 %v27677_v40  ;;  %v23833_v58 = vpack.c.bf16 %v9328_v31, %v9325_v49 }
 0x4f6   :  { %17281 = vmatpush3.bf16.msra.mxu0 %v17280_v13  ;;  %17326 = vmatpush3.bf16.msra.mxu1 %v23813_v54  ;;  %v23837_v13 = vsub.f32 %v9275_v23, %v9298_v28  ;;  %v25948_v23 = vand.u32 4294901760, %v23839_v41 }
 0x4f7   :  { %17282 = vmatprep.subr.bf16.mxu0 %v27677_v40  ;;  %17327 = vmatprep.subr.bf16.mxu1 %v27677_v40 }
 0x4fa   :  { %17284 = vmatpush3.bf16.msra.mxu0 %v17283_v46  ;;  %v9286_v46 = vld [vmem:[#allocation8 + $0x7f0] sm:$0xff] }
 0x4fb   :  { %17285 = vmatprep.subr.bf16.mxu0 %v27677_v40 }
 0x4fe   :  { %17287 = vmatpush3.bf16.msra.mxu0 %v17286_v5  ;;  %v13864_v25 = vpop.f32.mrb[174].mxu1 }
 0x4ff   :  { %17288 = vmatprep.subr.bf16.mxu0 %v27677_v40  ;;  %v13865_v18 = vpop.f32.mrb[175].mxu1 }
 0x500   :  { %v13866_v16 = vadd.f32 %v13865_v18, %v13864_v25  ;;  %v23857_v18 = vsub.f32 %v9284_v14, %v9325_v49 }
 0x502   :  { %17290 = vmatpush3.bf16.msra.mxu0 %v17289_v17  ;;  %v7854_v36 = vadd.f32 %v13866_v16, %v7746_v33  ;;  %v9282_v33 = vld [vmem:[#allocation8 + $0x7d0] sm:$0xff]  ;;  %v23859_v16 = vsub.f32 %v9285_v56, %v9328_v31 }
 0x503   :  { %17291 = vmatprep.subr.bf16.mxu0 %v27677_v40 }
 0x506   :  { %17293 = vmatpush3.bf16.msra.mxu0 %v17292_v10  ;;  %v25951_v10 = vand.u32 4294901760, %v23681_v35 }
 0x507   :  { %17294 = vmatprep.subr.bf16.mxu0 %v27677_v40 }
 0x50a   :  { %17296 = vmatpush3.bf16.msra.mxu0 %v17295_v11  ;;  %v23867_v11 = vsub.f32 %v9287_v1, %v9334_v61 }
 0x50b   :  { %17297 = vmatprep.subr.bf16.mxu0 %v27677_v40 }
 0x50d   :  { %15112 = vmatmul.mubr.f32.vlgmr.msra.gmra.mrb[80].mxu0 %v23607_v39 }
 0x50e   :  { %17299 = vmatpush3.bf16.msra.mxu0 %v27684_v0  ;;  %15146 = vmatprep.mubr.msk.f32.mxu0 %vm18084_vm14, %v27674_v9  ;;  %v9278_v0 = vld [vmem:[#allocation8 + $0x7b0] sm:$0xff] }
 0x50f   :  { %17300 = vmatprep.subr.bf16.mxu0 %v27677_v40 }
 0x512   :  { %17302 = vmatpush3.bf16.msra.mxu0 %v27685_v55  ;;  %v9307_v55 = vand.u32 4294901760, %v9278_v0 }
 0x513   :  { %17303 = vmatprep.subr.bf16.mxu0 %v27677_v40 }
 0x514   :  { %v23844_v37 = vsub.f32 %v9278_v0, %v9307_v55 }
 0x516   :  { %17305 = vmatpush3.bf16.msra.mxu0 %v27686_v7  ;;  %v9310_v7 = vand.u32 4294901760, %v9279_v26 }
 0x517   :  { %17306 = vmatprep.subr.bf16.mxu0 %v27677_v40 }
 0x518   :  { %v23846_v5 = vsub.f32 %v9279_v26, %v9310_v7 }
 0x51a   :  { %17308 = vmatpush3.bf16.msra.mxu0 %v27687_v2  ;;  %v23821_v2 = vpack.c.bf16 %v9310_v7, %v9307_v55  ;;  %v25946_v7 = vand.u32 4294901760, %v23844_v37 }
 0x51b   :  { %17309 = vmatprep.subr.bf16.mxu0 %v27677_v40 }
 0x51e   :  { %17311 = vmatpush3.bf16.msra.mxu0 %v27688_v21  ;;  %v13899_v6 = vpop.f32.mrb[176].mxu1  ;;  %v9280_v21 = vld [vmem:[#allocation8 + $0x7c0] sm:$0xff] }
 0x51f   :  { %17312 = vmatprep.subr.bf16.mxu0 %v27677_v40  ;;  %v13900_v38 = vpop.f32.mrb[177].mxu1  ;;  %v9313_v30 = vand.u32 4294901760, %v9280_v21 }
 0x520   :  { %v13901_v3 = vadd.f32 %v13900_v38, %v13899_v6  ;;  %v9383_v6 = vsub.f32 %v23676_v32, %v25952_v44  ;;  %v9390_v38 = vsub.f32 %v23681_v35, %v25951_v10 }
 0x521   :  { %v23848_v24 = vsub.f32 %v9280_v21, %v9313_v30  ;;  %v25945_v21 = vand.u32 4294901760, %v23846_v5 }
 0x522   :  { %17314 = vmatpush3.bf16.msra.mxu0 %v27689_v51  ;;  %v8022_v42 = vadd.f32 %v13901_v3, %v7854_v36  ;;  %v23825_v51 = vpack.c.bf16 %v9316_v19, %v9313_v30  ;;  %v9331_v36 = vand.u32 4294901760, %v9286_v46  ;;  %v25950_v3 = vand.u32 4294901760, %v23835_v22 }
 0x523   :  { %17315 = vmatprep.subr.bf16.mxu0 %v27677_v40  ;;  %v9425_v30 = vsub.f32 %v23844_v37, %v25946_v7  ;;  %v9432_v19 = vsub.f32 %v23846_v5, %v25945_v21 }
 0x524   :  { %v23863_v45 = vpack.c.bf16 %v9334_v61, %v9331_v36  ;;  %v23865_v4 = vsub.f32 %v9286_v46, %v9331_v36 }
 0x526   :  { %17317 = vmatpush3.bf16.msra.mxu0 %v27690_v52  ;;  %v9283_v52 = vld [vmem:[#allocation8 + $0x7d8] sm:$0xff] }
 0x527   :  { %17318 = vmatprep.subr.bf16.mxu0 %v27677_v40  ;;  %v9322_v8 = vand.u32 4294901760, %v9283_v52 }
 0x529   :  { %v23855_v25 = vsub.f32 %v9283_v52, %v9322_v8  ;;  %v9433_v52 = vand.u32 4294901760, %v9432_v19 }
 0x52a   :  { %17320 = vmatpush3.bf16.msra.mxu0 %v27691_v48  ;;  %v9319_v48 = vand.u32 4294901760, %v9282_v33 }
 0x52b   :  { %17465 = vmatprep.subr.bf16.mxu0 %v27677_v40  ;;  %v25941_v36 = vand.u32 4294901760, %v23855_v25 }
 0x52c   :  { %v23829_v50 = vpack.c.bf16 %v9322_v8, %v9319_v48  ;;  %v23853_v17 = vsub.f32 %v9282_v33, %v9319_v48  ;;  %v9426_v33 = vand.u32 4294901760, %v9425_v30  ;;  %v25944_v48 = vand.u32 4294901760, %v23848_v24 }
 0x52d   :  { %15147 = vmatmul.mubr.f32.vlgmr.msra.gmra.mrb[80].mxu0 %v23607_v39  ;;  %v9304_v39 = vand.u32 4294901760, %v9277_v62  ;;  %v25943_v8 = vand.u32 4294901760, %v23850_v53  ;;  %v25937_v30 = vand.u32 4294901760, %v23867_v11 }
 0x52e   :  { %15393 = vmatprep.mubr.msk.f32.mxu0 %vm18084_vm14, %v27674_v9  ;;  %v23909_v14 = vpack.c.bf16 %v9433_v52, %v9426_v33  ;;  %v9439_v56 = vsub.f32 %v23848_v24, %v25944_v48  ;;  %v25942_v1 = vand.u32 4294901760, %v23853_v17 }
 0x52f   :  { %v23817_v60 = vpack.c.bf16 %v9304_v39, %v9301_v27  ;;  %v23841_v43 = vsub.f32 %v9277_v62, %v9304_v39  ;;  %v9411_v27 = vsub.f32 %v23839_v41, %v25948_v23  ;;  %v9446_v49 = vsub.f32 %v23850_v53, %v25943_v8 }
 0x530   :  { %v9440_v31 = vand.u32 4294901760, %v9439_v56  ;;  %v9488_v52 = vsub.f32 %v23867_v11, %v25937_v30 }
 0x531   :  { %17329 = vmatpush3.bf16.msra.mxu1 %v23817_v60  ;;  %v25947_v47 = vand.u32 4294901760, %v23841_v43  ;;  %v9412_v26 = vand.u32 4294901760, %v9411_v27  ;;  %v9447_v46 = vand.u32 4294901760, %v9446_v49 }
 0x532   :  { %17330 = vmatprep.subr.bf16.mxu1 %v27677_v40  ;;  %v9489_v49 = vand.u32 4294901760, %v9488_v52 }
 0x533   :  { %v9418_v39 = vsub.f32 %v23841_v43, %v25947_v47  ;;  %v23919_v61 = vpack.c.bf16 %v9447_v46, %v9440_v31  ;;  %v17370_v46 = vpack.c.bf16 %v23681_v35, %v23676_v32 }
 0x535   :  { %17332 = vmatpush3.bf16.msra.mxu1 %v23821_v2  ;;  %v9419_v55 = vand.u32 4294901760, %v9418_v39 }
 0x536   :  { %17333 = vmatprep.subr.bf16.mxu1 %v27677_v40 }
 0x537   :  { %v23899_v57 = vpack.c.bf16 %v9419_v55, %v9412_v26  ;;  %v25938_v55 = vand.u32 4294901760, %v23865_v4 }
 0x539   :  { %17335 = vmatpush3.bf16.msra.mxu1 %v23825_v51  ;;  %v9481_v33 = vsub.f32 %v23865_v4, %v25938_v55 }
 0x53a   :  { %17336 = vmatprep.subr.bf16.mxu1 %v27677_v40 }
 0x53b   :  { %v9482_v56 = vand.u32 4294901760, %v9481_v33 }
 0x53d   :  { %17338 = vmatpush3.bf16.msra.mxu1 %v23829_v50  ;;  %v23947_v31 = vpack.c.bf16 %v9489_v49, %v9482_v56  ;;  %v17385_v49 = vpack.c.bf16 %v23855_v25, %v23853_v17 }
 0x53e   :  { %v13934_v29 = vpop.f32.mrb[178].mxu1  ;;  %17339 = vmatprep.subr.bf16.mxu1 %v27677_v40 }
 0x53f   :  { %v13935_v59 = vpop.f32.mrb[179].mxu1 }
 0x540   :  { %v13936_v20 = vadd.f32 %v13935_v59, %v13934_v29  ;;  %v9384_v29 = vand.u32 4294901760, %v9383_v6  ;;  %v9391_v59 = vand.u32 4294901760, %v9390_v38  ;;  %v9453_v6 = vsub.f32 %v23853_v17, %v25942_v1 }
 0x541   :  { %17341 = vmatpush3.bf16.msra.mxu1 %v23833_v58  ;;  %v9460_v38 = vsub.f32 %v23855_v25, %v25941_v36 }
 0x542   :  { %v23811_v34 = vadd.f32 %v13936_v20, %v8022_v42  ;;  %17342 = vmatprep.subr.bf16.mxu1 %v27677_v40  ;;  %v25949_v42 = vand.u32 4294901760, %v23837_v13  ;;  %v9397_v20 = vsub.f32 %v23835_v22, %v25950_v3  ;;  %v23887_v28 = vpack.c.bf16 %v9391_v59, %v9384_v29 }
 0x543   :  { %v9454_v29 = vand.u32 4294901760, %v9453_v6  ;;  %v9461_v59 = vand.u32 4294901760, %v9460_v38  ;;  %v8785_v6 = vpop.xlane.xlu0 %8784  ;;  %v17373_v38 = vpack.c.bf16 %v23837_v13, %v23835_v22 }
 0x544   :  { %v9404_v63 = vsub.f32 %v23837_v13, %v25949_v42  ;;  %v9398_v12 = vand.u32 4294901760, %v9397_v20  ;;  %v25940_v20 = vand.u32 4294901760, %v23857_v18  ;;  %17927 = vrsqrt.f32 %v8785_v6 }
 0x545   :  { %17344 = vmatpush3.bf16.msra.mxu1 %v23863_v45  ;;  %vm8792_vm3 = vcmp.gt.f32.partialorder %v8785_v6, 0.0  ;;  %v17388_v6 = vpack.c.bf16 %v23859_v16, %v23857_v18 }
 0x546   :  { %17345 = vmatprep.subr.bf16.mxu1 %v27677_v40  ;;  %v9405_v62 = vand.u32 4294901760, %v9404_v63  ;;  %v25939_v63 = vand.u32 4294901760, %v23859_v16 }
 0x548   :  { %v23895_v0 = vpack.c.bf16 %v9405_v62, %v9398_v12  ;;  %v23929_v12 = vpack.c.bf16 %v9461_v59, %v9454_v29  ;;  %v9467_v62 = vsub.f32 %v23857_v18, %v25940_v20  ;;  %v9474_v27 = vsub.f32 %v23859_v16, %v25939_v63 }
 0x549   :  { %v17376_v29 = vpack.c.bf16 %v23841_v43, %v23839_v41  ;;  %v17379_v59 = vpack.c.bf16 %v23846_v5, %v23844_v37 }
 0x54a   :  { %v9468_v39 = vand.u32 4294901760, %v9467_v62  ;;  %v9475_v26 = vand.u32 4294901760, %v9474_v27 }
 0x54c   :  { %v23939_v19 = vpack.c.bf16 %v9475_v26, %v9468_v39  ;;  %v17382_v39 = vpack.c.bf16 %v23850_v53, %v23848_v24 }
 0x54e   :  { %v17928_v62 = vpop.eup %17927 }
 0x54f   :  { %v23957_v27 = vsel %vm8792_vm3, %v17928_v62, 0.0 }
 0x5c4   :  { %v9244_v26 = vpop.f32.mrb[180].mxu1 }
 0x5c5   :  { %v9248_v33 = vmul.f32 %v9244_v26, %v23957_v27  ;;  %v15178_v52 = vpop.f32.mrb[181].mxu1  ;;  %v9270_v26 = vld [vmem:[#allocation8 + $0x800] sm:$0xff] }
 0x5c6   :  { %v9271_v52 = vld [vmem:[#allocation8 + $0x808] sm:$0xff]  ;;  %v9934_v21 = vand.u32 4294901760, %v9270_v26 }
 0x5c7   :  { %v9250_v56 = vsel %vm9249_vm4, %v9248_v33, 0.0  ;;  %v9937_v7 = vand.u32 4294901760, %v9271_v52 }
 0x5c8   :  { %v9251_v30 = vrot.slane %v9250_v56, 4  ;;  %v10012_v23 = vsub.f32 %v9270_v26, %v9934_v21 }
 0x5c9   :  { %v17466_v10 = vpack.c.bf16 %v9937_v7, %v9934_v21 }
 0x5ca   :  { %v9252_v55 = vadd.f32 %v9251_v30, %v9250_v56  ;;  %v10019_v30 = vsub.f32 %v9271_v52, %v9937_v7  ;;  %v10013_v56 = vand.u32 4294901760, %v10012_v23 }
 0x5cb   :  { %17467 = vmatpush3.bf16.msra.mxu0 %v17466_v10 }
 0x5cc   :  { %v9253_v63 = vrot.slane %v9252_v55, 2  ;;  %v10020_v42 = vand.u32 4294901760, %v10019_v30  ;;  %17468 = vmatprep.subr.bf16.mxu0 %v27677_v40 }
 0x5ce   :  { %v9254_v62 = vadd.f32 %v9253_v63, %v9252_v55  ;;  %v10014_v63 = vsub.f32 %v10012_v23, %v10013_v56  ;;  %v10021_v55 = vsub.f32 %v10019_v30, %v10020_v42 }
 0x5d0   :  { %v9255_v36 = vrot.slane %v9254_v62, 1  ;;  %v10015_v20 = vand.u32 4294901760, %v10014_v63 }
 0x5d2   :  { %v9256_v1 = vadd.f32 %v9255_v36, %v9254_v62  ;;  %v10022_v36 = vand.u32 4294901760, %v10021_v55  ;;  %v27709_v55 = vand.u32 4294901760, %v23676_v32  ;;  %v27713_v32 = vand.u32 4294901760, %v23839_v41 }
 0x5d3   :  { %v27719_v41 = vand.u32 4294901760, %v23853_v17  ;;  %v24129_v17 = vld [vmem:[#allocation8 + $0x8a0] sm:$0xff] }
 0x5d4   :  { %v9258_v8 = vmul.f32 0.125, %v9256_v1 }
 0x5d6   :  { %v9931_v48 = vsel %vm9249_vm4, %v9258_v8, 0  ;;  %v17469_v8 = vpack.c.bf16 %v10022_v36, %v10015_v20  ;;  %v27710_v36 = vand.u32 4294901760, %v23681_v35  ;;  %v27714_v35 = vand.u32 4294901760, %v23841_v43 }
 0x5d7   :  { %v10000_v33 = vand.u32 4294901760, %v9931_v48  ;;  %v27720_v43 = vand.u32 4294901760, %v23855_v25  ;;  %v24132_v25 = vld [vmem:[#allocation8 + $0x8a8] sm:$0xff] }
 0x5d9   :  { %v10001_v47 = vsub.f32 %v9931_v48, %v10000_v33  ;;  %v17472_v48 = vpack.c.bf16 %v10019_v30, %v10012_v23 }
 0x5db   :  { %v10002_v3 = vand.u32 4294901760, %v10001_v47 }
 0x5dd   :  { %v10003_v44 = vsub.f32 %v10001_v47, %v10002_v3 }
 0x5df   :  { %v10004_v1 = vand.u32 4294901760, %v10003_v44  ;;  %v17478_v44 = vpack.c.bf16 %v10020_v42, %v10013_v56 }
 0x5e1   :  { %15394 = vmatmul.mubr.f32.vlgmr.msra.gmra.mrb[82].mxu0 %v10004_v1  ;;  %v17418_v1 = vpack.c.bf16 %v27710_v36, %v27709_v55 }
 0x5e2   :  { %17470 = vmatpush3.bf16.msra.mxu0 %v17469_v8  ;;  %15400 = vmatprep.mubr.msk.f32.mxu0 %vm18084_vm14, %v27674_v9  ;;  %v27711_v8 = vand.u32 4294901760, %v23835_v22  ;;  %v27716_v22 = vand.u32 4294901760, %v23846_v5  ;;  %v27722_v5 = vand.u32 4294901760, %v23859_v16  ;;  %v10494_v16 = vand.u32 4294901760, %v24132_v25 }
 0x5e3   :  { %17471 = vmatprep.subr.bf16.mxu0 %v27677_v40 }
 0x5e5   :  { %15401 = vmatmul.mubr.f32.vlgmr.msra.gmra.mrb[84].mxu0 %v10000_v33 }
 0x5e6   :  { %17473 = vmatpush3.bf16.msra.mxu0 %v17472_v48  ;;  %15407 = vmatprep.mubr.msk.f32.mxu0 %vm18084_vm14, %v27674_v9  ;;  %v27712_v48 = vand.u32 4294901760, %v23837_v13 }
 0x5e7   :  { %17474 = vmatprep.subr.bf16.mxu0 %v27677_v40 }
 0x5e9   :  { %15408 = vmatmul.mubr.f32.vlgmr.msra.gmra.mrb[86].mxu0 %v10001_v47 }
 0x5ea   :  { %17476 = vmatpush3.bf16.msra.mxu0 %v17466_v10  ;;  %15414 = vmatprep.mubr.msk.f32.mxu0 %vm18084_vm14, %v27674_v9 }
 0x5eb   :  { %17477 = vmatprep.subr.bf16.mxu0 %v27677_v40 }
 0x5ed   :  { %15415 = vmatmul.mubr.f32.vlgmr.msra.gmra.mrb[88].mxu0 %v10002_v3 }
 0x5ee   :  { %17479 = vmatpush3.bf16.msra.mxu0 %v17478_v44  ;;  %15421 = vmatprep.mubr.msk.f32.mxu0 %vm18084_vm14, %v27674_v9  ;;  %v17421_v44 = vpack.c.bf16 %v27712_v48, %v27711_v8 }
 0x5ef   :  { %17480 = vmatprep.subr.bf16.mxu0 %v27677_v40 }
 0x5f1   :  { %15422 = vmatmul.mubr.f32.vlgmr.msra.gmra.mrb[90].mxu0 %v10000_v33 }
 0x5f2   :  { %17482 = vmatpush3.bf16.msra.mxu0 %v17466_v10  ;;  %15428 = vmatprep.mubr.msk.f32.mxu0 %vm18084_vm14, %v27674_v9 }
 0x5f5   :  { %15429 = vmatmul.mubr.f32.vlgmr.msra.gmra.mrb[92].mxu0 %v10000_v33 }
 0x600   :  { %v8766_v23 = vpop.f32.mrb[80].mxu0 }
 0x601   :  { %v17825_v47 = vadd.f32 %v8766_v23, %v23811_v34  ;;  %v15148_v7 = vpop.f32.mrb[81].mxu0  ;;  %v17424_v23 = vpack.c.bf16 %v27714_v35, %v27713_v32 }
 0x602   :  { %v27717_v7 = vand.u32 4294901760, %v23848_v24  ;;  %v27723_v24 = vand.u32 4294901760, %v23865_v4 }
 0x603   :  { %v8773_v21 = vsel %vm8772_vm5, %v17825_v47, 0.0  ;;  %v27715_v47 = vand.u32 4294901760, %v23844_v37  ;;  %v27721_v37 = vand.u32 4294901760, %v23857_v18  ;;  %v10491_v18 = vand.u32 4294901760, %v24129_v17 }
 0x604   :  { %v8774_v42 = vrot.slane %v8773_v21, 4 }
 0x605   :  { %v17427_v13 = vpack.c.bf16 %v27716_v22, %v27715_v47 }
 0x606   :  { %v8775_v3 = vadd.f32 %v8774_v42, %v8773_v21  ;;  %v27718_v21 = vand.u32 4294901760, %v23850_v53  ;;  %v27724_v53 = vand.u32 4294901760, %v23867_v11 }
 0x608   :  { %v8776_v20 = vrot.slane %v8775_v3, 2  ;;  %v17430_v42 = vpack.c.bf16 %v27718_v21, %v27717_v7 }
 0x60a   :  { %v8777_v62 = vadd.f32 %v8776_v20, %v8775_v3  ;;  %v17433_v3 = vpack.c.bf16 %v27720_v43, %v27719_v41  ;;  %v17436_v20 = vpack.c.bf16 %v27722_v5, %v27721_v37 }
 0x60c   :  { %v8778_v26 = vrot.slane %v8777_v62, 1 }
 0x60e   :  { %v8779_v52 = vadd.f32 %v8778_v26, %v8777_v62  ;;  %v17439_v62 = vpack.c.bf16 %v27724_v53, %v27723_v24  ;;  %v24149_v26 = vsub.f32 %v24129_v17, %v10491_v18 }
 0x610   :  { %v8781_v30 = vmul.f32 0.5, %v8779_v52 }
 0x612   :  { %v23984_v56 = vand.u32 4294901760, %v8781_v30 }
 0x614   :  { %v23987_v10 = vsub.f32 %v8781_v30, %v23984_v56 }
 0x616   :  { %v9371_v33 = vand.u32 4294901760, %v23987_v10 }
 0x618   :  { %v9372_v34 = vsub.f32 %v23987_v10, %v9371_v33 }
 0x61a   :  { %v9373_v63 = vand.u32 4294901760, %v9372_v34 }
 0x61c   :  { %15212 = vmatmul.mubr.f32.vlgmr.msra.gmra.mrb[182].mxu1 %v9373_v63 }
 0x61d   :  { %17347 = vmatpush3.bf16.msra.mxu1 %v23887_v28  ;;  %15246 = vmatprep.mubr.msk.f32.mxu1 %vm18084_vm14, %v27674_v9  ;;  %v10415_v28 = vld [vmem:[#allocation8 + $0x890] sm:$0xff] }
 0x61e   :  { %17348 = vmatprep.subr.bf16.mxu1 %v27677_v40 }
 0x621   :  { %17350 = vmatpush3.bf16.msra.mxu1 %v23895_v0  ;;  %v10416_v0 = vld [vmem:[#allocation8 + $0x898] sm:$0xff] }
 0x622   :  { %17351 = vmatprep.subr.bf16.mxu1 %v27677_v40 }
 0x625   :  { %17353 = vmatpush3.bf16.msra.mxu1 %v23899_v57  ;;  %v10399_v57 = vld [vmem:[#allocation8 + $0x810] sm:$0xff] }
 0x626   :  { %17354 = vmatprep.subr.bf16.mxu1 %v27677_v40 }
 0x629   :  { %17356 = vmatpush3.bf16.msra.mxu1 %v23909_v14  ;;  %v10485_v14 = vand.u32 4294901760, %v10415_v28 }
 0x62a   :  { %17357 = vmatprep.subr.bf16.mxu1 %v27677_v40 }
 0x62d   :  { %17359 = vmatpush3.bf16.msra.mxu1 %v23919_v61  ;;  %v10488_v61 = vand.u32 4294901760, %v10416_v0 }
 0x62e   :  { %17360 = vmatprep.subr.bf16.mxu1 %v27677_v40 }
 0x631   :  { %17362 = vmatpush3.bf16.msra.mxu1 %v23929_v12  ;;  %v10400_v12 = vld [vmem:[#allocation8 + $0x818] sm:$0xff] }
 0x632   :  { %17363 = vmatprep.subr.bf16.mxu1 %v27677_v40 }
 0x635   :  { %17365 = vmatpush3.bf16.msra.mxu1 %v23939_v19  ;;  %v10437_v19 = vand.u32 4294901760, %v10399_v57 }
 0x636   :  { %17366 = vmatprep.subr.bf16.mxu1 %v27677_v40 }
 0x639   :  { %17368 = vmatpush3.bf16.msra.mxu1 %v23947_v31  ;;  %v10440_v31 = vand.u32 4294901760, %v10400_v12 }
 0x63a   :  { %17369 = vmatprep.subr.bf16.mxu1 %v27677_v40 }
 0x63c   :  { %15247 = vmatmul.mubr.f32.vlgmr.msra.gmra.mrb[182].mxu1 %v23984_v56 }
 0x63d   :  { %17371 = vmatpush3.bf16.msra.mxu1 %v17370_v46  ;;  %15281 = vmatprep.mubr.msk.f32.mxu1 %vm18084_vm14, %v27674_v9  ;;  %v24038_v46 = vsub.f32 %v10415_v28, %v10485_v14  ;;  %v24164_v28 = vld [vmem:[#allocation8 + $0x830] sm:$0xff] }
 0x63e   :  { %17372 = vmatprep.subr.bf16.mxu1 %v27677_v40 }
 0x641   :  { %17374 = vmatpush3.bf16.msra.mxu1 %v17373_v38  ;;  %v24040_v38 = vsub.f32 %v10416_v0, %v10488_v61 }
 0x642   :  { %17375 = vmatprep.subr.bf16.mxu1 %v27677_v40 }
 0x645   :  { %17377 = vmatpush3.bf16.msra.mxu1 %v17376_v29  ;;  %v24042_v29 = vsub.f32 %v10399_v57, %v10437_v19 }
 0x646   :  { %17378 = vmatprep.subr.bf16.mxu1 %v27677_v40 }
 0x647   :  { %v25962_v0 = vand.u32 4294901760, %v24042_v29 }
 0x649   :  { %17380 = vmatpush3.bf16.msra.mxu1 %v17379_v59  ;;  %v24047_v59 = vsub.f32 %v10400_v12, %v10440_v31  ;;  %v10552_v8 = vsub.f32 %v24042_v29, %v25962_v0 }
 0x64a   :  { %17381 = vmatprep.subr.bf16.mxu1 %v27677_v40 }
 0x64b   :  { %v25961_v57 = vand.u32 4294901760, %v24047_v59 }
 0x64d   :  { %17383 = vmatpush3.bf16.msra.mxu1 %v17382_v39  ;;  %v27708_v39 = vpack.c.bf16 %v23867_v11, %v23865_v4  ;;  %v24140_v4 = vld [vmem:[#allocation8 + $0x828] sm:$0xff]  ;;  %v24142_v11 = vld [vmem:[#allocation8 + $0x8b0] sm:$0xff]  ;;  %v10559_v48 = vsub.f32 %v24047_v59, %v25961_v57 }
 0x64e   :  { %17384 = vmatprep.subr.bf16.mxu1 %v27677_v40  ;;  %v25979_v30 = vand.u32 4294901760, %v24140_v4  ;;  %v25977_v34 = vand.u32 4294901760, %v24142_v11  ;;  %v27732_v17 = vand.u32 4294901760, %v24140_v4 }
 0x64f   :  { %v10560_v41 = vand.u32 4294901760, %v10559_v48 }
 0x650   :  { %v24195_v36 = vsub.f32 %v24142_v11, %v25977_v34 }
 0x651   :  { %17386 = vmatpush3.bf16.msra.mxu1 %v17385_v49  ;;  %v24055_v49 = vpack.c.bf16 %v10488_v61, %v10485_v14  ;;  %v25960_v14 = vand.u32 4294901760, %v24149_v26 }
 0x652   :  { %17387 = vmatprep.subr.bf16.mxu1 %v27677_v40  ;;  %27727 = vst [vmem:[#allocation129_spill] sm:$0xff] %v24195_v36  ;;  %v25955_v7 = vand.u32 4294901760, %v24195_v36 }
 0x653   :  { %17484 = vmatprep.subr.bf16.mxu0 %v24055_v49 }
 0x655   :  { %17389 = vmatpush3.bf16.msra.mxu1 %v17388_v6  ;;  %v24062_v6 = vpack.c.bf16 %v10440_v31, %v10437_v19  ;;  %v24181_v19 = vsub.f32 %v24140_v4, %v25979_v30  ;;  %v25974_v31 = vand.u32 4294901760, %v24164_v28  ;;  %v24368_v30 = vld [vmem:[#allocation8 + $0x868] sm:$0xff] }
 0x656   :  { %17390 = vmatprep.subr.bf16.mxu1 %v27677_v40 }
 0x657   :  { %17486 = vmatpush3.bf16.msra.mxu0 %v24062_v6  ;;  %27726 = vst [vmem:[#allocation128_spill] sm:$0xff] %v24181_v19  ;;  %v24220_v47 = vsub.f32 %v24164_v28, %v25974_v31 }
 0x659   :  { %17392 = vmatpush3.bf16.msra.mxu1 %v27708_v39  ;;  %27729 = vst [vmem:[#allocation134_spill] sm:$0xff] %v24220_v47  ;;  %v25954_v5 = vand.u32 4294901760, %v24220_v47 }
 0x65a   :  { %17393 = vmatprep.subr.bf16.mxu1 %v27677_v40 }
 0x65b   :  { %v10580_v48 = vsub.f32 %v24220_v47, %v25954_v5 }
 0x65c   :  { %15282 = vmatmul.mubr.f32.vlgmr.msra.gmra.mrb[182].mxu1 %v23987_v10  ;;  %v25964_v10 = vand.u32 4294901760, %v24038_v46 }
 0x65d   :  { %17395 = vmatpush3.bf16.msra.mxu1 %v23756_v15  ;;  %15316 = vmatprep.mubr.msk.f32.mxu1 %vm18084_vm14, %v27674_v9 }
 0x65e   :  { %17396 = vmatprep.subr.bf16.mxu1 %v27677_v40  ;;  %v10664_v55 = vsub.f32 %v24038_v46, %v25964_v10 }
 0x661   :  { %17398 = vmatpush3.bf16.msra.mxu1 %v23813_v54 }
 0x662   :  { %17399 = vmatprep.subr.bf16.mxu1 %v27677_v40 }
 0x665   :  { %17401 = vmatpush3.bf16.msra.mxu1 %v23817_v60 }
 0x666   :  { %17402 = vmatprep.subr.bf16.mxu1 %v27677_v40 }
 0x669   :  { %17404 = vmatpush3.bf16.msra.mxu1 %v23821_v2 }
 0x66a   :  { %17405 = vmatprep.subr.bf16.mxu1 %v27677_v40 }
 0x66d   :  { %17407 = vmatpush3.bf16.msra.mxu1 %v23825_v51 }
 0x66e   :  { %17408 = vmatprep.subr.bf16.mxu1 %v27677_v40 }
 0x671   :  { %17410 = vmatpush3.bf16.msra.mxu1 %v23829_v50 }
 0x672   :  { %17411 = vmatprep.subr.bf16.mxu1 %v27677_v40 }
 0x675   :  { %17413 = vmatpush3.bf16.msra.mxu1 %v23833_v58 }
 0x676   :  { %17414 = vmatprep.subr.bf16.mxu1 %v27677_v40 }
 0x679   :  { %17416 = vmatpush3.bf16.msra.mxu1 %v23863_v45 }
 0x67a   :  { %17417 = vmatprep.subr.bf16.mxu1 %v27677_v40 }
 0x67c   :  { %15317 = vmatmul.mubr.f32.vlgmr.msra.gmra.mrb[182].mxu1 %v9371_v33  ;;  %v25963_v33 = vand.u32 4294901760, %v24040_v38 }
 0x67d   :  { %17419 = vmatpush3.bf16.msra.mxu1 %v17418_v1  ;;  %15351 = vmatprep.mubr.msk.f32.mxu1 %vm18084_vm14, %v27674_v9 }
 0x67e   :  { %17420 = vmatprep.subr.bf16.mxu1 %v27677_v40 }
 0x681   :  { %17422 = vmatpush3.bf16.msra.mxu1 %v17421_v44  ;;  %v10678_v44 = vsub.f32 %v24149_v26, %v25960_v14 }
 0x682   :  { %17423 = vmatprep.subr.bf16.mxu1 %v27677_v40 }
 0x685   :  { %17425 = vmatpush3.bf16.msra.mxu1 %v17424_v23  ;;  %v25957_v23 = vand.u32 4294901760, %v24181_v19 }
 0x686   :  { %17426 = vmatprep.subr.bf16.mxu1 %v27677_v40 }
 0x687   :  { %v10573_v37 = vsub.f32 %v24181_v19, %v25957_v23 }
 0x689   :  { %17428 = vmatpush3.bf16.msra.mxu1 %v17427_v13  ;;  %v10665_v13 = vand.u32 4294901760, %v10664_v55 }
 0x68a   :  { %17429 = vmatprep.subr.bf16.mxu1 %v27677_v40 }
 0x68d   :  { %17431 = vmatpush3.bf16.msra.mxu1 %v17430_v42  ;;  %v10553_v42 = vand.u32 4294901760, %v10552_v8  ;;  %v10574_v8 = vand.u32 4294901760, %v10573_v37 }
 0x68e   :  { %17432 = vmatprep.subr.bf16.mxu1 %v27677_v40 }
 0x691   :  { %17434 = vmatpush3.bf16.msra.mxu1 %v17433_v3  ;;  %v10679_v3 = vand.u32 4294901760, %v10678_v44 }
 0x692   :  { %17435 = vmatprep.subr.bf16.mxu1 %v27677_v40 }
 0x695   :  { %17437 = vmatpush3.bf16.msra.mxu1 %v17436_v20 }
 0x696   :  { %17438 = vmatprep.subr.bf16.mxu1 %v27677_v40 }
 0x699   :  { %17440 = vmatpush3.bf16.msra.mxu1 %v17439_v62  ;;  %v10692_v62 = vsub.f32 %v24195_v36, %v25955_v7 }
 0x69a   :  { %17441 = vmatprep.subr.bf16.mxu1 %v27677_v40 }
 0x69c   :  { %15352 = vmatmul.mubr.f32.vlgmr.msra.gmra.mrb[182].mxu1 %v23984_v56 }
 0x69d   :  { %17443 = vmatpush3.bf16.msra.mxu1 %v23756_v15  ;;  %15386 = vmatprep.mubr.msk.f32.mxu1 %vm18084_vm14, %v27674_v9  ;;  %v24137_v15 = vld [vmem:[#allocation8 + $0x820] sm:$0xff] }
 0x69e   :  { %17444 = vmatprep.subr.bf16.mxu1 %v27677_v40  ;;  %v25980_v52 = vand.u32 4294901760, %v24137_v15 }
 0x6a0   :  { %v24174_v61 = vsub.f32 %v24137_v15, %v25980_v52  ;;  %v24350_v52 = vld [vmem:[#allocation8 + $0x8e0] sm:$0xff] }
 0x6a1   :  { %17446 = vmatpush3.bf16.msra.mxu1 %v23813_v54  ;;  %v24144_v54 = vld [vmem:[#allocation8 + $0x8b8] sm:$0xff] }
 0x6a2   :  { %17447 = vmatprep.subr.bf16.mxu1 %v27677_v40  ;;  %v25976_v63 = vand.u32 4294901760, %v24144_v54  ;;  %27725 = vst [vmem:[#allocation86_spill] sm:$0xff] %v24174_v61  ;;  %v25958_v32 = vand.u32 4294901760, %v24174_v61 }
 0x6a4   :  { %v24200_v1 = vsub.f32 %v24144_v54, %v25976_v63  ;;  %v10566_v43 = vsub.f32 %v24174_v61, %v25958_v32  ;;  %v24306_v32 = vld [vmem:[#allocation8 + $0x850] sm:$0xff] }
 0x6a5   :  { %17449 = vmatpush3.bf16.msra.mxu1 %v23817_v60  ;;  %v24156_v60 = vsub.f32 %v24132_v25, %v10494_v16  ;;  %v25981_v0 = vand.u32 4294901760, %v24306_v32 }
 0x6a6   :  { %17450 = vmatprep.subr.bf16.mxu1 %v27677_v40  ;;  %27728 = vst [vmem:[#allocation85_spill] sm:$0xff] %v24200_v1  ;;  %v25953_v21 = vand.u32 4294901760, %v24200_v1  ;;  %v10567_v55 = vand.u32 4294901760, %v10566_v43 }
 0x6a7   :  { %v25959_v12 = vand.u32 4294901760, %v24156_v60 }
 0x6a9   :  { %17452 = vmatpush3.bf16.msra.mxu1 %v23821_v2  ;;  %v24166_v2 = vld [vmem:[#allocation8 + $0x838] sm:$0xff]  ;;  %v10685_v35 = vsub.f32 %v24156_v60, %v25959_v12 }
 0x6aa   :  { %17453 = vmatprep.subr.bf16.mxu1 %v27677_v40  ;;  %v25973_v39 = vand.u32 4294901760, %v24166_v2  ;;  %v24308_v12 = vld [vmem:[#allocation8 + $0x858] sm:$0xff] }
 0x6ab   :  { %v10686_v53 = vand.u32 4294901760, %v10685_v35 }
 0x6ac   :  { %v24225_v22 = vsub.f32 %v24166_v2, %v25973_v39 }
 0x6ad   :  { %17455 = vmatpush3.bf16.msra.mxu1 %v23825_v51  ;;  %v10671_v51 = vsub.f32 %v24040_v38, %v25963_v33  ;;  %v17519_v35 = vpack.c.bf16 %v10686_v53, %v10679_v3  ;;  %v25982_v33 = vand.u32 4294901760, %v24308_v12 }
 0x6ae   :  { %17456 = vmatprep.subr.bf16.mxu1 %v27677_v40  ;;  %27730 = vst [vmem:[#allocation135_spill] sm:$0xff] %v24225_v22  ;;  %v25956_v20 = vand.u32 4294901760, %v24225_v22 }
 0x6b0   :  { %v10587_v44 = vsub.f32 %v24225_v22, %v25956_v20 }
 0x6b1   :  { %17458 = vmatpush3.bf16.msra.mxu1 %v23829_v50  ;;  %v10672_v50 = vand.u32 4294901760, %v10671_v51  ;;  %v17517_v51 = vpack.c.bf16 %v10560_v41, %v10553_v42  ;;  %v10581_v42 = vand.u32 4294901760, %v10580_v48  ;;  %v24268_v48 = vld [vmem:[#allocation8 + $0x8c8] sm:$0xff] }
 0x6b2   :  { %17459 = vmatprep.subr.bf16.mxu1 %v27677_v40  ;;  %v10588_v41 = vand.u32 4294901760, %v10587_v44  ;;  %v25967_v44 = vand.u32 4294901760, %v24268_v48 }
 0x6b3   :  { %v17515_v24 = vpack.c.bf16 %v10672_v50, %v10665_v13  ;;  %v10693_v13 = vand.u32 4294901760, %v10692_v62 }
 0x6b4   :  { %v17525_v20 = vpack.c.bf16 %v10588_v41, %v10581_v42 }
 0x6b5   :  { %17461 = vmatpush3.bf16.msra.mxu1 %v23833_v58  ;;  %v10699_v58 = vsub.f32 %v24200_v1, %v25953_v21  ;;  %v24254_v21 = vpop.f32.mrb[82].mxu0 }
 0x6b6   :  { %17462 = vmatprep.subr.bf16.mxu1 %v27677_v40  ;;  %v15395_v43 = vpop.f32.mrb[83].mxu0 }
 0x6b7   :  { %v10700_v50 = vand.u32 4294901760, %v10699_v58 }
 0x6b8   :  { %v24256_v5 = vpop.f32.mrb[84].mxu0 }
 0x6b9   :  { %17464 = vmatpush3.bf16.msra.mxu1 %v23863_v45  ;;  %v17521_v45 = vpack.c.bf16 %v10574_v8, %v10567_v55  ;;  %v17523_v37 = vpack.c.bf16 %v10700_v50, %v10693_v13  ;;  %v15402_v7 = vpop.f32.mrb[85].mxu0  ;;  %v24266_v8 = vld [vmem:[#allocation8 + $0x8c0] sm:$0xff] }
 0x6ba   :  { %17516 = vmatprep.subr.bf16.mxu1 %v17515_v24  ;;  %v25968_v7 = vand.u32 4294901760, %v24266_v8 }
 0x6bc   :  { %15387 = vmatmul.mubr.f32.vlgmr.msra.gmra.mrb[182].mxu1 %v23984_v56  ;;  %v24258_v3 = vpop.f32.mrb[86].mxu0  ;;  %v24281_v43 = vsub.f32 %v24266_v8, %v25968_v7 }
 0x6bd   :  { %17518 = vmatpush3.bf16.msra.mxu1 %v17517_v51  ;;  %v15409_v24 = vpop.f32.mrb[87].mxu0 }
 0x6be   :  { %17520 = vmatprep.subr.bf16.mxu1 %v17519_v35  ;;  %v24272_v35 = vld [vmem:[#allocation8 + $0x840] sm:$0xff]  ;;  %v24300_v24 = vld [vmem:[#allocation8 + $0x8d8] sm:$0xff] }
 0x6bf   :  { %v25966_v13 = vand.u32 4294901760, %v24272_v35  ;;  %v25972_v23 = vand.u32 4294901760, %v24300_v24 }
 0x6c0   :  { %v24260_v56 = vpop.f32.mrb[88].mxu0 }
 0x6c1   :  { %17522 = vmatpush3.bf16.msra.mxu1 %v17521_v45  ;;  %v15416_v53 = vpop.f32.mrb[89].mxu0  ;;  %v24286_v45 = vsub.f32 %v24268_v48, %v25967_v44  ;;  %v24291_v42 = vsub.f32 %v24272_v35, %v25966_v13  ;;  %v24328_v44 = vsub.f32 %v24300_v24, %v25972_v23 }
 0x6c2   :  { %17524 = vmatprep.subr.bf16.mxu1 %v17523_v37  ;;  %v24298_v37 = vld [vmem:[#allocation8 + $0x8d0] sm:$0xff]  ;;  %v25969_v53 = vand.u32 4294901760, %v24281_v43 }
 0x6c3   :  { %v25975_v14 = vand.u32 4294901760, %v24291_v42 }
 0x6c4   :  { %v24262_v62 = vpop.f32.mrb[90].mxu0  ;;  %v10706_v10 = vsub.f32 %v24281_v43, %v25969_v53 }
 0x6c5   :  { %17526 = vmatpush3.bf16.msra.mxu1 %v17525_v20  ;;  %v15423_v58 = vpop.f32.mrb[91].mxu0  ;;  %v24274_v20 = vld [vmem:[#allocation8 + $0x848] sm:$0xff]  ;;  %v10594_v7 = vsub.f32 %v24291_v42, %v25975_v14  ;;  %v25984_v14 = vand.u32 4294901760, %v24328_v44 }
 0x6c6   :  { %v25965_v50 = vand.u32 4294901760, %v24274_v20  ;;  %v25970_v58 = vand.u32 4294901760, %v24286_v45  ;;  %v10707_v23 = vand.u32 4294901760, %v10706_v10  ;;  %v24358_v10 = vpack.c.bf16 %v10494_v16, %v10491_v18 }
 0x6c7   :  { %v10595_v63 = vand.u32 4294901760, %v10594_v7 }
 0x6c8   :  { %v24264_v55 = vpop.f32.mrb[92].mxu0  ;;  %v24296_v41 = vsub.f32 %v24274_v20, %v25965_v50  ;;  %v10713_v50 = vsub.f32 %v24286_v45, %v25970_v58  ;;  %v24339_v58 = vsub.f32 %v24306_v32, %v25981_v0  ;;  %v24352_v0 = vld [vmem:[#allocation8 + $0x8e8] sm:$0xff]  ;;  %17488 = vmatprep.subr.bf16.mxu0 %v24358_v10 }
 0x6c9   :  { %v15430_v51 = vpop.f32.mrb[93].mxu0 }
 0x6ca   :  { %v25971_v51 = vand.u32 4294901760, %v24298_v37  ;;  %v25978_v57 = vand.u32 4294901760, %v24296_v41  ;;  %v10714_v39 = vand.u32 4294901760, %v10713_v50  ;;  %v27733_v16 = vand.u32 4294901760, %v24339_v58 }
 0x6cc   :  { %v24323_v13 = vsub.f32 %v24298_v37, %v25971_v51  ;;  %v10601_v53 = vsub.f32 %v24296_v41, %v25978_v57  ;;  %v24344_v51 = vsub.f32 %v24308_v12, %v25982_v33  ;;  %v17527_v50 = vpack.c.bf16 %v10714_v39, %v10707_v23  ;;  %v24366_v33 = vld [vmem:[#allocation8 + $0x860] sm:$0xff] }
 0x6cd   :  { %v27731_v57 = vand.u32 4294901760, %v24137_v15  ;;  %v10608_v39 = vsub.f32 %v24339_v58, %v27733_v16  ;;  %v25986_v15 = vand.u32 4294901760, %v24350_v52  ;;  %v24388_v16 = vld [vmem:[#allocation8 + $0x8f0] sm:$0xff] }
 0x6ce   :  { %v25983_v31 = vand.u32 4294901760, %v24323_v13  ;;  %v10602_v34 = vand.u32 4294901760, %v10601_v53  ;;  %v10727_v53 = vsub.f32 %v24328_v44, %v25984_v14  ;;  %v27734_v23 = vand.u32 4294901760, %v24344_v51  ;;  %17528 = vmatprep.subr.bf16.mxu1 %v17527_v50 }
 0x6cf   :  { %v24374_v25 = vpack.c.bf16 %v27732_v17, %v27731_v57  ;;  %v27735_v50 = vand.u32 4294901760, %v24142_v11  ;;  %v24408_v17 = vld [vmem:[#allocation8 + $0x870] sm:$0xff]  ;;  %v24410_v57 = vld [vmem:[#allocation8 + $0x878] sm:$0xff]  ;;  %v27738_v11 = vand.u32 4294901760, %v24164_v28  ;;  %v27743_v28 = vand.u32 4294901760, %v24268_v48 }
 0x6d0   :  { %v10720_v7 = vsub.f32 %v24323_v13, %v25983_v31  ;;  %v17529_v18 = vpack.c.bf16 %v10602_v34, %v10595_v63  ;;  %v10615_v31 = vsub.f32 %v24344_v51, %v27734_v23  ;;  %v10728_v9 = vand.u32 4294901760, %v10727_v53  ;;  %v24390_v23 = vld [vmem:[#allocation8 + $0x8f8] sm:$0xff] }
 0x6d1   :  { %17490 = vmatpush3.bf16.msra.mxu0 %v24374_v25  ;;  %v10609_v34 = vand.u32 4294901760, %v10608_v39 }
 0x6d2   :  { %v10721_v14 = vand.u32 4294901760, %v10720_v7  ;;  %17530 = vmatpush3.bf16.msra.mxu1 %v17529_v18  ;;  %v10616_v63 = vand.u32 4294901760, %v10615_v31  ;;  %v27736_v7 = vand.u32 4294901760, %v24144_v54  ;;  %v24401_v18 = vsub.f32 %v24350_v52, %v25986_v15 }
 0x6d3   :  { %v27737_v31 = vand.u32 4294901760, %v24352_v0  ;;  %v27739_v54 = vand.u32 4294901760, %v24166_v2  ;;  %v27741_v15 = vand.u32 4294901760, %v24368_v30 }
 0x6d4   :  { %v24396_v53 = vpack.c.bf16 %v27736_v7, %v27735_v50  ;;  %v17531_v4 = vpack.c.bf16 %v10728_v9, %v10721_v14  ;;  %v17533_v9 = vpack.c.bf16 %v10616_v63, %v10609_v34  ;;  %v27740_v14 = vand.u32 4294901760, %v24366_v33 }
 0x6d5   :  { %v24406_v39 = vsub.f32 %v24352_v0, %v27737_v31  ;;  %v24416_v50 = vpack.c.bf16 %v27739_v54, %v27738_v11  ;;  %v24426_v31 = vsub.f32 %v24368_v30, %v27741_v15  ;;  %v10521_v11 = vand.u32 4294901760, %v24388_v16 }
 0x6d6   :  { %v24421_v7 = vsub.f32 %v24366_v33, %v27740_v14  ;;  %17492 = vmatprep.subr.bf16.mxu0 %v24396_v53  ;;  %17532 = vmatprep.subr.bf16.mxu1 %v17531_v4  ;;  %v10524_v34 = vand.u32 4294901760, %v24390_v23  ;;  %v27742_v4 = vand.u32 4294901760, %v24266_v8  ;;  %v27745_v40 = vand.u32 4294901760, %v24401_v18 }
 0x6d7   :  { %17494 = vmatpush3.bf16.msra.mxu0 %v24416_v50  ;;  %17534 = vmatpush3.bf16.msra.mxu1 %v17533_v9  ;;  %v27746_v9 = vand.u32 4294901760, %v24406_v39  ;;  %v24451_v54 = vsub.f32 %v24388_v16, %v10521_v11  ;;  %v27747_v15 = vand.u32 4294901760, %v24272_v35  ;;  %v27748_v14 = vand.u32 4294901760, %v24274_v20 }
 0x6d8   :  { %v24442_v2 = vpack.c.bf16 %v27743_v28, %v27742_v4  ;;  %v10734_v22 = vsub.f32 %v24401_v18, %v27745_v40  ;;  %v27750_v48 = vand.u32 4294901760, %v24421_v7  ;;  %v27751_v4 = vand.u32 4294901760, %v24426_v31 }
 0x6d9   :  { %v10741_v63 = vsub.f32 %v24406_v39, %v27746_v9  ;;  %v24457_v8 = vpack.c.bf16 %v27748_v14, %v27747_v15  ;;  %v24466_v47 = vsub.f32 %v24390_v23, %v10524_v34  ;;  %v27752_v20 = vand.u32 4294901760, %v24408_v17 }
 0x6da   :  { %27744 = vst [vmem:[#allocation172_spill] sm:$0xff] %v24442_v2  ;;  %v10622_v28 = vsub.f32 %v24421_v7, %v27750_v48  ;;  %v10629_v40 = vsub.f32 %v24426_v31, %v27751_v4  ;;  %17496 = vmatprep.subr.bf16.mxu0 %v24442_v2  ;;  %v10735_v16 = vand.u32 4294901760, %v10734_v22  ;;  %v27753_v23 = vand.u32 4294901760, %v24410_v57  ;;  %v10429_v22 = vld [vmem:[#allocation8 + $0x900] sm:$0xff]  ;;  %v10430_v4 = vld [vmem:[#allocation8 + $0x908] sm:$0xff] }
 0x6db   :  { %27749 = vst [vmem:[#allocation144_spill] sm:$0xff] %v24457_v8  ;;  %v10742_v9 = vand.u32 4294901760, %v10741_v63  ;;  %v24473_v15 = vsub.f32 %v24408_v17, %v27752_v20  ;;  %17498 = vmatpush3.bf16.msra.mxu0 %v24457_v8  ;;  %v27754_v35 = vand.u32 4294901760, %v24298_v37  ;;  %v27755_v2 = vand.u32 4294901760, %v24300_v24 }
 0x6dc   :  { %v10623_v14 = vand.u32 4294901760, %v10622_v28  ;;  %v10630_v48 = vand.u32 4294901760, %v10629_v40  ;;  %v24480_v1 = vsub.f32 %v24410_v57, %v27753_v23  ;;  %v27757_v20 = vand.u32 4294901760, %v24451_v54 }
 0x6dd   :  { %v17535_v63 = vpack.c.bf16 %v10742_v9, %v10735_v16  ;;  %v24486_v36 = vpack.c.bf16 %v27755_v2, %v27754_v35  ;;  %v26002_v40 = vand.u32 4294901760, %v24473_v15  ;;  %v27758_v19 = vand.u32 4294901760, %v24466_v47  ;;  %v10413_v2 = vld [vmem:[#allocation8 + $0x880] sm:$0xff]  ;;  %v10414_v35 = vld [vmem:[#allocation8 + $0x888] sm:$0xff] }
 0x6de   :  { %v10748_v28 = vsub.f32 %v24451_v54, %v27757_v20  ;;  %v17537_v8 = vpack.c.bf16 %v10630_v48, %v10623_v14  ;;  %v27759_v16 = vand.u32 4294901760, %v24306_v32  ;;  %v27760_v37 = vand.u32 4294901760, %v24308_v12 }
 0x6df   :  { %27756 = vst [vmem:[#allocation145_spill] sm:$0xff] %v24486_v36  ;;  %v10755_v23 = vsub.f32 %v24466_v47, %v27758_v19  ;;  %v26009_v24 = vand.u32 4294901760, %v24480_v1  ;;  %17536 = vmatprep.subr.bf16.mxu1 %v17535_v63  ;;  %17500 = vmatprep.subr.bf16.mxu0 %v24486_v36  ;;  %v10636_v14 = vsub.f32 %v24473_v15, %v26002_v40  ;;  %v27762_v19 = vand.u32 4294901760, %v24350_v52 }
 0x6e0   :  { %v24499_v9 = vpack.c.bf16 %v27760_v37, %v27759_v16  ;;  %v10749_v20 = vand.u32 4294901760, %v10748_v28  ;;  %v27763_v32 = vand.u32 4294901760, %v24352_v0  ;;  %v10527_v12 = vand.u32 4294901760, %v10429_v22  ;;  %17538 = vmatpush3.bf16.msra.mxu1 %v17537_v8 }
 0x6e1   :  { %v10756_v16 = vand.u32 4294901760, %v10755_v23  ;;  %v10643_v63 = vsub.f32 %v24480_v1, %v26009_v24  ;;  %v10530_v28 = vand.u32 4294901760, %v10430_v4  ;;  %v27764_v37 = vand.u32 4294901760, %v24366_v33 }
 0x6e2   :  { %27761 = vst [vmem:[#allocation17_spill] sm:$0xff] %v24499_v9  ;;  %v24510_v48 = vpack.c.bf16 %v27763_v32, %v27762_v19  ;;  %17502 = vmatpush3.bf16.msra.mxu0 %v24499_v9  ;;  %v27765_v40 = vand.u32 4294901760, %v24368_v30  ;;  %v10637_v52 = vand.u32 4294901760, %v10636_v14  ;;  %v24523_v0 = vsub.f32 %v10429_v22, %v10527_v12 }
 0x6e3   :  { %v10479_v8 = vand.u32 4294901760, %v10413_v2  ;;  %v10482_v23 = vand.u32 4294901760, %v10414_v35  ;;  %v17539_v19 = vpack.c.bf16 %v10756_v16, %v10749_v20  ;;  %v10644_v32 = vand.u32 4294901760, %v10643_v63 }
 0x6e4   :  { %v24520_v36 = vpack.c.bf16 %v27765_v40, %v27764_v37  ;;  %17504 = vmatprep.subr.bf16.mxu0 %v24510_v48  ;;  %v24525_v9 = vsub.f32 %v10430_v4, %v10530_v28  ;;  %v24527_v61 = vpack.c.bf16 %v10524_v34, %v10521_v11  ;;  %v26013_v24 = vand.u32 4294901760, %v24523_v0 }
 0x6e5   :  { %v24530_v33 = vsub.f32 %v10413_v2, %v10479_v8  ;;  %v24532_v30 = vsub.f32 %v10414_v35, %v10482_v23  ;;  %17540 = vmatprep.subr.bf16.mxu1 %v17539_v19  ;;  %v17541_v40 = vpack.c.bf16 %v10644_v32, %v10637_v52  ;;  %v27766_v2 = vand.u32 4294901760, %v24408_v17 }
 0x6e6   :  { %v26012_v14 = vand.u32 4294901760, %v24525_v9  ;;  %17506 = vmatpush3.bf16.msra.mxu0 %v24520_v36  ;;  %v10762_v22 = vsub.f32 %v24523_v0, %v26013_v24  ;;  %v27767_v35 = vand.u32 4294901760, %v24410_v57 }
 0x6e7   :  { %v26011_v4 = vand.u32 4294901760, %v24530_v33  ;;  %v26010_v11 = vand.u32 4294901760, %v24532_v30  ;;  %17508 = vmatprep.subr.bf16.mxu0 %v24527_v61  ;;  %17542 = vmatpush3.bf16.msra.mxu1 %v17541_v40  ;;  %v24558_v40 = vpack.c.bf16 %v10530_v28, %v10527_v12  ;;  %v17559_v12 = vpack.c.bf16 %v24286_v45, %v24281_v43 }
 0x6e8   :  { %v10769_v34 = vsub.f32 %v24525_v9, %v26012_v14  ;;  %v24549_v20 = vpack.c.bf16 %v27767_v35, %v27766_v2  ;;  %v10763_v16 = vand.u32 4294901760, %v10762_v22  ;;  %v24561_v22 = vpack.c.bf16 %v10482_v23, %v10479_v8 }
 0x6e9   :  { %v10650_v63 = vsub.f32 %v24530_v33, %v26011_v4  ;;  %v10657_v37 = vsub.f32 %v24532_v30, %v26010_v11  ;;  %v17561_v28 = vpack.c.bf16 %v24296_v41, %v24291_v42  ;;  %v17563_v8 = vpack.c.bf16 %v24328_v44, %v24323_v13 }
 0x6ea   :  { %v10770_v52 = vand.u32 4294901760, %v10769_v34  ;;  %17510 = vmatpush3.bf16.msra.mxu0 %v24549_v20  ;;  %v17547_v34 = vpack.c.bf16 %v24040_v38, %v24038_v46 }
 0x6eb   :  { %v10651_v19 = vand.u32 4294901760, %v10650_v63  ;;  %v10658_v32 = vand.u32 4294901760, %v10657_v37  ;;  %17512 = vmatprep.subr.bf16.mxu0 %v24558_v40 }
 0x6ec   :  { %v17543_v17 = vpack.c.bf16 %v10770_v52, %v10763_v16  ;;  %v24591_v52 = vld [vmem:[#allocation7] sm:$0x3] }
 0x6ed   :  { %v17545_v57 = vpack.c.bf16 %v10658_v32, %v10651_v19  ;;  %v9261_v19 = vpop.xlane.xlu1 %9260 }
 0x6ee   :  { %17544 = vmatprep.subr.bf16.mxu1 %v17543_v17  ;;  %17514 = vmatpush3.bf16.msra.mxu0 %v24561_v22  ;;  %v9262_v32 = vmul.f32 %v9261_v19, %v23957_v27  ;;  %v24595_v19 = vand.u32 4294901760, %v24591_v52 }
 0x6ef   :  { %17546 = vmatpush3.bf16.msra.mxu1 %v17545_v57  ;;  %17548 = vmatprep.subr.bf16.mxu0 %v17547_v34 }
 0x6f0   :  { %17580 = vmatprep.subr.bf16.mxu1 %v24055_v49  ;;  %v9263_v17 = vrot.slane %v9262_v32, 4 }
 0x6f2   :  { %v9264_v57 = vadd.f32 %v9263_v17, %v9262_v32  ;;  %v17551_v17 = vpack.c.bf16 %v24156_v60, %v24149_v26 }
 0x6f4   :  { %v9265_v34 = vrot.slane %v9264_v57, 2 }
 0x6f6   :  { %v9266_v11 = vadd.f32 %v9265_v34, %v9264_v57  ;;  %v27769_v57 = vld [vmem:[#allocation86_spill] sm:$0xff]  ;;  %v27770_v34 = vld [vmem:[#allocation128_spill] sm:$0xff] }
 0x6f8   :  { %v9267_v4 = vrot.slane %v9266_v11, 1 }
 0x6fa   :  { %v9268_v14 = vadd.f32 %v9267_v4, %v9266_v11  ;;  %v10392_v4 = vld [vmem:[#allocation10 + $0x4] sm:$0x1] }
 0x6fc   :  { %v9269_v24 = vmul.f32 0.125, %v9268_v14 }
 0x78f   :  { %v9925_v16 = vpop.f32.mrb[182].mxu1 }
 0x790   :  { %v9929_v35 = vmul.f32 %v9925_v16, %v9269_v24  ;;  %v15388_v2 = vpop.f32.mrb[183].mxu1  ;;  %v27768_v24 = vld [vmem:[#allocation92_spill] sm:$0xff] }
 0x791   :  { %v10396_v11 = vsub.s32 0, %v27768_v24  ;;  %v27773_v24 = vld [vmem:[#allocation172_spill] sm:$0xff] }
 0x792   :  { %v10007_v63 = vadd.f32 %v24254_v21, %v9929_v35  ;;  %v10539_v21 = vsub.f32 %v24591_v52, %v24595_v19 }
 0x794   :  { %v10088_v37 = vadd.f32 %v24256_v5, %v10007_v63 }
 0x796   :  { %v10164_v23 = vadd.f32 %v24258_v3, %v10088_v37  ;;  %v10540_v3 = vand.u32 4294901760, %v10539_v21  ;;  %v17549_v37 = vpack.c.bf16 %v24047_v59, %v24042_v29 }
 0x798   :  { %v10239_v27 = vadd.f32 %v24260_v56, %v10164_v23 }
 0x79a   :  { %v10316_v32 = vadd.f32 %v24262_v62, %v10239_v27  ;;  %v10541_v62 = vsub.f32 %v10539_v21, %v10540_v3  ;;  %v17553_v27 = vpack.c.bf16 %v27770_v34, %v27769_v57 }
 0x79c   :  { %v10389_v14 = vadd.f32 %v24264_v55, %v10316_v32  ;;  %v10542_v16 = vand.u32 4294901760, %v10541_v62  ;;  %v27771_v32 = vld [vmem:[#allocation129_spill] sm:$0xff]  ;;  %v27776_v62 = vld [vmem:[#allocation135_spill] sm:$0xff] }
 0x79e   :  { %v10393_v5 = vadd.f32 %v10392_v4, %v10389_v14  ;;  %v27772_v4 = vld [vmem:[#allocation85_spill] sm:$0xff] }
 0x79f   :  { %v17555_v14 = vpack.c.bf16 %v27772_v4, %v27771_v32 }
 0x7a0   :  { %v24602_v2 = vrot.slane %v10393_v5, %v10396_v11  ;;  %v27774_v11 = vld [vmem:[#allocation144_spill] sm:$0xff]  ;;  %v27775_v5 = vld [vmem:[#allocation134_spill] sm:$0xff] }
 0x7a2   :  { %v10532_v35 = vand.u32 4294901760, %v24602_v2 }
 0x7a4   :  { %10773 = vmatprep.mubr.f32.mxu1 %v10532_v35  ;;  %v10533_v56 = vsub.f32 %v24602_v2, %v10532_v35 }
 0x7a5   :  { %10775 = vmatmul.mubr.f32.vlgmr.msra.gmra.mrb[184].mxu1 %v24595_v19 }
 0x7a6   :  { %17582 = vmatpush3.bf16.msra.mxu1 %v24062_v6  ;;  %v10534_v55 = vand.u32 4294901760, %v10533_v56 }
 0x7a7   :  { %17584 = vmatprep.subr.bf16.mxu1 %v24358_v10 }
 0x7a8   :  { %11017 = vmatprep.mubr.f32.mxu1 %v10534_v55  ;;  %v10535_v23 = vsub.f32 %v10533_v56, %v10534_v55  ;;  %v17557_v55 = vpack.c.bf16 %v27776_v62, %v27775_v5 }
 0x7aa   :  { %17586 = vmatpush3.bf16.msra.mxu1 %v24374_v25  ;;  %v10536_v63 = vand.u32 4294901760, %v10535_v23  ;;  %v27777_v23 = vld [vmem:[#allocation145_spill] sm:$0xff] }
 0x7ab   :  { %17588 = vmatprep.subr.bf16.mxu1 %v24396_v53 }
 0x7ac   :  { %10537 = vmatprep.mubr.f32.mxu0 %v10536_v63  ;;  %v27783_v63 = vpack.c.bf16 %v24480_v1, %v24473_v15 }
 0x7ad   :  { %10543 = vmatmul.mubr.f32.vlgmr.msra.gmra.mrb[94].mxu0 %v10542_v16  ;;  %v27778_v16 = vld [vmem:[#allocation17_spill] sm:$0xff] }
 0x7ae   :  { %17550 = vmatpush3.bf16.msra.mxu0 %v17549_v37  ;;  %17590 = vmatpush3.bf16.msra.mxu1 %v24416_v50  ;;  %v27784_v37 = vpack.c.bf16 %v24525_v9, %v24523_v0 }
 0x7af   :  { %10910 = vmatprep.mubr.f32.mxu0 %v10533_v56  ;;  %17552 = vmatprep.subr.bf16.mxu0 %v17551_v17  ;;  %v27779_v56 = vpack.c.bf16 %v24344_v51, %v24339_v58  ;;  %v27785_v17 = vand.u32 4294901760, %v24038_v46  ;;  %v27791_v46 = vand.u32 4294901760, %v24156_v60  ;;  %v27796_v60 = vand.u32 4294901760, %v27775_v5 }
 0x7b0   :  { %17592 = vmatprep.subr.bf16.mxu1 %v27773_v24 }
 0x7b2   :  { %17554 = vmatpush3.bf16.msra.mxu0 %v17553_v27  ;;  %17594 = vmatpush3.bf16.msra.mxu1 %v27774_v11  ;;  %v27786_v27 = vand.u32 4294901760, %v24040_v38 }
 0x7b3   :  { %17556 = vmatprep.subr.bf16.mxu0 %v17555_v14  ;;  %17596 = vmatprep.subr.bf16.mxu1 %v27777_v23 }
 0x7b4   :  { %v17611_v14 = vpack.c.bf16 %v27786_v27, %v27785_v17 }
 0x7b6   :  { %17558 = vmatpush3.bf16.msra.mxu0 %v17557_v55  ;;  %17598 = vmatpush3.bf16.msra.mxu1 %v27778_v16  ;;  %v27789_v55 = vand.u32 4294901760, %v24047_v59  ;;  %v27794_v59 = vand.u32 4294901760, %v27771_v32 }
 0x7b7   :  { %17560 = vmatprep.subr.bf16.mxu0 %v17559_v12  ;;  %17600 = vmatprep.subr.bf16.mxu1 %v24510_v48  ;;  %v27780_v12 = vpack.c.bf16 %v24406_v39, %v24401_v18 }
 0x7ba   :  { %17562 = vmatpush3.bf16.msra.mxu0 %v17561_v28  ;;  %17602 = vmatpush3.bf16.msra.mxu1 %v24520_v36  ;;  %v27781_v28 = vpack.c.bf16 %v24426_v31, %v24421_v7 }
 0x7bb   :  { %17564 = vmatprep.subr.bf16.mxu0 %v17563_v8  ;;  %17604 = vmatprep.subr.bf16.mxu1 %v24527_v61  ;;  %v27782_v8 = vpack.c.bf16 %v24466_v47, %v24451_v54 }
 0x7be   :  { %17566 = vmatpush3.bf16.msra.mxu0 %v27779_v56  ;;  %17606 = vmatpush3.bf16.msra.mxu1 %v24549_v20 }
 0x7bf   :  { %17568 = vmatprep.subr.bf16.mxu0 %v27780_v12  ;;  %17608 = vmatprep.subr.bf16.mxu1 %v24558_v40  ;;  %v27790_v12 = vand.u32 4294901760, %v24149_v26  ;;  %v27795_v26 = vand.u32 4294901760, %v27772_v4  ;;  %v27802_v4 = vand.u32 4294901760, %v24323_v13  ;;  %v27809_v13 = vand.u32 4294901760, %v24426_v31 }
 0x7c1   :  { %v17615_v38 = vpack.c.bf16 %v27791_v46, %v27790_v12 }
 0x7c2   :  { %17570 = vmatpush3.bf16.msra.mxu0 %v27781_v28  ;;  %17610 = vmatpush3.bf16.msra.mxu1 %v24561_v22  ;;  %v17619_v28 = vpack.c.bf16 %v27795_v26, %v27794_v59 }
 0x7c3   :  { %17572 = vmatprep.subr.bf16.mxu0 %v27782_v8  ;;  %17644 = vmatprep.subr.bf16.mxu1 %v24055_v49  ;;  %v27787_v49 = vpack.c.bf16 %v24532_v30, %v24530_v33 }
 0x7c5   :  { %11021 = vmatmul.mubr.f32.vlgmr.msra.gmra.mrb[186].mxu1 %v10540_v3  ;;  %v27788_v3 = vand.u32 4294901760, %v24042_v29  ;;  %v27793_v29 = vand.u32 4294901760, %v27770_v34  ;;  %v27801_v34 = vand.u32 4294901760, %v24296_v41  ;;  %v27807_v41 = vand.u32 4294901760, %v24406_v39 }
 0x7c6   :  { %17574 = vmatpush3.bf16.msra.mxu0 %v27783_v63  ;;  %11291 = vmatprep.mubr.f32.mxu1 %v10532_v35  ;;  %v27814_v39 = vand.u32 4294901760, %v24523_v0  ;;  %v11316_v0 = vld [vmem:[#allocation8 + $0x910] sm:$0xff] }
 0x7c7   :  { %17576 = vmatprep.subr.bf16.mxu0 %v27784_v37  ;;  %17646 = vmatpush3.bf16.msra.mxu1 %v24062_v6  ;;  %v17613_v56 = vpack.c.bf16 %v27789_v55, %v27788_v3  ;;  %v27792_v6 = vand.u32 4294901760, %v27769_v57  ;;  %v11320_v63 = vld [vmem:[#allocation8 + $0x930] sm:$0xff]  ;;  %v11321_v37 = vld [vmem:[#allocation8 + $0x938] sm:$0xff] }
 0x7c8   :  { %17648 = vmatprep.subr.bf16.mxu1 %v24358_v10  ;;  %v11350_v27 = vand.u32 4294901760, %v11320_v63  ;;  %v11324_v3 = vld [vmem:[#allocation8 + $0x950] sm:$0xff] }
 0x7c9   :  { %v17617_v10 = vpack.c.bf16 %v27793_v29, %v27792_v6 }
 0x7ca   :  { %17578 = vmatpush3.bf16.msra.mxu0 %v27787_v49  ;;  %v11322_v49 = vld [vmem:[#allocation8 + $0x940] sm:$0xff] }
 0x7cb   :  { %17612 = vmatprep.subr.bf16.mxu0 %v17611_v14  ;;  %17650 = vmatpush3.bf16.msra.mxu1 %v24374_v25  ;;  %v27797_v25 = vand.u32 4294901760, %v27776_v62  ;;  %v11353_v14 = vand.u32 4294901760, %v11321_v37  ;;  %v11356_v26 = vand.u32 4294901760, %v11322_v49 }
 0x7cc   :  { %17652 = vmatprep.subr.bf16.mxu1 %v24396_v53 }
 0x7cd   :  { %10913 = vmatmul.mubr.f32.vlgmr.msra.gmra.mrb[96].mxu0 %v10539_v21  ;;  %v17621_v53 = vpack.c.bf16 %v27797_v25, %v27796_v60  ;;  %v27798_v21 = vand.u32 4294901760, %v24281_v43  ;;  %v27804_v43 = vand.u32 4294901760, %v24339_v58  ;;  %v27810_v58 = vand.u32 4294901760, %v24451_v54 }
 0x7ce   :  { %17614 = vmatpush3.bf16.msra.mxu0 %v17613_v56  ;;  %11187 = vmatprep.mubr.f32.mxu0 %v10532_v35  ;;  %v27799_v35 = vand.u32 4294901760, %v24286_v45  ;;  %v27805_v45 = vand.u32 4294901760, %v24344_v51  ;;  %v27811_v51 = vand.u32 4294901760, %v24466_v47  ;;  %v27816_v47 = vand.u32 4294901760, %v24530_v33  ;;  %v11318_v33 = vld [vmem:[#allocation8 + $0x920] sm:$0xff] }
 0x7cf   :  { %17616 = vmatprep.subr.bf16.mxu0 %v17615_v38  ;;  %17654 = vmatpush3.bf16.msra.mxu1 %v24416_v50  ;;  %v27800_v50 = vand.u32 4294901760, %v24291_v42  ;;  %v27806_v42 = vand.u32 4294901760, %v24401_v18  ;;  %v27817_v54 = vand.u32 4294901760, %v24532_v30  ;;  %v11344_v8 = vand.u32 4294901760, %v11318_v33  ;;  %v11325_v38 = vld [vmem:[#allocation8 + $0x958] sm:$0xff] }
 0x7d0   :  { %17656 = vmatprep.subr.bf16.mxu1 %v27773_v24  ;;  %v17623_v57 = vpack.c.bf16 %v27799_v35, %v27798_v21  ;;  %v27803_v24 = vand.u32 4294901760, %v24328_v44  ;;  %v27808_v44 = vand.u32 4294901760, %v24421_v7  ;;  %v27815_v7 = vand.u32 4294901760, %v24525_v9 }
 0x7d1   :  { %v17625_v32 = vpack.c.bf16 %v27801_v34, %v27800_v50  ;;  %v17631_v62 = vpack.c.bf16 %v27807_v41, %v27806_v42  ;;  %v18085_v9 = vmov 1   ;;  %v24754_v46 = vsub.f32 %v11318_v33, %v11344_v8 }
 0x7d2   :  { %17618 = vmatpush3.bf16.msra.mxu0 %v17617_v10  ;;  %v17627_v5 = vpack.c.bf16 %v27803_v24, %v27802_v4  ;;  %v17639_v31 = vpack.c.bf16 %v27815_v7, %v27814_v39  ;;  %17923 = vset.pattern.permute.xlu1 %v18085_v9  ;;  %v24760_v10 = vsub.f32 %v11320_v63, %v11350_v27  ;;  %v11362_v60 = vand.u32 4294901760, %v11324_v3 }
 0x7d3   :  { %17620 = vmatprep.subr.bf16.mxu0 %v17619_v28  ;;  %17658 = vmatpush3.bf16.msra.mxu1 %v27774_v11  ;;  %v17629_v11 = vpack.c.bf16 %v27805_v45, %v27804_v43  ;;  %v24763_v59 = vsub.f32 %v11321_v37, %v11353_v14  ;;  %v11365_v25 = vand.u32 4294901760, %v11325_v38  ;;  %v24775_v50 = vpack.c.bf16 %v11353_v14, %v11350_v27  ;;  %v12164_v45 = vld [vmem:[#allocation10 + $0x5] ss:$0 sm:$0xff]  ;;  %v11329_v14 = vld [vmem:[#allocation8 + $0x978] sm:$0xff] }
 0x7d4   :  { %17660 = vmatprep.subr.bf16.mxu1 %v27777_v23  ;;  %v17635_v23 = vpack.c.bf16 %v27811_v51, %v27810_v58  ;;  %v24770_v35 = vsub.f32 %v11324_v3, %v11362_v60  ;;  %v11328_v27 = vld [vmem:[#allocation8 + $0x970] sm:$0xff] }
 0x7d6   :  { %17622 = vmatpush3.bf16.msra.mxu0 %v17621_v53  ;;  %v24766_v53 = vsub.f32 %v11322_v49, %v11356_v26  ;;  %v11374_v49 = vand.u32 4294901760, %v11328_v27 }
 0x7d7   :  { %17624 = vmatprep.subr.bf16.mxu0 %v17623_v57  ;;  %17662 = vmatpush3.bf16.msra.mxu1 %v27778_v16  ;;  %v11319_v16 = vld [vmem:[#allocation8 + $0x928] sm:$0xff]  ;;  %v24772_v57 = vsub.f32 %v11325_v38, %v11365_v25  ;;  %v11330_v38 = vld [vmem:[#allocation8 + $0x980] sm:$0xff] }
 0x7d8   :  { %17664 = vmatprep.subr.bf16.mxu1 %v24510_v48  ;;  %v17633_v48 = vpack.c.bf16 %v27809_v13, %v27808_v44  ;;  %v11347_v17 = vand.u32 4294901760, %v11319_v16 }
 0x7da   :  { %17626 = vmatpush3.bf16.msra.mxu0 %v17625_v32  ;;  %v24756_v6 = vpack.c.bf16 %v11347_v17, %v11344_v8  ;;  %v24758_v29 = vsub.f32 %v11319_v16, %v11347_v17  ;;  %v24783_v32 = vpack.c.bf16 %v11365_v25, %v11362_v60  ;;  %v11327_v16 = vld [vmem:[#allocation8 + $0x968] sm:$0xff] }
 0x7db   :  { %17628 = vmatprep.subr.bf16.mxu0 %v17627_v5  ;;  %17666 = vmatpush3.bf16.msra.mxu1 %v24520_v36  ;;  %v27812_v36 = vand.u32 4294901760, %v24473_v15  ;;  %v27819_v15 = vmov 0.0   ;;  %v11371_v63 = vand.u32 4294901760, %v11327_v16 }
 0x7dc   :  { %17668 = vmatprep.subr.bf16.mxu1 %v24527_v61  ;;  %v27813_v61 = vand.u32 4294901760, %v24480_v1  ;;  %v27818_v1 = vmov 0.0|0.0  }
 0x7de   :  { %17630 = vmatpush3.bf16.msra.mxu0 %v17629_v11  ;;  %v17637_v18 = vpack.c.bf16 %v27813_v61, %v27812_v36 }
 0x7df   :  { %17632 = vmatprep.subr.bf16.mxu0 %v17631_v62  ;;  %17670 = vmatpush3.bf16.msra.mxu1 %v24549_v20  ;;  %v17641_v20 = vpack.c.bf16 %v27817_v54, %v27816_v47 }
 0x7e0   :  { %17672 = vmatprep.subr.bf16.mxu1 %v24558_v40  ;;  %v11317_v40 = vld [vmem:[#allocation8 + $0x918] sm:$0xff] }
 0x7e1   :  { %v11341_v30 = vand.u32 4294901760, %v11317_v40 }
 0x7e2   :  { %17634 = vmatpush3.bf16.msra.mxu0 %v17633_v48 }
 0x7e3   :  { %17636 = vmatprep.subr.bf16.mxu0 %v17635_v23  ;;  %17674 = vmatpush3.bf16.msra.mxu1 %v24561_v22  ;;  %v11338_v22 = vand.u32 4294901760, %v11316_v0  ;;  %v24752_v12 = vsub.f32 %v11317_v40, %v11341_v30 }
 0x7e5   :  { %v24748_v55 = vpack.c.bf16 %v11341_v30, %v11338_v22  ;;  %v24750_v56 = vsub.f32 %v11316_v0, %v11338_v22  ;;  %v11326_v30 = vld [vmem:[#allocation8 + $0x960] sm:$0xff] }
 0x7e6   :  { %17638 = vmatpush3.bf16.msra.mxu0 %v17637_v18  ;;  %11293 = vmatmul.mubr.f32.vlgmr.msra.gmra.mrb[188].mxu1 %v24595_v19  ;;  %v11368_v8 = vand.u32 4294901760, %v11326_v30 }
 0x7e7   :  { %17640 = vmatprep.subr.bf16.mxu0 %v17639_v31  ;;  %v11431_v25 = vand.u32 4294901760, %v24750_v56 }
 0x7e8   :  { %v24788_v17 = vpack.c.bf16 %v11371_v63, %v11368_v8 }
 0x7ea   :  { %17642 = vmatpush3.bf16.msra.mxu0 %v17641_v20 }
 0x7eb   :  { %17675 = vmatprep.subr.bf16.mxu0 %v27818_v1 }
 0x7ed   :  { %11189 = vmatmul.mubr.f32.vlgmr.msra.gmra.mrb[98].mxu0 %v24595_v19  ;;  %v11323_v19 = vld [vmem:[#allocation8 + $0x948] sm:$0xff] }
 0x7ee   :  { %15463 = vmatprep.mubr.msk.f32.mxu0 %vm18084_vm14, %v27819_v15  ;;  %17677 = vmatpush3.bf16.msra.mxu0 %v24748_v55  ;;  %v11359_v28 = vand.u32 4294901760, %v11323_v19 }
 0x7ef   :  { %17678 = vmatprep.subr.bf16.mxu0 %v27818_v1 }
 0x7f0   :  { %v24768_v21 = vsub.f32 %v11323_v19, %v11359_v28  ;;  %v24779_v34 = vpack.c.bf16 %v11359_v28, %v11356_v26  ;;  %v11377_v19 = vand.u32 4294901760, %v11329_v14  ;;  %v11331_v26 = vld [vmem:[#allocation8 + $0x988] sm:$0xff]  ;;  %v11380_v28 = vand.u32 4294901760, %v11330_v38 }
 0x7f1   :  { %v11383_v60 = vand.u32 4294901760, %v11331_v26 }
 0x7f2   :  { %17680 = vmatpush3.bf16.msra.mxu0 %v24756_v6  ;;  %v24792_v3 = vpack.c.bf16 %v11377_v19, %v11374_v49 }
 0x7f3   :  { %17681 = vmatprep.subr.bf16.mxu0 %v27818_v1 }
 0x7f6   :  { %17683 = vmatpush3.bf16.msra.mxu0 %v24775_v50 }
 0x7f7   :  { %17684 = vmatprep.subr.bf16.mxu0 %v27818_v1 }
 0x7fa   :  { %17686 = vmatpush3.bf16.msra.mxu0 %v24779_v34 }
 0x7fb   :  { %17687 = vmatprep.subr.bf16.mxu0 %v27818_v1 }
 0x7fe   :  { %17689 = vmatpush3.bf16.msra.mxu0 %v24783_v32 }
 0x7ff   :  { %17690 = vmatprep.subr.bf16.mxu0 %v27818_v1 }
 0x802   :  { %17692 = vmatpush3.bf16.msra.mxu0 %v24788_v17 }
 0x803   :  { %17693 = vmatprep.subr.bf16.mxu0 %v27818_v1 }
 0x806   :  { %17695 = vmatpush3.bf16.msra.mxu0 %v24792_v3 }
 0x807   :  { %17696 = vmatprep.subr.bf16.mxu0 %v27818_v1 }
 0x878   :  { %v14238_v4 = vpop.f32.mrb[184].mxu1 }
 0x879   :  { %v14239_v24 = vpop.f32.mrb[185].mxu1 }
 0x87a   :  { %v14240_v5 = vadd.f32 %v14239_v24, %v14238_v4  ;;  %v11438_v4 = vand.u32 4294901760, %v24752_v12  ;;  %v24799_v24 = vsub.f32 %v11326_v30, %v11368_v8 }
 0x880   :  { %v14203_v43 = vpop.f32.mrb[94].mxu0 }
 0x881   :  { %v14204_v11 = vpop.f32.mrb[95].mxu0 }
 0x882   :  { %v14205_v42 = vadd.f32 %v14204_v11, %v14203_v43  ;;  %v24803_v43 = vsub.f32 %v11328_v27, %v11374_v49  ;;  %v24809_v11 = vsub.f32 %v11330_v38, %v11380_v28  ;;  %v11494_v27 = vand.u32 4294901760, %v24772_v57 }
 0x884   :  { %v10545_v41 = vadd.f32 %v14205_v42, %v12164_v45  ;;  %v24805_v45 = vsub.f32 %v11329_v14, %v11377_v19  ;;  %v24811_v42 = vsub.f32 %v11331_v26, %v11383_v60  ;;  %v11495_v19 = vsub.f32 %v24772_v57, %v11494_v27 }
 0x886   :  { %v10777_v62 = vadd.f32 %v14240_v5, %v10545_v41  ;;  %v24801_v5 = vsub.f32 %v11327_v16, %v11371_v63  ;;  %v11432_v41 = vsub.f32 %v24750_v56, %v11431_v25  ;;  %v11496_v26 = vand.u32 4294901760, %v11495_v19 }
 0x898   :  { %v14308_v44 = vpop.f32.mrb[186].mxu1 }
 0x899   :  { %v14309_v13 = vpop.f32.mrb[187].mxu1 }
 0x89a   :  { %v14310_v48 = vadd.f32 %v14309_v13, %v14308_v44  ;;  %v11433_v44 = vand.u32 4294901760, %v11432_v41  ;;  %v11445_v13 = vand.u32 4294901760, %v24754_v46 }
 0x8a0   :  { %v14273_v58 = vpop.f32.mrb[96].mxu0 }
 0x8a1   :  { %v14274_v51 = vpop.f32.mrb[97].mxu0 }
 0x8a2   :  { %v14275_v23 = vadd.f32 %v14274_v51, %v14273_v58  ;;  %v11446_v51 = vsub.f32 %v24754_v46, %v11445_v13 }
 0x8a4   :  { %v10915_v36 = vadd.f32 %v14275_v23, %v10777_v62  ;;  %v11439_v62 = vsub.f32 %v24752_v12, %v11438_v4 }
 0x8a6   :  { %v11023_v61 = vadd.f32 %v14310_v48, %v10915_v36  ;;  %v11452_v48 = vand.u32 4294901760, %v24758_v29  ;;  %v11440_v58 = vand.u32 4294901760, %v11439_v62 }
 0x8a8   :  { %v11453_v23 = vsub.f32 %v24758_v29, %v11452_v48  ;;  %v24829_v36 = vpack.c.bf16 %v11440_v58, %v11433_v44 }
 0x8b9   :  { %v14378_v18 = vpop.f32.mrb[188].mxu1 }
 0x8ba   :  { %v14379_v39 = vpop.f32.mrb[189].mxu1 }
 0x8bb   :  { %v14380_v7 = vadd.f32 %v14379_v39, %v14378_v18  ;;  %v11454_v18 = vand.u32 4294901760, %v11453_v23  ;;  %v11459_v39 = vand.u32 4294901760, %v24760_v10  ;;  %v26017_v23 = vand.u32 4294901760, %v24803_v43 }
 0x8c0   :  { %v14343_v31 = vpop.f32.mrb[98].mxu0 }
 0x8c1   :  { %v14344_v47 = vpop.f32.mrb[99].mxu0 }
 0x8c2   :  { %v14345_v54 = vadd.f32 %v14344_v47, %v14343_v31  ;;  %v11460_v47 = vsub.f32 %v24760_v10, %v11459_v39 }
 0x8c4   :  { %v11191_v20 = vadd.f32 %v14345_v54, %v11023_v61  ;;  %v11447_v61 = vand.u32 4294901760, %v11446_v51 }
 0x8c6   :  { %v11295_v0 = vadd.f32 %v14380_v7, %v11191_v20  ;;  %v11466_v7 = vand.u32 4294901760, %v24763_v59  ;;  %v17703_v31 = vpack.c.bf16 %v11454_v18, %v11447_v61  ;;  %v11461_v20 = vand.u32 4294901760, %v11460_v47 }
 0x8c7   :  { %v26016_v61 = vand.u32 4294901760, %v24805_v45  ;;  %v11516_v47 = vsub.f32 %v24803_v43, %v26017_v23 }
 0x8c8   :  { %v12165_v40 = vmul.f32 -1.442695, %v11295_v0  ;;  %v11467_v54 = vsub.f32 %v24763_v59, %v11466_v7 }
 0x8ca   :  { %17929 = vpow2.f32 %v12165_v40  ;;  %v11468_v0 = vand.u32 4294901760, %v11467_v54  ;;  %v11473_v40 = vand.u32 4294901760, %v24766_v53  ;;  %v11523_v54 = vsub.f32 %v24805_v45, %v26016_v61 }
 0x8cc   :  { %v11474_v30 = vsub.f32 %v24766_v53, %v11473_v40 }
 0x8ce   :  { %v11475_v8 = vand.u32 4294901760, %v11474_v30  ;;  %v26015_v30 = vand.u32 4294901760, %v24809_v11 }
 0x8d4   :  { %v17930_v33 = vpop.eup %17929 }
 0x8d5   :  { %v11301_v22 = vadd.f32 1.0, %v17930_v33  ;;  %v11480_v33 = vand.u32 4294901760, %v24768_v21 }
 0x8d7   :  { %17931 = vrcp.f32 %v11301_v22  ;;  %v17706_v22 = vpack.c.bf16 %v11468_v0, %v11461_v20  ;;  %v11481_v16 = vsub.f32 %v24768_v21, %v11480_v33  ;;  %v11517_v20 = vand.u32 4294901760, %v11516_v47 }
 0x8d8   :  { %v11524_v0 = vand.u32 4294901760, %v11523_v54  ;;  %v17736_v47 = vpack.c.bf16 %v24772_v57, %v24770_v35  ;;  %v17739_v54 = vpack.c.bf16 %v24801_v5, %v24799_v24  ;;  %v27825_v57 = vand.u32 4294901760, %v24811_v42 }
 0x8d9   :  { %v11482_v63 = vand.u32 4294901760, %v11481_v16  ;;  %v26014_v16 = vand.u32 4294901760, %v24811_v42 }
 0x8db   :  { %v17709_v14 = vpack.c.bf16 %v11482_v63, %v11475_v8  ;;  %v17718_v8 = vpack.c.bf16 %v11524_v0, %v11517_v20  ;;  %v11530_v63 = vsub.f32 %v24809_v11, %v26015_v30  ;;  %v17742_v20 = vpack.c.bf16 %v24805_v45, %v24803_v43 }
 0x8dc   :  { %v17745_v0 = vpack.c.bf16 %v24811_v42, %v24809_v11 }
 0x8dd   :  { %v11531_v19 = vand.u32 4294901760, %v11530_v63 }
 0x8e1   :  { %v17932_v37 = vpop.eup %17931 }
 0x8e2   :  { %11311 = vperm.xlu1 %17923, %v17932_v37   ;;  %11306 = vperm.xlu0 %17921, %v17932_v37   ;;  %v11487_v37 = vand.u32 4294901760, %v24770_v35 }
 0x8e4   :  { %v11488_v49 = vsub.f32 %v24770_v35, %v11487_v37  ;;  %v27824_v35 = vand.u32 4294901760, %v24809_v11 }
 0x8e6   :  { %17924 = vset.pattern.permute.xlu0 %v18085_v9  ;;  %v24807_v9 = vpack.c.bf16 %v11383_v60, %v11380_v28  ;;  %v11489_v38 = vand.u32 4294901760, %v11488_v49  ;;  %v26019_v28 = vand.u32 4294901760, %v24799_v24  ;;  %v26018_v60 = vand.u32 4294901760, %v24801_v5 }
 0x8e7   :  { %v11537_v49 = vsub.f32 %v24811_v42, %v26014_v16 }
 0x8e8   :  { %17698 = vmatpush3.bf16.msra.mxu0 %v24807_v9  ;;  %v17712_v41 = vpack.c.bf16 %v11496_v26, %v11489_v38  ;;  %v11502_v62 = vsub.f32 %v24799_v24, %v26019_v28  ;;  %v11509_v44 = vsub.f32 %v24801_v5, %v26018_v60 }
 0x8e9   :  { %17699 = vmatprep.subr.bf16.mxu0 %v27818_v1  ;;  %v11538_v38 = vand.u32 4294901760, %v11537_v49 }
 0x8ea   :  { %v11503_v58 = vand.u32 4294901760, %v11502_v62  ;;  %v11510_v51 = vand.u32 4294901760, %v11509_v44  ;;  %v17724_v62 = vpack.c.bf16 %v24752_v12, %v24750_v56  ;;  %v17727_v44 = vpack.c.bf16 %v24758_v29, %v24754_v46 }
 0x8eb   :  { %v17721_v26 = vpack.c.bf16 %v11538_v38, %v11531_v19  ;;  %v17778_v56 = vpack.c.bf16 %v11466_v7, %v11459_v39  ;;  %v17781_v12 = vpack.c.bf16 %v11480_v33, %v11473_v40  ;;  %v17784_v46 = vpack.c.bf16 %v11494_v27, %v11487_v37 }
 0x8ec   :  { %v17715_v18 = vpack.c.bf16 %v11510_v51, %v11503_v58  ;;  %v17730_v58 = vpack.c.bf16 %v24763_v59, %v24760_v10  ;;  %v17733_v51 = vpack.c.bf16 %v24768_v21, %v24766_v53  ;;  %v27820_v29 = vand.u32 4294901760, %v24799_v24 }
 0x8ed   :  { %v27821_v10 = vand.u32 4294901760, %v24801_v5  ;;  %v27822_v53 = vand.u32 4294901760, %v24803_v43  ;;  %v27823_v21 = vand.u32 4294901760, %v24805_v45 }
 0x8ef   :  { %v17787_v59 = vpack.c.bf16 %v27821_v10, %v27820_v29 }
 0x961   :  { %v11312_v63 = vpop.permute.xlu1 %11311  ;;  %v11307_v49 = vpop.permute.xlu0 %11306 }
 0x962   :  { %v11314_v19 = vmul.f32 %v11312_v63, %v24602_v2  ;;  %v11309_v38 = vmul.f32 %v11307_v49, %v24591_v52  ;;  %v17772_v52 = vpack.c.bf16 %v11438_v4, %v11431_v25  ;;  %v17775_v2 = vpack.c.bf16 %v11452_v48, %v11445_v13 }
 0x963   :  { %v17790_v25 = vpack.c.bf16 %v27823_v21, %v27822_v53  ;;  %v17793_v4 = vpack.c.bf16 %v27825_v57, %v27824_v35 }
 0x964   :  { %v11315_v16 = vadd.f32 %v11314_v19, %v11309_v38 }
 0x966   :  { %v24897_v30 = vand.u32 4294901760, %v11315_v16 }
 0x968   :  { %v11419_v61 = vsub.f32 %v11315_v16, %v24897_v30 }
 0x96a   :  { %v11420_v23 = vand.u32 4294901760, %v11419_v61 }
 0x96c   :  { %v11421_v60 = vsub.f32 %v11419_v61, %v11420_v23 }
 0x96e   :  { %v11422_v28 = vand.u32 4294901760, %v11421_v60 }
 0x970   :  { %15464 = vmatmul.mubr.f32.vlgmr.msra.gmra.mrb[100].mxu0 %v11422_v28 }
 0x971   :  { %17701 = vmatpush3.bf16.msra.mxu0 %v24829_v36  ;;  %15498 = vmatprep.mubr.msk.f32.mxu0 %vm18084_vm14, %v27819_v15 }
 0x972   :  { %17702 = vmatprep.subr.bf16.mxu0 %v27818_v1 }
 0x975   :  { %17704 = vmatpush3.bf16.msra.mxu0 %v17703_v31 }
 0x976   :  { %17705 = vmatprep.subr.bf16.mxu0 %v27818_v1 }
 0x979   :  { %17707 = vmatpush3.bf16.msra.mxu0 %v17706_v22 }
 0x97a   :  { %17708 = vmatprep.subr.bf16.mxu0 %v27818_v1 }
 0x97d   :  { %17710 = vmatpush3.bf16.msra.mxu0 %v17709_v14 }
 0x97e   :  { %17711 = vmatprep.subr.bf16.mxu0 %v27818_v1 }
 0x981   :  { %17713 = vmatpush3.bf16.msra.mxu0 %v17712_v41 }
 0x982   :  { %17714 = vmatprep.subr.bf16.mxu0 %v27818_v1 }
 0x985   :  { %17716 = vmatpush3.bf16.msra.mxu0 %v17715_v18 }
 0x986   :  { %17717 = vmatprep.subr.bf16.mxu0 %v27818_v1 }
 0x989   :  { %17719 = vmatpush3.bf16.msra.mxu0 %v17718_v8 }
 0x98a   :  { %17720 = vmatprep.subr.bf16.mxu0 %v27818_v1 }
 0x98d   :  { %17722 = vmatpush3.bf16.msra.mxu0 %v17721_v26 }
 0x98e   :  { %17723 = vmatprep.subr.bf16.mxu0 %v27818_v1 }
 0x990   :  { %15499 = vmatmul.mubr.f32.vlgmr.msra.gmra.mrb[100].mxu0 %v24897_v30 }
 0x991   :  { %17725 = vmatpush3.bf16.msra.mxu0 %v17724_v62  ;;  %15533 = vmatprep.mubr.msk.f32.mxu0 %vm18084_vm14, %v27819_v15 }
 0x992   :  { %17726 = vmatprep.subr.bf16.mxu0 %v27818_v1 }
 0x995   :  { %17728 = vmatpush3.bf16.msra.mxu0 %v17727_v44 }
 0x996   :  { %17729 = vmatprep.subr.bf16.mxu0 %v27818_v1 }
 0x999   :  { %17731 = vmatpush3.bf16.msra.mxu0 %v17730_v58 }
 0x99a   :  { %17732 = vmatprep.subr.bf16.mxu0 %v27818_v1 }
 0x99d   :  { %17734 = vmatpush3.bf16.msra.mxu0 %v17733_v51 }
 0x99e   :  { %17735 = vmatprep.subr.bf16.mxu0 %v27818_v1 }
 0x9a1   :  { %17737 = vmatpush3.bf16.msra.mxu0 %v17736_v47 }
 0x9a2   :  { %17738 = vmatprep.subr.bf16.mxu0 %v27818_v1 }
 0x9a5   :  { %17740 = vmatpush3.bf16.msra.mxu0 %v17739_v54 }
 0x9a6   :  { %17741 = vmatprep.subr.bf16.mxu0 %v27818_v1 }
 0x9a9   :  { %17743 = vmatpush3.bf16.msra.mxu0 %v17742_v20 }
 0x9aa   :  { %17744 = vmatprep.subr.bf16.mxu0 %v27818_v1 }
 0x9ad   :  { %17746 = vmatpush3.bf16.msra.mxu0 %v17745_v0 }
 0x9ae   :  { %17747 = vmatprep.subr.bf16.mxu0 %v27818_v1 }
 0x9b0   :  { %15534 = vmatmul.mubr.f32.vlgmr.msra.gmra.mrb[100].mxu0 %v11419_v61 }
 0x9b1   :  { %17749 = vmatpush3.bf16.msra.mxu0 %v24748_v55  ;;  %15568 = vmatprep.mubr.msk.f32.mxu0 %vm18084_vm14, %v27819_v15 }
 0x9b2   :  { %17750 = vmatprep.subr.bf16.mxu0 %v27818_v1 }
 0x9b5   :  { %17752 = vmatpush3.bf16.msra.mxu0 %v24756_v6 }
 0x9b6   :  { %17753 = vmatprep.subr.bf16.mxu0 %v27818_v1 }
 0x9b9   :  { %17755 = vmatpush3.bf16.msra.mxu0 %v24775_v50 }
 0x9ba   :  { %17756 = vmatprep.subr.bf16.mxu0 %v27818_v1 }
 0x9bd   :  { %17758 = vmatpush3.bf16.msra.mxu0 %v24779_v34 }
 0x9be   :  { %17759 = vmatprep.subr.bf16.mxu0 %v27818_v1 }
 0x9c1   :  { %17761 = vmatpush3.bf16.msra.mxu0 %v24783_v32 }
 0x9c2   :  { %17762 = vmatprep.subr.bf16.mxu0 %v27818_v1 }
 0x9c5   :  { %17764 = vmatpush3.bf16.msra.mxu0 %v24788_v17 }
 0x9c6   :  { %17765 = vmatprep.subr.bf16.mxu0 %v27818_v1 }
 0x9c9   :  { %17767 = vmatpush3.bf16.msra.mxu0 %v24792_v3 }
 0x9ca   :  { %17768 = vmatprep.subr.bf16.mxu0 %v27818_v1 }
 0x9cd   :  { %17770 = vmatpush3.bf16.msra.mxu0 %v24807_v9 }
 0x9ce   :  { %17771 = vmatprep.subr.bf16.mxu0 %v27818_v1 }
 0x9d0   :  { %15569 = vmatmul.mubr.f32.vlgmr.msra.gmra.mrb[100].mxu0 %v11420_v23 }
 0x9d1   :  { %17773 = vmatpush3.bf16.msra.mxu0 %v17772_v52  ;;  %15603 = vmatprep.mubr.msk.f32.mxu0 %vm18084_vm14, %v27819_v15 }
 0x9d2   :  { %17774 = vmatprep.subr.bf16.mxu0 %v27818_v1 }
 0x9d5   :  { %17776 = vmatpush3.bf16.msra.mxu0 %v17775_v2 }
 0x9d6   :  { %17777 = vmatprep.subr.bf16.mxu0 %v27818_v1 }
 0x9d9   :  { %17779 = vmatpush3.bf16.msra.mxu0 %v17778_v56 }
 0x9da   :  { %17780 = vmatprep.subr.bf16.mxu0 %v27818_v1 }
 0x9dd   :  { %17782 = vmatpush3.bf16.msra.mxu0 %v17781_v12 }
 0x9de   :  { %17783 = vmatprep.subr.bf16.mxu0 %v27818_v1 }
 0x9e1   :  { %17785 = vmatpush3.bf16.msra.mxu0 %v17784_v46 }
 0x9e2   :  { %17786 = vmatprep.subr.bf16.mxu0 %v27818_v1 }
 0x9e5   :  { %17788 = vmatpush3.bf16.msra.mxu0 %v17787_v59 }
 0x9e6   :  { %17789 = vmatprep.subr.bf16.mxu0 %v27818_v1 }
 0x9e9   :  { %17791 = vmatpush3.bf16.msra.mxu0 %v17790_v25 }
 0x9ea   :  { %17792 = vmatprep.subr.bf16.mxu0 %v27818_v1 }
 0x9ed   :  { %17794 = vmatpush3.bf16.msra.mxu0 %v17793_v4 }
 0x9ee   :  { %17795 = vmatprep.subr.bf16.mxu0 %v27818_v1 }
 0x9f0   :  { %15604 = vmatmul.mubr.f32.vlgmr.msra.gmra.mrb[100].mxu0 %v24897_v30 }
 0x9f1   :  { %17797 = vmatpush3.bf16.msra.mxu0 %v24748_v55  ;;  %15638 = vmatprep.mubr.msk.f32.mxu0 %vm18084_vm14, %v27819_v15  ;;  %v12166_v15 = vld [vmem:[#allocation10 + $0x6] ss:$0 sm:$0xff] }
 0x9f2   :  { %17798 = vmatprep.subr.bf16.mxu0 %v27818_v1 }
 0x9f5   :  { %17800 = vmatpush3.bf16.msra.mxu0 %v24756_v6 }
 0x9f6   :  { %17801 = vmatprep.subr.bf16.mxu0 %v27818_v1 }
 0x9f9   :  { %17803 = vmatpush3.bf16.msra.mxu0 %v24775_v50 }
 0x9fa   :  { %17804 = vmatprep.subr.bf16.mxu0 %v27818_v1 }
 0x9fd   :  { %17806 = vmatpush3.bf16.msra.mxu0 %v24779_v34 }
 0x9fe   :  { %17807 = vmatprep.subr.bf16.mxu0 %v27818_v1 }
 0xa01   :  { %17809 = vmatpush3.bf16.msra.mxu0 %v24783_v32 }
 0xa02   :  { %17810 = vmatprep.subr.bf16.mxu0 %v27818_v1 }
 0xa05   :  { %17812 = vmatpush3.bf16.msra.mxu0 %v24788_v17 }
 0xa06   :  { %17813 = vmatprep.subr.bf16.mxu0 %v27818_v1 }
 0xa09   :  { %17815 = vmatpush3.bf16.msra.mxu0 %v24792_v3 }
 0xa0a   :  { %17816 = vmatprep.subr.bf16.mxu0 %v27818_v1 }
 0xa0d   :  { %17818 = vmatpush3.bf16.msra.mxu0 %v24807_v9 }
 0xa10   :  { %15639 = vmatmul.mubr.f32.vlgmr.msra.gmra.mrb[100].mxu0 %v24897_v30 }
 0xae3   :  { %v11974_v55 = vpop.f32.mrb[100].mxu0 }
 0xae4   :  { %v17826_v6 = vadd.f32 %v12166_v15, %v11974_v55  ;;  %v15640_v50 = vpop.f32.mrb[101].mxu0 }
 0xae6   :  { %11978 = vst [vmem:[#allocation11] sm:$0x3] %v17826_v6 }
 0xae7   :  { %18054 = shalt.err (!%p18051_p2)
}
 0xae8   :  { %s18055_s1 = scalar_lea.hbm %s25019_s6, 32 }
 0xae9   :  { %p18056_p3 = scmp.ne.s32.totalorder %s25019_s6, %s18055_s1  ;;  %p18059_p4 = scmp.lt.u32.totalorder %s18055_s1, %s25019_s6 }
 0xaeb   :  { %p18061_p5 = pnand %p18059_p4, %p18056_p3 }
 0xaed   :  { %18064 = shalt.err (!%p18061_p5)
}
 0xaee   :  { %11988 = dma.vmem_to_hbm [thread:$0]  %s11986_s15, 32, %s25019_s6, [#allocation4]  }
 0xaef   :  { %18071 = dma.done.wait [#allocation4], 32  }
 0xaf0   :  { %18072 = vsyncadd [#allocation4], 4294967264 }
 0xaf1   :  { %11992 = vsyncpa [#allocation3], 1 }
 0xaf2   :  { %11993 = vsyncpa [#allocation6], 1 }
 0xaf3   :  { %11994 = vsyncpa [#allocation9], 1 }
 0xaf4   :  { %11995 = vsyncpa [#allocation4], 1 }

</bundles_post_ra>
